<compile_context>
chip_gen: v6e
topology: v6e:2x2x1
jax: 0.10.0
libtpu: 0.0.40
codegen_flags: <defaults>
</compile_context>

<pallas_src>
import math
from functools import lru_cache, partial

import jax
import jax.numpy as jnp
import numpy as np
from jax.experimental import pallas as pl
from jax.experimental.pallas import tpu as pltpu

_PAR = pltpu.CompilerParams(dimension_semantics=("parallel",))


# ---------------------------------------------------------------------------
# Pointwise / channel-mixing kernels
# ---------------------------------------------------------------------------
def _linear_kernel(x_ref, w_ref, b_ref, o_ref, *, relu):
    y = jnp.dot(x_ref[...], w_ref[...], preferred_element_type=jnp.float32)
    y = y + b_ref[...]
    if relu:
        y = jnp.maximum(y, 0.0)
    o_ref[...] = y.astype(o_ref.dtype)


def _linear_add_kernel(x_ref, w_ref, b_ref, res_ref, o_ref, *, relu):
    # 1x1 conv + spectral-branch add (+ ReLU), fully fused.
    y = jnp.dot(x_ref[...], w_ref[...], preferred_element_type=jnp.float32)
    y = y + b_ref[...] + res_ref[...]
    if relu:
        y = jnp.maximum(y, 0.0)
    o_ref[...] = y.astype(o_ref.dtype)


def _head_kernel(x_ref, w1_ref, b1_ref, w2_ref, b2_ref, o_ref):
    # fused fc1 + ReLU + fc2 : the (tn, 128) intermediate never leaves VMEM.
    h = jnp.dot(x_ref[...], w1_ref[...], preferred_element_type=jnp.float32)
    h = jnp.maximum(h + b1_ref[...], 0.0)
    y = jnp.dot(h, w2_ref[...], preferred_element_type=jnp.float32) + b2_ref[...]
    o_ref[...] = y.astype(o_ref.dtype)


# ---------------------------------------------------------------------------
# Fused SpectralConv2d kernel: truncated DFT -> complex mix -> inverse DFT.
# One grid step = one batch element; everything stays in VMEM as 2D matmuls.
# ---------------------------------------------------------------------------
def _spectral_kernel(x_ref, wyc_ref, wys_ref, fxc_ref, fxs_ref, wmix_ref,
                     gxc_ref, gxs_ref, gyc_ref, gys_ref, o_ref, *, n_kx, dmix):
    f32 = jnp.float32
    xb = x_ref[0]                                          # (S1, S2*C)

    # forward DFT along y (structured kron(DFT, I_C) matrices; e^{-i phi})
    hr = jnp.dot(xb, wyc_ref[...], preferred_element_type=f32)      # (S1, m2*C)
    hi = -jnp.dot(xb, wys_ref[...], preferred_element_type=f32)

    # forward DFT along x at the kept +/- modes (e^{-i theta})
    fxc = fxc_ref[...]
    fxs = fxs_ref[...]                                     # (2*m1, S1)
    x2r = (jnp.dot(fxc, hr, preferred_element_type=f32)
           + jnp.dot(fxs, hi, preferred_element_type=f32))          # (2*m1, m2*C)
    x2i = (jnp.dot(fxc, hi, preferred_element_type=f32)
           - jnp.dot(fxs, hr, preferred_element_type=f32))

    # complex channel mix: one packed (1, 2D) x (2D, 2D) matmul per kept kx
    xp = jnp.concatenate([x2r, x2i], axis=-1)              # (2*m1, 2*D)
    two_d = 2 * dmix
    rows = []
    for k in range(n_kx):
        wk = wmix_ref[k * two_d:(k + 1) * two_d, :]        # (2D, 2D)
        rows.append(jnp.dot(xp[k:k + 1, :], wk, preferred_element_type=f32))
    op = jnp.concatenate(rows, axis=0)                     # (2*m1, 2*D)
    orr = op[:, :dmix]
    oii = op[:, dmix:]

    # inverse DFT along x (e^{+i theta})
    gxc = gxc_ref[...]
    gxs = gxs_ref[...]                                     # (S1, 2*m1)
    tr = (jnp.dot(gxc, orr, preferred_element_type=f32)
          - jnp.dot(gxs, oii, preferred_element_type=f32))           # (S1, m2*C)
    ti = (jnp.dot(gxs, orr, preferred_element_type=f32)
          + jnp.dot(gxc, oii, preferred_element_type=f32))

    # inverse DFT along y, real output (alpha and 1/(S1*S2) folded into g*)
    y = (jnp.dot(tr, gyc_ref[...], preferred_element_type=f32)
         - jnp.dot(ti, gys_ref[...], preferred_element_type=f32))    # (S1, S2*C)
    o_ref[0] = y.astype(o_ref.dtype)


# ---------------------------------------------------------------------------
# Wrappers around pallas_call
# ---------------------------------------------------------------------------
def _pick_tile(n_rows, tn=4096):
    """Largest row tile <= tn, but keep >= 2 grid steps (two v7x TensorCores)."""
    if n_rows <= 16:
        return n_rows
    half = (((n_rows + 1) // 2) + 7) // 8 * 8
    return min(tn, half)


def linear_pallas(x2d, w, b, residual=None, relu=False, tn=4096):
    """Y = relu?(x2d @ w + b (+ residual)); x2d: (N, K), w: (K, C), b: (C,)."""
    N, K = x2d.shape
    C = w.shape[1]
    t = _pick_tile(N, tn)
    grid = (pl.cdiv(N, t),)
    b2 = b.reshape(1, C)

    x_spec = pl.BlockSpec((t, K), lambda i: (i, 0))
    w_spec = pl.BlockSpec((K, C), lambda i: (0, 0))
    b_spec = pl.BlockSpec((1, C), lambda i: (0, 0))
    o_spec = pl.BlockSpec((t, C), lambda i: (i, 0))

    if residual is None:
        return pl.pallas_call(
            partial(_linear_kernel, relu=relu),
            out_shape=jax.ShapeDtypeStruct((N, C), jnp.float32),
            grid=grid,
            in_specs=[x_spec, w_spec, b_spec],
            out_specs=o_spec,
            compiler_params=_PAR,
        )(x2d, w, b2)

    r_spec = pl.BlockSpec((t, C), lambda i: (i, 0))
    return pl.pallas_call(
        partial(_linear_add_kernel, relu=relu),
        out_shape=jax.ShapeDtypeStruct((N, C), jnp.float32),
        grid=grid,
        in_specs=[x_spec, w_spec, b_spec, r_spec],
        out_specs=o_spec,
        compiler_params=_PAR,
    )(x2d, w, b2, residual)


def head_pallas(x2d, w1, b1, w2, b2, tn=4096):
    """Fused projection head: relu(x2d @ w1 + b1) @ w2 + b2."""
    N, K = x2d.shape
    H = w1.shape[1]
    C = w2.shape[1]
    t = _pick_tile(N, tn)
    grid = (pl.cdiv(N, t),)
    return pl.pallas_call(
        _head_kernel,
        out_shape=jax.ShapeDtypeStruct((N, C), jnp.float32),
        grid=grid,
        in_specs=[
            pl.BlockSpec((t, K), lambda i: (i, 0)),
            pl.BlockSpec((K, H), lambda i: (0, 0)),
            pl.BlockSpec((1, H), lambda i: (0, 0)),
            pl.BlockSpec((H, C), lambda i: (0, 0)),
            pl.BlockSpec((1, C), lambda i: (0, 0)),
        ],
        out_specs=pl.BlockSpec((t, C), lambda i: (i, 0)),
        compiler_params=_PAR,
    )(x2d, w1, b1.reshape(1, H), w2, b2.reshape(1, C))


@lru_cache(maxsize=None)
def _dft_constants(S1, S2, C, m1, m2):
    """Trace-time (numpy) truncated-DFT matrices; exact match of rfft2/irfft2
    restricted to the kept modes (including irfft's Hermitian handling)."""
    eye = np.eye(C)
    # forward along y (rfft axis):  e^{-2 pi i ky y / S2}
    yy = np.arange(S2)
    ky = np.arange(m2)
    ang_y = 2.0 * np.pi * np.outer(yy, ky) / S2            # (S2, m2)
    wyc = np.kron(np.cos(ang_y), eye)                       # (S2*C, m2*C)
    wys = np.kron(np.sin(ang_y), eye)
    # forward / inverse along x at kept +/- modes
    kx = np.concatenate([np.arange(m1), np.arange(S1 - m1, S1)]).astype(np.float64)
    xs = np.arange(S1)
    ang_x = 2.0 * np.pi * np.outer(kx, xs) / S1             # (2m1, S1)
    fxc = np.cos(ang_x)
    fxs = np.sin(ang_x)
    gxc = np.ascontiguousarray(fxc.T)                       # (S1, 2m1)
    gxs = np.ascontiguousarray(fxs.T)
    # inverse along y with Hermitian doubling (alpha) and 1/(S1*S2) folded in
    nn_ = np.arange(S2)
    ang_n = 2.0 * np.pi * np.outer(ky, nn_) / S2            # (m2, S2)
    alpha = np.where((ky == 0) | ((S2 % 2 == 0) & (ky == S2 // 2)), 1.0, 2.0)
    sc = (alpha / (S1 * S2))[:, None]
    gyc = np.kron(sc * np.cos(ang_n), eye)                  # (m2*C, S2*C)
    gys = np.kron(sc * np.sin(ang_n), eye)
    return tuple(np.asarray(a, np.float32)
                 for a in (wyc, wys, fxc, fxs, gxc, gxs, gyc, gys))


def spectral_conv2d(x4, wmix, m1, m2):
    """SpectralConv2d.  x4: (B, S1, S2, C) f32;  wmix: (2*m1*2*m2*C, 2*m2*C)."""
    B, S1, S2, C = x4.shape
    D = m2 * C
    n_kx = 2 * m1
    consts = _dft_constants(S1, S2, C, m1, m2)
    wyc, wys, fxc, fxs, gxc, gxs, gyc, gys = [jnp.asarray(a) for a in consts]
    x3 = x4.reshape(B, S1, S2 * C)                          # free reshape

    def _const(a):
        return pl.BlockSpec(a.shape, lambda b: (0, 0))

    out = pl.pallas_call(
        partial(_spectral_kernel, n_kx=n_kx, dmix=D),
        out_shape=jax.ShapeDtypeStruct((B, S1, S2 * C), jnp.float32),
        grid=(B,),
        in_specs=[
            pl.BlockSpec((1, S1, S2 * C), lambda b: (b, 0, 0)),
            _const(wyc), _const(wys),
            _const(fxc), _const(fxs),
            _const(wmix),
            _const(gxc), _const(gxs),
            _const(gyc), _const(gys),
        ],
        out_specs=pl.BlockSpec((1, S1, S2 * C), lambda b: (b, 0, 0)),
        compiler_params=_PAR,
    )(x3, wyc, wys, fxc, fxs, wmix, gxc, gxs, gyc, gys)
    return out.reshape(B, S1, S2, C)


# ---------------------------------------------------------------------------
# FNO2d forward
# ---------------------------------------------------------------------------
def fno2d_forward(x, params, *, modes1, modes2, width):
    # x: (B, S, S, 3)  -> (B, S, S, 1)
    B, Sx, Sy, _ = x.shape
    N = B * Sx * Sy

    # fc0: lift to `width` channels
    h = linear_pallas(x.reshape(N, 3), params["fc0_w"], params["fc0_b"])

    # 4 Fourier layers: x = act(SpectralConv(x) + Conv1x1(x))
    for k in range(4):
        h4 = h.reshape(B, Sx, Sy, width)
        x1 = spectral_conv2d(h4, params[f"conv{k}_wm"], modes1, modes2)
        h = linear_pallas(h, params[f"w{k}_w"], params[f"w{k}_b"],
                          residual=x1.reshape(N, width), relu=(k < 3))

    # projection head: fused fc1 + relu + fc2
    out = head_pallas(h, params["fc1_w"], params["fc1_b"],
                      params["fc2_w"], params["fc2_b"])
    return out.reshape(B, Sx, Sy, 1)


# ---------------------------------------------------------------------------
# Parameter init (shapes follow the PyTorch module); spectral weights are
# packed ONCE here into the per-kx, block-diag-over-ky real matmul layout.
# ---------------------------------------------------------------------------
def _pack_mix_weights(w1r, w1i, w2r, w2i):
    """4 x (Cin, Cout, m1, m2) -> (2*m1*2*D, 2*D) with D = m2*Cout.

    Per kept kx:  [xr | xi] @ [[Br, Bi], [-Bi, Br]] = [out_re | out_im],
    where Br/Bi are block-diagonal over ky with the (Cin, Cout) blocks.
    """
    Cin, Cout, m1, m2 = w1r.shape
    D = m2 * Cout
    n_kx = 2 * m1
    wr = jnp.concatenate([jnp.transpose(w1r, (2, 3, 0, 1)),
                          jnp.transpose(w2r, (2, 3, 0, 1))], axis=0)  # (2m1,m2,Ci,Co)
    wi = jnp.concatenate([jnp.transpose(w1i, (2, 3, 0, 1)),
                          jnp.transpose(w2i, (2, 3, 0, 1))], axis=0)
    br = jnp.zeros((n_kx, D, D), jnp.float32)
    bi = jnp.zeros((n_kx, D, D), jnp.float32)
    for ky in range(m2):
        sl = slice(ky * Cin, ky * Cin + Cin)
        br = br.at[:, sl, sl].set(wr[:, ky])
        bi = bi.at[:, sl, sl].set(wi[:, ky])
    top = jnp.concatenate([br, bi], axis=-1)               # (n_kx, D, 2D)
    bot = jnp.concatenate([-bi, br], axis=-1)
    wmix = jnp.concatenate([top, bot], axis=-2)            # (n_kx, 2D, 2D)
    return wmix.reshape(n_kx * 2 * D, 2 * D)


def init_params(key, modes1, modes2, width):
    keys = jax.random.split(key, 16)
    p = {}

    def lin(k, fan_in, fan_out):
        kw, kb = jax.random.split(k)
        bound = 1.0 / math.sqrt(fan_in)
        w = jax.random.uniform(kw, (fan_in, fan_out), jnp.float32, -bound, bound)
        b = jax.random.uniform(kb, (fan_out,), jnp.float32, -bound, bound)
        return w, b

    p["fc0_w"], p["fc0_b"] = lin(keys[0], 3, width)          # nn.Linear(3, width)
    p["fc1_w"], p["fc1_b"] = lin(keys[1], width, 128)        # nn.Linear(width, 128)
    p["fc2_w"], p["fc2_b"] = lin(keys[2], 128, 1)            # nn.Linear(128, 1)

    scale = 1.0 / (width * width)
    for k in range(4):
        # nn.Conv1d(width, width, 1) == pointwise channel matmul
        p[f"w{k}_w"], p[f"w{k}_b"] = lin(keys[3 + k], width, width)
        # SpectralConv2d complex weights (in, out, m1, m2), packed once.
        kk = jax.random.split(keys[7 + k], 4)
        shp = (width, width, modes1, modes2)
        w1r = scale * jax.random.uniform(kk[0], shp, jnp.float32)
        w1i = scale * jax.random.uniform(kk[1], shp, jnp.float32)
        w2r = scale * jax.random.uniform(kk[2], shp, jnp.float32)
        w2i = scale * jax.random.uniform(kk[3], shp, jnp.float32)
        p[f"conv{k}_wm"] = _pack_mix_weights(w1r, w1i, w2r, w2i)
    return p


# ---------------------------------------------------------------------------
if __name__ == "__main__":
    MODES1, MODES2, WIDTH = 4, 4, 32
    B, S = 2, 16

    key = jax.random.PRNGKey(0)
    k_params, k_x = jax.random.split(key)
    params = init_params(k_params, MODES1, MODES2, WIDTH)
    x = jax.random.normal(k_x, (B, S, S, 3), dtype=jnp.float32)

    fwd = jax.jit(partial(fno2d_forward, modes1=MODES1, modes2=MODES2,
                          width=WIDTH))
    y = fwd(x, params)
    jax.block_until_ready(y)
    assert y.shape == (B, S, S, 1), y.shape
    print("KERNEL_OK")
</pallas_src>

<mosaic_0001>
module attributes {stable_mosaic.version = 11 : i64} {
  func.func @_linear_kernel(%arg0: i32, %arg1: memref<256x3xf32, #tpu.memory_space<vmem>>, %arg2: memref<3x32xf32, #tpu.memory_space<vmem>>, %arg3: memref<1x32xf32, #tpu.memory_space<vmem>>, %arg4: memref<256x32xf32, #tpu.memory_space<vmem>>) attributes {dimension_semantics = [#tpu.dimension_semantics<parallel>], iteration_bounds = array<i64: 2>, scalar_prefetch = 0 : i64, scratch_operands = 0 : i64, tpu.core_type = #tpu.core_type<tc>, window_params = [{transform_indices = @transform_0, window_bounds = array<i64: 256, 3>}, {pipeline_mode = #tpu.pipeline_mode<synchronous>, transform_indices = @transform_1, window_bounds = array<i64: 3, 32>}, {pipeline_mode = #tpu.pipeline_mode<synchronous>, transform_indices = @transform_2, window_bounds = array<i64: 1, 32>}, {transform_indices = @transform_3, window_bounds = array<i64: 256, 32>}]} {
    %c0 = arith.constant 0 : index
    %c0_0 = arith.constant 0 : index
    %0 = vector.load %arg1[%c0, %c0_0] : memref<256x3xf32, #tpu.memory_space<vmem>>, vector<256x3xf32>
    %c0_1 = arith.constant 0 : index
    %c0_2 = arith.constant 0 : index
    %1 = vector.load %arg2[%c0_1, %c0_2] : memref<3x32xf32, #tpu.memory_space<vmem>>, vector<3x32xf32>
    %cst = arith.constant dense<0.000000e+00> : vector<256x32xf32>
    %2 = tpu.matmul %0, %1, %cst {dimension_numbers = #tpu.dot_dimension_numbers<[1], [0], [0], [1], [0, 0, 1, 1], [], []>} : vector<256x3xf32>, vector<3x32xf32>, vector<256x32xf32> -> vector<256x32xf32>
    %c0_3 = arith.constant 0 : index
    %c0_4 = arith.constant 0 : index
    %3 = vector.load %arg3[%c0_3, %c0_4] : memref<1x32xf32, #tpu.memory_space<vmem>>, vector<1x32xf32>
    %4 = vector.broadcast %3 : vector<1x32xf32> to vector<256x32xf32>
    %5 = arith.addf %2, %4 : vector<256x32xf32>
    %c0_5 = arith.constant 0 : index
    %c0_6 = arith.constant 0 : index
    %6 = vector.load %arg4[%c0_5, %c0_6] : memref<256x32xf32, #tpu.memory_space<vmem>>, vector<256x32xf32>
    tpu.vector_store %arg4[%c0_5, %c0_6], %5 {strides = array<i32>} : memref<256x32xf32, #tpu.memory_space<vmem>>, vector<256x32xf32>,
    return
  }
  func.func @transform_0(%arg0: i32) -> (i32, i32) {
    %c0_i32 = arith.constant 0 : i32
    %c0_i32_0 = arith.constant 0 : i32
    return %arg0, %c0_i32 : i32, i32
  }
  func.func @transform_1(%arg0: i32) -> (i32, i32) {
    %c0_i32 = arith.constant 0 : i32
    %c0_i32_0 = arith.constant 0 : i32
    %c0_i32_1 = arith.constant 0 : i32
    return %c0_i32, %c0_i32_0 : i32, i32
  }
  func.func @transform_2(%arg0: i32) -> (i32, i32) {
    %c0_i32 = arith.constant 0 : i32
    %c0_i32_0 = arith.constant 0 : i32
    %c0_i32_1 = arith.constant 0 : i32
    return %c0_i32, %c0_i32_0 : i32, i32
  }
  func.func @transform_3(%arg0: i32) -> (i32, i32) {
    %c0_i32 = arith.constant 0 : i32
    %c0_i32_0 = arith.constant 0 : i32
    return %arg0, %c0_i32 : i32, i32
  }
}

module attributes {stable_mosaic.version = 11 : i64} {
  func.func @_spectral_kernel(%arg0: i32, %arg1: memref<1x16x512xf32, #tpu.memory_space<vmem>>, %arg2: memref<512x128xf32, #tpu.memory_space<vmem>>, %arg3: memref<512x128xf32, #tpu.memory_space<vmem>>, %arg4: memref<8x16xf32, #tpu.memory_space<vmem>>, %arg5: memref<8x16xf32, #tpu.memory_space<vmem>>, %arg6: memref<2048x256xf32, #tpu.memory_space<vmem>>, %arg7: memref<16x8xf32, #tpu.memory_space<vmem>>, %arg8: memref<16x8xf32, #tpu.memory_space<vmem>>, %arg9: memref<128x512xf32, #tpu.memory_space<vmem>>, %arg10: memref<128x512xf32, #tpu.memory_space<vmem>>, %arg11: memref<1x16x512xf32, #tpu.memory_space<vmem>>) attributes {dimension_semantics = [#tpu.dimension_semantics<parallel>], iteration_bounds = array<i64: 2>, scalar_prefetch = 0 : i64, scratch_operands = 0 : i64, tpu.core_type = #tpu.core_type<tc>, window_params = [{transform_indices = @transform_0, window_bounds = array<i64: 1, 16, 512>}, {pipeline_mode = #tpu.pipeline_mode<synchronous>, transform_indices = @transform_1, window_bounds = array<i64: 512, 128>}, {pipeline_mode = #tpu.pipeline_mode<synchronous>, transform_indices = @transform_2, window_bounds = array<i64: 512, 128>}, {pipeline_mode = #tpu.pipeline_mode<synchronous>, transform_indices = @transform_3, window_bounds = array<i64: 8, 16>}, {pipeline_mode = #tpu.pipeline_mode<synchronous>, transform_indices = @transform_4, window_bounds = array<i64: 8, 16>}, {pipeline_mode = #tpu.pipeline_mode<synchronous>, transform_indices = @transform_5, window_bounds = array<i64: 2048, 256>}, {pipeline_mode = #tpu.pipeline_mode<synchronous>, transform_indices = @transform_6, window_bounds = array<i64: 16, 8>}, {pipeline_mode = #tpu.pipeline_mode<synchronous>, transform_indices = @transform_7, window_bounds = array<i64: 16, 8>}, {pipeline_mode = #tpu.pipeline_mode<synchronous>, transform_indices = @transform_8, window_bounds = array<i64: 128, 512>}, {pipeline_mode = #tpu.pipeline_mode<synchronous>, transform_indices = @transform_9, window_bounds = array<i64: 128, 512>}, {transform_indices = @transform_10, window_bounds = array<i64: 1, 16, 512>}]} {
    %c0 = arith.constant 0 : index
    %c0_0 = arith.constant 0 : index
    %c0_1 = arith.constant 0 : index
    %0 = vector.load %arg1[%c0, %c0_0, %c0_1] : memref<1x16x512xf32, #tpu.memory_space<vmem>>, vector<1x16x512xf32>
    %1 = vector.shape_cast %0 : vector<1x16x512xf32> to vector<16x512xf32>
    %c0_2 = arith.constant 0 : index
    %c0_3 = arith.constant 0 : index
    %2 = vector.load %arg2[%c0_2, %c0_3] : memref<512x128xf32, #tpu.memory_space<vmem>>, vector<512x128xf32>
    %cst = arith.constant dense<0.000000e+00> : vector<16x128xf32>
    %3 = tpu.matmul %1, %2, %cst {dimension_numbers = #tpu.dot_dimension_numbers<[1], [0], [0], [1], [0, 0, 1, 1], [], []>} : vector<16x512xf32>, vector<512x128xf32>, vector<16x128xf32> -> vector<16x128xf32>
    %c0_4 = arith.constant 0 : index
    %c0_5 = arith.constant 0 : index
    %4 = vector.load %arg3[%c0_4, %c0_5] : memref<512x128xf32, #tpu.memory_space<vmem>>, vector<512x128xf32>
    %cst_6 = arith.constant dense<0.000000e+00> : vector<16x128xf32>
    %5 = tpu.matmul %1, %4, %cst_6 {dimension_numbers = #tpu.dot_dimension_numbers<[1], [0], [0], [1], [0, 0, 1, 1], [], []>} : vector<16x512xf32>, vector<512x128xf32>, vector<16x128xf32> -> vector<16x128xf32>
    %cst_7 = arith.constant 0.000000e+00 : f32
    %6 = vector.broadcast %cst_7 : f32 to vector<16x128xf32>
    %7 = arith.subf %6, %5 : vector<16x128xf32>
    %c0_8 = arith.constant 0 : index
    %c0_9 = arith.constant 0 : index
    %8 = vector.load %arg4[%c0_8, %c0_9] : memref<8x16xf32, #tpu.memory_space<vmem>>, vector<8x16xf32>
    %c0_10 = arith.constant 0 : index
    %c0_11 = arith.constant 0 : index
    %9 = vector.load %arg5[%c0_10, %c0_11] : memref<8x16xf32, #tpu.memory_space<vmem>>, vector<8x16xf32>
    %cst_12 = arith.constant dense<0.000000e+00> : vector<8x128xf32>
    %10 = tpu.matmul %8, %3, %cst_12 {dimension_numbers = #tpu.dot_dimension_numbers<[1], [0], [0], [1], [0, 0, 1, 1], [], []>} : vector<8x16xf32>, vector<16x128xf32>, vector<8x128xf32> -> vector<8x128xf32>
    %cst_13 = arith.constant dense<0.000000e+00> : vector<8x128xf32>
    %11 = tpu.matmul %9, %7, %cst_13 {dimension_numbers = #tpu.dot_dimension_numbers<[1], [0], [0], [1], [0, 0, 1, 1], [], []>} : vector<8x16xf32>, vector<16x128xf32>, vector<8x128xf32> -> vector<8x128xf32>
    %12 = arith.addf %10, %11 : vector<8x128xf32>
    %cst_14 = arith.constant dense<0.000000e+00> : vector<8x128xf32>
    %13 = tpu.matmul %8, %7, %cst_14 {dimension_numbers = #tpu.dot_dimension_numbers<[1], [0], [0], [1], [0, 0, 1, 1], [], []>} : vector<8x16xf32>, vector<16x128xf32>, vector<8x128xf32> -> vector<8x128xf32>
    %cst_15 = arith.constant dense<0.000000e+00> : vector<8x128xf32>
    %14 = tpu.matmul %9, %3, %cst_15 {dimension_numbers = #tpu.dot_dimension_numbers<[1], [0], [0], [1], [0, 0, 1, 1], [], []>} : vector<8x16xf32>, vector<16x128xf32>, vector<8x128xf32> -> vector<8x128xf32>
    %15 = arith.subf %13, %14 : vector<8x128xf32>
    %16 = tpu.concatenate %12, %15 in 1 : vector<8x128xf32>, vector<8x128xf32> -> vector<8x256xf32>
    %c0_16 = arith.constant 0 : index
    %c0_17 = arith.constant 0 : index
    %17 = vector.load %arg6[%c0_16, %c0_17] : memref<2048x256xf32, #tpu.memory_space<vmem>>, vector<256x256xf32>
    %18 = vector.extract_strided_slice %16 {offsets = [0, 0], sizes = [1, 256], strides = [1, 1]} : vector<8x256xf32> to vector<1x256xf32>
    %cst_18 = arith.constant dense<0.000000e+00> : vector<1x256xf32>
    %19 = tpu.matmul %18, %17, %cst_18 {dimension_numbers = #tpu.dot_dimension_numbers<[1], [0], [0], [1], [0, 0, 1, 1], [], []>} : vector<1x256xf32>, vector<256x256xf32>, vector<1x256xf32> -> vector<1x256xf32>
    %c256 = arith.constant 256 : index
    %c0_19 = arith.constant 0 : index
    %20 = vector.load %arg6[%c256, %c0_19] : memref<2048x256xf32, #tpu.memory_space<vmem>>, vector<256x256xf32>
    %21 = vector.extract_strided_slice %16 {offsets = [1, 0], sizes = [1, 256], strides = [1, 1]} : vector<8x256xf32> to vector<1x256xf32>
    %cst_20 = arith.constant dense<0.000000e+00> : vector<1x256xf32>
    %22 = tpu.matmul %21, %20, %cst_20 {dimension_numbers = #tpu.dot_dimension_numbers<[1], [0], [0], [1], [0, 0, 1, 1], [], []>} : vector<1x256xf32>, vector<256x256xf32>, vector<1x256xf32> -> vector<1x256xf32>
    %c512 = arith.constant 512 : index
    %c0_21 = arith.constant 0 : index
    %23 = vector.load %arg6[%c512, %c0_21] : memref<2048x256xf32, #tpu.memory_space<vmem>>, vector<256x256xf32>
    %24 = vector.extract_strided_slice %16 {offsets = [2, 0], sizes = [1, 256], strides = [1, 1]} : vector<8x256xf32> to vector<1x256xf32>
    %cst_22 = arith.constant dense<0.000000e+00> : vector<1x256xf32>
    %25 = tpu.matmul %24, %23, %cst_22 {dimension_numbers = #tpu.dot_dimension_numbers<[1], [0], [0], [1], [0, 0, 1, 1], [], []>} : vector<1x256xf32>, vector<256x256xf32>, vector<1x256xf32> -> vector<1x256xf32>
    %c768 = arith.constant 768 : index
    %c0_23 = arith.constant 0 : index
    %26 = vector.load %arg6[%c768, %c0_23] : memref<2048x256xf32, #tpu.memory_space<vmem>>, vector<256x256xf32>
    %27 = vector.extract_strided_slice %16 {offsets = [3, 0], sizes = [1, 256], strides = [1, 1]} : vector<8x256xf32> to vector<1x256xf32>
    %cst_24 = arith.constant dense<0.000000e+00> : vector<1x256xf32>
    %28 = tpu.matmul %27, %26, %cst_24 {dimension_numbers = #tpu.dot_dimension_numbers<[1], [0], [0], [1], [0, 0, 1, 1], [], []>} : vector<1x256xf32>, vector<256x256xf32>, vector<1x256xf32> -> vector<1x256xf32>
    %c1024 = arith.constant 1024 : index
    %c0_25 = arith.constant 0 : index
    %29 = vector.load %arg6[%c1024, %c0_25] : memref<2048x256xf32, #tpu.memory_space<vmem>>, vector<256x256xf32>
    %30 = vector.extract_strided_slice %16 {offsets = [4, 0], sizes = [1, 256], strides = [1, 1]} : vector<8x256xf32> to vector<1x256xf32>
    %cst_26 = arith.constant dense<0.000000e+00> : vector<1x256xf32>
    %31 = tpu.matmul %30, %29, %cst_26 {dimension_numbers = #tpu.dot_dimension_numbers<[1], [0], [0], [1], [0, 0, 1, 1], [], []>} : vector<1x256xf32>, vector<256x256xf32>, vector<1x256xf32> -> vector<1x256xf32>
    %c1280 = arith.constant 1280 : index
    %c0_27 = arith.constant 0 : index
    %32 = vector.load %arg6[%c1280, %c0_27] : memref<2048x256xf32, #tpu.memory_space<vmem>>, vector<256x256xf32>
    %33 = vector.extract_strided_slice %16 {offsets = [5, 0], sizes = [1, 256], strides = [1, 1]} : vector<8x256xf32> to vector<1x256xf32>
    %cst_28 = arith.constant dense<0.000000e+00> : vector<1x256xf32>
    %34 = tpu.matmul %33, %32, %cst_28 {dimension_numbers = #tpu.dot_dimension_numbers<[1], [0], [0], [1], [0, 0, 1, 1], [], []>} : vector<1x256xf32>, vector<256x256xf32>, vector<1x256xf32> -> vector<1x256xf32>
    %c1536 = arith.constant 1536 : index
    %c0_29 = arith.constant 0 : index
    %35 = vector.load %arg6[%c1536, %c0_29] : memref<2048x256xf32, #tpu.memory_space<vmem>>, vector<256x256xf32>
    %36 = vector.extract_strided_slice %16 {offsets = [6, 0], sizes = [1, 256], strides = [1, 1]} : vector<8x256xf32> to vector<1x256xf32>
    %cst_30 = arith.constant dense<0.000000e+00> : vector<1x256xf32>
    %37 = tpu.matmul %36, %35, %cst_30 {dimension_numbers = #tpu.dot_dimension_numbers<[1], [0], [0], [1], [0, 0, 1, 1], [], []>} : vector<1x256xf32>, vector<256x256xf32>, vector<1x256xf32> -> vector<1x256xf32>
    %c1792 = arith.constant 1792 : index
    %c0_31 = arith.constant 0 : index
    %38 = vector.load %arg6[%c1792, %c0_31] : memref<2048x256xf32, #tpu.memory_space<vmem>>, vector<256x256xf32>
    %39 = vector.extract_strided_slice %16 {offsets = [7, 0], sizes = [1, 256], strides = [1, 1]} : vector<8x256xf32> to vector<1x256xf32>
    %cst_32 = arith.constant dense<0.000000e+00> : vector<1x256xf32>
    %40 = tpu.matmul %39, %38, %cst_32 {dimension_numbers = #tpu.dot_dimension_numbers<[1], [0], [0], [1], [0, 0, 1, 1], [], []>} : vector<1x256xf32>, vector<256x256xf32>, vector<1x256xf32> -> vector<1x256xf32>
    %41 = tpu.concatenate %19, %22, %25, %28, %31, %34, %37, %40 in 0 : vector<1x256xf32>, vector<1x256xf32>, vector<1x256xf32>, vector<1x256xf32>, vector<1x256xf32>, vector<1x256xf32>, vector<1x256xf32>, vector<1x256xf32> -> vector<8x256xf32>
    %42 = vector.extract_strided_slice %41 {offsets = [0, 0], sizes = [8, 128], strides = [1, 1]} : vector<8x256xf32> to vector<8x128xf32>
    %43 = vector.extract_strided_slice %41 {offsets = [0, 128], sizes = [8, 128], strides = [1, 1]} : vector<8x256xf32> to vector<8x128xf32>
    %c0_33 = arith.constant 0 : index
    %c0_34 = arith.constant 0 : index
    %44 = vector.load %arg7[%c0_33, %c0_34] : memref<16x8xf32, #tpu.memory_space<vmem>>, vector<16x8xf32>
    %c0_35 = arith.constant 0 : index
    %c0_36 = arith.constant 0 : index
    %45 = vector.load %arg8[%c0_35, %c0_36] : memref<16x8xf32, #tpu.memory_space<vmem>>, vector<16x8xf32>
    %cst_37 = arith.constant dense<0.000000e+00> : vector<16x128xf32>
    %46 = tpu.matmul %44, %42, %cst_37 {dimension_numbers = #tpu.dot_dimension_numbers<[1], [0], [0], [1], [0, 0, 1, 1], [], []>} : vector<16x8xf32>, vector<8x128xf32>, vector<16x128xf32> -> vector<16x128xf32>
    %cst_38 = arith.constant dense<0.000000e+00> : vector<16x128xf32>
    %47 = tpu.matmul %45, %43, %cst_38 {dimension_numbers = #tpu.dot_dimension_numbers<[1], [0], [0], [1], [0, 0, 1, 1], [], []>} : vector<16x8xf32>, vector<8x128xf32>, vector<16x128xf32> -> vector<16x128xf32>
    %48 = arith.subf %46, %47 : vector<16x128xf32>
    %cst_39 = arith.constant dense<0.000000e+00> : vector<16x128xf32>
    %49 = tpu.matmul %45, %42, %cst_39 {dimension_numbers = #tpu.dot_dimension_numbers<[1], [0], [0], [1], [0, 0, 1, 1], [], []>} : vector<16x8xf32>, vector<8x128xf32>, vector<16x128xf32> -> vector<16x128xf32>
    %cst_40 = arith.constant dense<0.000000e+00> : vector<16x128xf32>
    %50 = tpu.matmul %44, %43, %cst_40 {dimension_numbers = #tpu.dot_dimension_numbers<[1], [0], [0], [1], [0, 0, 1, 1], [], []>} : vector<16x8xf32>, vector<8x128xf32>, vector<16x128xf32> -> vector<16x128xf32>
    %51 = arith.addf %49, %50 : vector<16x128xf32>
    %c0_41 = arith.constant 0 : index
    %c0_42 = arith.constant 0 : index
    %52 = vector.load %arg9[%c0_41, %c0_42] : memref<128x512xf32, #tpu.memory_space<vmem>>, vector<128x512xf32>
    %cst_43 = arith.constant dense<0.000000e+00> : vector<16x512xf32>
    %53 = tpu.matmul %48, %52, %cst_43 {dimension_numbers = #tpu.dot_dimension_numbers<[1], [0], [0], [1], [0, 0, 1, 1], [], []>} : vector<16x128xf32>, vector<128x512xf32>, vector<16x512xf32> -> vector<16x512xf32>
    %c0_44 = arith.constant 0 : index
    %c0_45 = arith.constant 0 : index
    %54 = vector.load %arg10[%c0_44, %c0_45] : memref<128x512xf32, #tpu.memory_space<vmem>>, vector<128x512xf32>
    %cst_46 = arith.constant dense<0.000000e+00> : vector<16x512xf32>
    %55 = tpu.matmul %51, %54, %cst_46 {dimension_numbers = #tpu.dot_dimension_numbers<[1], [0], [0], [1], [0, 0, 1, 1], [], []>} : vector<16x128xf32>, vector<128x512xf32>, vector<16x512xf32> -> vector<16x512xf32>
    %56 = arith.subf %53, %55 : vector<16x512xf32>
    %c0_47 = arith.constant 0 : index
    %c0_48 = arith.constant 0 : index
    %c0_49 = arith.constant 0 : index
    %57 = vector.load %arg11[%c0_47, %c0_48, %c0_49] : memref<1x16x512xf32, #tpu.memory_space<vmem>>, vector<1x16x512xf32>
    %58 = vector.shape_cast %57 : vector<1x16x512xf32> to vector<16x512xf32>
    %59 = vector.shape_cast %56 : vector<16x512xf32> to vector<1x16x512xf32>
    tpu.vector_store %arg11[%c0_47, %c0_48, %c0_49], %59 {strides = array<i32>} : memref<1x16x512xf32, #tpu.memory_space<vmem>>, vector<1x16x512xf32>,
    return
  }
  func.func @transform_0(%arg0: i32) -> (i32, i32, i32) {
    %c0_i32 = arith.constant 0 : i32
    %c0_i32_0 = arith.constant 0 : i32
    %c0_i32_1 = arith.constant 0 : i32
    return %arg0, %c0_i32, %c0_i32_0 : i32, i32, i32
  }
  func.func @transform_1(%arg0: i32) -> (i32, i32) {
    %c0_i32 = arith.constant 0 : i32
    %c0_i32_0 = arith.constant 0 : i32
    %c0_i32_1 = arith.constant 0 : i32
    return %c0_i32, %c0_i32_0 : i32, i32
  }
  func.func @transform_2(%arg0: i32) -> (i32, i32) {
    %c0_i32 = arith.constant 0 : i32
    %c0_i32_0 = arith.constant 0 : i32
    %c0_i32_1 = arith.constant 0 : i32
    return %c0_i32, %c0_i32_0 : i32, i32
  }
  func.func @transform_3(%arg0: i32) -> (i32, i32) {
    %c0_i32 = arith.constant 0 : i32
    %c0_i32_0 = arith.constant 0 : i32
    %c0_i32_1 = arith.constant 0 : i32
    return %c0_i32, %c0_i32_0 : i32, i32
  }
  func.func @transform_4(%arg0: i32) -> (i32, i32) {
    %c0_i32 = arith.constant 0 : i32
    %c0_i32_0 = arith.constant 0 : i32
    %c0_i32_1 = arith.constant 0 : i32
    return %c0_i32, %c0_i32_0 : i32, i32
  }
  func.func @transform_5(%arg0: i32) -> (i32, i32) {
    %c0_i32 = arith.constant 0 : i32
    %c0_i32_0 = arith.constant 0 : i32
    %c0_i32_1 = arith.constant 0 : i32
    return %c0_i32, %c0_i32_0 : i32, i32
  }
  func.func @transform_6(%arg0: i32) -> (i32, i32) {
    %c0_i32 = arith.constant 0 : i32
    %c0_i32_0 = arith.constant 0 : i32
    %c0_i32_1 = arith.constant 0 : i32
    return %c0_i32, %c0_i32_0 : i32, i32
  }
  func.func @transform_7(%arg0: i32) -> (i32, i32) {
    %c0_i32 = arith.constant 0 : i32
    %c0_i32_0 = arith.constant 0 : i32
    %c0_i32_1 = arith.constant 0 : i32
    return %c0_i32, %c0_i32_0 : i32, i32
  }
  func.func @transform_8(%arg0: i32) -> (i32, i32) {
    %c0_i32 = arith.constant 0 : i32
    %c0_i32_0 = arith.constant 0 : i32
    %c0_i32_1 = arith.constant 0 : i32
    return %c0_i32, %c0_i32_0 : i32, i32
  }
  func.func @transform_9(%arg0: i32) -> (i32, i32) {
    %c0_i32 = arith.constant 0 : i32
    %c0_i32_0 = arith.constant 0 : i32
    %c0_i32_1 = arith.constant 0 : i32
    return %c0_i32, %c0_i32_0 : i32, i32
  }
  func.func @transform_10(%arg0: i32) -> (i32, i32, i32) {
    %c0_i32 = arith.constant 0 : i32
    %c0_i32_0 = arith.constant 0 : i32
    %c0_i32_1 = arith.constant 0 : i32
    return %arg0, %c0_i32, %c0_i32_0 : i32, i32, i32
  }
}

module attributes {stable_mosaic.version = 11 : i64} {
  func.func @_linear_add_kernel(%arg0: i32, %arg1: memref<256x32xf32, #tpu.memory_space<vmem>>, %arg2: memref<32x32xf32, #tpu.memory_space<vmem>>, %arg3: memref<1x32xf32, #tpu.memory_space<vmem>>, %arg4: memref<256x32xf32, #tpu.memory_space<vmem>>, %arg5: memref<256x32xf32, #tpu.memory_space<vmem>>) attributes {dimension_semantics = [#tpu.dimension_semantics<parallel>], iteration_bounds = array<i64: 2>, scalar_prefetch = 0 : i64, scratch_operands = 0 : i64, tpu.core_type = #tpu.core_type<tc>, window_params = [{transform_indices = @transform_0, window_bounds = array<i64: 256, 32>}, {pipeline_mode = #tpu.pipeline_mode<synchronous>, transform_indices = @transform_1, window_bounds = array<i64: 32, 32>}, {pipeline_mode = #tpu.pipeline_mode<synchronous>, transform_indices = @transform_2, window_bounds = array<i64: 1, 32>}, {transform_indices = @transform_3, window_bounds = array<i64: 256, 32>}, {transform_indices = @transform_4, window_bounds = array<i64: 256, 32>}]} {
    %c0 = arith.constant 0 : index
    %c0_0 = arith.constant 0 : index
    %0 = vector.load %arg1[%c0, %c0_0] : memref<256x32xf32, #tpu.memory_space<vmem>>, vector<256x32xf32>
    %c0_1 = arith.constant 0 : index
    %c0_2 = arith.constant 0 : index
    %1 = vector.load %arg2[%c0_1, %c0_2] : memref<32x32xf32, #tpu.memory_space<vmem>>, vector<32x32xf32>
    %cst = arith.constant dense<0.000000e+00> : vector<256x32xf32>
    %2 = tpu.matmul %0, %1, %cst {dimension_numbers = #tpu.dot_dimension_numbers<[1], [0], [0], [1], [0, 0, 1, 1], [], []>} : vector<256x32xf32>, vector<32x32xf32>, vector<256x32xf32> -> vector<256x32xf32>
    %c0_3 = arith.constant 0 : index
    %c0_4 = arith.constant 0 : index
    %3 = vector.load %arg3[%c0_3, %c0_4] : memref<1x32xf32, #tpu.memory_space<vmem>>, vector<1x32xf32>
    %4 = vector.broadcast %3 : vector<1x32xf32> to vector<256x32xf32>
    %5 = arith.addf %2, %4 : vector<256x32xf32>
    %c0_5 = arith.constant 0 : index
    %c0_6 = arith.constant 0 : index
    %6 = vector.load %arg4[%c0_5, %c0_6] : memref<256x32xf32, #tpu.memory_space<vmem>>, vector<256x32xf32>
    %7 = arith.addf %5, %6 : vector<256x32xf32>
    %cst_7 = arith.constant 0.000000e+00 : f32
    %8 = vector.broadcast %cst_7 : f32 to vector<256x32xf32>
    %9 = arith.maximumf %7, %8 : vector<256x32xf32>
    %c0_8 = arith.constant 0 : index
    %c0_9 = arith.constant 0 : index
    %10 = vector.load %arg5[%c0_8, %c0_9] : memref<256x32xf32, #tpu.memory_space<vmem>>, vector<256x32xf32>
    tpu.vector_store %arg5[%c0_8, %c0_9], %9 {strides = array<i32>} : memref<256x32xf32, #tpu.memory_space<vmem>>, vector<256x32xf32>,
    return
  }
  func.func @transform_0(%arg0: i32) -> (i32, i32) {
    %c0_i32 = arith.constant 0 : i32
    %c0_i32_0 = arith.constant 0 : i32
    return %arg0, %c0_i32 : i32, i32
  }
  func.func @transform_1(%arg0: i32) -> (i32, i32) {
    %c0_i32 = arith.constant 0 : i32
    %c0_i32_0 = arith.constant 0 : i32
    %c0_i32_1 = arith.constant 0 : i32
    return %c0_i32, %c0_i32_0 : i32, i32
  }
  func.func @transform_2(%arg0: i32) -> (i32, i32) {
    %c0_i32 = arith.constant 0 : i32
    %c0_i32_0 = arith.constant 0 : i32
    %c0_i32_1 = arith.constant 0 : i32
    return %c0_i32, %c0_i32_0 : i32, i32
  }
  func.func @transform_3(%arg0: i32) -> (i32, i32) {
    %c0_i32 = arith.constant 0 : i32
    %c0_i32_0 = arith.constant 0 : i32
    return %arg0, %c0_i32 : i32, i32
  }
  func.func @transform_4(%arg0: i32) -> (i32, i32) {
    %c0_i32 = arith.constant 0 : i32
    %c0_i32_0 = arith.constant 0 : i32
    return %arg0, %c0_i32 : i32, i32
  }
}

module attributes {stable_mosaic.version = 11 : i64} {
  func.func @_spectral_kernel(%arg0: i32, %arg1: memref<1x16x512xf32, #tpu.memory_space<vmem>>, %arg2: memref<512x128xf32, #tpu.memory_space<vmem>>, %arg3: memref<512x128xf32, #tpu.memory_space<vmem>>, %arg4: memref<8x16xf32, #tpu.memory_space<vmem>>, %arg5: memref<8x16xf32, #tpu.memory_space<vmem>>, %arg6: memref<2048x256xf32, #tpu.memory_space<vmem>>, %arg7: memref<16x8xf32, #tpu.memory_space<vmem>>, %arg8: memref<16x8xf32, #tpu.memory_space<vmem>>, %arg9: memref<128x512xf32, #tpu.memory_space<vmem>>, %arg10: memref<128x512xf32, #tpu.memory_space<vmem>>, %arg11: memref<1x16x512xf32, #tpu.memory_space<vmem>>) attributes {dimension_semantics = [#tpu.dimension_semantics<parallel>], iteration_bounds = array<i64: 2>, scalar_prefetch = 0 : i64, scratch_operands = 0 : i64, tpu.core_type = #tpu.core_type<tc>, window_params = [{transform_indices = @transform_0, window_bounds = array<i64: 1, 16, 512>}, {pipeline_mode = #tpu.pipeline_mode<synchronous>, transform_indices = @transform_1, window_bounds = array<i64: 512, 128>}, {pipeline_mode = #tpu.pipeline_mode<synchronous>, transform_indices = @transform_2, window_bounds = array<i64: 512, 128>}, {pipeline_mode = #tpu.pipeline_mode<synchronous>, transform_indices = @transform_3, window_bounds = array<i64: 8, 16>}, {pipeline_mode = #tpu.pipeline_mode<synchronous>, transform_indices = @transform_4, window_bounds = array<i64: 8, 16>}, {pipeline_mode = #tpu.pipeline_mode<synchronous>, transform_indices = @transform_5, window_bounds = array<i64: 2048, 256>}, {pipeline_mode = #tpu.pipeline_mode<synchronous>, transform_indices = @transform_6, window_bounds = array<i64: 16, 8>}, {pipeline_mode = #tpu.pipeline_mode<synchronous>, transform_indices = @transform_7, window_bounds = array<i64: 16, 8>}, {pipeline_mode = #tpu.pipeline_mode<synchronous>, transform_indices = @transform_8, window_bounds = array<i64: 128, 512>}, {pipeline_mode = #tpu.pipeline_mode<synchronous>, transform_indices = @transform_9, window_bounds = array<i64: 128, 512>}, {transform_indices = @transform_10, window_bounds = array<i64: 1, 16, 512>}]} {
    %c0 = arith.constant 0 : index
    %c0_0 = arith.constant 0 : index
    %c0_1 = arith.constant 0 : index
    %0 = vector.load %arg1[%c0, %c0_0, %c0_1] : memref<1x16x512xf32, #tpu.memory_space<vmem>>, vector<1x16x512xf32>
    %1 = vector.shape_cast %0 : vector<1x16x512xf32> to vector<16x512xf32>
    %c0_2 = arith.constant 0 : index
    %c0_3 = arith.constant 0 : index
    %2 = vector.load %arg2[%c0_2, %c0_3] : memref<512x128xf32, #tpu.memory_space<vmem>>, vector<512x128xf32>
    %cst = arith.constant dense<0.000000e+00> : vector<16x128xf32>
    %3 = tpu.matmul %1, %2, %cst {dimension_numbers = #tpu.dot_dimension_numbers<[1], [0], [0], [1], [0, 0, 1, 1], [], []>} : vector<16x512xf32>, vector<512x128xf32>, vector<16x128xf32> -> vector<16x128xf32>
    %c0_4 = arith.constant 0 : index
    %c0_5 = arith.constant 0 : index
    %4 = vector.load %arg3[%c0_4, %c0_5] : memref<512x128xf32, #tpu.memory_space<vmem>>, vector<512x128xf32>
    %cst_6 = arith.constant dense<0.000000e+00> : vector<16x128xf32>
    %5 = tpu.matmul %1, %4, %cst_6 {dimension_numbers = #tpu.dot_dimension_numbers<[1], [0], [0], [1], [0, 0, 1, 1], [], []>} : vector<16x512xf32>, vector<512x128xf32>, vector<16x128xf32> -> vector<16x128xf32>
    %cst_7 = arith.constant 0.000000e+00 : f32
    %6 = vector.broadcast %cst_7 : f32 to vector<16x128xf32>
    %7 = arith.subf %6, %5 : vector<16x128xf32>
    %c0_8 = arith.constant 0 : index
    %c0_9 = arith.constant 0 : index
    %8 = vector.load %arg4[%c0_8, %c0_9] : memref<8x16xf32, #tpu.memory_space<vmem>>, vector<8x16xf32>
    %c0_10 = arith.constant 0 : index
    %c0_11 = arith.constant 0 : index
    %9 = vector.load %arg5[%c0_10, %c0_11] : memref<8x16xf32, #tpu.memory_space<vmem>>, vector<8x16xf32>
    %cst_12 = arith.constant dense<0.000000e+00> : vector<8x128xf32>
    %10 = tpu.matmul %8, %3, %cst_12 {dimension_numbers = #tpu.dot_dimension_numbers<[1], [0], [0], [1], [0, 0, 1, 1], [], []>} : vector<8x16xf32>, vector<16x128xf32>, vector<8x128xf32> -> vector<8x128xf32>
    %cst_13 = arith.constant dense<0.000000e+00> : vector<8x128xf32>
    %11 = tpu.matmul %9, %7, %cst_13 {dimension_numbers = #tpu.dot_dimension_numbers<[1], [0], [0], [1], [0, 0, 1, 1], [], []>} : vector<8x16xf32>, vector<16x128xf32>, vector<8x128xf32> -> vector<8x128xf32>
    %12 = arith.addf %10, %11 : vector<8x128xf32>
    %cst_14 = arith.constant dense<0.000000e+00> : vector<8x128xf32>
    %13 = tpu.matmul %8, %7, %cst_14 {dimension_numbers = #tpu.dot_dimension_numbers<[1], [0], [0], [1], [0, 0, 1, 1], [], []>} : vector<8x16xf32>, vector<16x128xf32>, vector<8x128xf32> -> vector<8x128xf32>
    %cst_15 = arith.constant dense<0.000000e+00> : vector<8x128xf32>
    %14 = tpu.matmul %9, %3, %cst_15 {dimension_numbers = #tpu.dot_dimension_numbers<[1], [0], [0], [1], [0, 0, 1, 1], [], []>} : vector<8x16xf32>, vector<16x128xf32>, vector<8x128xf32> -> vector<8x128xf32>
    %15 = arith.subf %13, %14 : vector<8x128xf32>
    %16 = tpu.concatenate %12, %15 in 1 : vector<8x128xf32>, vector<8x128xf32> -> vector<8x256xf32>
    %c0_16 = arith.constant 0 : index
    %c0_17 = arith.constant 0 : index
    %17 = vector.load %arg6[%c0_16, %c0_17] : memref<2048x256xf32, #tpu.memory_space<vmem>>, vector<256x256xf32>
    %18 = vector.extract_strided_slice %16 {offsets = [0, 0], sizes = [1, 256], strides = [1, 1]} : vector<8x256xf32> to vector<1x256xf32>
    %cst_18 = arith.constant dense<0.000000e+00> : vector<1x256xf32>
    %19 = tpu.matmul %18, %17, %cst_18 {dimension_numbers = #tpu.dot_dimension_numbers<[1], [0], [0], [1], [0, 0, 1, 1], [], []>} : vector<1x256xf32>, vector<256x256xf32>, vector<1x256xf32> -> vector<1x256xf32>
    %c256 = arith.constant 256 : index
    %c0_19 = arith.constant 0 : index
    %20 = vector.load %arg6[%c256, %c0_19] : memref<2048x256xf32, #tpu.memory_space<vmem>>, vector<256x256xf32>
    %21 = vector.extract_strided_slice %16 {offsets = [1, 0], sizes = [1, 256], strides = [1, 1]} : vector<8x256xf32> to vector<1x256xf32>
    %cst_20 = arith.constant dense<0.000000e+00> : vector<1x256xf32>
    %22 = tpu.matmul %21, %20, %cst_20 {dimension_numbers = #tpu.dot_dimension_numbers<[1], [0], [0], [1], [0, 0, 1, 1], [], []>} : vector<1x256xf32>, vector<256x256xf32>, vector<1x256xf32> -> vector<1x256xf32>
    %c512 = arith.constant 512 : index
    %c0_21 = arith.constant 0 : index
    %23 = vector.load %arg6[%c512, %c0_21] : memref<2048x256xf32, #tpu.memory_space<vmem>>, vector<256x256xf32>
    %24 = vector.extract_strided_slice %16 {offsets = [2, 0], sizes = [1, 256], strides = [1, 1]} : vector<8x256xf32> to vector<1x256xf32>
    %cst_22 = arith.constant dense<0.000000e+00> : vector<1x256xf32>
    %25 = tpu.matmul %24, %23, %cst_22 {dimension_numbers = #tpu.dot_dimension_numbers<[1], [0], [0], [1], [0, 0, 1, 1], [], []>} : vector<1x256xf32>, vector<256x256xf32>, vector<1x256xf32> -> vector<1x256xf32>
    %c768 = arith.constant 768 : index
    %c0_23 = arith.constant 0 : index
    %26 = vector.load %arg6[%c768, %c0_23] : memref<2048x256xf32, #tpu.memory_space<vmem>>, vector<256x256xf32>
    %27 = vector.extract_strided_slice %16 {offsets = [3, 0], sizes = [1, 256], strides = [1, 1]} : vector<8x256xf32> to vector<1x256xf32>
    %cst_24 = arith.constant dense<0.000000e+00> : vector<1x256xf32>
    %28 = tpu.matmul %27, %26, %cst_24 {dimension_numbers = #tpu.dot_dimension_numbers<[1], [0], [0], [1], [0, 0, 1, 1], [], []>} : vector<1x256xf32>, vector<256x256xf32>, vector<1x256xf32> -> vector<1x256xf32>
    %c1024 = arith.constant 1024 : index
    %c0_25 = arith.constant 0 : index
    %29 = vector.load %arg6[%c1024, %c0_25] : memref<2048x256xf32, #tpu.memory_space<vmem>>, vector<256x256xf32>
    %30 = vector.extract_strided_slice %16 {offsets = [4, 0], sizes = [1, 256], strides = [1, 1]} : vector<8x256xf32> to vector<1x256xf32>
    %cst_26 = arith.constant dense<0.000000e+00> : vector<1x256xf32>
    %31 = tpu.matmul %30, %29, %cst_26 {dimension_numbers = #tpu.dot_dimension_numbers<[1], [0], [0], [1], [0, 0, 1, 1], [], []>} : vector<1x256xf32>, vector<256x256xf32>, vector<1x256xf32> -> vector<1x256xf32>
    %c1280 = arith.constant 1280 : index
    %c0_27 = arith.constant 0 : index
    %32 = vector.load %arg6[%c1280, %c0_27] : memref<2048x256xf32, #tpu.memory_space<vmem>>, vector<256x256xf32>
    %33 = vector.extract_strided_slice %16 {offsets = [5, 0], sizes = [1, 256], strides = [1, 1]} : vector<8x256xf32> to vector<1x256xf32>
    %cst_28 = arith.constant dense<0.000000e+00> : vector<1x256xf32>
    %34 = tpu.matmul %33, %32, %cst_28 {dimension_numbers = #tpu.dot_dimension_numbers<[1], [0], [0], [1], [0, 0, 1, 1], [], []>} : vector<1x256xf32>, vector<256x256xf32>, vector<1x256xf32> -> vector<1x256xf32>
    %c1536 = arith.constant 1536 : index
    %c0_29 = arith.constant 0 : index
    %35 = vector.load %arg6[%c1536, %c0_29] : memref<2048x256xf32, #tpu.memory_space<vmem>>, vector<256x256xf32>
    %36 = vector.extract_strided_slice %16 {offsets = [6, 0], sizes = [1, 256], strides = [1, 1]} : vector<8x256xf32> to vector<1x256xf32>
    %cst_30 = arith.constant dense<0.000000e+00> : vector<1x256xf32>
    %37 = tpu.matmul %36, %35, %cst_30 {dimension_numbers = #tpu.dot_dimension_numbers<[1], [0], [0], [1], [0, 0, 1, 1], [], []>} : vector<1x256xf32>, vector<256x256xf32>, vector<1x256xf32> -> vector<1x256xf32>
    %c1792 = arith.constant 1792 : index
    %c0_31 = arith.constant 0 : index
    %38 = vector.load %arg6[%c1792, %c0_31] : memref<2048x256xf32, #tpu.memory_space<vmem>>, vector<256x256xf32>
    %39 = vector.extract_strided_slice %16 {offsets = [7, 0], sizes = [1, 256], strides = [1, 1]} : vector<8x256xf32> to vector<1x256xf32>
    %cst_32 = arith.constant dense<0.000000e+00> : vector<1x256xf32>
    %40 = tpu.matmul %39, %38, %cst_32 {dimension_numbers = #tpu.dot_dimension_numbers<[1], [0], [0], [1], [0, 0, 1, 1], [], []>} : vector<1x256xf32>, vector<256x256xf32>, vector<1x256xf32> -> vector<1x256xf32>
    %41 = tpu.concatenate %19, %22, %25, %28, %31, %34, %37, %40 in 0 : vector<1x256xf32>, vector<1x256xf32>, vector<1x256xf32>, vector<1x256xf32>, vector<1x256xf32>, vector<1x256xf32>, vector<1x256xf32>, vector<1x256xf32> -> vector<8x256xf32>
    %42 = vector.extract_strided_slice %41 {offsets = [0, 0], sizes = [8, 128], strides = [1, 1]} : vector<8x256xf32> to vector<8x128xf32>
    %43 = vector.extract_strided_slice %41 {offsets = [0, 128], sizes = [8, 128], strides = [1, 1]} : vector<8x256xf32> to vector<8x128xf32>
    %c0_33 = arith.constant 0 : index
    %c0_34 = arith.constant 0 : index
    %44 = vector.load %arg7[%c0_33, %c0_34] : memref<16x8xf32, #tpu.memory_space<vmem>>, vector<16x8xf32>
    %c0_35 = arith.constant 0 : index
    %c0_36 = arith.constant 0 : index
    %45 = vector.load %arg8[%c0_35, %c0_36] : memref<16x8xf32, #tpu.memory_space<vmem>>, vector<16x8xf32>
    %cst_37 = arith.constant dense<0.000000e+00> : vector<16x128xf32>
    %46 = tpu.matmul %44, %42, %cst_37 {dimension_numbers = #tpu.dot_dimension_numbers<[1], [0], [0], [1], [0, 0, 1, 1], [], []>} : vector<16x8xf32>, vector<8x128xf32>, vector<16x128xf32> -> vector<16x128xf32>
    %cst_38 = arith.constant dense<0.000000e+00> : vector<16x128xf32>
    %47 = tpu.matmul %45, %43, %cst_38 {dimension_numbers = #tpu.dot_dimension_numbers<[1], [0], [0], [1], [0, 0, 1, 1], [], []>} : vector<16x8xf32>, vector<8x128xf32>, vector<16x128xf32> -> vector<16x128xf32>
    %48 = arith.subf %46, %47 : vector<16x128xf32>
    %cst_39 = arith.constant dense<0.000000e+00> : vector<16x128xf32>
    %49 = tpu.matmul %45, %42, %cst_39 {dimension_numbers = #tpu.dot_dimension_numbers<[1], [0], [0], [1], [0, 0, 1, 1], [], []>} : vector<16x8xf32>, vector<8x128xf32>, vector<16x128xf32> -> vector<16x128xf32>
    %cst_40 = arith.constant dense<0.000000e+00> : vector<16x128xf32>
    %50 = tpu.matmul %44, %43, %cst_40 {dimension_numbers = #tpu.dot_dimension_numbers<[1], [0], [0], [1], [0, 0, 1, 1], [], []>} : vector<16x8xf32>, vector<8x128xf32>, vector<16x128xf32> -> vector<16x128xf32>
    %51 = arith.addf %49, %50 : vector<16x128xf32>
    %c0_41 = arith.constant 0 : index
    %c0_42 = arith.constant 0 : index
    %52 = vector.load %arg9[%c0_41, %c0_42] : memref<128x512xf32, #tpu.memory_space<vmem>>, vector<128x512xf32>
    %cst_43 = arith.constant dense<0.000000e+00> : vector<16x512xf32>
    %53 = tpu.matmul %48, %52, %cst_43 {dimension_numbers = #tpu.dot_dimension_numbers<[1], [0], [0], [1], [0, 0, 1, 1], [], []>} : vector<16x128xf32>, vector<128x512xf32>, vector<16x512xf32> -> vector<16x512xf32>
    %c0_44 = arith.constant 0 : index
    %c0_45 = arith.constant 0 : index
    %54 = vector.load %arg10[%c0_44, %c0_45] : memref<128x512xf32, #tpu.memory_space<vmem>>, vector<128x512xf32>
    %cst_46 = arith.constant dense<0.000000e+00> : vector<16x512xf32>
    %55 = tpu.matmul %51, %54, %cst_46 {dimension_numbers = #tpu.dot_dimension_numbers<[1], [0], [0], [1], [0, 0, 1, 1], [], []>} : vector<16x128xf32>, vector<128x512xf32>, vector<16x512xf32> -> vector<16x512xf32>
    %56 = arith.subf %53, %55 : vector<16x512xf32>
    %c0_47 = arith.constant 0 : index
    %c0_48 = arith.constant 0 : index
    %c0_49 = arith.constant 0 : index
    %57 = vector.load %arg11[%c0_47, %c0_48, %c0_49] : memref<1x16x512xf32, #tpu.memory_space<vmem>>, vector<1x16x512xf32>
    %58 = vector.shape_cast %57 : vector<1x16x512xf32> to vector<16x512xf32>
    %59 = vector.shape_cast %56 : vector<16x512xf32> to vector<1x16x512xf32>
    tpu.vector_store %arg11[%c0_47, %c0_48, %c0_49], %59 {strides = array<i32>} : memref<1x16x512xf32, #tpu.memory_space<vmem>>, vector<1x16x512xf32>,
    return
  }
  func.func @transform_0(%arg0: i32) -> (i32, i32, i32) {
    %c0_i32 = arith.constant 0 : i32
    %c0_i32_0 = arith.constant 0 : i32
    %c0_i32_1 = arith.constant 0 : i32
    return %arg0, %c0_i32, %c0_i32_0 : i32, i32, i32
  }
  func.func @transform_1(%arg0: i32) -> (i32, i32) {
    %c0_i32 = arith.constant 0 : i32
    %c0_i32_0 = arith.constant 0 : i32
    %c0_i32_1 = arith.constant 0 : i32
    return %c0_i32, %c0_i32_0 : i32, i32
  }
  func.func @transform_2(%arg0: i32) -> (i32, i32) {
    %c0_i32 = arith.constant 0 : i32
    %c0_i32_0 = arith.constant 0 : i32
    %c0_i32_1 = arith.constant 0 : i32
    return %c0_i32, %c0_i32_0 : i32, i32
  }
  func.func @transform_3(%arg0: i32) -> (i32, i32) {
    %c0_i32 = arith.constant 0 : i32
    %c0_i32_0 = arith.constant 0 : i32
    %c0_i32_1 = arith.constant 0 : i32
    return %c0_i32, %c0_i32_0 : i32, i32
  }
  func.func @transform_4(%arg0: i32) -> (i32, i32) {
    %c0_i32 = arith.constant 0 : i32
    %c0_i32_0 = arith.constant 0 : i32
    %c0_i32_1 = arith.constant 0 : i32
    return %c0_i32, %c0_i32_0 : i32, i32
  }
  func.func @transform_5(%arg0: i32) -> (i32, i32) {
    %c0_i32 = arith.constant 0 : i32
    %c0_i32_0 = arith.constant 0 : i32
    %c0_i32_1 = arith.constant 0 : i32
    return %c0_i32, %c0_i32_0 : i32, i32
  }
  func.func @transform_6(%arg0: i32) -> (i32, i32) {
    %c0_i32 = arith.constant 0 : i32
    %c0_i32_0 = arith.constant 0 : i32
    %c0_i32_1 = arith.constant 0 : i32
    return %c0_i32, %c0_i32_0 : i32, i32
  }
  func.func @transform_7(%arg0: i32) -> (i32, i32) {
    %c0_i32 = arith.constant 0 : i32
    %c0_i32_0 = arith.constant 0 : i32
    %c0_i32_1 = arith.constant 0 : i32
    return %c0_i32, %c0_i32_0 : i32, i32
  }
  func.func @transform_8(%arg0: i32) -> (i32, i32) {
    %c0_i32 = arith.constant 0 : i32
    %c0_i32_0 = arith.constant 0 : i32
    %c0_i32_1 = arith.constant 0 : i32
    return %c0_i32, %c0_i32_0 : i32, i32
  }
  func.func @transform_9(%arg0: i32) -> (i32, i32) {
    %c0_i32 = arith.constant 0 : i32
    %c0_i32_0 = arith.constant 0 : i32
    %c0_i32_1 = arith.constant 0 : i32
    return %c0_i32, %c0_i32_0 : i32, i32
  }
  func.func @transform_10(%arg0: i32) -> (i32, i32, i32) {
    %c0_i32 = arith.constant 0 : i32
    %c0_i32_0 = arith.constant 0 : i32
    %c0_i32_1 = arith.constant 0 : i32
    return %arg0, %c0_i32, %c0_i32_0 : i32, i32, i32
  }
}

module attributes {stable_mosaic.version = 11 : i64} {
  func.func @_linear_add_kernel(%arg0: i32, %arg1: memref<256x32xf32, #tpu.memory_space<vmem>>, %arg2: memref<32x32xf32, #tpu.memory_space<vmem>>, %arg3: memref<1x32xf32, #tpu.memory_space<vmem>>, %arg4: memref<256x32xf32, #tpu.memory_space<vmem>>, %arg5: memref<256x32xf32, #tpu.memory_space<vmem>>) attributes {dimension_semantics = [#tpu.dimension_semantics<parallel>], iteration_bounds = array<i64: 2>, scalar_prefetch = 0 : i64, scratch_operands = 0 : i64, tpu.core_type = #tpu.core_type<tc>, window_params = [{transform_indices = @transform_0, window_bounds = array<i64: 256, 32>}, {pipeline_mode = #tpu.pipeline_mode<synchronous>, transform_indices = @transform_1, window_bounds = array<i64: 32, 32>}, {pipeline_mode = #tpu.pipeline_mode<synchronous>, transform_indices = @transform_2, window_bounds = array<i64: 1, 32>}, {transform_indices = @transform_3, window_bounds = array<i64: 256, 32>}, {transform_indices = @transform_4, window_bounds = array<i64: 256, 32>}]} {
    %c0 = arith.constant 0 : index
    %c0_0 = arith.constant 0 : index
    %0 = vector.load %arg1[%c0, %c0_0] : memref<256x32xf32, #tpu.memory_space<vmem>>, vector<256x32xf32>
    %c0_1 = arith.constant 0 : index
    %c0_2 = arith.constant 0 : index
    %1 = vector.load %arg2[%c0_1, %c0_2] : memref<32x32xf32, #tpu.memory_space<vmem>>, vector<32x32xf32>
    %cst = arith.constant dense<0.000000e+00> : vector<256x32xf32>
    %2 = tpu.matmul %0, %1, %cst {dimension_numbers = #tpu.dot_dimension_numbers<[1], [0], [0], [1], [0, 0, 1, 1], [], []>} : vector<256x32xf32>, vector<32x32xf32>, vector<256x32xf32> -> vector<256x32xf32>
    %c0_3 = arith.constant 0 : index
    %c0_4 = arith.constant 0 : index
    %3 = vector.load %arg3[%c0_3, %c0_4] : memref<1x32xf32, #tpu.memory_space<vmem>>, vector<1x32xf32>
    %4 = vector.broadcast %3 : vector<1x32xf32> to vector<256x32xf32>
    %5 = arith.addf %2, %4 : vector<256x32xf32>
    %c0_5 = arith.constant 0 : index
    %c0_6 = arith.constant 0 : index
    %6 = vector.load %arg4[%c0_5, %c0_6] : memref<256x32xf32, #tpu.memory_space<vmem>>, vector<256x32xf32>
    %7 = arith.addf %5, %6 : vector<256x32xf32>
    %c0_7 = arith.constant 0 : index
    %c0_8 = arith.constant 0 : index
    %8 = vector.load %arg5[%c0_7, %c0_8] : memref<256x32xf32, #tpu.memory_space<vmem>>, vector<256x32xf32>
    tpu.vector_store %arg5[%c0_7, %c0_8], %7 {strides = array<i32>} : memref<256x32xf32, #tpu.memory_space<vmem>>, vector<256x32xf32>,
    return
  }
  func.func @transform_0(%arg0: i32) -> (i32, i32) {
    %c0_i32 = arith.constant 0 : i32
    %c0_i32_0 = arith.constant 0 : i32
    return %arg0, %c0_i32 : i32, i32
  }
  func.func @transform_1(%arg0: i32) -> (i32, i32) {
    %c0_i32 = arith.constant 0 : i32
    %c0_i32_0 = arith.constant 0 : i32
    %c0_i32_1 = arith.constant 0 : i32
    return %c0_i32, %c0_i32_0 : i32, i32
  }
  func.func @transform_2(%arg0: i32) -> (i32, i32) {
    %c0_i32 = arith.constant 0 : i32
    %c0_i32_0 = arith.constant 0 : i32
    %c0_i32_1 = arith.constant 0 : i32
    return %c0_i32, %c0_i32_0 : i32, i32
  }
  func.func @transform_3(%arg0: i32) -> (i32, i32) {
    %c0_i32 = arith.constant 0 : i32
    %c0_i32_0 = arith.constant 0 : i32
    return %arg0, %c0_i32 : i32, i32
  }
  func.func @transform_4(%arg0: i32) -> (i32, i32) {
    %c0_i32 = arith.constant 0 : i32
    %c0_i32_0 = arith.constant 0 : i32
    return %arg0, %c0_i32 : i32, i32
  }
}

module attributes {stable_mosaic.version = 11 : i64} {
  func.func @_head_kernel(%arg0: i32, %arg1: memref<256x32xf32, #tpu.memory_space<vmem>>, %arg2: memref<32x128xf32, #tpu.memory_space<vmem>>, %arg3: memref<1x128xf32, #tpu.memory_space<vmem>>, %arg4: memref<128x1xf32, #tpu.memory_space<vmem>>, %arg5: memref<1x1xf32, #tpu.memory_space<vmem>>, %arg6: memref<256x1xf32, #tpu.memory_space<vmem>>) attributes {dimension_semantics = [#tpu.dimension_semantics<parallel>], iteration_bounds = array<i64: 2>, scalar_prefetch = 0 : i64, scratch_operands = 0 : i64, tpu.core_type = #tpu.core_type<tc>, window_params = [{transform_indices = @transform_0, window_bounds = array<i64: 256, 32>}, {pipeline_mode = #tpu.pipeline_mode<synchronous>, transform_indices = @transform_1, window_bounds = array<i64: 32, 128>}, {pipeline_mode = #tpu.pipeline_mode<synchronous>, transform_indices = @transform_2, window_bounds = array<i64: 1, 128>}, {pipeline_mode = #tpu.pipeline_mode<synchronous>, transform_indices = @transform_3, window_bounds = array<i64: 128, 1>}, {pipeline_mode = #tpu.pipeline_mode<synchronous>, transform_indices = @transform_4, window_bounds = array<i64: 1, 1>}, {transform_indices = @transform_5, window_bounds = array<i64: 256, 1>}]} {
    %c0 = arith.constant 0 : index
    %c0_0 = arith.constant 0 : index
    %0 = vector.load %arg1[%c0, %c0_0] : memref<256x32xf32, #tpu.memory_space<vmem>>, vector<256x32xf32>
    %c0_1 = arith.constant 0 : index
    %c0_2 = arith.constant 0 : index
    %1 = vector.load %arg2[%c0_1, %c0_2] : memref<32x128xf32, #tpu.memory_space<vmem>>, vector<32x128xf32>
    %cst = arith.constant dense<0.000000e+00> : vector<256x128xf32>
    %2 = tpu.matmul %0, %1, %cst {dimension_numbers = #tpu.dot_dimension_numbers<[1], [0], [0], [1], [0, 0, 1, 1], [], []>} : vector<256x32xf32>, vector<32x128xf32>, vector<256x128xf32> -> vector<256x128xf32>
    %c0_3 = arith.constant 0 : index
    %c0_4 = arith.constant 0 : index
    %3 = vector.load %arg3[%c0_3, %c0_4] : memref<1x128xf32, #tpu.memory_space<vmem>>, vector<1x128xf32>
    %4 = vector.broadcast %3 : vector<1x128xf32> to vector<256x128xf32>
    %5 = arith.addf %2, %4 : vector<256x128xf32>
    %cst_5 = arith.constant 0.000000e+00 : f32
    %6 = vector.broadcast %cst_5 : f32 to vector<256x128xf32>
    %7 = arith.maximumf %5, %6 : vector<256x128xf32>
    %c0_6 = arith.constant 0 : index
    %c0_7 = arith.constant 0 : index
    %8 = vector.load %arg4[%c0_6, %c0_7] : memref<128x1xf32, #tpu.memory_space<vmem>>, vector<128x1xf32>
    %cst_8 = arith.constant dense<0.000000e+00> : vector<256x1xf32>
    %9 = tpu.matmul %7, %8, %cst_8 {dimension_numbers = #tpu.dot_dimension_numbers<[1], [0], [0], [1], [0, 0, 1, 1], [], []>} : vector<256x128xf32>, vector<128x1xf32>, vector<256x1xf32> -> vector<256x1xf32>
    %c0_9 = arith.constant 0 : index
    %c0_10 = arith.constant 0 : index
    %10 = vector.load %arg5[%c0_9, %c0_10] : memref<1x1xf32, #tpu.memory_space<vmem>>, vector<1x1xf32>
    %11 = vector.broadcast %10 : vector<1x1xf32> to vector<256x1xf32>
    %12 = arith.addf %9, %11 : vector<256x1xf32>
    %c0_11 = arith.constant 0 : index
    %c0_12 = arith.constant 0 : index
    %13 = vector.load %arg6[%c0_11, %c0_12] : memref<256x1xf32, #tpu.memory_space<vmem>>, vector<256x1xf32>
    tpu.vector_store %arg6[%c0_11, %c0_12], %12 {strides = array<i32>} : memref<256x1xf32, #tpu.memory_space<vmem>>, vector<256x1xf32>,
    return
  }
  func.func @transform_0(%arg0: i32) -> (i32, i32) {
    %c0_i32 = arith.constant 0 : i32
    %c0_i32_0 = arith.constant 0 : i32
    return %arg0, %c0_i32 : i32, i32
  }
  func.func @transform_1(%arg0: i32) -> (i32, i32) {
    %c0_i32 = arith.constant 0 : i32
    %c0_i32_0 = arith.constant 0 : i32
    %c0_i32_1 = arith.constant 0 : i32
    return %c0_i32, %c0_i32_0 : i32, i32
  }
  func.func @transform_2(%arg0: i32) -> (i32, i32) {
    %c0_i32 = arith.constant 0 : i32
    %c0_i32_0 = arith.constant 0 : i32
    %c0_i32_1 = arith.constant 0 : i32
    return %c0_i32, %c0_i32_0 : i32, i32
  }
  func.func @transform_3(%arg0: i32) -> (i32, i32) {
    %c0_i32 = arith.constant 0 : i32
    %c0_i32_0 = arith.constant 0 : i32
    %c0_i32_1 = arith.constant 0 : i32
    return %c0_i32, %c0_i32_0 : i32, i32
  }
  func.func @transform_4(%arg0: i32) -> (i32, i32) {
    %c0_i32 = arith.constant 0 : i32
    %c0_i32_0 = arith.constant 0 : i32
    %c0_i32_1 = arith.constant 0 : i32
    return %c0_i32, %c0_i32_0 : i32, i32
  }
  func.func @transform_5(%arg0: i32) -> (i32, i32) {
    %c0_i32 = arith.constant 0 : i32
    %c0_i32_0 = arith.constant 0 : i32
    return %arg0, %c0_i32 : i32, i32
  }
}

</mosaic_0001>

<bundles_post_ra>
// kernel: fno2d_forward.10
= control target key start
LH: loop header
LB: loop body
LE: loop exit
PB: predicated region body
PF: predicated region fallthrough
CT: control target
= control target key end

     0   :  { %8 = vsyncpa [#allocation3], 0  ;;  %s1168_s0 = inlined_call_operand.vmem [shape: f32[512,3], index: 0, kind: input, shape index: {}]   ;;  %s1169_s1 = inlined_call_operand.hbm [shape: f32[3,32], index: 1, kind: input, shape index: {}]   ;;  %s1170_s2 = inlined_call_operand.hbm [shape: f32[1,32], index: 2, kind: input, shape index: {}]   ;;  %s1171_s3 = inlined_call_operand.vmem [shape: f32[512,32], index: 3, kind: output, shape index: {}]  }
   0x1   :  { %9 = vsyncpa [#allocation5], 0  ;;  %s930_s12 = smov 0  }
   0x2 LB: > { %s677_s13 = sadd.s32 4294967295, %s906_s12   ;;  %p679_p0 = scmp.ge.s32.totalorder %s906_s12, 1  ;;  %s906_s12 = sphi %s930_s12, %s15_s12  }
   0x3   : > { %p114_p1 = scmp.lt.s32.totalorder %s906_s12, 3  ;;  %p940_p2 = scmp.eq.s32.totalorder %s677_s13, 0 }
   0x4   : > { %s908_s16 = smov [#allocation2]   ;;  %s909_s18 = smov [#allocation4]  }
   0x5   : > { %s1174_s14 = scalar_select %p940_p2, 1, 0 }
   0x6   : > { %p944_p3 = pnand %p679_p0, %p114_p1  ;;  %s127_s17 = sshll.u32 %s908_s16, 4  ;;  %s128_s17 = int_to_ptr.vmem [resolvable:$true] %s127_s17 }
   0x7   : > { %s138_s19 = sshll.u32 %s909_s18, 4  ;;  %s851_s21 = scalar_lea.vmem %s128_s17, 64  ;;  %s139_s19 = int_to_ptr.vmem [resolvable:$true] %s138_s19 }
   0x8   : > { %p819_p4 = pneg %p944_p3  ;;  %p852_p7 = scmp.ne.s32.totalorder %s128_s17, %s851_s21 }
   0x9   : > { %p859_p10 = scmp.lt.s32.totalorder %s128_s17, %s128_s17  ;;  %p860_p11 = scmp.lt.s32.totalorder %s851_s21, %s851_s21 }
   0xa   : > { %p952_p5 = pnand %p940_p2, %p819_p4 }
   0xb   : > { %p861_p12 = por %p860_p11, %p859_p10 }
   0xc   : > { %p842_p6 = pneg %p952_p5 }
   0xe   : > { %p854_p8 = pnand %p852_p7, %p842_p6 }
  0x10   : > { %p855_p9 = pneg %p854_p8 }
  0x12   : > { %p862_p13 = pnand %p861_p12, %p855_p9 }
  0x14   : > { %865 = shalt.err (!%p862_p13)
}
  0x15   : > { %822 = dma.hbm_to_vmem [thread:$0]  (!%p952_p5), %s1169_s1, 64, %s128_s17, [#allocation3]  }
  0x16   : > { %s877_s24 = scalar_lea.vmem %s139_s19, 16  ;;  %s884_s25 = scalar_lea.vmem %s139_s19, 32 }
  0x17   : > { %p878_p0 = scmp.ne.s32.totalorder %s139_s19, %s877_s24  ;;  %p885_p7 = scmp.lt.s32.totalorder %s139_s19, %s139_s19 }
  0x18   : > { %p886_p8 = scmp.lt.s32.totalorder %s884_s25, %s877_s24 }
  0x19   : > { %p880_p1 = pnand %p878_p0, %p842_p6 }
  0x1a   : > { %p887_p2 = por %p886_p8, %p885_p7 }
  0x1b   : > { %p881_p4 = pneg %p880_p1 }
  0x1d   : > { %p888_p10 = pnand %p887_p2, %p881_p4 }
  0x1f   : > { %891 = shalt.err (!%p888_p10)
}
  0x20   : > { %825 = dma.hbm_to_vmem [thread:$0]  (!%p952_p5), %s1170_s2, 16, %s139_s19, [#allocation5]  }
  0x21   : > { %160 = sbr.rel (%p944_p3) target bundleno = 276 (0x114), region = 32  ;;  %p1177_p9 = scmp.ne.s32.totalorder (!%p944_p3), %s1174_s14, 0 }
  0x26   : > { %897 = dma.done.wait (%p1177_p9), [#allocation3], 64  }
  0x27   : > { %899 = vsyncadd (%p1177_p9), [#allocation3], 4294967232 }
  0x28   : > { %901 = dma.done.wait (%p1177_p9), [#allocation5], 16  }
  0x29   : > { %903 = vsyncadd (%p1177_p9), [#allocation5], 4294967280  ;;  %s686_s28 = sshll.u32 %s677_s13, 5  ;;  %vm337_vm0 = vcmask 1042432   ;;  %v232_v0 = vld [vmem:[#allocation2] sm:$0x7] }
  0x2a   : > { %p189_p2 = scmp.lt.s32.totalorder %s686_s28, 63  ;;  %vm240_vm1 = vcmask 23552   ;;  %759 = vmatprep.subr.msk.mxu0 %vm337_vm0, %v232_v0  ;;  %809 = vmatprep.subr.msk.mxu1 %vm337_vm0, %v232_v0  ;;  %v1060_v33 = vld [vmem:[#allocation4] ss:$0 sm:$0xff]  ;;  %vm566_vm2 = vcmask 261120  }
  0x2b   : > { %760 = vmatpush3.msk.msra.mxu0 %vm337_vm0, %v232_v0  ;;  %810 = vmatpush3.msk.msra.mxu1 %vm337_vm0, %v232_v0 }
  0x2c   : > { %s1179_s28 = smov (!%p189_p2, %s686_s28), 63 }
  0x2d   : > { %s687_s29 = sshll.u32 %s1179_s28, 3 }
  0x2e   : > { %s994_s5 = scalar_lea.vmem %s1168_s0, %s687_s29  ;;  %s1067_s8 = scalar_lea.vmem %s1171_s3, %s687_s29 }
  0x2f   : > { %v200_v1 = vld [vmem:[%s994_s5] sm:$0xff]  ;;  %v201_v3 = vld [vmem:[%s994_s5 + $0x8] sm:$0xff]  ;;  %v202_v5 = vld [vmem:[%s994_s5 + $0x10] sm:$0xff] }
  0x30   : > { %v216_v2 = vld [vmem:[%s994_s5 + $0x80] sm:$0xff]  ;;  %v217_v4 = vld [vmem:[%s994_s5 + $0x88] sm:$0xff]  ;;  %v218_v6 = vld [vmem:[%s994_s5 + $0x90] sm:$0xff]  ;;  %761 = vmatprep.mubr.msk.f32.mxu0 %vm240_vm1, %v200_v1 }
  0x31   : > { %785 = vmatprep.mubr.msk.f32.mxu1 %vm240_vm1, %v216_v2  ;;  %762 = vmatmul.mubr.msk.f32.vlgmr.msra.gmra.mxu0 %vm240_vm1, %v201_v3  ;;  %v203_v7 = vld [vmem:[%s994_s5 + $0x18] sm:$0xff]  ;;  %v204_v9 = vld [vmem:[%s994_s5 + $0x20] sm:$0xff]  ;;  %v205_v11 = vld [vmem:[%s994_s5 + $0x28] sm:$0xff] }
  0x32   : > { %786 = vmatmul.mubr.msk.f32.vlgmr.msra.gmra.mxu1 %vm240_vm1, %v217_v4  ;;  %764 = vmatprep.mubr.msk.f32.mxu0 %vm240_vm1, %v202_v5  ;;  %v219_v8 = vld [vmem:[%s994_s5 + $0x98] sm:$0xff]  ;;  %v220_v10 = vld [vmem:[%s994_s5 + $0xa0] sm:$0xff]  ;;  %v221_v12 = vld [vmem:[%s994_s5 + $0xa8] sm:$0xff] }
  0x33   : > { %788 = vmatprep.mubr.msk.f32.mxu1 %vm240_vm1, %v218_v6  ;;  %v206_v13 = vld [vmem:[%s994_s5 + $0x30] sm:$0xff]  ;;  %v207_v15 = vld [vmem:[%s994_s5 + $0x38] sm:$0xff]  ;;  %v208_v17 = vld [vmem:[%s994_s5 + $0x40] sm:$0xff] }
  0x34   : > { %v222_v14 = vld [vmem:[%s994_s5 + $0xb0] sm:$0xff]  ;;  %v223_v16 = vld [vmem:[%s994_s5 + $0xb8] sm:$0xff]  ;;  %v224_v18 = vld [vmem:[%s994_s5 + $0xc0] sm:$0xff] }
  0x35   : > { %765 = vmatmul.mubr.msk.f32.gmra.mxu0 %vm240_vm1, %v203_v7  ;;  %v209_v19 = vld [vmem:[%s994_s5 + $0x48] sm:$0xff]  ;;  %v210_v21 = vld [vmem:[%s994_s5 + $0x50] sm:$0xff]  ;;  %v211_v23 = vld [vmem:[%s994_s5 + $0x58] sm:$0xff] }
  0x36   : > { %789 = vmatmul.mubr.msk.f32.gmra.mxu1 %vm240_vm1, %v219_v8  ;;  %767 = vmatprep.mubr.msk.f32.mxu0 %vm240_vm1, %v204_v9  ;;  %v225_v20 = vld [vmem:[%s994_s5 + $0xc8] sm:$0xff]  ;;  %v226_v22 = vld [vmem:[%s994_s5 + $0xd0] sm:$0xff]  ;;  %v227_v24 = vld [vmem:[%s994_s5 + $0xd8] sm:$0xff] }
  0x37   : > { %791 = vmatprep.mubr.msk.f32.mxu1 %vm240_vm1, %v220_v10  ;;  %v212_v25 = vld [vmem:[%s994_s5 + $0x60] sm:$0xff]  ;;  %v213_v27 = vld [vmem:[%s994_s5 + $0x68] sm:$0xff]  ;;  %v214_v29 = vld [vmem:[%s994_s5 + $0x70] sm:$0xff] }
  0x38   : > { %v228_v26 = vld [vmem:[%s994_s5 + $0xe0] sm:$0xff]  ;;  %v229_v28 = vld [vmem:[%s994_s5 + $0xe8] sm:$0xff]  ;;  %v230_v30 = vld [vmem:[%s994_s5 + $0xf0] sm:$0xff] }
  0x39   : > { %768 = vmatmul.mubr.msk.f32.gmra.mxu0 %vm240_vm1, %v205_v11  ;;  %v215_v31 = vld [vmem:[%s994_s5 + $0x78] sm:$0xff] }
  0x3a   : > { %792 = vmatmul.mubr.msk.f32.gmra.mxu1 %vm240_vm1, %v221_v12  ;;  %770 = vmatprep.mubr.msk.f32.mxu0 %vm240_vm1, %v206_v13  ;;  %v231_v32 = vld [vmem:[%s994_s5 + $0xf8] sm:$0xff] }
  0x3b   : > { %794 = vmatprep.mubr.msk.f32.mxu1 %vm240_vm1, %v222_v14 }
  0x3d   : > { %771 = vmatmul.mubr.msk.f32.gmra.mxu0 %vm240_vm1, %v207_v15 }
  0x3e   : > { %795 = vmatmul.mubr.msk.f32.gmra.mxu1 %vm240_vm1, %v223_v16  ;;  %773 = vmatprep.mubr.msk.f32.mxu0 %vm240_vm1, %v208_v17 }
  0x3f   : > { %797 = vmatprep.mubr.msk.f32.mxu1 %vm240_vm1, %v224_v18 }
  0x41   : > { %774 = vmatmul.mubr.msk.f32.gmra.mxu0 %vm240_vm1, %v209_v19 }
  0x42   : > { %798 = vmatmul.mubr.msk.f32.gmra.mxu1 %vm240_vm1, %v225_v20  ;;  %776 = vmatprep.mubr.msk.f32.mxu0 %vm240_vm1, %v210_v21 }
  0x43   : > { %800 = vmatprep.mubr.msk.f32.mxu1 %vm240_vm1, %v226_v22 }
  0x45   : > { %777 = vmatmul.mubr.msk.f32.gmra.mxu0 %vm240_vm1, %v211_v23 }
  0x46   : > { %801 = vmatmul.mubr.msk.f32.gmra.mxu1 %vm240_vm1, %v227_v24  ;;  %779 = vmatprep.mubr.msk.f32.mxu0 %vm240_vm1, %v212_v25 }
  0x47   : > { %803 = vmatprep.mubr.msk.f32.mxu1 %vm240_vm1, %v228_v26 }
  0x49   : > { %780 = vmatmul.mubr.msk.f32.gmra.mxu0 %vm240_vm1, %v213_v27 }
  0x4a   : > { %804 = vmatmul.mubr.msk.f32.gmra.mxu1 %vm240_vm1, %v229_v28  ;;  %782 = vmatprep.mubr.msk.f32.mxu0 %vm240_vm1, %v214_v29 }
  0x4b   : > { %806 = vmatprep.mubr.msk.f32.mxu1 %vm240_vm1, %v230_v30 }
  0x4d   : > { %783 = vmatmul.mubr.msk.f32.gmra.mxu0 %vm240_vm1, %v215_v31 }
  0x4e   : > { %807 = vmatmul.mubr.msk.f32.gmra.mxu1 %vm240_vm1, %v231_v32 }
  0xf1   : > { %v763_v34 = vpop.f32.mrf.mxu0 }
  0xf2   : > { %v787_v35 = vpop.f32.mrf.mxu1  ;;  %v413_v36 = vadd.f32 %v763_v34, %v1060_v33 }
  0xf3   : > { %v493_v37 = vadd.f32 %v787_v35, %v1060_v33  ;;  %v407_v38 = vpop.f32.mrf.mxu0 }
  0xf4   : > { %v487_v39 = vpop.f32.mrf.mxu1  ;;  %568 = vst.msk [vmem:[%s1067_s8 + $0x8] sm:$0xff] %vm566_vm2, %v413_v36  ;;  %v408_v40 = vadd.f32 %v1060_v33, %v407_v38 }
  0xf5   : > { %584 = vst.msk [vmem:[%s1067_s8 + $0x88] sm:$0xff] %vm566_vm2, %v493_v37  ;;  %v488_v41 = vadd.f32 %v1060_v33, %v487_v39  ;;  %v766_v42 = vpop.f32.mrf.mxu0 }
  0xf6   : > { %v790_v43 = vpop.f32.mrf.mxu1  ;;  %567 = vst.msk [vmem:[%s1067_s8] sm:$0xff] %vm566_vm2, %v408_v40  ;;  %v423_v44 = vadd.f32 %v766_v42, %v1060_v33 }
  0xf7   : > { %583 = vst.msk [vmem:[%s1067_s8 + $0x80] sm:$0xff] %vm566_vm2, %v488_v41  ;;  %v503_v45 = vadd.f32 %v790_v43, %v1060_v33  ;;  %v417_v46 = vpop.f32.mrf.mxu0 }
  0xf8   : > { %v497_v47 = vpop.f32.mrf.mxu1  ;;  %570 = vst.msk [vmem:[%s1067_s8 + $0x18] sm:$0xff] %vm566_vm2, %v423_v44  ;;  %v418_v48 = vadd.f32 %v1060_v33, %v417_v46 }
  0xf9   : > { %586 = vst.msk [vmem:[%s1067_s8 + $0x98] sm:$0xff] %vm566_vm2, %v503_v45  ;;  %v498_v49 = vadd.f32 %v1060_v33, %v497_v47  ;;  %v769_v50 = vpop.f32.mrf.mxu0 }
  0xfa   : > { %v793_v51 = vpop.f32.mrf.mxu1  ;;  %569 = vst.msk [vmem:[%s1067_s8 + $0x10] sm:$0xff] %vm566_vm2, %v418_v48  ;;  %v433_v52 = vadd.f32 %v769_v50, %v1060_v33 }
  0xfb   : > { %585 = vst.msk [vmem:[%s1067_s8 + $0x90] sm:$0xff] %vm566_vm2, %v498_v49  ;;  %v513_v53 = vadd.f32 %v793_v51, %v1060_v33  ;;  %v427_v54 = vpop.f32.mrf.mxu0 }
  0xfc   : > { %v507_v55 = vpop.f32.mrf.mxu1  ;;  %572 = vst.msk [vmem:[%s1067_s8 + $0x28] sm:$0xff] %vm566_vm2, %v433_v52  ;;  %v428_v56 = vadd.f32 %v1060_v33, %v427_v54 }
  0xfd   : > { %588 = vst.msk [vmem:[%s1067_s8 + $0xa8] sm:$0xff] %vm566_vm2, %v513_v53  ;;  %v508_v57 = vadd.f32 %v1060_v33, %v507_v55  ;;  %v772_v58 = vpop.f32.mrf.mxu0 }
  0xfe   : > { %v796_v59 = vpop.f32.mrf.mxu1  ;;  %571 = vst.msk [vmem:[%s1067_s8 + $0x20] sm:$0xff] %vm566_vm2, %v428_v56  ;;  %v443_v60 = vadd.f32 %v772_v58, %v1060_v33 }
  0xff   : > { %587 = vst.msk [vmem:[%s1067_s8 + $0xa0] sm:$0xff] %vm566_vm2, %v508_v57  ;;  %v523_v61 = vadd.f32 %v796_v59, %v1060_v33  ;;  %v437_v62 = vpop.f32.mrf.mxu0 }
 0x100   : > { %v517_v63 = vpop.f32.mrf.mxu1  ;;  %574 = vst.msk [vmem:[%s1067_s8 + $0x38] sm:$0xff] %vm566_vm2, %v443_v60  ;;  %v438_v0 = vadd.f32 %v1060_v33, %v437_v62 }
 0x101   : > { %590 = vst.msk [vmem:[%s1067_s8 + $0xb8] sm:$0xff] %vm566_vm2, %v523_v61  ;;  %v518_v1 = vadd.f32 %v1060_v33, %v517_v63  ;;  %v775_v2 = vpop.f32.mrf.mxu0 }
 0x102   : > { %v799_v3 = vpop.f32.mrf.mxu1  ;;  %573 = vst.msk [vmem:[%s1067_s8 + $0x30] sm:$0xff] %vm566_vm2, %v438_v0  ;;  %v453_v4 = vadd.f32 %v775_v2, %v1060_v33 }
 0x103   : > { %589 = vst.msk [vmem:[%s1067_s8 + $0xb0] sm:$0xff] %vm566_vm2, %v518_v1  ;;  %v533_v5 = vadd.f32 %v799_v3, %v1060_v33  ;;  %v447_v6 = vpop.f32.mrf.mxu0 }
 0x104   : > { %v527_v7 = vpop.f32.mrf.mxu1  ;;  %576 = vst.msk [vmem:[%s1067_s8 + $0x48] sm:$0xff] %vm566_vm2, %v453_v4  ;;  %v448_v8 = vadd.f32 %v1060_v33, %v447_v6 }
 0x105   : > { %592 = vst.msk [vmem:[%s1067_s8 + $0xc8] sm:$0xff] %vm566_vm2, %v533_v5  ;;  %v528_v9 = vadd.f32 %v1060_v33, %v527_v7  ;;  %v778_v10 = vpop.f32.mrf.mxu0 }
 0x106   : > { %v802_v11 = vpop.f32.mrf.mxu1  ;;  %575 = vst.msk [vmem:[%s1067_s8 + $0x40] sm:$0xff] %vm566_vm2, %v448_v8  ;;  %v463_v12 = vadd.f32 %v778_v10, %v1060_v33 }
 0x107   : > { %591 = vst.msk [vmem:[%s1067_s8 + $0xc0] sm:$0xff] %vm566_vm2, %v528_v9  ;;  %v543_v13 = vadd.f32 %v802_v11, %v1060_v33  ;;  %v457_v14 = vpop.f32.mrf.mxu0 }
 0x108   : > { %v537_v15 = vpop.f32.mrf.mxu1  ;;  %578 = vst.msk [vmem:[%s1067_s8 + $0x58] sm:$0xff] %vm566_vm2, %v463_v12  ;;  %v458_v16 = vadd.f32 %v1060_v33, %v457_v14 }
 0x109   : > { %594 = vst.msk [vmem:[%s1067_s8 + $0xd8] sm:$0xff] %vm566_vm2, %v543_v13  ;;  %v538_v17 = vadd.f32 %v1060_v33, %v537_v15  ;;  %v781_v18 = vpop.f32.mrf.mxu0 }
 0x10a   : > { %v805_v19 = vpop.f32.mrf.mxu1  ;;  %577 = vst.msk [vmem:[%s1067_s8 + $0x50] sm:$0xff] %vm566_vm2, %v458_v16  ;;  %v473_v20 = vadd.f32 %v781_v18, %v1060_v33 }
 0x10b   : > { %593 = vst.msk [vmem:[%s1067_s8 + $0xd0] sm:$0xff] %vm566_vm2, %v538_v17  ;;  %v553_v21 = vadd.f32 %v805_v19, %v1060_v33  ;;  %v467_v22 = vpop.f32.mrf.mxu0 }
 0x10c   : > { %v547_v23 = vpop.f32.mrf.mxu1  ;;  %580 = vst.msk [vmem:[%s1067_s8 + $0x68] sm:$0xff] %vm566_vm2, %v473_v20  ;;  %v468_v24 = vadd.f32 %v1060_v33, %v467_v22 }
 0x10d   : > { %596 = vst.msk [vmem:[%s1067_s8 + $0xe8] sm:$0xff] %vm566_vm2, %v553_v21  ;;  %v548_v25 = vadd.f32 %v1060_v33, %v547_v23  ;;  %v784_v26 = vpop.f32.mrf.mxu0 }
 0x10e   : > { %v808_v27 = vpop.f32.mrf.mxu1  ;;  %579 = vst.msk [vmem:[%s1067_s8 + $0x60] sm:$0xff] %vm566_vm2, %v468_v24  ;;  %v483_v28 = vadd.f32 %v784_v26, %v1060_v33 }
 0x10f   : > { %595 = vst.msk [vmem:[%s1067_s8 + $0xe0] sm:$0xff] %vm566_vm2, %v548_v25  ;;  %v563_v29 = vadd.f32 %v808_v27, %v1060_v33  ;;  %v477_v30 = vpop.f32.mrf.mxu0 }
 0x110   : > { %v557_v31 = vpop.f32.mrf.mxu1  ;;  %582 = vst.msk [vmem:[%s1067_s8 + $0x78] sm:$0xff] %vm566_vm2, %v483_v28  ;;  %v478_v32 = vadd.f32 %v1060_v33, %v477_v30 }
 0x111   : > { %598 = vst.msk [vmem:[%s1067_s8 + $0xf8] sm:$0xff] %vm566_vm2, %v563_v29  ;;  %v558_v34 = vadd.f32 %v1060_v33, %v557_v31 }
 0x112   : > { %581 = vst.msk [vmem:[%s1067_s8 + $0x70] sm:$0xff] %vm566_vm2, %v478_v32 }
 0x113   : > { %597 = vst.msk [vmem:[%s1067_s8 + $0xf0] sm:$0xff] %vm566_vm2, %v558_v34 }
 0x114 PF: > { %s15_s12 = sadd.s32 1, %s906_s12  }
 0x115   : > { %p12_p3 = scmp.ge.s32.totalorder %s15_s12, 4  }
 0x117   :  { %14 = sbr.rel (!%p12_p3) target bundleno = 2 (0x2), region = 71 }
 0x11c   :  { %621 = vsyncpa [#allocation3], 1 }
 0x11d   :  { %623 = vsyncpa [#allocation3 + $0x1], 1 }
 0x11e   :  { %624 = vsyncpa [#allocation5], 1 }

// kernel: fno2d_forward.12
= control target key start
LH: loop header
LB: loop body
LE: loop exit
PB: predicated region body
PF: predicated region fallthrough
CT: control target
= control target key end

     0   :  { %s971_s15 = smov 0   ;;  %s1211_s0 = inlined_call_operand.vmem [shape: f32[512,32], index: 0, kind: input, shape index: {}]   ;;  %s1212_s1 = inlined_call_operand.vmem [shape: f32[32,32], index: 1, kind: input, shape index: {}]   ;;  %s1213_s2 = inlined_call_operand.vmem [shape: f32[1,32], index: 2, kind: input, shape index: {}]   ;;  %s1214_s3 = inlined_call_operand.vmem [shape: f32[512,32], index: 3, kind: input, shape index: {}]   ;;  %s1215_s4 = inlined_call_operand.vmem [shape: f32[512,32], index: 4, kind: output, shape index: {}]  }
   0x1 LB: > { %s784_s16 = sadd.s32 4294967295, %s944_s15   ;;  %p788_p0 = scmp.ge.s32.totalorder %s944_s15, 1  ;;  %s944_s15 = sphi %s971_s15, %s14_s15  }
   0x2   : > { %p174_p1 = scmp.lt.s32.totalorder %s944_s15, 3 }
   0x4   : > { %p175_p2 = pnand %p788_p0, %p174_p1 }
   0x5   : > { %s789_s21 = sshll.u32 (!%p175_p2), %s784_s16, 5 }
   0x6   : > { %178 = sbr.rel (%p175_p2) target bundleno = 251 (0xfb), region = 36  ;;  %p206_p3 = scmp.lt.s32.totalorder (!%p175_p2), %s789_s21, 63 }
   0xb   : > { %v258_v0 = vld [vmem:[%s1212_s1 + $0x18] sm:$0xff]  ;;  %v257_v1 = vld [vmem:[%s1212_s1 + $0x10] sm:$0xff]  ;;  %v256_v2 = vld [vmem:[%s1212_s1 + $0x8] sm:$0xff]  ;;  %s1217_s21 = smov (!%p206_p3, %s789_s21), 63  ;;  %vm266_vm0 = vcmask 261120  }
   0xc   : > { %866 = vmatprep.subr.mxu0 %v258_v0  ;;  %922 = vmatprep.subr.mxu1 %v258_v0  ;;  %v255_v3 = vld [vmem:[%s1212_s1] sm:$0xff]  ;;  %s991_s26 = sshll.u32 %s1217_s21, 3 }
   0xd   : > { %867 = vmatpush3.msra.mxu0 %v258_v0  ;;  %926 = vmatpush3.msra.mxu1 %v258_v0  ;;  %s997_s29 = scalar_lea.vmem %s1211_s0, %s991_s26  ;;  %s1067_s6 = scalar_lea.vmem %s1214_s3, %s991_s26  ;;  %v1072_v36 = vld [vmem:[%s1213_s2] ss:$0 sm:$0xff] }
   0xe   : > { %868 = vmatprep.subr.mxu0 %v257_v1  ;;  %923 = vmatprep.subr.mxu1 %v257_v1  ;;  %v223_v4 = vld [vmem:[%s997_s29] sm:$0xff]  ;;  %v224_v6 = vld [vmem:[%s997_s29 + $0x8] sm:$0xff]  ;;  %v225_v8 = vld [vmem:[%s997_s29 + $0x10] sm:$0xff]  ;;  %s1086_s11 = scalar_lea.vmem %s1215_s4, %s991_s26 }
   0xf   : > { %869 = vmatpush3.msra.mxu0 %v257_v1  ;;  %927 = vmatpush3.msra.mxu1 %v257_v1  ;;  %v239_v5 = vld [vmem:[%s997_s29 + $0x80] sm:$0xff]  ;;  %v240_v7 = vld [vmem:[%s997_s29 + $0x88] sm:$0xff]  ;;  %v241_v9 = vld [vmem:[%s997_s29 + $0x90] sm:$0xff] }
  0x10   : > { %870 = vmatprep.subr.mxu0 %v256_v2  ;;  %924 = vmatprep.subr.mxu1 %v256_v2  ;;  %v226_v10 = vld [vmem:[%s997_s29 + $0x18] sm:$0xff]  ;;  %v227_v12 = vld [vmem:[%s997_s29 + $0x20] sm:$0xff]  ;;  %v228_v14 = vld [vmem:[%s997_s29 + $0x28] sm:$0xff] }
  0x11   : > { %871 = vmatpush3.msra.mxu0 %v256_v2  ;;  %928 = vmatpush3.msra.mxu1 %v256_v2  ;;  %v242_v11 = vld [vmem:[%s997_s29 + $0x98] sm:$0xff]  ;;  %v243_v13 = vld [vmem:[%s997_s29 + $0xa0] sm:$0xff]  ;;  %v244_v15 = vld [vmem:[%s997_s29 + $0xa8] sm:$0xff] }
  0x12   : > { %872 = vmatprep.subr.mxu0 %v255_v3  ;;  %925 = vmatprep.subr.mxu1 %v255_v3  ;;  %v229_v16 = vld [vmem:[%s997_s29 + $0x30] sm:$0xff]  ;;  %v230_v18 = vld [vmem:[%s997_s29 + $0x38] sm:$0xff]  ;;  %v231_v20 = vld [vmem:[%s997_s29 + $0x40] sm:$0xff] }
  0x13   : > { %873 = vmatpush3.msra.mxu0 %v255_v3  ;;  %929 = vmatpush3.msra.mxu1 %v255_v3  ;;  %v245_v17 = vld [vmem:[%s997_s29 + $0xb0] sm:$0xff]  ;;  %v246_v19 = vld [vmem:[%s997_s29 + $0xb8] sm:$0xff]  ;;  %v247_v21 = vld [vmem:[%s997_s29 + $0xc0] sm:$0xff] }
  0x14   : > { %874 = vmatprep.mubr.msk.f32.mxu0 %vm266_vm0, %v223_v4  ;;  %898 = vmatprep.mubr.msk.f32.mxu1 %vm266_vm0, %v239_v5  ;;  %v232_v22 = vld [vmem:[%s997_s29 + $0x48] sm:$0xff]  ;;  %v233_v24 = vld [vmem:[%s997_s29 + $0x50] sm:$0xff]  ;;  %v234_v26 = vld [vmem:[%s997_s29 + $0x58] sm:$0xff] }
  0x15   : > { %875 = vmatmul.mubr.msk.f32.vlgmr.msra.gmra.mxu0 %vm266_vm0, %v224_v6  ;;  %899 = vmatmul.mubr.msk.f32.vlgmr.msra.gmra.mxu1 %vm266_vm0, %v240_v7  ;;  %v248_v23 = vld [vmem:[%s997_s29 + $0xc8] sm:$0xff]  ;;  %v249_v25 = vld [vmem:[%s997_s29 + $0xd0] sm:$0xff]  ;;  %v250_v27 = vld [vmem:[%s997_s29 + $0xd8] sm:$0xff] }
  0x16   : > { %877 = vmatprep.mubr.msk.f32.mxu0 %vm266_vm0, %v225_v8  ;;  %901 = vmatprep.mubr.msk.f32.mxu1 %vm266_vm0, %v241_v9  ;;  %v235_v28 = vld [vmem:[%s997_s29 + $0x60] sm:$0xff]  ;;  %v236_v30 = vld [vmem:[%s997_s29 + $0x68] sm:$0xff]  ;;  %v237_v32 = vld [vmem:[%s997_s29 + $0x70] sm:$0xff] }
  0x17   : > { %v251_v29 = vld [vmem:[%s997_s29 + $0xe0] sm:$0xff]  ;;  %v252_v31 = vld [vmem:[%s997_s29 + $0xe8] sm:$0xff]  ;;  %v253_v33 = vld [vmem:[%s997_s29 + $0xf0] sm:$0xff] }
  0x18   : > { %v238_v34 = vld [vmem:[%s997_s29 + $0x78] sm:$0xff]  ;;  %v589_v38 = vld [vmem:[%s1067_s6 + $0x8] sm:$0xff]  ;;  %v588_v44 = vld [vmem:[%s1067_s6] sm:$0xff] }
  0x19   : > { %878 = vmatmul.mubr.msk.f32.gmra.mxu0 %vm266_vm0, %v226_v10  ;;  %902 = vmatmul.mubr.msk.f32.gmra.mxu1 %vm266_vm0, %v242_v11  ;;  %v254_v35 = vld [vmem:[%s997_s29 + $0xf8] sm:$0xff]  ;;  %v605_v40 = vld [vmem:[%s1067_s6 + $0x88] sm:$0xff]  ;;  %v604_v46 = vld [vmem:[%s1067_s6 + $0x80] sm:$0xff] }
  0x1a   : > { %880 = vmatprep.mubr.msk.f32.mxu0 %vm266_vm0, %v227_v12  ;;  %904 = vmatprep.mubr.msk.f32.mxu1 %vm266_vm0, %v243_v13  ;;  %v591_v57 = vld [vmem:[%s1067_s6 + $0x18] sm:$0xff]  ;;  %v590_v62 = vld [vmem:[%s1067_s6 + $0x10] sm:$0xff]  ;;  %v593_v8 = vld [vmem:[%s1067_s6 + $0x28] sm:$0xff] }
  0x1b   : > { %v607_v58 = vld [vmem:[%s1067_s6 + $0x98] sm:$0xff]  ;;  %v606_v0 = vld [vmem:[%s1067_s6 + $0x90] sm:$0xff]  ;;  %v609_v10 = vld [vmem:[%s1067_s6 + $0xa8] sm:$0xff] }
  0x1d   : > { %881 = vmatmul.mubr.msk.f32.gmra.mxu0 %vm266_vm0, %v228_v14  ;;  %905 = vmatmul.mubr.msk.f32.gmra.mxu1 %vm266_vm0, %v244_v15 }
  0x1e   : > { %883 = vmatprep.mubr.msk.f32.mxu0 %vm266_vm0, %v229_v16  ;;  %907 = vmatprep.mubr.msk.f32.mxu1 %vm266_vm0, %v245_v17 }
  0x21   : > { %884 = vmatmul.mubr.msk.f32.gmra.mxu0 %vm266_vm0, %v230_v18  ;;  %908 = vmatmul.mubr.msk.f32.gmra.mxu1 %vm266_vm0, %v246_v19 }
  0x22   : > { %886 = vmatprep.mubr.msk.f32.mxu0 %vm266_vm0, %v231_v20  ;;  %910 = vmatprep.mubr.msk.f32.mxu1 %vm266_vm0, %v247_v21 }
  0x25   : > { %887 = vmatmul.mubr.msk.f32.gmra.mxu0 %vm266_vm0, %v232_v22  ;;  %911 = vmatmul.mubr.msk.f32.gmra.mxu1 %vm266_vm0, %v248_v23  ;;  %v592_v23 = vld [vmem:[%s1067_s6 + $0x20] sm:$0xff] }
  0x26   : > { %889 = vmatprep.mubr.msk.f32.mxu0 %vm266_vm0, %v233_v24  ;;  %913 = vmatprep.mubr.msk.f32.mxu1 %vm266_vm0, %v249_v25  ;;  %v608_v24 = vld [vmem:[%s1067_s6 + $0xa0] sm:$0xff] }
  0x29   : > { %890 = vmatmul.mubr.msk.f32.gmra.mxu0 %vm266_vm0, %v234_v26  ;;  %914 = vmatmul.mubr.msk.f32.gmra.mxu1 %vm266_vm0, %v250_v27 }
  0x2a   : > { %892 = vmatprep.mubr.msk.f32.mxu0 %vm266_vm0, %v235_v28  ;;  %916 = vmatprep.mubr.msk.f32.mxu1 %vm266_vm0, %v251_v29  ;;  %v595_v28 = vld [vmem:[%s1067_s6 + $0x38] sm:$0xff] }
  0x2d   : > { %893 = vmatmul.mubr.msk.f32.gmra.mxu0 %vm266_vm0, %v236_v30  ;;  %917 = vmatmul.mubr.msk.f32.gmra.mxu1 %vm266_vm0, %v252_v31  ;;  %v611_v30 = vld [vmem:[%s1067_s6 + $0xb8] sm:$0xff] }
  0x2e   : > { %895 = vmatprep.mubr.msk.f32.mxu0 %vm266_vm0, %v237_v32  ;;  %919 = vmatprep.mubr.msk.f32.mxu1 %vm266_vm0, %v253_v33 }
  0x31   : > { %896 = vmatmul.mubr.msk.f32.gmra.mxu0 %vm266_vm0, %v238_v34  ;;  %920 = vmatmul.mubr.msk.f32.gmra.mxu1 %vm266_vm0, %v254_v35 }
  0xd5   : > { %v876_v37 = vpop.f32.mrf.mxu0  ;;  %v900_v39 = vpop.f32.mrf.mxu1 }
  0xd6   : > { %v435_v41 = vadd.f32 %v876_v37, %v1072_v36  ;;  %v515_v42 = vadd.f32 %v900_v39, %v1072_v36  ;;  %v594_v39 = vld [vmem:[%s1067_s6 + $0x30] sm:$0xff] }
  0xd7   : > { %v429_v43 = vpop.f32.mrf.mxu0  ;;  %v509_v45 = vpop.f32.mrf.mxu1 }
  0xd8   : > { %v621_v47 = vadd.f32 %v589_v38, %v435_v41  ;;  %v637_v48 = vadd.f32 %v605_v40, %v515_v42  ;;  %v430_v49 = vadd.f32 %v1072_v36, %v429_v43  ;;  %v510_v50 = vadd.f32 %v1072_v36, %v509_v45  ;;  %v610_v41 = vld [vmem:[%s1067_s6 + $0xb0] sm:$0xff] }
  0xd9   : > { %v879_v51 = vpop.f32.mrf.mxu0  ;;  %v903_v52 = vpop.f32.mrf.mxu1 }
  0xda   : > { %v653_v53 = vmax.f32 %v621_v47, 0.0  ;;  %v669_v54 = vmax.f32 %v637_v48, 0.0  ;;  %v620_v55 = vadd.f32 %v588_v44, %v430_v49  ;;  %v636_v56 = vadd.f32 %v604_v46, %v510_v50 }
  0xdb   : > { %v445_v59 = vadd.f32 %v879_v51, %v1072_v36  ;;  %v525_v60 = vadd.f32 %v903_v52, %v1072_v36  ;;  %v439_v61 = vpop.f32.mrf.mxu0  ;;  %v519_v63 = vpop.f32.mrf.mxu1 }
  0xdc   : > { %685 = vst.msk [vmem:[%s1086_s11 + $0x8] sm:$0xff] %vm266_vm0, %v653_v53  ;;  %701 = vst.msk [vmem:[%s1086_s11 + $0x88] sm:$0xff] %vm266_vm0, %v669_v54  ;;  %v652_v1 = vmax.f32 %v620_v55, 0.0  ;;  %v668_v2 = vmax.f32 %v636_v56, 0.0  ;;  %v440_v3 = vadd.f32 %v1072_v36, %v439_v61  ;;  %v520_v4 = vadd.f32 %v1072_v36, %v519_v63  ;;  %v597_v54 = vld [vmem:[%s1067_s6 + $0x48] sm:$0xff]  ;;  %v612_v61 = vld [vmem:[%s1067_s6 + $0xc0] sm:$0xff] }
  0xdd   : > { %v623_v5 = vadd.f32 %v591_v57, %v445_v59  ;;  %v639_v6 = vadd.f32 %v607_v58, %v525_v60  ;;  %v882_v7 = vpop.f32.mrf.mxu0  ;;  %v906_v9 = vpop.f32.mrf.mxu1  ;;  %v613_v55 = vld [vmem:[%s1067_s6 + $0xc8] sm:$0xff]  ;;  %v596_v59 = vld [vmem:[%s1067_s6 + $0x40] sm:$0xff] }
  0xde   : > { %684 = vst.msk [vmem:[%s1086_s11] sm:$0xff] %vm266_vm0, %v652_v1  ;;  %700 = vst.msk [vmem:[%s1086_s11 + $0x80] sm:$0xff] %vm266_vm0, %v668_v2  ;;  %v622_v11 = vadd.f32 %v590_v62, %v440_v3  ;;  %v638_v12 = vadd.f32 %v606_v0, %v520_v4  ;;  %v455_v13 = vadd.f32 %v882_v7, %v1072_v36  ;;  %v615_v7 = vld [vmem:[%s1067_s6 + $0xd8] sm:$0xff] }
  0xdf   : > { %v535_v14 = vadd.f32 %v906_v9, %v1072_v36  ;;  %v655_v15 = vmax.f32 %v623_v5, 0.0  ;;  %v671_v16 = vmax.f32 %v639_v6, 0.0  ;;  %v449_v17 = vpop.f32.mrf.mxu0  ;;  %v529_v18 = vpop.f32.mrf.mxu1  ;;  %v599_v5 = vld [vmem:[%s1067_s6 + $0x58] sm:$0xff] }
  0xe0   : > { %v654_v19 = vmax.f32 %v622_v11, 0.0  ;;  %v670_v20 = vmax.f32 %v638_v12, 0.0  ;;  %v625_v21 = vadd.f32 %v593_v8, %v455_v13  ;;  %v450_v25 = vadd.f32 %v1072_v36, %v449_v17 }
  0xe1   : > { %v641_v22 = vadd.f32 %v609_v10, %v535_v14  ;;  %687 = vst.msk [vmem:[%s1086_s11 + $0x18] sm:$0xff] %vm266_vm0, %v655_v15  ;;  %703 = vst.msk [vmem:[%s1086_s11 + $0x98] sm:$0xff] %vm266_vm0, %v671_v16  ;;  %v530_v26 = vadd.f32 %v1072_v36, %v529_v18  ;;  %v885_v27 = vpop.f32.mrf.mxu0  ;;  %v909_v29 = vpop.f32.mrf.mxu1 }
  0xe2   : > { %686 = vst.msk [vmem:[%s1086_s11 + $0x10] sm:$0xff] %vm266_vm0, %v654_v19  ;;  %702 = vst.msk [vmem:[%s1086_s11 + $0x90] sm:$0xff] %vm266_vm0, %v670_v20  ;;  %v657_v31 = vmax.f32 %v625_v21, 0.0  ;;  %v465_v33 = vadd.f32 %v885_v27, %v1072_v36  ;;  %v545_v34 = vadd.f32 %v909_v29, %v1072_v36  ;;  %v624_v35 = vadd.f32 %v592_v23, %v450_v25  ;;  %v598_v20 = vld [vmem:[%s1067_s6 + $0x50] sm:$0xff]  ;;  %v601_v25 = vld [vmem:[%s1067_s6 + $0x68] sm:$0xff] }
  0xe3   : > { %v673_v32 = vmax.f32 %v641_v22, 0.0  ;;  %v640_v37 = vadd.f32 %v608_v24, %v530_v26  ;;  %v459_v38 = vpop.f32.mrf.mxu0  ;;  %v539_v40 = vpop.f32.mrf.mxu1  ;;  %v614_v21 = vld [vmem:[%s1067_s6 + $0xd0] sm:$0xff]  ;;  %v617_v27 = vld [vmem:[%s1067_s6 + $0xe8] sm:$0xff] }
  0xe4   : > { %689 = vst.msk [vmem:[%s1086_s11 + $0x28] sm:$0xff] %vm266_vm0, %v657_v31  ;;  %v627_v42 = vadd.f32 %v595_v28, %v465_v33  ;;  %v643_v43 = vadd.f32 %v611_v30, %v545_v34  ;;  %v460_v44 = vadd.f32 %v1072_v36, %v459_v38  ;;  %v540_v45 = vadd.f32 %v1072_v36, %v539_v40  ;;  %v616_v38 = vld [vmem:[%s1067_s6 + $0xe0] sm:$0xff] }
  0xe5   : > { %705 = vst.msk [vmem:[%s1086_s11 + $0xa8] sm:$0xff] %vm266_vm0, %v673_v32  ;;  %v656_v46 = vmax.f32 %v624_v35, 0.0  ;;  %v672_v47 = vmax.f32 %v640_v37, 0.0  ;;  %v888_v48 = vpop.f32.mrf.mxu0  ;;  %v912_v49 = vpop.f32.mrf.mxu1  ;;  %v600_v35 = vld [vmem:[%s1067_s6 + $0x60] sm:$0xff] }
  0xe6   : > { %v659_v50 = vmax.f32 %v627_v42, 0.0  ;;  %v675_v51 = vmax.f32 %v643_v43, 0.0  ;;  %v626_v52 = vadd.f32 %v594_v39, %v460_v44  ;;  %v642_v53 = vadd.f32 %v610_v41, %v540_v45 }
  0xe7   : > { %688 = vst.msk [vmem:[%s1086_s11 + $0x20] sm:$0xff] %vm266_vm0, %v656_v46  ;;  %704 = vst.msk [vmem:[%s1086_s11 + $0xa0] sm:$0xff] %vm266_vm0, %v672_v47  ;;  %v475_v56 = vadd.f32 %v888_v48, %v1072_v36  ;;  %v555_v57 = vadd.f32 %v912_v49, %v1072_v36  ;;  %v469_v58 = vpop.f32.mrf.mxu0  ;;  %v549_v60 = vpop.f32.mrf.mxu1 }
  0xe8   : > { %691 = vst.msk [vmem:[%s1086_s11 + $0x38] sm:$0xff] %vm266_vm0, %v659_v50  ;;  %707 = vst.msk [vmem:[%s1086_s11 + $0xb8] sm:$0xff] %vm266_vm0, %v675_v51  ;;  %v658_v62 = vmax.f32 %v626_v52, 0.0  ;;  %v674_v63 = vmax.f32 %v642_v53, 0.0  ;;  %v470_v0 = vadd.f32 %v1072_v36, %v469_v58  ;;  %v550_v1 = vadd.f32 %v1072_v36, %v549_v60  ;;  %v603_v51 = vld [vmem:[%s1067_s6 + $0x78] sm:$0xff]  ;;  %v618_v58 = vld [vmem:[%s1067_s6 + $0xf0] sm:$0xff] }
  0xe9   : > { %v629_v2 = vadd.f32 %v597_v54, %v475_v56  ;;  %v645_v3 = vadd.f32 %v613_v55, %v555_v57  ;;  %v891_v4 = vpop.f32.mrf.mxu0  ;;  %v915_v6 = vpop.f32.mrf.mxu1  ;;  %v619_v52 = vld [vmem:[%s1067_s6 + $0xf8] sm:$0xff]  ;;  %v602_v56 = vld [vmem:[%s1067_s6 + $0x70] sm:$0xff] }
  0xea   : > { %690 = vst.msk [vmem:[%s1086_s11 + $0x30] sm:$0xff] %vm266_vm0, %v658_v62  ;;  %706 = vst.msk [vmem:[%s1086_s11 + $0xb0] sm:$0xff] %vm266_vm0, %v674_v63  ;;  %v628_v8 = vadd.f32 %v596_v59, %v470_v0  ;;  %v644_v9 = vadd.f32 %v612_v61, %v550_v1  ;;  %v485_v10 = vadd.f32 %v891_v4, %v1072_v36 }
  0xeb   : > { %v565_v11 = vadd.f32 %v915_v6, %v1072_v36  ;;  %v661_v12 = vmax.f32 %v629_v2, 0.0  ;;  %v677_v13 = vmax.f32 %v645_v3, 0.0  ;;  %v479_v14 = vpop.f32.mrf.mxu0  ;;  %v559_v15 = vpop.f32.mrf.mxu1 }
  0xec   : > { %v660_v16 = vmax.f32 %v628_v8, 0.0  ;;  %v676_v17 = vmax.f32 %v644_v9, 0.0  ;;  %v631_v18 = vadd.f32 %v599_v5, %v485_v10  ;;  %v480_v22 = vadd.f32 %v1072_v36, %v479_v14 }
  0xed   : > { %v647_v19 = vadd.f32 %v615_v7, %v565_v11  ;;  %693 = vst.msk [vmem:[%s1086_s11 + $0x48] sm:$0xff] %vm266_vm0, %v661_v12  ;;  %709 = vst.msk [vmem:[%s1086_s11 + $0xc8] sm:$0xff] %vm266_vm0, %v677_v13  ;;  %v560_v23 = vadd.f32 %v1072_v36, %v559_v15  ;;  %v894_v24 = vpop.f32.mrf.mxu0  ;;  %v918_v26 = vpop.f32.mrf.mxu1 }
  0xee   : > { %692 = vst.msk [vmem:[%s1086_s11 + $0x40] sm:$0xff] %vm266_vm0, %v660_v16  ;;  %708 = vst.msk [vmem:[%s1086_s11 + $0xc0] sm:$0xff] %vm266_vm0, %v676_v17  ;;  %v663_v28 = vmax.f32 %v631_v18, 0.0  ;;  %v495_v30 = vadd.f32 %v894_v24, %v1072_v36  ;;  %v575_v31 = vadd.f32 %v918_v26, %v1072_v36  ;;  %v630_v32 = vadd.f32 %v598_v20, %v480_v22 }
  0xef   : > { %v679_v29 = vmax.f32 %v647_v19, 0.0  ;;  %v646_v33 = vadd.f32 %v614_v21, %v560_v23  ;;  %v489_v34 = vpop.f32.mrf.mxu0  ;;  %v569_v37 = vpop.f32.mrf.mxu1 }
  0xf0   : > { %695 = vst.msk [vmem:[%s1086_s11 + $0x58] sm:$0xff] %vm266_vm0, %v663_v28  ;;  %v633_v39 = vadd.f32 %v601_v25, %v495_v30  ;;  %v649_v40 = vadd.f32 %v617_v27, %v575_v31  ;;  %v490_v41 = vadd.f32 %v1072_v36, %v489_v34  ;;  %v570_v42 = vadd.f32 %v1072_v36, %v569_v37 }
  0xf1   : > { %711 = vst.msk [vmem:[%s1086_s11 + $0xd8] sm:$0xff] %vm266_vm0, %v679_v29  ;;  %v662_v43 = vmax.f32 %v630_v32, 0.0  ;;  %v678_v44 = vmax.f32 %v646_v33, 0.0  ;;  %v897_v45 = vpop.f32.mrf.mxu0  ;;  %v921_v46 = vpop.f32.mrf.mxu1 }
  0xf2   : > { %v665_v47 = vmax.f32 %v633_v39, 0.0  ;;  %v681_v48 = vmax.f32 %v649_v40, 0.0  ;;  %v632_v49 = vadd.f32 %v600_v35, %v490_v41  ;;  %v648_v50 = vadd.f32 %v616_v38, %v570_v42 }
  0xf3   : > { %694 = vst.msk [vmem:[%s1086_s11 + $0x50] sm:$0xff] %vm266_vm0, %v662_v43  ;;  %710 = vst.msk [vmem:[%s1086_s11 + $0xd0] sm:$0xff] %vm266_vm0, %v678_v44  ;;  %v505_v53 = vadd.f32 %v897_v45, %v1072_v36  ;;  %v585_v54 = vadd.f32 %v921_v46, %v1072_v36  ;;  %v499_v55 = vpop.f32.mrf.mxu0  ;;  %v579_v57 = vpop.f32.mrf.mxu1 }
  0xf4   : > { %697 = vst.msk [vmem:[%s1086_s11 + $0x68] sm:$0xff] %vm266_vm0, %v665_v47  ;;  %713 = vst.msk [vmem:[%s1086_s11 + $0xe8] sm:$0xff] %vm266_vm0, %v681_v48  ;;  %v664_v59 = vmax.f32 %v632_v49, 0.0  ;;  %v680_v60 = vmax.f32 %v648_v50, 0.0  ;;  %v500_v61 = vadd.f32 %v1072_v36, %v499_v55  ;;  %v580_v62 = vadd.f32 %v1072_v36, %v579_v57 }
  0xf5   : > { %v635_v63 = vadd.f32 %v603_v51, %v505_v53  ;;  %v651_v0 = vadd.f32 %v619_v52, %v585_v54 }
  0xf6   : > { %696 = vst.msk [vmem:[%s1086_s11 + $0x60] sm:$0xff] %vm266_vm0, %v664_v59  ;;  %712 = vst.msk [vmem:[%s1086_s11 + $0xe0] sm:$0xff] %vm266_vm0, %v680_v60  ;;  %v634_v1 = vadd.f32 %v602_v56, %v500_v61  ;;  %v650_v2 = vadd.f32 %v618_v58, %v580_v62 }
  0xf7   : > { %v667_v3 = vmax.f32 %v635_v63, 0.0  ;;  %v683_v4 = vmax.f32 %v651_v0, 0.0 }
  0xf8   : > { %v666_v5 = vmax.f32 %v634_v1, 0.0  ;;  %v682_v6 = vmax.f32 %v650_v2, 0.0 }
  0xf9   : > { %699 = vst.msk [vmem:[%s1086_s11 + $0x78] sm:$0xff] %vm266_vm0, %v667_v3  ;;  %715 = vst.msk [vmem:[%s1086_s11 + $0xf8] sm:$0xff] %vm266_vm0, %v683_v4 }
  0xfa   : > { %698 = vst.msk [vmem:[%s1086_s11 + $0x70] sm:$0xff] %vm266_vm0, %v666_v5  ;;  %714 = vst.msk [vmem:[%s1086_s11 + $0xf0] sm:$0xff] %vm266_vm0, %v682_v6 }
  0xfb PF: > { %s14_s15 = sadd.s32 1, %s944_s15  }
  0xfc   : > { %p11_p4 = scmp.ge.s32.totalorder %s14_s15, 4  }
  0xfe   :  { %13 = sbr.rel (!%p11_p4) target bundleno = 1 (0x1), region = 69 }

// kernel: fno2d_forward.18
= control target key start
LH: loop header
LB: loop body
LE: loop exit
PB: predicated region body
PF: predicated region fallthrough
CT: control target
= control target key end

     0   :  { %s939_s15 = smov 0   ;;  %s1179_s0 = inlined_call_operand.vmem [shape: f32[512,32], index: 0, kind: input, shape index: {}]   ;;  %s1180_s1 = inlined_call_operand.vmem [shape: f32[32,32], index: 1, kind: input, shape index: {}]   ;;  %s1181_s2 = inlined_call_operand.vmem [shape: f32[1,32], index: 2, kind: input, shape index: {}]   ;;  %s1182_s3 = inlined_call_operand.vmem [shape: f32[512,32], index: 3, kind: input, shape index: {}]   ;;  %s1183_s4 = inlined_call_operand.vmem [shape: f32[512,32], index: 4, kind: output, shape index: {}]  }
   0x1 LB: > { %s752_s16 = sadd.s32 4294967295, %s912_s15   ;;  %p756_p0 = scmp.ge.s32.totalorder %s912_s15, 1  ;;  %s912_s15 = sphi %s939_s15, %s14_s15  }
   0x2   : > { %p174_p1 = scmp.lt.s32.totalorder %s912_s15, 3 }
   0x4   : > { %p175_p2 = pnand %p756_p0, %p174_p1 }
   0x5   : > { %s757_s21 = sshll.u32 (!%p175_p2), %s752_s16, 5 }
   0x6   : > { %178 = sbr.rel (%p175_p2) target bundleno = 249 (0xf9), region = 36  ;;  %p206_p3 = scmp.lt.s32.totalorder (!%p175_p2), %s757_s21, 63 }
   0xb   : > { %v258_v0 = vld [vmem:[%s1180_s1 + $0x18] sm:$0xff]  ;;  %v257_v1 = vld [vmem:[%s1180_s1 + $0x10] sm:$0xff]  ;;  %v256_v2 = vld [vmem:[%s1180_s1 + $0x8] sm:$0xff]  ;;  %s1185_s21 = smov (!%p206_p3, %s757_s21), 63  ;;  %vm266_vm0 = vcmask 261120  }
   0xc   : > { %834 = vmatprep.subr.mxu0 %v258_v0  ;;  %890 = vmatprep.subr.mxu1 %v258_v0  ;;  %v255_v3 = vld [vmem:[%s1180_s1] sm:$0xff]  ;;  %s959_s26 = sshll.u32 %s1185_s21, 3 }
   0xd   : > { %835 = vmatpush3.msra.mxu0 %v258_v0  ;;  %894 = vmatpush3.msra.mxu1 %v258_v0  ;;  %s965_s29 = scalar_lea.vmem %s1179_s0, %s959_s26  ;;  %s1035_s6 = scalar_lea.vmem %s1182_s3, %s959_s26  ;;  %v1040_v36 = vld [vmem:[%s1181_s2] ss:$0 sm:$0xff] }
   0xe   : > { %836 = vmatprep.subr.mxu0 %v257_v1  ;;  %891 = vmatprep.subr.mxu1 %v257_v1  ;;  %v223_v4 = vld [vmem:[%s965_s29] sm:$0xff]  ;;  %v224_v6 = vld [vmem:[%s965_s29 + $0x8] sm:$0xff]  ;;  %v225_v8 = vld [vmem:[%s965_s29 + $0x10] sm:$0xff]  ;;  %s1050_s11 = scalar_lea.vmem %s1183_s4, %s959_s26 }
   0xf   : > { %837 = vmatpush3.msra.mxu0 %v257_v1  ;;  %895 = vmatpush3.msra.mxu1 %v257_v1  ;;  %v239_v5 = vld [vmem:[%s965_s29 + $0x80] sm:$0xff]  ;;  %v240_v7 = vld [vmem:[%s965_s29 + $0x88] sm:$0xff]  ;;  %v241_v9 = vld [vmem:[%s965_s29 + $0x90] sm:$0xff] }
  0x10   : > { %838 = vmatprep.subr.mxu0 %v256_v2  ;;  %892 = vmatprep.subr.mxu1 %v256_v2  ;;  %v226_v10 = vld [vmem:[%s965_s29 + $0x18] sm:$0xff]  ;;  %v227_v12 = vld [vmem:[%s965_s29 + $0x20] sm:$0xff]  ;;  %v228_v14 = vld [vmem:[%s965_s29 + $0x28] sm:$0xff] }
  0x11   : > { %839 = vmatpush3.msra.mxu0 %v256_v2  ;;  %896 = vmatpush3.msra.mxu1 %v256_v2  ;;  %v242_v11 = vld [vmem:[%s965_s29 + $0x98] sm:$0xff]  ;;  %v243_v13 = vld [vmem:[%s965_s29 + $0xa0] sm:$0xff]  ;;  %v244_v15 = vld [vmem:[%s965_s29 + $0xa8] sm:$0xff] }
  0x12   : > { %840 = vmatprep.subr.mxu0 %v255_v3  ;;  %893 = vmatprep.subr.mxu1 %v255_v3  ;;  %v229_v16 = vld [vmem:[%s965_s29 + $0x30] sm:$0xff]  ;;  %v230_v18 = vld [vmem:[%s965_s29 + $0x38] sm:$0xff]  ;;  %v231_v20 = vld [vmem:[%s965_s29 + $0x40] sm:$0xff] }
  0x13   : > { %841 = vmatpush3.msra.mxu0 %v255_v3  ;;  %897 = vmatpush3.msra.mxu1 %v255_v3  ;;  %v245_v17 = vld [vmem:[%s965_s29 + $0xb0] sm:$0xff]  ;;  %v246_v19 = vld [vmem:[%s965_s29 + $0xb8] sm:$0xff]  ;;  %v247_v21 = vld [vmem:[%s965_s29 + $0xc0] sm:$0xff] }
  0x14   : > { %842 = vmatprep.mubr.msk.f32.mxu0 %vm266_vm0, %v223_v4  ;;  %866 = vmatprep.mubr.msk.f32.mxu1 %vm266_vm0, %v239_v5  ;;  %v232_v22 = vld [vmem:[%s965_s29 + $0x48] sm:$0xff]  ;;  %v233_v24 = vld [vmem:[%s965_s29 + $0x50] sm:$0xff]  ;;  %v234_v26 = vld [vmem:[%s965_s29 + $0x58] sm:$0xff] }
  0x15   : > { %843 = vmatmul.mubr.msk.f32.vlgmr.msra.gmra.mxu0 %vm266_vm0, %v224_v6  ;;  %867 = vmatmul.mubr.msk.f32.vlgmr.msra.gmra.mxu1 %vm266_vm0, %v240_v7  ;;  %v248_v23 = vld [vmem:[%s965_s29 + $0xc8] sm:$0xff]  ;;  %v249_v25 = vld [vmem:[%s965_s29 + $0xd0] sm:$0xff]  ;;  %v250_v27 = vld [vmem:[%s965_s29 + $0xd8] sm:$0xff] }
  0x16   : > { %845 = vmatprep.mubr.msk.f32.mxu0 %vm266_vm0, %v225_v8  ;;  %869 = vmatprep.mubr.msk.f32.mxu1 %vm266_vm0, %v241_v9  ;;  %v235_v28 = vld [vmem:[%s965_s29 + $0x60] sm:$0xff]  ;;  %v236_v30 = vld [vmem:[%s965_s29 + $0x68] sm:$0xff]  ;;  %v237_v32 = vld [vmem:[%s965_s29 + $0x70] sm:$0xff] }
  0x17   : > { %v251_v29 = vld [vmem:[%s965_s29 + $0xe0] sm:$0xff]  ;;  %v252_v31 = vld [vmem:[%s965_s29 + $0xe8] sm:$0xff]  ;;  %v253_v33 = vld [vmem:[%s965_s29 + $0xf0] sm:$0xff] }
  0x18   : > { %v238_v34 = vld [vmem:[%s965_s29 + $0x78] sm:$0xff]  ;;  %v589_v38 = vld [vmem:[%s1035_s6 + $0x8] sm:$0xff]  ;;  %v588_v44 = vld [vmem:[%s1035_s6] sm:$0xff] }
  0x19   : > { %846 = vmatmul.mubr.msk.f32.gmra.mxu0 %vm266_vm0, %v226_v10  ;;  %870 = vmatmul.mubr.msk.f32.gmra.mxu1 %vm266_vm0, %v242_v11  ;;  %v254_v35 = vld [vmem:[%s965_s29 + $0xf8] sm:$0xff]  ;;  %v605_v40 = vld [vmem:[%s1035_s6 + $0x88] sm:$0xff]  ;;  %v604_v46 = vld [vmem:[%s1035_s6 + $0x80] sm:$0xff] }
  0x1a   : > { %848 = vmatprep.mubr.msk.f32.mxu0 %vm266_vm0, %v227_v12  ;;  %872 = vmatprep.mubr.msk.f32.mxu1 %vm266_vm0, %v243_v13  ;;  %v591_v52 = vld [vmem:[%s1035_s6 + $0x18] sm:$0xff]  ;;  %v590_v60 = vld [vmem:[%s1035_s6 + $0x10] sm:$0xff]  ;;  %v593_v4 = vld [vmem:[%s1035_s6 + $0x28] sm:$0xff] }
  0x1b   : > { %v607_v54 = vld [vmem:[%s1035_s6 + $0x98] sm:$0xff]  ;;  %v606_v62 = vld [vmem:[%s1035_s6 + $0x90] sm:$0xff]  ;;  %v609_v6 = vld [vmem:[%s1035_s6 + $0xa8] sm:$0xff] }
  0x1c   : > { %v592_v12 = vld [vmem:[%s1035_s6 + $0x20] sm:$0xff] }
  0x1d   : > { %849 = vmatmul.mubr.msk.f32.gmra.mxu0 %vm266_vm0, %v228_v14  ;;  %873 = vmatmul.mubr.msk.f32.gmra.mxu1 %vm266_vm0, %v244_v15  ;;  %v608_v14 = vld [vmem:[%s1035_s6 + $0xa0] sm:$0xff] }
  0x1e   : > { %851 = vmatprep.mubr.msk.f32.mxu0 %vm266_vm0, %v229_v16  ;;  %875 = vmatprep.mubr.msk.f32.mxu1 %vm266_vm0, %v245_v17 }
  0x21   : > { %852 = vmatmul.mubr.msk.f32.gmra.mxu0 %vm266_vm0, %v230_v18  ;;  %876 = vmatmul.mubr.msk.f32.gmra.mxu1 %vm266_vm0, %v246_v19 }
  0x22   : > { %854 = vmatprep.mubr.msk.f32.mxu0 %vm266_vm0, %v231_v20  ;;  %878 = vmatprep.mubr.msk.f32.mxu1 %vm266_vm0, %v247_v21  ;;  %v595_v20 = vld [vmem:[%s1035_s6 + $0x38] sm:$0xff] }
  0x25   : > { %855 = vmatmul.mubr.msk.f32.gmra.mxu0 %vm266_vm0, %v232_v22  ;;  %879 = vmatmul.mubr.msk.f32.gmra.mxu1 %vm266_vm0, %v248_v23  ;;  %v611_v22 = vld [vmem:[%s1035_s6 + $0xb8] sm:$0xff] }
  0x26   : > { %857 = vmatprep.mubr.msk.f32.mxu0 %vm266_vm0, %v233_v24  ;;  %881 = vmatprep.mubr.msk.f32.mxu1 %vm266_vm0, %v249_v25 }
  0x29   : > { %858 = vmatmul.mubr.msk.f32.gmra.mxu0 %vm266_vm0, %v234_v26  ;;  %882 = vmatmul.mubr.msk.f32.gmra.mxu1 %vm266_vm0, %v250_v27 }
  0x2a   : > { %860 = vmatprep.mubr.msk.f32.mxu0 %vm266_vm0, %v235_v28  ;;  %884 = vmatprep.mubr.msk.f32.mxu1 %vm266_vm0, %v251_v29  ;;  %v594_v28 = vld [vmem:[%s1035_s6 + $0x30] sm:$0xff] }
  0x2d   : > { %861 = vmatmul.mubr.msk.f32.gmra.mxu0 %vm266_vm0, %v236_v30  ;;  %885 = vmatmul.mubr.msk.f32.gmra.mxu1 %vm266_vm0, %v252_v31  ;;  %v610_v30 = vld [vmem:[%s1035_s6 + $0xb0] sm:$0xff] }
  0x2e   : > { %863 = vmatprep.mubr.msk.f32.mxu0 %vm266_vm0, %v237_v32  ;;  %887 = vmatprep.mubr.msk.f32.mxu1 %vm266_vm0, %v253_v33 }
  0x31   : > { %864 = vmatmul.mubr.msk.f32.gmra.mxu0 %vm266_vm0, %v238_v34  ;;  %888 = vmatmul.mubr.msk.f32.gmra.mxu1 %vm266_vm0, %v254_v35 }
  0xd5   : > { %v844_v37 = vpop.f32.mrf.mxu0  ;;  %v868_v39 = vpop.f32.mrf.mxu1 }
  0xd6   : > { %v435_v41 = vadd.f32 %v844_v37, %v1040_v36  ;;  %v515_v42 = vadd.f32 %v868_v39, %v1040_v36  ;;  %v597_v37 = vld [vmem:[%s1035_s6 + $0x48] sm:$0xff] }
  0xd7   : > { %v429_v43 = vpop.f32.mrf.mxu0  ;;  %v509_v45 = vpop.f32.mrf.mxu1  ;;  %v613_v39 = vld [vmem:[%s1035_s6 + $0xc8] sm:$0xff] }
  0xd8   : > { %v621_v47 = vadd.f32 %v589_v38, %v435_v41  ;;  %v637_v48 = vadd.f32 %v605_v40, %v515_v42  ;;  %v430_v49 = vadd.f32 %v1040_v36, %v429_v43  ;;  %v510_v50 = vadd.f32 %v1040_v36, %v509_v45  ;;  %v596_v45 = vld [vmem:[%s1035_s6 + $0x40] sm:$0xff] }
  0xd9   : > { %v847_v51 = vpop.f32.mrf.mxu0  ;;  %v871_v53 = vpop.f32.mrf.mxu1 }
  0xda   : > { %653 = vst.msk [vmem:[%s1050_s11 + $0x8] sm:$0xff] %vm266_vm0, %v621_v47  ;;  %669 = vst.msk [vmem:[%s1050_s11 + $0x88] sm:$0xff] %vm266_vm0, %v637_v48  ;;  %v620_v55 = vadd.f32 %v588_v44, %v430_v49  ;;  %v636_v56 = vadd.f32 %v604_v46, %v510_v50  ;;  %v445_v57 = vadd.f32 %v847_v51, %v1040_v36  ;;  %v612_v47 = vld [vmem:[%s1035_s6 + $0xc0] sm:$0xff] }
  0xdb   : > { %v525_v58 = vadd.f32 %v871_v53, %v1040_v36  ;;  %v439_v59 = vpop.f32.mrf.mxu0  ;;  %v519_v61 = vpop.f32.mrf.mxu1  ;;  %v599_v53 = vld [vmem:[%s1035_s6 + $0x58] sm:$0xff] }
  0xdc   : > { %652 = vst.msk [vmem:[%s1050_s11] sm:$0xff] %vm266_vm0, %v620_v55  ;;  %668 = vst.msk [vmem:[%s1050_s11 + $0x80] sm:$0xff] %vm266_vm0, %v636_v56  ;;  %v623_v63 = vadd.f32 %v591_v52, %v445_v57  ;;  %v440_v1 = vadd.f32 %v1040_v36, %v439_v59  ;;  %v520_v2 = vadd.f32 %v1040_v36, %v519_v61  ;;  %v615_v55 = vld [vmem:[%s1035_s6 + $0xd8] sm:$0xff]  ;;  %v598_v61 = vld [vmem:[%s1035_s6 + $0x50] sm:$0xff] }
  0xdd   : > { %v639_v0 = vadd.f32 %v607_v54, %v525_v58  ;;  %v850_v3 = vpop.f32.mrf.mxu0  ;;  %v874_v5 = vpop.f32.mrf.mxu1 }
  0xde   : > { %655 = vst.msk [vmem:[%s1050_s11 + $0x18] sm:$0xff] %vm266_vm0, %v623_v63  ;;  %v622_v7 = vadd.f32 %v590_v60, %v440_v1  ;;  %v638_v8 = vadd.f32 %v606_v62, %v520_v2  ;;  %v455_v9 = vadd.f32 %v850_v3, %v1040_v36  ;;  %v535_v10 = vadd.f32 %v874_v5, %v1040_v36  ;;  %v614_v63 = vld [vmem:[%s1035_s6 + $0xd0] sm:$0xff]  ;;  %v601_v5 = vld [vmem:[%s1035_s6 + $0x68] sm:$0xff] }
  0xdf   : > { %671 = vst.msk [vmem:[%s1050_s11 + $0x98] sm:$0xff] %vm266_vm0, %v639_v0  ;;  %v449_v11 = vpop.f32.mrf.mxu0  ;;  %v529_v13 = vpop.f32.mrf.mxu1 }
  0xe0   : > { %654 = vst.msk [vmem:[%s1050_s11 + $0x10] sm:$0xff] %vm266_vm0, %v622_v7  ;;  %670 = vst.msk [vmem:[%s1050_s11 + $0x90] sm:$0xff] %vm266_vm0, %v638_v8  ;;  %v625_v15 = vadd.f32 %v593_v4, %v455_v9  ;;  %v641_v16 = vadd.f32 %v609_v6, %v535_v10  ;;  %v450_v17 = vadd.f32 %v1040_v36, %v449_v11  ;;  %v617_v7 = vld [vmem:[%s1035_s6 + $0xe8] sm:$0xff] }
  0xe1   : > { %v530_v18 = vadd.f32 %v1040_v36, %v529_v13  ;;  %v853_v19 = vpop.f32.mrf.mxu0  ;;  %v877_v21 = vpop.f32.mrf.mxu1  ;;  %v600_v13 = vld [vmem:[%s1035_s6 + $0x60] sm:$0xff] }
  0xe2   : > { %657 = vst.msk [vmem:[%s1050_s11 + $0x28] sm:$0xff] %vm266_vm0, %v625_v15  ;;  %673 = vst.msk [vmem:[%s1050_s11 + $0xa8] sm:$0xff] %vm266_vm0, %v641_v16  ;;  %v624_v23 = vadd.f32 %v592_v12, %v450_v17  ;;  %v465_v25 = vadd.f32 %v853_v19, %v1040_v36  ;;  %v545_v26 = vadd.f32 %v877_v21, %v1040_v36  ;;  %v616_v15 = vld [vmem:[%s1035_s6 + $0xe0] sm:$0xff]  ;;  %v603_v21 = vld [vmem:[%s1035_s6 + $0x78] sm:$0xff] }
  0xe3   : > { %v640_v24 = vadd.f32 %v608_v14, %v530_v18  ;;  %v459_v27 = vpop.f32.mrf.mxu0  ;;  %v539_v29 = vpop.f32.mrf.mxu1 }
  0xe4   : > { %656 = vst.msk [vmem:[%s1050_s11 + $0x20] sm:$0xff] %vm266_vm0, %v624_v23  ;;  %v627_v31 = vadd.f32 %v595_v20, %v465_v25  ;;  %v643_v32 = vadd.f32 %v611_v22, %v545_v26  ;;  %v460_v33 = vadd.f32 %v1040_v36, %v459_v27  ;;  %v540_v34 = vadd.f32 %v1040_v36, %v539_v29  ;;  %v619_v23 = vld [vmem:[%s1035_s6 + $0xf8] sm:$0xff]  ;;  %v602_v29 = vld [vmem:[%s1035_s6 + $0x70] sm:$0xff] }
  0xe5   : > { %672 = vst.msk [vmem:[%s1050_s11 + $0xa0] sm:$0xff] %vm266_vm0, %v640_v24  ;;  %v856_v35 = vpop.f32.mrf.mxu0  ;;  %v880_v38 = vpop.f32.mrf.mxu1 }
  0xe6   : > { %659 = vst.msk [vmem:[%s1050_s11 + $0x38] sm:$0xff] %vm266_vm0, %v627_v31  ;;  %675 = vst.msk [vmem:[%s1050_s11 + $0xb8] sm:$0xff] %vm266_vm0, %v643_v32  ;;  %v626_v40 = vadd.f32 %v594_v28, %v460_v33  ;;  %v642_v41 = vadd.f32 %v610_v30, %v540_v34  ;;  %v475_v42 = vadd.f32 %v856_v35, %v1040_v36  ;;  %v618_v31 = vld [vmem:[%s1035_s6 + $0xf0] sm:$0xff] }
  0xe7   : > { %v555_v43 = vadd.f32 %v880_v38, %v1040_v36  ;;  %v469_v44 = vpop.f32.mrf.mxu0  ;;  %v549_v46 = vpop.f32.mrf.mxu1 }
  0xe8   : > { %658 = vst.msk [vmem:[%s1050_s11 + $0x30] sm:$0xff] %vm266_vm0, %v626_v40  ;;  %674 = vst.msk [vmem:[%s1050_s11 + $0xb0] sm:$0xff] %vm266_vm0, %v642_v41  ;;  %v629_v48 = vadd.f32 %v597_v37, %v475_v42  ;;  %v470_v50 = vadd.f32 %v1040_v36, %v469_v44  ;;  %v550_v51 = vadd.f32 %v1040_v36, %v549_v46 }
  0xe9   : > { %v645_v49 = vadd.f32 %v613_v39, %v555_v43  ;;  %v859_v52 = vpop.f32.mrf.mxu0  ;;  %v883_v54 = vpop.f32.mrf.mxu1 }
  0xea   : > { %661 = vst.msk [vmem:[%s1050_s11 + $0x48] sm:$0xff] %vm266_vm0, %v629_v48  ;;  %v628_v56 = vadd.f32 %v596_v45, %v470_v50  ;;  %v644_v57 = vadd.f32 %v612_v47, %v550_v51  ;;  %v485_v58 = vadd.f32 %v859_v52, %v1040_v36  ;;  %v565_v59 = vadd.f32 %v883_v54, %v1040_v36 }
  0xeb   : > { %677 = vst.msk [vmem:[%s1050_s11 + $0xc8] sm:$0xff] %vm266_vm0, %v645_v49  ;;  %v479_v60 = vpop.f32.mrf.mxu0  ;;  %v559_v62 = vpop.f32.mrf.mxu1 }
  0xec   : > { %660 = vst.msk [vmem:[%s1050_s11 + $0x40] sm:$0xff] %vm266_vm0, %v628_v56  ;;  %676 = vst.msk [vmem:[%s1050_s11 + $0xc0] sm:$0xff] %vm266_vm0, %v644_v57  ;;  %v631_v0 = vadd.f32 %v599_v53, %v485_v58  ;;  %v647_v1 = vadd.f32 %v615_v55, %v565_v59  ;;  %v480_v2 = vadd.f32 %v1040_v36, %v479_v60 }
  0xed   : > { %v560_v3 = vadd.f32 %v1040_v36, %v559_v62  ;;  %v862_v4 = vpop.f32.mrf.mxu0  ;;  %v886_v6 = vpop.f32.mrf.mxu1 }
  0xee   : > { %663 = vst.msk [vmem:[%s1050_s11 + $0x58] sm:$0xff] %vm266_vm0, %v631_v0  ;;  %679 = vst.msk [vmem:[%s1050_s11 + $0xd8] sm:$0xff] %vm266_vm0, %v647_v1  ;;  %v630_v8 = vadd.f32 %v598_v61, %v480_v2  ;;  %v495_v10 = vadd.f32 %v862_v4, %v1040_v36  ;;  %v575_v11 = vadd.f32 %v886_v6, %v1040_v36 }
  0xef   : > { %v646_v9 = vadd.f32 %v614_v63, %v560_v3  ;;  %v489_v12 = vpop.f32.mrf.mxu0  ;;  %v569_v14 = vpop.f32.mrf.mxu1 }
  0xf0   : > { %662 = vst.msk [vmem:[%s1050_s11 + $0x50] sm:$0xff] %vm266_vm0, %v630_v8  ;;  %v633_v16 = vadd.f32 %v601_v5, %v495_v10  ;;  %v649_v17 = vadd.f32 %v617_v7, %v575_v11  ;;  %v490_v18 = vadd.f32 %v1040_v36, %v489_v12  ;;  %v570_v19 = vadd.f32 %v1040_v36, %v569_v14 }
  0xf1   : > { %678 = vst.msk [vmem:[%s1050_s11 + $0xd0] sm:$0xff] %vm266_vm0, %v646_v9  ;;  %v865_v20 = vpop.f32.mrf.mxu0  ;;  %v889_v22 = vpop.f32.mrf.mxu1 }
  0xf2   : > { %665 = vst.msk [vmem:[%s1050_s11 + $0x68] sm:$0xff] %vm266_vm0, %v633_v16  ;;  %681 = vst.msk [vmem:[%s1050_s11 + $0xe8] sm:$0xff] %vm266_vm0, %v649_v17  ;;  %v632_v24 = vadd.f32 %v600_v13, %v490_v18  ;;  %v648_v25 = vadd.f32 %v616_v15, %v570_v19  ;;  %v505_v26 = vadd.f32 %v865_v20, %v1040_v36 }
  0xf3   : > { %v585_v27 = vadd.f32 %v889_v22, %v1040_v36  ;;  %v499_v28 = vpop.f32.mrf.mxu0  ;;  %v579_v30 = vpop.f32.mrf.mxu1 }
  0xf4   : > { %664 = vst.msk [vmem:[%s1050_s11 + $0x60] sm:$0xff] %vm266_vm0, %v632_v24  ;;  %680 = vst.msk [vmem:[%s1050_s11 + $0xe0] sm:$0xff] %vm266_vm0, %v648_v25  ;;  %v635_v32 = vadd.f32 %v603_v21, %v505_v26  ;;  %v500_v34 = vadd.f32 %v1040_v36, %v499_v28  ;;  %v580_v35 = vadd.f32 %v1040_v36, %v579_v30 }
  0xf5   : > { %v651_v33 = vadd.f32 %v619_v23, %v585_v27 }
  0xf6   : > { %667 = vst.msk [vmem:[%s1050_s11 + $0x78] sm:$0xff] %vm266_vm0, %v635_v32  ;;  %v634_v37 = vadd.f32 %v602_v29, %v500_v34  ;;  %v650_v38 = vadd.f32 %v618_v31, %v580_v35 }
  0xf7   : > { %683 = vst.msk [vmem:[%s1050_s11 + $0xf8] sm:$0xff] %vm266_vm0, %v651_v33 }
  0xf8   : > { %666 = vst.msk [vmem:[%s1050_s11 + $0x70] sm:$0xff] %vm266_vm0, %v634_v37  ;;  %682 = vst.msk [vmem:[%s1050_s11 + $0xf0] sm:$0xff] %vm266_vm0, %v650_v38 }
  0xf9 PF: > { %s14_s15 = sadd.s32 1, %s912_s15  }
  0xfa   : > { %p11_p4 = scmp.ge.s32.totalorder %s14_s15, 4  }
  0xfc   :  { %13 = sbr.rel (!%p11_p4) target bundleno = 1 (0x1), region = 69 }

// kernel: fno2d_forward.19
= control target key start
LH: loop header
LB: loop body
LE: loop exit
PB: predicated region body
PF: predicated region fallthrough
CT: control target
= control target key end

     0   :  { %s1310_s20 = smov 0   ;;  %s1597_s0 = inlined_call_operand.vmem [shape: f32[512,32], index: 0, kind: input, shape index: {}]   ;;  %s1598_s1 = inlined_call_operand.vmem [shape: f32[32,128], index: 1, kind: input, shape index: {}]   ;;  %s1599_s2 = inlined_call_operand.vmem [shape: f32[1,128], index: 2, kind: input, shape index: {}]   ;;  %s1600_s3 = inlined_call_operand.vmem [shape: f32[128,1], index: 3, kind: input, shape index: {}]   ;;  %s1601_s4 = inlined_call_operand.<no memory space> [shape: f32[1,1], index: 4, kind: input, shape index: {}]   ;;  %s1602_s5 = inlined_call_operand.vmem [shape: f32[512,1], index: 5, kind: output, shape index: {}]  }
   0x1   :  { %v10_v0 = vstv %s1601_s4 }
   0x2   :  { %11 = vst [vmem:[#allocation2] sm:$0x1] %v10_v0 }
   0x3 LB: > { %s964_s21 = sadd.s32 4294967295, %s1275_s20   ;;  %p968_p0 = scmp.ge.s32.totalorder %s1275_s20, 1  ;;  %s1275_s20 = sphi %s1310_s20, %s17_s20  }
   0x4   : > { %p190_p1 = scmp.lt.s32.totalorder %s1275_s20, 3 }
   0x6   : > { %p191_p2 = pnand %p968_p0, %p190_p1 }
   0x7   : > { %s969_s25 = sshll.u32 (!%p191_p2), %s964_s21, 5 }
   0x8   : > { %194 = sbr.rel (%p191_p2) target bundleno = 480 (0x1e0), region = 40  ;;  %p219_p3 = scmp.lt.s32.totalorder (!%p191_p2), %s969_s25, 63 }
   0xd   : > { %v265_v1 = vld [vmem:[%s1598_s1 + $0x18] sm:$0xff]  ;;  %v264_v2 = vld [vmem:[%s1598_s1 + $0x10] sm:$0xff]  ;;  %v263_v4 = vld [vmem:[%s1598_s1 + $0x8] sm:$0xff]  ;;  %s1604_s25 = smov (!%p219_p3, %s969_s25), 63  ;;  %vm273_vm0 = vcmask 261120   ;;  %vm875_vm1 = vcmask 7168  }
   0xe   : > { %1093 = vmatprep.subr.mxu0 %v265_v1  ;;  %v642_v3 = vld [vmem:[%s1600_s3 + $0x78] sm:$0xff]  ;;  %v641_v5 = vld [vmem:[%s1600_s3 + $0x70] sm:$0xff]  ;;  %v262_v6 = vld [vmem:[%s1598_s1] sm:$0xff]  ;;  %s970_s9 = sshll.u32 %s1604_s25, 3 }
   0xf   : > { %1094 = vmatpush3.msra.mxu0 %v265_v1  ;;  %1229 = vmatprep.subr.mxu1 %v642_v3  ;;  %v640_v7 = vld [vmem:[%s1600_s3 + $0x68] sm:$0xff]  ;;  %s1347_s14 = scalar_lea.vmem %s1597_s0, %s970_s9  ;;  %v639_v12 = vld [vmem:[%s1600_s3 + $0x60] sm:$0xff]  ;;  %v638_v15 = vld [vmem:[%s1600_s3 + $0x58] sm:$0xff]  ;;  %s1496_s23 = scalar_lea.vmem %s1602_s5, %s970_s9 }
  0x10   : > { %1095 = vmatprep.subr.mxu0 %v264_v2  ;;  %1245 = vmatpush3.msra.mxu1 %v642_v3  ;;  %v230_v8 = vld [vmem:[%s1347_s14] sm:$0xff]  ;;  %v231_v9 = vld [vmem:[%s1347_s14 + $0x8] sm:$0xff]  ;;  %v232_v10 = vld [vmem:[%s1347_s14 + $0x10] sm:$0xff] }
  0x11   : > { %1096 = vmatpush3.msra.mxu0 %v264_v2  ;;  %1230 = vmatprep.subr.mxu1 %v641_v5  ;;  %v233_v11 = vld [vmem:[%s1347_s14 + $0x18] sm:$0xff]  ;;  %v234_v13 = vld [vmem:[%s1347_s14 + $0x20] sm:$0xff]  ;;  %v235_v14 = vld [vmem:[%s1347_s14 + $0x28] sm:$0xff] }
  0x12   : > { %1097 = vmatprep.subr.mxu0 %v263_v4  ;;  %1246 = vmatpush3.msra.mxu1 %v641_v5  ;;  %v236_v16 = vld [vmem:[%s1347_s14 + $0x30] sm:$0xff]  ;;  %v237_v18 = vld [vmem:[%s1347_s14 + $0x38] sm:$0xff]  ;;  %v636_v19 = vld [vmem:[%s1600_s3 + $0x48] sm:$0xff] }
  0x13   : > { %1098 = vmatpush3.msra.mxu0 %v263_v4  ;;  %1231 = vmatprep.subr.mxu1 %v640_v7  ;;  %v637_v17 = vld [vmem:[%s1600_s3 + $0x50] sm:$0xff]  ;;  %v238_v20 = vld [vmem:[%s1347_s14 + $0x40] sm:$0xff]  ;;  %v239_v22 = vld [vmem:[%s1347_s14 + $0x48] sm:$0xff] }
  0x14   : > { %1099 = vmatprep.subr.mxu0 %v262_v6  ;;  %1247 = vmatpush3.msra.mxu1 %v640_v7  ;;  %v635_v21 = vld [vmem:[%s1600_s3 + $0x40] sm:$0xff]  ;;  %v634_v23 = vld [vmem:[%s1600_s3 + $0x38] sm:$0xff]  ;;  %v240_v24 = vld [vmem:[%s1347_s14 + $0x50] sm:$0xff] }
  0x15   : > { %1100 = vmatpush3.msra.mxu0 %v262_v6  ;;  %1101 = vmatprep.mubr.msk.f32.mxu0 %vm273_vm0, %v230_v8  ;;  %v633_v25 = vld [vmem:[%s1600_s3 + $0x30] sm:$0xff]  ;;  %v241_v26 = vld [vmem:[%s1347_s14 + $0x58] sm:$0xff]  ;;  %v632_v27 = vld [vmem:[%s1600_s3 + $0x28] sm:$0xff] }
  0x16   : > { %1102 = vmatmul.mubr.msk.f32.vlgmr.msra.gmra.mxu0 %vm273_vm0, %v231_v9  ;;  %1149 = vmatprep.subr.mxu0 %v642_v3  ;;  %v242_v28 = vld [vmem:[%s1347_s14 + $0x60] sm:$0xff]  ;;  %v243_v30 = vld [vmem:[%s1347_s14 + $0x68] sm:$0xff]  ;;  %v244_v31 = vld [vmem:[%s1347_s14 + $0x70] sm:$0xff] }
  0x17   : > { %1104 = vmatprep.mubr.msk.f32.mxu0 %vm273_vm0, %v232_v10  ;;  %1150 = vmatpush3.msra.mxu0 %v642_v3  ;;  %v631_v29 = vld [vmem:[%s1600_s3 + $0x20] sm:$0xff]  ;;  %v245_v32 = vld [vmem:[%s1347_s14 + $0x78] sm:$0xff]  ;;  %v247_v34 = vld [vmem:[%s1347_s14 + $0x88] sm:$0xff] }
  0x18   : > { %1151 = vmatprep.subr.mxu0 %v641_v5  ;;  %1232 = vmatprep.subr.mxu1 %v639_v12  ;;  %v246_v33 = vld [vmem:[%s1347_s14 + $0x80] sm:$0xff]  ;;  %v248_v35 = vld [vmem:[%s1347_s14 + $0x90] sm:$0xff]  ;;  %v249_v36 = vld [vmem:[%s1347_s14 + $0x98] sm:$0xff] }
  0x19   : > { %1152 = vmatpush3.msra.mxu0 %v641_v5  ;;  %1248 = vmatpush3.msra.mxu1 %v639_v12  ;;  %v250_v37 = vld [vmem:[%s1347_s14 + $0xa0] sm:$0xff]  ;;  %v251_v38 = vld [vmem:[%s1347_s14 + $0xa8] sm:$0xff]  ;;  %v252_v39 = vld [vmem:[%s1347_s14 + $0xb0] sm:$0xff] }
  0x1a   : > { %1105 = vmatmul.mubr.msk.f32.gmra.mxu0 %vm273_vm0, %v233_v11  ;;  %1153 = vmatprep.subr.mxu0 %v640_v7  ;;  %v253_v40 = vld [vmem:[%s1347_s14 + $0xb8] sm:$0xff]  ;;  %v254_v41 = vld [vmem:[%s1347_s14 + $0xc0] sm:$0xff]  ;;  %v255_v42 = vld [vmem:[%s1347_s14 + $0xc8] sm:$0xff] }
  0x1b   : > { %1107 = vmatprep.mubr.msk.f32.mxu0 %vm273_vm0, %v234_v13  ;;  %1154 = vmatpush3.msra.mxu0 %v640_v7  ;;  %v256_v43 = vld [vmem:[%s1347_s14 + $0xd0] sm:$0xff]  ;;  %v257_v44 = vld [vmem:[%s1347_s14 + $0xd8] sm:$0xff]  ;;  %v258_v45 = vld [vmem:[%s1347_s14 + $0xe0] sm:$0xff] }
  0x1c   : > { %1155 = vmatprep.subr.mxu0 %v639_v12  ;;  %1233 = vmatprep.subr.mxu1 %v638_v15  ;;  %v259_v46 = vld [vmem:[%s1347_s14 + $0xe8] sm:$0xff]  ;;  %v260_v47 = vld [vmem:[%s1347_s14 + $0xf0] sm:$0xff]  ;;  %v261_v48 = vld [vmem:[%s1347_s14 + $0xf8] sm:$0xff] }
  0x1d   : > { %1156 = vmatpush3.msra.mxu0 %v639_v12  ;;  %1249 = vmatpush3.msra.mxu1 %v638_v15  ;;  %v630_v49 = vld [vmem:[%s1600_s3 + $0x18] sm:$0xff]  ;;  %v629_v50 = vld [vmem:[%s1600_s3 + $0x10] sm:$0xff]  ;;  %v628_v51 = vld [vmem:[%s1600_s3 + $0x8] sm:$0xff] }
  0x1e   : > { %1108 = vmatmul.mubr.msk.f32.gmra.mxu0 %vm273_vm0, %v235_v14  ;;  %1157 = vmatprep.subr.mxu0 %v638_v15  ;;  %v627_v52 = vld [vmem:[%s1600_s3] sm:$0xff] }
  0x1f   : > { %1110 = vmatprep.mubr.msk.f32.mxu0 %vm273_vm0, %v236_v16  ;;  %1158 = vmatpush3.msra.mxu0 %v638_v15  ;;  %v1455_v53 = vld [vmem:[%s1599_s2] ss:$0 sm:$0xff] }
  0x20   : > { %1159 = vmatprep.subr.mxu0 %v637_v17  ;;  %1234 = vmatprep.subr.mxu1 %v637_v17 }
  0x21   : > { %1160 = vmatpush3.msra.mxu0 %v637_v17  ;;  %1250 = vmatpush3.msra.mxu1 %v637_v17 }
  0x22   : > { %1111 = vmatmul.mubr.msk.f32.gmra.mxu0 %vm273_vm0, %v237_v18  ;;  %1161 = vmatprep.subr.mxu0 %v636_v19 }
  0x23   : > { %1113 = vmatprep.mubr.msk.f32.mxu0 %vm273_vm0, %v238_v20  ;;  %1162 = vmatpush3.msra.mxu0 %v636_v19 }
  0x24   : > { %1163 = vmatprep.subr.mxu0 %v635_v21  ;;  %1235 = vmatprep.subr.mxu1 %v636_v19 }
  0x25   : > { %1164 = vmatpush3.msra.mxu0 %v635_v21  ;;  %1251 = vmatpush3.msra.mxu1 %v636_v19 }
  0x26   : > { %1114 = vmatmul.mubr.msk.f32.gmra.mxu0 %vm273_vm0, %v239_v22  ;;  %1165 = vmatprep.subr.mxu0 %v634_v23 }
  0x27   : > { %1116 = vmatprep.mubr.msk.f32.mxu0 %vm273_vm0, %v240_v24  ;;  %1166 = vmatpush3.msra.mxu0 %v634_v23 }
  0x28   : > { %1167 = vmatprep.subr.mxu0 %v633_v25  ;;  %1236 = vmatprep.subr.mxu1 %v635_v21 }
  0x29   : > { %1168 = vmatpush3.msra.mxu0 %v633_v25  ;;  %1252 = vmatpush3.msra.mxu1 %v635_v21 }
  0x2a   : > { %1117 = vmatmul.mubr.msk.f32.gmra.mxu0 %vm273_vm0, %v241_v26  ;;  %1169 = vmatprep.subr.mxu0 %v632_v27 }
  0x2b   : > { %1119 = vmatprep.mubr.msk.f32.mxu0 %vm273_vm0, %v242_v28  ;;  %1170 = vmatpush3.msra.mxu0 %v632_v27 }
  0x2c   : > { %1171 = vmatprep.subr.mxu0 %v631_v29  ;;  %1237 = vmatprep.subr.mxu1 %v634_v23 }
  0x2d   : > { %1172 = vmatpush3.msra.mxu0 %v631_v29  ;;  %1253 = vmatpush3.msra.mxu1 %v634_v23 }
  0x2e   : > { %1120 = vmatmul.mubr.msk.f32.gmra.mxu0 %vm273_vm0, %v243_v30  ;;  %1238 = vmatprep.subr.mxu1 %v633_v25 }
  0x2f   : > { %1122 = vmatprep.mubr.msk.f32.mxu0 %vm273_vm0, %v244_v31  ;;  %1254 = vmatpush3.msra.mxu1 %v633_v25 }
  0x30   : > { %1239 = vmatprep.subr.mxu1 %v632_v27  ;;  %1173 = vmatprep.subr.mxu0 %v630_v49 }
  0x31   : > { %1255 = vmatpush3.msra.mxu1 %v632_v27  ;;  %1174 = vmatpush3.msra.mxu0 %v630_v49 }
  0x32   : > { %1123 = vmatmul.mubr.msk.f32.gmra.mxu0 %vm273_vm0, %v245_v32  ;;  %1240 = vmatprep.subr.mxu1 %v631_v29 }
  0x33   : > { %1125 = vmatprep.mubr.msk.f32.mxu0 %vm273_vm0, %v246_v33  ;;  %1256 = vmatpush3.msra.mxu1 %v631_v29 }
  0x34   : > { %1241 = vmatprep.subr.mxu1 %v630_v49  ;;  %1175 = vmatprep.subr.mxu0 %v629_v50 }
  0x35   : > { %1257 = vmatpush3.msra.mxu1 %v630_v49  ;;  %1176 = vmatpush3.msra.mxu0 %v629_v50 }
  0x36   : > { %1126 = vmatmul.mubr.msk.f32.gmra.mxu0 %vm273_vm0, %v247_v34  ;;  %1242 = vmatprep.subr.mxu1 %v629_v50 }
  0x37   : > { %1128 = vmatprep.mubr.msk.f32.mxu0 %vm273_vm0, %v248_v35  ;;  %1258 = vmatpush3.msra.mxu1 %v629_v50 }
  0x38   : > { %1177 = vmatprep.subr.mxu0 %v628_v51  ;;  %1243 = vmatprep.subr.mxu1 %v628_v51 }
  0x39   : > { %1178 = vmatpush3.msra.mxu0 %v628_v51  ;;  %1259 = vmatpush3.msra.mxu1 %v628_v51 }
  0x3a   : > { %1129 = vmatmul.mubr.msk.f32.gmra.mxu0 %vm273_vm0, %v249_v36  ;;  %1179 = vmatprep.subr.mxu0 %v627_v52 }
  0x3b   : > { %1131 = vmatprep.mubr.msk.f32.mxu0 %vm273_vm0, %v250_v37  ;;  %1244 = vmatprep.subr.mxu1 %v627_v52 }
  0x3c   : > { %1180 = vmatpush3.msra.mxu0 %v627_v52  ;;  %1260 = vmatpush3.msra.mxu1 %v627_v52 }
  0x3e   : > { %1132 = vmatmul.mubr.msk.f32.gmra.mxu0 %vm273_vm0, %v251_v38 }
  0x3f   : > { %1134 = vmatprep.mubr.msk.f32.mxu0 %vm273_vm0, %v252_v39 }
  0x42   : > { %1135 = vmatmul.mubr.msk.f32.gmra.mxu0 %vm273_vm0, %v253_v40 }
  0x43   : > { %1137 = vmatprep.mubr.msk.f32.mxu0 %vm273_vm0, %v254_v41 }
  0x46   : > { %1138 = vmatmul.mubr.msk.f32.gmra.mxu0 %vm273_vm0, %v255_v42 }
  0x47   : > { %1140 = vmatprep.mubr.msk.f32.mxu0 %vm273_vm0, %v256_v43 }
  0x4a   : > { %1141 = vmatmul.mubr.msk.f32.gmra.mxu0 %vm273_vm0, %v257_v44 }
  0x4b   : > { %1143 = vmatprep.mubr.msk.f32.mxu0 %vm273_vm0, %v258_v45 }
  0x4e   : > { %1144 = vmatmul.mubr.msk.f32.gmra.mxu0 %vm273_vm0, %v259_v46 }
  0x4f   : > { %1146 = vmatprep.mubr.msk.f32.mxu0 %vm273_vm0, %v260_v47 }
  0x52   : > { %1147 = vmatmul.mubr.msk.f32.gmra.mxu0 %vm273_vm0, %v261_v48 }
  0xd6   : > { %v1103_v54 = vpop.f32.mrf.mxu0 }
  0xd7   : > { %v442_v55 = vadd.f32 %v1103_v54, %v1455_v53 }
  0xd8   : > { %v436_v56 = vpop.f32.mrf.mxu0 }
  0xd9   : > { %v437_v57 = vadd.f32 %v1455_v53, %v436_v56  ;;  %v596_v60 = vmax.f32 %v442_v55, 0.0 }
  0xda   : > { %v1106_v58 = vpop.f32.mrf.mxu0 }
  0xdb   : > { %v595_v59 = vmax.f32 %v437_v57, 0.0  ;;  %v452_v61 = vadd.f32 %v1106_v58, %v1455_v53 }
  0xdc   : > { %v446_v62 = vpop.f32.mrf.mxu0 }
  0xdd   : > { %v447_v63 = vadd.f32 %v1455_v53, %v446_v62  ;;  %1181 = vmatprep.mubr.f32.mxu0 %v595_v59  ;;  %v598_v2 = vmax.f32 %v452_v61, 0.0 }
  0xde   : > { %v1109_v0 = vpop.f32.mrf.mxu0  ;;  %1182 = vmatmul.mubr.f32.vlgmr.msra.gmra.mxu0 %v596_v60 }
  0xdf   : > { %v597_v1 = vmax.f32 %v447_v63, 0.0  ;;  %v462_v3 = vadd.f32 %v1109_v0, %v1455_v53 }
  0xe0   : > { %v456_v4 = vpop.f32.mrf.mxu0 }
  0xe1   : > { %v457_v5 = vadd.f32 %v1455_v53, %v456_v4  ;;  %1184 = vmatprep.mubr.f32.mxu0 %v597_v1  ;;  %v600_v8 = vmax.f32 %v462_v3, 0.0 }
  0xe2   : > { %v1112_v6 = vpop.f32.mrf.mxu0  ;;  %1185 = vmatmul.mubr.f32.gmra.mxu0 %v598_v2 }
  0xe3   : > { %v599_v7 = vmax.f32 %v457_v5, 0.0  ;;  %v472_v9 = vadd.f32 %v1112_v6, %v1455_v53 }
  0xe4   : > { %v466_v10 = vpop.f32.mrf.mxu0 }
  0xe5   : > { %1187 = vmatprep.mubr.f32.mxu0 %v599_v7  ;;  %v467_v11 = vadd.f32 %v1455_v53, %v466_v10  ;;  %v602_v14 = vmax.f32 %v472_v9, 0.0 }
  0xe6   : > { %v1115_v12 = vpop.f32.mrf.mxu0  ;;  %1188 = vmatmul.mubr.f32.gmra.mxu0 %v600_v8 }
  0xe7   : > { %v601_v13 = vmax.f32 %v467_v11, 0.0  ;;  %v482_v15 = vadd.f32 %v1115_v12, %v1455_v53 }
  0xe8   : > { %v476_v16 = vpop.f32.mrf.mxu0 }
  0xe9   : > { %v477_v17 = vadd.f32 %v1455_v53, %v476_v16  ;;  %1190 = vmatprep.mubr.f32.mxu1 %v601_v13  ;;  %v604_v20 = vmax.f32 %v482_v15, 0.0 }
  0xea   : > { %v1118_v18 = vpop.f32.mrf.mxu0  ;;  %1191 = vmatmul.mubr.f32.vlgmr.msra.gmra.mxu1 %v602_v14 }
  0xeb   : > { %v603_v19 = vmax.f32 %v477_v17, 0.0  ;;  %v492_v21 = vadd.f32 %v1118_v18, %v1455_v53 }
  0xec   : > { %v486_v22 = vpop.f32.mrf.mxu0 }
  0xed   : > { %v487_v23 = vadd.f32 %v1455_v53, %v486_v22  ;;  %1193 = vmatprep.mubr.f32.mxu1 %v603_v19  ;;  %v606_v26 = vmax.f32 %v492_v21, 0.0 }
  0xee   : > { %v1121_v24 = vpop.f32.mrf.mxu0  ;;  %1194 = vmatmul.mubr.f32.gmra.mxu1 %v604_v20 }
  0xef   : > { %v605_v25 = vmax.f32 %v487_v23, 0.0  ;;  %v502_v27 = vadd.f32 %v1121_v24, %v1455_v53  ;;  %v1489_v23 = vld [vmem:[#allocation2] ss:$0 sm:$0xff] }
  0xf0   : > { %v496_v28 = vpop.f32.mrf.mxu0 }
  0xf1   : > { %v497_v29 = vadd.f32 %v1455_v53, %v496_v28  ;;  %1196 = vmatprep.mubr.f32.mxu1 %v605_v25  ;;  %v608_v32 = vmax.f32 %v502_v27, 0.0 }
  0xf2   : > { %v1124_v30 = vpop.f32.mrf.mxu0  ;;  %1197 = vmatmul.mubr.f32.gmra.mxu1 %v606_v26 }
  0xf3   : > { %v607_v31 = vmax.f32 %v497_v29, 0.0  ;;  %v512_v33 = vadd.f32 %v1124_v30, %v1455_v53 }
  0xf4   : > { %v506_v34 = vpop.f32.mrf.mxu0 }
  0xf5   : > { %v507_v35 = vadd.f32 %v1455_v53, %v506_v34  ;;  %1199 = vmatprep.mubr.f32.mxu1 %v607_v31  ;;  %v610_v38 = vmax.f32 %v512_v33, 0.0 }
  0xf6   : > { %v1127_v36 = vpop.f32.mrf.mxu0  ;;  %1200 = vmatmul.mubr.f32.gmra.mxu1 %v608_v32 }
  0xf7   : > { %v609_v37 = vmax.f32 %v507_v35, 0.0  ;;  %v522_v39 = vadd.f32 %v1127_v36, %v1455_v53 }
  0xf8   : > { %v516_v40 = vpop.f32.mrf.mxu0 }
  0xf9   : > { %v517_v41 = vadd.f32 %v1455_v53, %v516_v40  ;;  %1202 = vmatprep.mubr.f32.mxu1 %v609_v37  ;;  %v612_v44 = vmax.f32 %v522_v39, 0.0 }
  0xfa   : > { %v1130_v42 = vpop.f32.mrf.mxu0  ;;  %1203 = vmatmul.mubr.f32.gmra.mxu1 %v610_v38 }
  0xfb   : > { %v611_v43 = vmax.f32 %v517_v41, 0.0  ;;  %v532_v45 = vadd.f32 %v1130_v42, %v1455_v53 }
  0xfc   : > { %v526_v46 = vpop.f32.mrf.mxu0 }
  0xfd   : > { %v527_v47 = vadd.f32 %v1455_v53, %v526_v46  ;;  %1205 = vmatprep.mubr.f32.mxu1 %v611_v43  ;;  %v614_v50 = vmax.f32 %v532_v45, 0.0 }
  0xfe   : > { %v1133_v48 = vpop.f32.mrf.mxu0  ;;  %1206 = vmatmul.mubr.f32.gmra.mxu1 %v612_v44 }
  0xff   : > { %v613_v49 = vmax.f32 %v527_v47, 0.0  ;;  %v542_v51 = vadd.f32 %v1133_v48, %v1455_v53 }
 0x100   : > { %v536_v52 = vpop.f32.mrf.mxu0 }
 0x101   : > { %v537_v54 = vadd.f32 %v1455_v53, %v536_v52  ;;  %1208 = vmatprep.mubr.f32.mxu1 %v613_v49  ;;  %v616_v57 = vmax.f32 %v542_v51, 0.0 }
 0x102   : > { %v1136_v55 = vpop.f32.mrf.mxu0  ;;  %1209 = vmatmul.mubr.f32.gmra.mxu1 %v614_v50 }
 0x103   : > { %v615_v56 = vmax.f32 %v537_v54, 0.0  ;;  %v552_v58 = vadd.f32 %v1136_v55, %v1455_v53 }
 0x104   : > { %v546_v59 = vpop.f32.mrf.mxu0 }
 0x105   : > { %v547_v60 = vadd.f32 %v1455_v53, %v546_v59  ;;  %1211 = vmatprep.mubr.f32.mxu1 %v615_v56  ;;  %v618_v63 = vmax.f32 %v552_v58, 0.0 }
 0x106   : > { %v1139_v61 = vpop.f32.mrf.mxu0  ;;  %1212 = vmatmul.mubr.f32.gmra.mxu1 %v616_v57 }
 0x107   : > { %v617_v62 = vmax.f32 %v547_v60, 0.0  ;;  %v562_v0 = vadd.f32 %v1139_v61, %v1455_v53 }
 0x108   : > { %v556_v1 = vpop.f32.mrf.mxu0 }
 0x109   : > { %v557_v2 = vadd.f32 %v1455_v53, %v556_v1  ;;  %1214 = vmatprep.mubr.f32.mxu1 %v617_v62  ;;  %v620_v5 = vmax.f32 %v562_v0, 0.0 }
 0x10a   : > { %v1142_v3 = vpop.f32.mrf.mxu0  ;;  %1215 = vmatmul.mubr.f32.gmra.mxu1 %v618_v63 }
 0x10b   : > { %v619_v4 = vmax.f32 %v557_v2, 0.0  ;;  %v572_v6 = vadd.f32 %v1142_v3, %v1455_v53 }
 0x10c   : > { %v566_v7 = vpop.f32.mrf.mxu0 }
 0x10d   : > { %v567_v8 = vadd.f32 %v1455_v53, %v566_v7  ;;  %1217 = vmatprep.mubr.f32.mxu1 %v619_v4  ;;  %v622_v11 = vmax.f32 %v572_v6, 0.0 }
 0x10e   : > { %v1145_v9 = vpop.f32.mrf.mxu0  ;;  %1218 = vmatmul.mubr.f32.gmra.mxu1 %v620_v5 }
 0x10f   : > { %v621_v10 = vmax.f32 %v567_v8, 0.0  ;;  %v582_v12 = vadd.f32 %v1145_v9, %v1455_v53 }
 0x110   : > { %v576_v13 = vpop.f32.mrf.mxu0 }
 0x111   : > { %v577_v14 = vadd.f32 %v1455_v53, %v576_v13  ;;  %1220 = vmatprep.mubr.f32.mxu1 %v621_v10  ;;  %v624_v17 = vmax.f32 %v582_v12, 0.0 }
 0x112   : > { %v1148_v15 = vpop.f32.mrf.mxu0  ;;  %1221 = vmatmul.mubr.f32.gmra.mxu1 %v622_v11 }
 0x113   : > { %v623_v16 = vmax.f32 %v577_v14, 0.0  ;;  %v592_v18 = vadd.f32 %v1148_v15, %v1455_v53 }
 0x114   : > { %v586_v19 = vpop.f32.mrf.mxu0 }
 0x115   : > { %v587_v20 = vadd.f32 %v1455_v53, %v586_v19  ;;  %1223 = vmatprep.mubr.f32.mxu1 %v623_v16  ;;  %v626_v22 = vmax.f32 %v592_v18, 0.0 }
 0x116   : > { %1224 = vmatmul.mubr.f32.gmra.mxu1 %v624_v17 }
 0x117   : > { %v625_v21 = vmax.f32 %v587_v20, 0.0 }
 0x119   : > { %1226 = vmatprep.mubr.f32.mxu1 %v625_v21 }
 0x11a   : > { %1227 = vmatmul.mubr.f32.gmra.mxu1 %v626_v22 }
 0x19e   : > { %v1183_v24 = vpop.f32.mrf.mxu0 }
 0x19f   : > { %v722_v53 = vadd.f32 %v1183_v24, %v1489_v23 }
 0x1a0   : > { %v716_v25 = vpop.f32.mrf.mxu0 }
 0x1a1   : > { %877 = vst.msk [vmem:[%s1496_s23 + $0x8] sm:$0xff] %vm875_vm1, %v722_v53  ;;  %v717_v26 = vadd.f32 %v1489_v23, %v716_v25 }
 0x1a2   : > { %v1186_v27 = vpop.f32.mrf.mxu0 }
 0x1a3   : > { %876 = vst.msk [vmem:[%s1496_s23] sm:$0xff] %vm875_vm1, %v717_v26  ;;  %v732_v28 = vadd.f32 %v1186_v27, %v1489_v23 }
 0x1a4   : > { %v726_v29 = vpop.f32.mrf.mxu0 }
 0x1a5   : > { %879 = vst.msk [vmem:[%s1496_s23 + $0x18] sm:$0xff] %vm875_vm1, %v732_v28  ;;  %v727_v30 = vadd.f32 %v1489_v23, %v726_v29 }
 0x1a6   : > { %v1189_v31 = vpop.f32.mrf.mxu0 }
 0x1a7   : > { %878 = vst.msk [vmem:[%s1496_s23 + $0x10] sm:$0xff] %vm875_vm1, %v727_v30  ;;  %v742_v32 = vadd.f32 %v1189_v31, %v1489_v23 }
 0x1a8   : > { %v736_v33 = vpop.f32.mrf.mxu0 }
 0x1a9   : > { %881 = vst.msk [vmem:[%s1496_s23 + $0x28] sm:$0xff] %vm875_vm1, %v742_v32  ;;  %v737_v34 = vadd.f32 %v1489_v23, %v736_v33 }
 0x1aa   : > { %v1192_v35 = vpop.f32.mrf.mxu1 }
 0x1ab   : > { %880 = vst.msk [vmem:[%s1496_s23 + $0x20] sm:$0xff] %vm875_vm1, %v737_v34  ;;  %v752_v36 = vadd.f32 %v1192_v35, %v1489_v23 }
 0x1ac   : > { %v746_v37 = vpop.f32.mrf.mxu1 }
 0x1ad   : > { %883 = vst.msk [vmem:[%s1496_s23 + $0x38] sm:$0xff] %vm875_vm1, %v752_v36  ;;  %v747_v38 = vadd.f32 %v1489_v23, %v746_v37 }
 0x1ae   : > { %v1195_v39 = vpop.f32.mrf.mxu1 }
 0x1af   : > { %882 = vst.msk [vmem:[%s1496_s23 + $0x30] sm:$0xff] %vm875_vm1, %v747_v38  ;;  %v762_v40 = vadd.f32 %v1195_v39, %v1489_v23 }
 0x1b0   : > { %v756_v41 = vpop.f32.mrf.mxu1 }
 0x1b1   : > { %885 = vst.msk [vmem:[%s1496_s23 + $0x48] sm:$0xff] %vm875_vm1, %v762_v40  ;;  %v757_v42 = vadd.f32 %v1489_v23, %v756_v41 }
 0x1b2   : > { %v1198_v43 = vpop.f32.mrf.mxu1 }
 0x1b3   : > { %884 = vst.msk [vmem:[%s1496_s23 + $0x40] sm:$0xff] %vm875_vm1, %v757_v42  ;;  %v772_v44 = vadd.f32 %v1198_v43, %v1489_v23 }
 0x1b4   : > { %v766_v45 = vpop.f32.mrf.mxu1 }
 0x1b5   : > { %887 = vst.msk [vmem:[%s1496_s23 + $0x58] sm:$0xff] %vm875_vm1, %v772_v44  ;;  %v767_v46 = vadd.f32 %v1489_v23, %v766_v45 }
 0x1b6   : > { %v1201_v47 = vpop.f32.mrf.mxu1 }
 0x1b7   : > { %886 = vst.msk [vmem:[%s1496_s23 + $0x50] sm:$0xff] %vm875_vm1, %v767_v46  ;;  %v782_v48 = vadd.f32 %v1201_v47, %v1489_v23 }
 0x1b8   : > { %v776_v49 = vpop.f32.mrf.mxu1 }
 0x1b9   : > { %889 = vst.msk [vmem:[%s1496_s23 + $0x68] sm:$0xff] %vm875_vm1, %v782_v48  ;;  %v777_v50 = vadd.f32 %v1489_v23, %v776_v49 }
 0x1ba   : > { %v1204_v51 = vpop.f32.mrf.mxu1 }
 0x1bb   : > { %888 = vst.msk [vmem:[%s1496_s23 + $0x60] sm:$0xff] %vm875_vm1, %v777_v50  ;;  %v792_v52 = vadd.f32 %v1204_v51, %v1489_v23 }
 0x1bc   : > { %v786_v54 = vpop.f32.mrf.mxu1 }
 0x1bd   : > { %891 = vst.msk [vmem:[%s1496_s23 + $0x78] sm:$0xff] %vm875_vm1, %v792_v52  ;;  %v787_v55 = vadd.f32 %v1489_v23, %v786_v54 }
 0x1be   : > { %v1207_v56 = vpop.f32.mrf.mxu1 }
 0x1bf   : > { %890 = vst.msk [vmem:[%s1496_s23 + $0x70] sm:$0xff] %vm875_vm1, %v787_v55  ;;  %v802_v57 = vadd.f32 %v1207_v56, %v1489_v23 }
 0x1c0   : > { %v796_v58 = vpop.f32.mrf.mxu1 }
 0x1c1   : > { %893 = vst.msk [vmem:[%s1496_s23 + $0x88] sm:$0xff] %vm875_vm1, %v802_v57  ;;  %v797_v59 = vadd.f32 %v1489_v23, %v796_v58 }
 0x1c2   : > { %v1210_v60 = vpop.f32.mrf.mxu1 }
 0x1c3   : > { %892 = vst.msk [vmem:[%s1496_s23 + $0x80] sm:$0xff] %vm875_vm1, %v797_v59  ;;  %v812_v61 = vadd.f32 %v1210_v60, %v1489_v23 }
 0x1c4   : > { %v806_v62 = vpop.f32.mrf.mxu1 }
 0x1c5   : > { %895 = vst.msk [vmem:[%s1496_s23 + $0x98] sm:$0xff] %vm875_vm1, %v812_v61  ;;  %v807_v63 = vadd.f32 %v1489_v23, %v806_v62 }
 0x1c6   : > { %v1213_v0 = vpop.f32.mrf.mxu1 }
 0x1c7   : > { %894 = vst.msk [vmem:[%s1496_s23 + $0x90] sm:$0xff] %vm875_vm1, %v807_v63  ;;  %v822_v1 = vadd.f32 %v1213_v0, %v1489_v23 }
 0x1c8   : > { %v816_v2 = vpop.f32.mrf.mxu1 }
 0x1c9   : > { %897 = vst.msk [vmem:[%s1496_s23 + $0xa8] sm:$0xff] %vm875_vm1, %v822_v1  ;;  %v817_v3 = vadd.f32 %v1489_v23, %v816_v2 }
 0x1ca   : > { %v1216_v4 = vpop.f32.mrf.mxu1 }
 0x1cb   : > { %896 = vst.msk [vmem:[%s1496_s23 + $0xa0] sm:$0xff] %vm875_vm1, %v817_v3  ;;  %v832_v5 = vadd.f32 %v1216_v4, %v1489_v23 }
 0x1cc   : > { %v826_v6 = vpop.f32.mrf.mxu1 }
 0x1cd   : > { %899 = vst.msk [vmem:[%s1496_s23 + $0xb8] sm:$0xff] %vm875_vm1, %v832_v5  ;;  %v827_v7 = vadd.f32 %v1489_v23, %v826_v6 }
 0x1ce   : > { %v1219_v8 = vpop.f32.mrf.mxu1 }
 0x1cf   : > { %898 = vst.msk [vmem:[%s1496_s23 + $0xb0] sm:$0xff] %vm875_vm1, %v827_v7  ;;  %v842_v9 = vadd.f32 %v1219_v8, %v1489_v23 }
 0x1d0   : > { %v836_v10 = vpop.f32.mrf.mxu1 }
 0x1d1   : > { %901 = vst.msk [vmem:[%s1496_s23 + $0xc8] sm:$0xff] %vm875_vm1, %v842_v9  ;;  %v837_v11 = vadd.f32 %v1489_v23, %v836_v10 }
 0x1d2   : > { %v1222_v12 = vpop.f32.mrf.mxu1 }
 0x1d3   : > { %900 = vst.msk [vmem:[%s1496_s23 + $0xc0] sm:$0xff] %vm875_vm1, %v837_v11  ;;  %v852_v13 = vadd.f32 %v1222_v12, %v1489_v23 }
 0x1d4   : > { %v846_v14 = vpop.f32.mrf.mxu1 }
 0x1d5   : > { %903 = vst.msk [vmem:[%s1496_s23 + $0xd8] sm:$0xff] %vm875_vm1, %v852_v13  ;;  %v847_v15 = vadd.f32 %v1489_v23, %v846_v14 }
 0x1d6   : > { %v1225_v16 = vpop.f32.mrf.mxu1 }
 0x1d7   : > { %902 = vst.msk [vmem:[%s1496_s23 + $0xd0] sm:$0xff] %vm875_vm1, %v847_v15  ;;  %v862_v17 = vadd.f32 %v1225_v16, %v1489_v23 }
 0x1d8   : > { %v856_v18 = vpop.f32.mrf.mxu1 }
 0x1d9   : > { %905 = vst.msk [vmem:[%s1496_s23 + $0xe8] sm:$0xff] %vm875_vm1, %v862_v17  ;;  %v857_v19 = vadd.f32 %v1489_v23, %v856_v18 }
 0x1da   : > { %v1228_v20 = vpop.f32.mrf.mxu1 }
 0x1db   : > { %904 = vst.msk [vmem:[%s1496_s23 + $0xe0] sm:$0xff] %vm875_vm1, %v857_v19  ;;  %v872_v21 = vadd.f32 %v1228_v20, %v1489_v23 }
 0x1dc   : > { %v866_v22 = vpop.f32.mrf.mxu1 }
 0x1dd   : > { %907 = vst.msk [vmem:[%s1496_s23 + $0xf8] sm:$0xff] %vm875_vm1, %v872_v21  ;;  %v867_v24 = vadd.f32 %v1489_v23, %v866_v22 }
 0x1df   : > { %906 = vst.msk [vmem:[%s1496_s23 + $0xf0] sm:$0xff] %vm875_vm1, %v867_v24 }
 0x1e0 PF: > { %s17_s20 = sadd.s32 1, %s1275_s20  }
 0x1e1   : > { %p14_p4 = scmp.ge.s32.totalorder %s17_s20, 4  }
 0x1e3   :  { %16 = sbr.rel (!%p14_p4) target bundleno = 3 (0x3), region = 70 }

// kernel: fno2d_forward.11
= control target key start
LH: loop header
LB: loop body
LE: loop exit
PB: predicated region body
PF: predicated region fallthrough
CT: control target
= control target key end

     0   :  { %15 = vsyncpa [#allocation3], 0  ;;  %s4293_s0 = inlined_call_operand.vmem [shape: f32[2,16,512], index: 0, kind: input, shape index: {}]   ;;  %s4294_s1 = inlined_call_operand.hbm [shape: f32[512,128], index: 1, kind: input, shape index: {}]   ;;  %s4295_s2 = inlined_call_operand.hbm [shape: f32[512,128], index: 2, kind: input, shape index: {}]   ;;  %s4296_s3 = inlined_call_operand.hbm [shape: f32[8,16], index: 3, kind: input, shape index: {}]   ;;  %s4297_s4 = inlined_call_operand.hbm [shape: f32[8,16], index: 4, kind: input, shape index: {}]   ;;  %s4298_s5 = inlined_call_operand.hbm [shape: f32[2048,256], index: 5, kind: input, shape index: {}]   ;;  %s4299_s6 = inlined_call_operand.hbm [shape: f32[16,8], index: 6, kind: input, shape index: {}]   ;;  %s4300_s7 = inlined_call_operand.hbm [shape: f32[16,8], index: 7, kind: input, shape index: {}]   ;;  %s4301_s8 = inlined_call_operand.hbm [shape: f32[128,512], index: 8, kind: input, shape index: {}]   ;;  %s4302_s9 = inlined_call_operand.hbm [shape: f32[128,512], index: 9, kind: input, shape index: {}]   ;;  %s4303_s10 = inlined_call_operand.vmem [shape: f32[2,16,512], index: 10, kind: output, shape index: {}]  }
   0x1   :  { %16 = vsyncpa [#allocation5], 0 }
   0x2   :  { %17 = vsyncpa [#allocation8], 0 }
   0x3   :  { %18 = vsyncpa [#allocation11], 0 }
   0x4   :  { %19 = vsyncpa [#allocation14], 0  ;;  %s4010_s13 = smov 0  }
   0x5 LB: > { %s4016_s14 = sadd.s32 4294967295, %s3936_s13   ;;  %p3304_p0 = scmp.ge.s32.totalorder %s3936_s13, 1  ;;  %s3936_s13 = sphi %s4010_s13, %s25_s13  }
   0x6   : > { %p271_p1 = scmp.lt.s32.totalorder %s3936_s13, 3  ;;  %p3633_p2 = scmp.eq.s32.totalorder %s4016_s14, 0 }
   0x7   : > { %s3938_s16 = smov [#allocation4]   ;;  %s3939_s18 = smov [#allocation7]  }
   0x8   : > { %p4021_p3 = pnand %p3304_p0, %p271_p1  ;;  %s296_s17 = sshll.u32 %s3938_s16, 4  ;;  %s297_s17 = int_to_ptr.vmem [resolvable:$true] %s296_s17 }
   0x9   : > { %s321_s19 = sshll.u32 %s3939_s18, 4  ;;  %s3940_s21 = smov [#allocation10]   ;;  %s4027_s19 = int_to_ptr.vmem [resolvable:$true] %s321_s19 }
   0xa   : > { %p3605_p4 = pneg %p4021_p3  ;;  %s344_s22 = sshll.u32 %s3940_s21, 4  ;;  %s4035_s22 = int_to_ptr.vmem [resolvable:$true] %s344_s22 }
   0xb   : > { %s3941_s23 = smov [#allocation13]   ;;  %s3687_s26 = scalar_lea.vmem %s297_s17, 8192 }
   0xc   : > { %p4031_p5 = pnand %p3633_p2, %p3605_p4  ;;  %s4037_s24 = sshll.u32 %s3941_s23, 4  ;;  %s371_s24 = int_to_ptr.vmem [resolvable:$true] %s4037_s24 }
   0xd   : > { %p3688_p7 = scmp.ne.s32.totalorder %s297_s17, %s3687_s26  ;;  %p3695_p10 = scmp.lt.s32.totalorder %s297_s17, %s297_s17 }
   0xe   : > { %p4041_p6 = pneg %p4031_p5  ;;  %p3696_p11 = scmp.lt.s32.totalorder %s3687_s26, %s3687_s26 }
  0x10   : > { %p3690_p8 = pnand %p3688_p7, %p4041_p6  ;;  %p3697_p12 = por %p3696_p11, %p3695_p10 }
  0x12   : > { %p3691_p9 = pneg %p3690_p8 }
  0x14   : > { %p3698_p13 = pnand %p3697_p12, %p3691_p9 }
  0x16   : > { %3701 = shalt.err (!%p3698_p13)
}
  0x17   : > { %s3942_s27 = smov 128   ;;  %s3943_s28 = smov 8  }
  0x18   : > { %3611 = dma.hbm_to_vmem [thread:$0]  (!%p4031_p5), %s4295_s2, 8192, %s297_s17, [#allocation5], %s3942_s27, %s3942_s27, %s3943_s28  }
  0x19   : > { %s3713_s11 = scalar_lea.vmem %s4027_s19, 128  ;;  %p3721_p7 = scmp.lt.s32.totalorder %s4027_s19, %s4027_s19 }
  0x1a   : > { %p3714_p0 = scmp.ne.s32.totalorder %s4027_s19, %s3713_s11  ;;  %p3722_p8 = scmp.lt.s32.totalorder %s3713_s11, %s3713_s11 }
  0x1c   : > { %p3716_p1 = pnand %p3714_p0, %p4041_p6  ;;  %p3723_p9 = por %p3722_p8, %p3721_p7 }
  0x1e   : > { %p3717_p4 = pneg %p3716_p1 }
  0x20   : > { %p3724_p10 = pnand %p3723_p9, %p3717_p4 }
  0x22   : > { %3727 = shalt.err (!%p3724_p10)
}
  0x23   : > { %3617 = dma.hbm_to_vmem [thread:$0]  (!%p4031_p5), %s4297_s4, 128, %s4027_s19, [#allocation8]  }
  0x24   : > { %s3739_s17 = scalar_lea.vmem %s4035_s22, 256  ;;  %p3747_p0 = scmp.lt.s32.totalorder %s4035_s22, %s4035_s22 }
  0x25   : > { %p3740_p11 = scmp.ne.s32.totalorder %s4035_s22, %s3739_s17  ;;  %p3748_p1 = scmp.lt.s32.totalorder %s3739_s17, %s3739_s17 }
  0x27   : > { %p3742_p12 = pnand %p3740_p11, %p4041_p6  ;;  %p3749_p4 = por %p3748_p1, %p3747_p0 }
  0x29   : > { %p3743_p13 = pneg %p3742_p12 }
  0x2b   : > { %p3750_p7 = pnand %p3749_p4, %p3743_p13 }
  0x2d   : > { %3753 = shalt.err (!%p3750_p7)
}
  0x2e   : > { %3623 = dma.hbm_to_vmem [thread:$0]  (!%p4031_p5), %s4299_s6, 256, %s4035_s22, [#allocation11], %s3942_s27, %s3942_s27, %s3943_s28  }
  0x2f   : > { %s3765_s19 = scalar_lea.vmem %s371_s24, 8192  ;;  %p3773_p11 = scmp.lt.s32.totalorder %s371_s24, %s371_s24 }
  0x30   : > { %p3766_p8 = scmp.ne.s32.totalorder %s371_s24, %s3765_s19  ;;  %p3774_p12 = scmp.lt.s32.totalorder %s3765_s19, %s3765_s19 }
  0x32   : > { %p3768_p9 = pnand %p3766_p8, %p4041_p6  ;;  %p3775_p13 = por %p3774_p12, %p3773_p11 }
  0x34   : > { %p3769_p10 = pneg %p3768_p9 }
  0x36   : > { %p3776_p0 = pnand %p3775_p13, %p3769_p10 }
  0x38   : > { %3779 = shalt.err (!%p3776_p0)
}
  0x39   : > { %s3944_s23 = smov 512   ;;  %s3945_s26 = smov 32  }
  0x3a   : > { %3629 = dma.hbm_to_vmem [thread:$0]  (!%p4031_p5), %s4301_s8, 8192, %s371_s24, [#allocation14], %s3944_s23, %s3944_s23, %s3945_s26  }
  0x3b   : > { %s3946_s30 = smov [#allocation2]   ;;  %s3947_s12 = smov [#allocation6]  }
  0x3c   : > { %s283_s11 = sshll.u32 %s3946_s30, 4  ;;  %s310_s16 = sshll.u32 %s3947_s12, 4  ;;  %s284_s11 = int_to_ptr.vmem [resolvable:$true] %s283_s11  ;;  %s311_s16 = int_to_ptr.vmem [resolvable:$true] %s310_s16 }
  0x3d   : > { %s3791_s17 = scalar_lea.vmem %s284_s11, 8192  ;;  %p3799_p8 = scmp.lt.s32.totalorder %s284_s11, %s284_s11 }
  0x3e   : > { %p3792_p1 = scmp.ne.s32.totalorder %s284_s11, %s3791_s17  ;;  %p3800_p9 = scmp.lt.s32.totalorder %s3791_s17, %s3791_s17 }
  0x40   : > { %p3794_p4 = pnand %p3792_p1, %p4041_p6  ;;  %p3801_p10 = por %p3800_p9, %p3799_p8 }
  0x42   : > { %p3795_p7 = pneg %p3794_p4 }
  0x44   : > { %p3802_p11 = pnand %p3801_p10, %p3795_p7 }
  0x46   : > { %3805 = shalt.err (!%p3802_p11)
}
  0x47   : > { %3608 = dma.hbm_to_vmem [thread:$0]  (!%p4031_p5), %s4294_s1, 8192, %s284_s11, [#allocation3], %s3942_s27, %s3942_s27, %s3943_s28  }
  0x48   : > { %s3817_s21 = scalar_lea.vmem %s311_s16, 128  ;;  %p3825_p1 = scmp.lt.s32.totalorder %s311_s16, %s311_s16 }
  0x49   : > { %p3818_p12 = scmp.ne.s32.totalorder %s311_s16, %s3817_s21  ;;  %p3826_p4 = scmp.lt.s32.totalorder %s3817_s21, %s3817_s21 }
  0x4b   : > { %p3820_p13 = pnand %p3818_p12, %p4041_p6  ;;  %p3827_p7 = por %p3826_p4, %p3825_p1 }
  0x4d   : > { %p3821_p0 = pneg %p3820_p13 }
  0x4f   : > { %p3828_p8 = pnand %p3827_p7, %p3821_p0 }
  0x51   : > { %3831 = shalt.err (!%p3828_p8)
}
  0x52   : > { %3614 = dma.hbm_to_vmem [thread:$0]  (!%p4031_p5), %s4296_s3, 128, %s311_s16, [#allocation5]  }
  0x53   : > { %s3948_s29 = smov [#allocation9]  }
  0x54   : > { %s331_s30 = sshll.u32 %s3948_s29, 4  ;;  %s332_s30 = int_to_ptr.vmem [resolvable:$true] %s331_s30 }
  0x55   : > { %s3843_s11 = scalar_lea.vmem %s332_s30, 65536  ;;  %p3851_p12 = scmp.lt.s32.totalorder %s332_s30, %s332_s30 }
  0x56   : > { %p3844_p9 = scmp.ne.s32.totalorder %s332_s30, %s3843_s11  ;;  %p3852_p13 = scmp.lt.s32.totalorder %s3843_s11, %s3843_s11 }
  0x58   : > { %p3846_p10 = pnand %p3844_p9, %p4041_p6  ;;  %p3853_p1 = por %p3852_p13, %p3851_p12 }
  0x5a   : > { %p3847_p11 = pneg %p3846_p10 }
  0x5c   : > { %p3854_p0 = pnand %p3853_p1, %p3847_p11 }
  0x5e   : > { %3857 = shalt.err (!%p3854_p0)
}
  0x5f   : > { %s3949_s12 = smov 256   ;;  %s3950_s17 = smov 16  }
  0x60   : > { %3620 = dma.hbm_to_vmem [thread:$0]  (!%p4031_p5), %s4298_s5, 65536, %s332_s30, [#allocation8], %s3949_s12, %s3949_s12, %s3950_s17  }
  0x61   : > { %s3951_s18 = smov [#allocation12]   ;;  %s3952_s19 = smov [#allocation15]  }
  0x62   : > { %s357_s21 = sshll.u32 %s3951_s18, 4  ;;  %s383_s22 = sshll.u32 %s3952_s19, 4  ;;  %s358_s21 = int_to_ptr.vmem [resolvable:$true] %s357_s21  ;;  %s384_s22 = int_to_ptr.vmem [resolvable:$true] %s383_s22 }
  0x63   : > { %s3869_s29 = scalar_lea.vmem %s358_s21, 256  ;;  %p3877_p9 = scmp.lt.s32.totalorder %s358_s21, %s358_s21 }
  0x64   : > { %p3870_p4 = scmp.ne.s32.totalorder %s358_s21, %s3869_s29  ;;  %p3878_p10 = scmp.lt.s32.totalorder %s3869_s29, %s3869_s29 }
  0x66   : > { %p3872_p7 = pnand %p3870_p4, %p4041_p6  ;;  %p3879_p11 = por %p3878_p10, %p3877_p9 }
  0x68   : > { %p3873_p8 = pneg %p3872_p7 }
  0x6a   : > { %p3880_p12 = pnand %p3879_p11, %p3873_p8 }
  0x6c   : > { %3883 = shalt.err (!%p3880_p12)
}
  0x6d   : > { %3626 = dma.hbm_to_vmem [thread:$0]  (!%p4031_p5), %s4300_s7, 256, %s358_s21, [#allocation11], %s3942_s27, %s3942_s27, %s3943_s28  }
  0x6e   : > { %s3895_s12 = scalar_lea.vmem %s384_s22, 8192  ;;  %p3903_p4 = scmp.lt.s32.totalorder %s384_s22, %s384_s22 }
  0x6f   : > { %p3896_p13 = scmp.ne.s32.totalorder %s384_s22, %s3895_s12  ;;  %p3904_p7 = scmp.lt.s32.totalorder %s3895_s12, %s3895_s12 }
  0x71   : > { %p3898_p1 = pnand %p3896_p13, %p4041_p6  ;;  %p3905_p9 = por %p3904_p7, %p3903_p4 }
  0x73   : > { %p3899_p0 = pneg %p3898_p1 }
  0x75   : > { %p3906_p8 = pnand %p3905_p9, %p3899_p0 }
  0x77   : > { %3909 = shalt.err (!%p3906_p8)
}
  0x78   : > { %3632 = dma.hbm_to_vmem [thread:$0]  (!%p4031_p5), %s4302_s9, 8192, %s384_s22, [#allocation14], %s3944_s23, %s3944_s23, %s3945_s26  }
  0x79   : > { %407 = sbr.rel (%p4021_p3) target bundleno = 1448 (0x5a8), region = 60 }
  0x7e   : > { %3915 = dma.done.wait (%p3633_p2), [#allocation3], 8192  }
  0x7f   : > { %3917 = vsyncadd (%p3633_p2), [#allocation3], 4294959104 }
  0x80   : > { %3919 = dma.done.wait (%p3633_p2), [#allocation5], 8320  }
  0x81   : > { %3921 = vsyncadd (%p3633_p2), [#allocation5], 4294958976 }
  0x82   : > { %3923 = dma.done.wait (%p3633_p2), [#allocation8], 65664  }
  0x83   : > { %3925 = vsyncadd (%p3633_p2), [#allocation8], 4294901632 }
  0x84   : > { %3927 = dma.done.wait (%p3633_p2), [#allocation11], 512  }
  0x85   : > { %3929 = vsyncadd (%p3633_p2), [#allocation11], 4294966784 }
  0x86   : > { %3931 = dma.done.wait (%p3633_p2), [#allocation14], 16384  }
  0x87   : > { %3933 = vsyncadd (%p3633_p2), [#allocation14], 4294950912  ;;  %v526_v0 = vld [vmem:[#allocation2 + $0xf8] sm:$0xff]  ;;  %v525_v4 = vld [vmem:[#allocation2 + $0xf0] sm:$0xff]  ;;  %p477_p2 = scmp.lt.s32.totalorder %s4016_s14, 1  ;;  %vm3954_vm0 = vmmov 0  }
  0x88   : > { %v558_v1 = vld [vmem:[#allocation2 + $0x1f8] sm:$0xff]  ;;  %3345 = vmatprep.subr.mxu0 %v526_v0  ;;  %v557_v5 = vld [vmem:[#allocation2 + $0x1f0] sm:$0xff]  ;;  %v524_v8 = vld [vmem:[#allocation2 + $0xe8] sm:$0xff]  ;;  %vm927_vm1 = vcmask 130048   ;;  %vm2392_vm2 = vcmask 64512   ;;  %vm2367_vm3 = vcmask 1040384  }
  0x89   : > { %v510_v2 = vld [vmem:[#allocation2 + $0x78] sm:$0xff]  ;;  %3383 = vmatprep.subr.mxu1 %v558_v1  ;;  %v509_v6 = vld [vmem:[#allocation2 + $0x70] sm:$0xff]  ;;  %v556_v9 = vld [vmem:[#allocation2 + $0x1e8] sm:$0xff]  ;;  %s4308_s14 = smov (!%p477_p2, %s4016_s14), 1  ;;  %vm2370_vm4 = vcmask 1041408   ;;  %vm2373_vm5 = vcmask 1042432  }
  0x8a   : > { %v542_v3 = vld [vmem:[#allocation2 + $0x178] sm:$0xff]  ;;  %3346 = vmatpush3.msra.mxu0 %v510_v2  ;;  %v541_v7 = vld [vmem:[#allocation2 + $0x170] sm:$0xff]  ;;  %v508_v10 = vld [vmem:[#allocation2 + $0x68] sm:$0xff]  ;;  %s3343_s15 = sshll.u32 %s4308_s14, 6  ;;  %vm2376_vm6 = vcmask 1043456   ;;  %vm2379_vm7 = vcmask 1044480  }
  0x8b   : > { %3384 = vmatpush3.msra.mxu1 %v542_v3  ;;  %3347 = vmatprep.subr.mxu0 %v525_v4  ;;  %v540_v11 = vld [vmem:[#allocation2 + $0x168] sm:$0xff]  ;;  %v523_v12 = vld [vmem:[#allocation2 + $0xe0] sm:$0xff]  ;;  %v522_v16 = vld [vmem:[#allocation2 + $0xd8] sm:$0xff]  ;;  %s4171_s27 = scalar_lea.vmem %s4293_s0, %s3343_s15  ;;  %vm2382_vm8 = vcmask 1045504   ;;  %vm2385_vm9 = vcmask 1046528   ;;  %s486_s26 = scalar_lea.vmem %s4303_s10, %s3343_s15 }
  0x8c   : > { %3385 = vmatprep.subr.mxu1 %v557_v5  ;;  %3348 = vmatpush3.msra.mxu0 %v509_v6  ;;  %v555_v13 = vld [vmem:[#allocation2 + $0x1e0] sm:$0xff]  ;;  %v554_v17 = vld [vmem:[#allocation2 + $0x1d8] sm:$0xff]  ;;  %v521_v20 = vld [vmem:[#allocation2 + $0xd0] sm:$0xff] }
  0x8d   : > { %3386 = vmatpush3.msra.mxu1 %v541_v7  ;;  %3349 = vmatprep.subr.mxu0 %v524_v8  ;;  %v507_v14 = vld [vmem:[#allocation2 + $0x60] sm:$0xff]  ;;  %v506_v18 = vld [vmem:[#allocation2 + $0x58] sm:$0xff]  ;;  %v553_v21 = vld [vmem:[#allocation2 + $0x1d0] sm:$0xff] }
  0x8e   : > { %3387 = vmatprep.subr.mxu1 %v556_v9  ;;  %v539_v15 = vld [vmem:[#allocation2 + $0x160] sm:$0xff]  ;;  %3350 = vmatpush3.msra.mxu0 %v508_v10  ;;  %v538_v19 = vld [vmem:[#allocation2 + $0x158] sm:$0xff]  ;;  %v505_v22 = vld [vmem:[#allocation2 + $0x50] sm:$0xff] }
  0x8f   : > { %3388 = vmatpush3.msra.mxu1 %v540_v11  ;;  %3351 = vmatprep.subr.mxu0 %v523_v12  ;;  %v537_v23 = vld [vmem:[#allocation2 + $0x150] sm:$0xff]  ;;  %v520_v24 = vld [vmem:[#allocation2 + $0xc8] sm:$0xff]  ;;  %v519_v28 = vld [vmem:[#allocation2 + $0xc0] sm:$0xff] }
  0x90   : > { %3389 = vmatprep.subr.mxu1 %v555_v13  ;;  %3352 = vmatpush3.msra.mxu0 %v507_v14  ;;  %v552_v25 = vld [vmem:[#allocation2 + $0x1c8] sm:$0xff]  ;;  %v551_v29 = vld [vmem:[#allocation2 + $0x1c0] sm:$0xff]  ;;  %v518_v32 = vld [vmem:[#allocation2 + $0xb8] sm:$0xff] }
  0x91   : > { %3390 = vmatpush3.msra.mxu1 %v539_v15  ;;  %3353 = vmatprep.subr.mxu0 %v522_v16  ;;  %v504_v26 = vld [vmem:[#allocation2 + $0x48] sm:$0xff]  ;;  %v503_v30 = vld [vmem:[#allocation2 + $0x40] sm:$0xff]  ;;  %v550_v33 = vld [vmem:[#allocation2 + $0x1b8] sm:$0xff] }
  0x92   : > { %3391 = vmatprep.subr.mxu1 %v554_v17  ;;  %3354 = vmatpush3.msra.mxu0 %v506_v18  ;;  %v536_v27 = vld [vmem:[#allocation2 + $0x148] sm:$0xff]  ;;  %v535_v31 = vld [vmem:[#allocation2 + $0x140] sm:$0xff]  ;;  %v502_v34 = vld [vmem:[#allocation2 + $0x38] sm:$0xff] }
  0x93   : > { %3392 = vmatpush3.msra.mxu1 %v538_v19  ;;  %3355 = vmatprep.subr.mxu0 %v521_v20  ;;  %v534_v35 = vld [vmem:[#allocation2 + $0x138] sm:$0xff]  ;;  %v517_v36 = vld [vmem:[#allocation2 + $0xb0] sm:$0xff]  ;;  %v516_v40 = vld [vmem:[#allocation2 + $0xa8] sm:$0xff] }
  0x94   : > { %3393 = vmatprep.subr.mxu1 %v553_v21  ;;  %3356 = vmatpush3.msra.mxu0 %v505_v22  ;;  %v549_v37 = vld [vmem:[#allocation2 + $0x1b0] sm:$0xff]  ;;  %v548_v41 = vld [vmem:[#allocation2 + $0x1a8] sm:$0xff]  ;;  %v515_v44 = vld [vmem:[#allocation2 + $0xa0] sm:$0xff] }
  0x95   : > { %3394 = vmatpush3.msra.mxu1 %v537_v23  ;;  %3357 = vmatprep.subr.mxu0 %v520_v24  ;;  %v501_v38 = vld [vmem:[#allocation2 + $0x30] sm:$0xff]  ;;  %v500_v42 = vld [vmem:[#allocation2 + $0x28] sm:$0xff]  ;;  %v547_v45 = vld [vmem:[#allocation2 + $0x1a0] sm:$0xff] }
  0x96   : > { %3395 = vmatprep.subr.mxu1 %v552_v25  ;;  %3358 = vmatpush3.msra.mxu0 %v504_v26  ;;  %v533_v39 = vld [vmem:[#allocation2 + $0x130] sm:$0xff]  ;;  %v532_v43 = vld [vmem:[#allocation2 + $0x128] sm:$0xff]  ;;  %v499_v46 = vld [vmem:[#allocation2 + $0x20] sm:$0xff] }
  0x97   : > { %3396 = vmatpush3.msra.mxu1 %v536_v27  ;;  %3359 = vmatprep.subr.mxu0 %v519_v28  ;;  %v531_v47 = vld [vmem:[#allocation2 + $0x120] sm:$0xff]  ;;  %v514_v48 = vld [vmem:[#allocation2 + $0x98] sm:$0xff]  ;;  %v513_v52 = vld [vmem:[#allocation2 + $0x90] sm:$0xff] }
  0x98   : > { %3397 = vmatprep.subr.mxu1 %v551_v29  ;;  %3360 = vmatpush3.msra.mxu0 %v503_v30  ;;  %v546_v49 = vld [vmem:[#allocation2 + $0x198] sm:$0xff]  ;;  %v545_v53 = vld [vmem:[#allocation2 + $0x190] sm:$0xff]  ;;  %v512_v56 = vld [vmem:[#allocation2 + $0x88] sm:$0xff] }
  0x99   : > { %3398 = vmatpush3.msra.mxu1 %v535_v31  ;;  %3361 = vmatprep.subr.mxu0 %v518_v32  ;;  %v498_v50 = vld [vmem:[#allocation2 + $0x18] sm:$0xff]  ;;  %v497_v54 = vld [vmem:[#allocation2 + $0x10] sm:$0xff]  ;;  %v544_v57 = vld [vmem:[#allocation2 + $0x188] sm:$0xff] }
  0x9a   : > { %3399 = vmatprep.subr.mxu1 %v550_v33  ;;  %3362 = vmatpush3.msra.mxu0 %v502_v34  ;;  %v530_v51 = vld [vmem:[#allocation2 + $0x118] sm:$0xff]  ;;  %v529_v55 = vld [vmem:[#allocation2 + $0x110] sm:$0xff]  ;;  %v496_v58 = vld [vmem:[#allocation2 + $0x8] sm:$0xff] }
  0x9b   : > { %3400 = vmatpush3.msra.mxu1 %v534_v35  ;;  %3363 = vmatprep.subr.mxu0 %v517_v36  ;;  %v528_v59 = vld [vmem:[#allocation2 + $0x108] sm:$0xff]  ;;  %v511_v60 = vld [vmem:[#allocation2 + $0x80] sm:$0xff]  ;;  %v4177_v1 = vld [vmem:[%s4171_s27 + $0x18] sm:$0xff] }
  0x9c   : > { %3401 = vmatprep.subr.mxu1 %v549_v37  ;;  %3364 = vmatpush3.msra.mxu0 %v501_v38  ;;  %v543_v61 = vld [vmem:[#allocation2 + $0x180] sm:$0xff]  ;;  %v4174_v63 = vld [vmem:[%s4171_s27 + $0x8] sm:$0xff]  ;;  %v4183_v3 = vld [vmem:[%s4171_s27 + $0x10] sm:$0xff] }
  0x9d   : > { %3402 = vmatpush3.msra.mxu1 %v533_v39  ;;  %3365 = vmatprep.subr.mxu0 %v516_v40  ;;  %v495_v62 = vld [vmem:[#allocation2] sm:$0xff]  ;;  %v740_v4 = vld [vmem:[#allocation4 + $0xf8] sm:$0xff]  ;;  %v739_v8 = vld [vmem:[#allocation4 + $0xf0] sm:$0xff] }
  0x9e   : > { %3403 = vmatprep.subr.mxu1 %v548_v41  ;;  %3366 = vmatpush3.msra.mxu0 %v500_v42  ;;  %v527_v0 = vld [vmem:[#allocation2 + $0x100] sm:$0xff]  ;;  %v772_v5 = vld [vmem:[#allocation4 + $0x1f8] sm:$0xff]  ;;  %v771_v9 = vld [vmem:[#allocation4 + $0x1f0] sm:$0xff] }
  0x9f   : > { %3404 = vmatpush3.msra.mxu1 %v532_v43  ;;  %3367 = vmatprep.subr.mxu0 %v515_v44  ;;  %v4180_v2 = vld [vmem:[%s4171_s27] sm:$0xff]  ;;  %v724_v6 = vld [vmem:[#allocation4 + $0x78] sm:$0xff]  ;;  %v4190_v10 = vld [vmem:[%s4171_s27 + $0x28] sm:$0xff] }
  0xa0   : > { %3405 = vmatprep.subr.mxu1 %v547_v45  ;;  %3368 = vmatpush3.msra.mxu0 %v499_v46  ;;  %v756_v7 = vld [vmem:[#allocation4 + $0x178] sm:$0xff]  ;;  %v723_v12 = vld [vmem:[#allocation4 + $0x70] sm:$0xff]  ;;  %v4196_v14 = vld [vmem:[%s4171_s27 + $0x20] sm:$0xff] }
  0xa1   : > { %3406 = vmatpush3.msra.mxu1 %v531_v47  ;;  %3369 = vmatprep.subr.mxu0 %v514_v48  ;;  %v4193_v11 = vld [vmem:[%s4171_s27 + $0x38] sm:$0xff]  ;;  %v755_v13 = vld [vmem:[#allocation4 + $0x170] sm:$0xff]  ;;  %v738_v16 = vld [vmem:[#allocation4 + $0xe8] sm:$0xff] }
  0xa2   : > { %3407 = vmatprep.subr.mxu1 %v546_v49  ;;  %3370 = vmatpush3.msra.mxu0 %v498_v50  ;;  %v4199_v15 = vld [vmem:[%s4171_s27 + $0x30] sm:$0xff]  ;;  %v770_v17 = vld [vmem:[#allocation4 + $0x1e8] sm:$0xff]  ;;  %v737_v20 = vld [vmem:[#allocation4 + $0xe0] sm:$0xff] }
  0xa3   : > { %3408 = vmatpush3.msra.mxu1 %v530_v51  ;;  %3371 = vmatprep.subr.mxu0 %v513_v52  ;;  %v722_v18 = vld [vmem:[#allocation4 + $0x68] sm:$0xff]  ;;  %v769_v21 = vld [vmem:[#allocation4 + $0x1e0] sm:$0xff]  ;;  %v736_v24 = vld [vmem:[#allocation4 + $0xd8] sm:$0xff] }
  0xa4   : > { %3409 = vmatprep.subr.mxu1 %v545_v53  ;;  %3372 = vmatpush3.msra.mxu0 %v497_v54  ;;  %v754_v19 = vld [vmem:[#allocation4 + $0x168] sm:$0xff]  ;;  %v721_v22 = vld [vmem:[#allocation4 + $0x60] sm:$0xff]  ;;  %v768_v25 = vld [vmem:[#allocation4 + $0x1d8] sm:$0xff] }
  0xa5   : > { %3410 = vmatpush3.msra.mxu1 %v529_v55  ;;  %3373 = vmatprep.subr.mxu0 %v512_v56  ;;  %v753_v23 = vld [vmem:[#allocation4 + $0x160] sm:$0xff]  ;;  %v720_v26 = vld [vmem:[#allocation4 + $0x58] sm:$0xff]  ;;  %v735_v28 = vld [vmem:[#allocation4 + $0xd0] sm:$0xff] }
  0xa6   : > { %3411 = vmatprep.subr.mxu1 %v544_v57  ;;  %3374 = vmatpush3.msra.mxu0 %v496_v58  ;;  %v752_v27 = vld [vmem:[#allocation4 + $0x158] sm:$0xff]  ;;  %v767_v29 = vld [vmem:[#allocation4 + $0x1d0] sm:$0xff]  ;;  %v734_v32 = vld [vmem:[#allocation4 + $0xc8] sm:$0xff] }
  0xa7   : > { %3412 = vmatpush3.msra.mxu1 %v528_v59  ;;  %3375 = vmatprep.subr.mxu0 %v511_v60  ;;  %v719_v30 = vld [vmem:[#allocation4 + $0x50] sm:$0xff]  ;;  %v766_v33 = vld [vmem:[#allocation4 + $0x1c8] sm:$0xff]  ;;  %v733_v36 = vld [vmem:[#allocation4 + $0xc0] sm:$0xff] }
  0xa8   : > { %3413 = vmatprep.subr.mxu1 %v543_v61  ;;  %3376 = vmatpush3.msra.mxu0 %v495_v62  ;;  %v751_v31 = vld [vmem:[#allocation4 + $0x150] sm:$0xff]  ;;  %v718_v34 = vld [vmem:[#allocation4 + $0x48] sm:$0xff]  ;;  %v765_v37 = vld [vmem:[#allocation4 + $0x1c0] sm:$0xff] }
  0xa9   : > { %623 = vmatprep.mubr.f32.mxu0 %v4174_v63  ;;  %3414 = vmatpush3.msra.mxu1 %v527_v0  ;;  %v750_v35 = vld [vmem:[#allocation4 + $0x148] sm:$0xff]  ;;  %v717_v38 = vld [vmem:[#allocation4 + $0x40] sm:$0xff]  ;;  %v732_v40 = vld [vmem:[#allocation4 + $0xb8] sm:$0xff] }
  0xaa   : > { %698 = vmatprep.mubr.f32.mxu1 %v4177_v1  ;;  %624 = vmatmul.mubr.f32.vlgmr.msra.gmra.mxu0 %v4180_v2  ;;  %v749_v39 = vld [vmem:[#allocation4 + $0x140] sm:$0xff]  ;;  %v764_v41 = vld [vmem:[#allocation4 + $0x1b8] sm:$0xff]  ;;  %v731_v44 = vld [vmem:[#allocation4 + $0xb0] sm:$0xff] }
  0xab   : > { %699 = vmatmul.mubr.f32.vlgmr.msra.gmra.mxu1 %v4183_v3  ;;  %3421 = vmatprep.subr.mxu0 %v740_v4  ;;  %v716_v42 = vld [vmem:[#allocation4 + $0x38] sm:$0xff]  ;;  %v763_v45 = vld [vmem:[#allocation4 + $0x1b0] sm:$0xff]  ;;  %v730_v48 = vld [vmem:[#allocation4 + $0xa8] sm:$0xff] }
  0xac   : > { %3459 = vmatprep.subr.mxu1 %v772_v5  ;;  %3422 = vmatpush3.msra.mxu0 %v724_v6  ;;  %v748_v43 = vld [vmem:[#allocation4 + $0x138] sm:$0xff]  ;;  %v715_v46 = vld [vmem:[#allocation4 + $0x30] sm:$0xff]  ;;  %v762_v49 = vld [vmem:[#allocation4 + $0x1a8] sm:$0xff] }
  0xad   : > { %3460 = vmatpush3.msra.mxu1 %v756_v7  ;;  %3423 = vmatprep.subr.mxu0 %v739_v8  ;;  %v747_v47 = vld [vmem:[#allocation4 + $0x130] sm:$0xff]  ;;  %v714_v50 = vld [vmem:[#allocation4 + $0x28] sm:$0xff]  ;;  %v729_v52 = vld [vmem:[#allocation4 + $0xa0] sm:$0xff] }
  0xae   : > { %3461 = vmatprep.subr.mxu1 %v771_v9  ;;  %628 = vmatprep.mubr.f32.mxu0 %v4190_v10  ;;  %v746_v51 = vld [vmem:[#allocation4 + $0x128] sm:$0xff]  ;;  %v761_v53 = vld [vmem:[#allocation4 + $0x1a0] sm:$0xff]  ;;  %v728_v56 = vld [vmem:[#allocation4 + $0x98] sm:$0xff] }
  0xaf   : > { %703 = vmatprep.mubr.f32.mxu1 %v4193_v11  ;;  %3424 = vmatpush3.msra.mxu0 %v723_v12  ;;  %v713_v54 = vld [vmem:[#allocation4 + $0x20] sm:$0xff]  ;;  %v760_v57 = vld [vmem:[#allocation4 + $0x198] sm:$0xff]  ;;  %v727_v60 = vld [vmem:[#allocation4 + $0x90] sm:$0xff] }
  0xb0   : > { %3462 = vmatpush3.msra.mxu1 %v755_v13  ;;  %629 = vmatmul.mubr.f32.gmra.mxu0 %v4196_v14  ;;  %v745_v55 = vld [vmem:[#allocation4 + $0x120] sm:$0xff]  ;;  %v712_v58 = vld [vmem:[#allocation4 + $0x18] sm:$0xff]  ;;  %v759_v61 = vld [vmem:[#allocation4 + $0x190] sm:$0xff] }
  0xb1   : > { %704 = vmatmul.mubr.f32.gmra.mxu1 %v4199_v15  ;;  %3425 = vmatprep.subr.mxu0 %v738_v16  ;;  %v744_v59 = vld [vmem:[#allocation4 + $0x118] sm:$0xff]  ;;  %v711_v62 = vld [vmem:[#allocation4 + $0x10] sm:$0xff]  ;;  %v726_v4 = vld [vmem:[#allocation4 + $0x88] sm:$0xff]  ;;  %v3953_v16 = vmov 0.0  }
  0xb2   : > { %3463 = vmatprep.subr.mxu1 %v770_v17  ;;  %3426 = vmatpush3.msra.mxu0 %v722_v18  ;;  %v743_v0 = vld [vmem:[#allocation4 + $0x110] sm:$0xff]  ;;  %v758_v5 = vld [vmem:[#allocation4 + $0x188] sm:$0xff]  ;;  %v725_v8 = vld [vmem:[#allocation4 + $0x80] sm:$0xff] }
  0xb3   : > { %3464 = vmatpush3.msra.mxu1 %v754_v19  ;;  %3427 = vmatprep.subr.mxu0 %v737_v20  ;;  %v710_v6 = vld [vmem:[#allocation4 + $0x8] sm:$0xff]  ;;  %v757_v9 = vld [vmem:[#allocation4 + $0x180] sm:$0xff] }
  0xb4   : > { %3465 = vmatprep.subr.mxu1 %v769_v21  ;;  %3428 = vmatpush3.msra.mxu0 %v721_v22  ;;  %v742_v7 = vld [vmem:[#allocation4 + $0x108] sm:$0xff]  ;;  %v709_v12 = vld [vmem:[#allocation4] sm:$0xff] }
  0xb5   : > { %3466 = vmatpush3.msra.mxu1 %v753_v23  ;;  %3429 = vmatprep.subr.mxu0 %v736_v24  ;;  %v741_v13 = vld [vmem:[#allocation4 + $0x100] sm:$0xff]  ;;  %v1381_v24 = vld [vmem:[#allocation9 + $0x2f8] sm:$0xff] }
  0xb6   : > { %3467 = vmatprep.subr.mxu1 %v768_v25  ;;  %3430 = vmatpush3.msra.mxu0 %v720_v26  ;;  %v4219_v23 = vld [vmem:[#allocation6] sm:$0xff]  ;;  %v4228_v26 = vld [vmem:[#allocation7] sm:$0xff] }
  0xb7   : > { %3468 = vmatpush3.msra.mxu1 %v752_v27  ;;  %3431 = vmatprep.subr.mxu0 %v735_v28  ;;  %v1380_v25 = vld [vmem:[#allocation9 + $0x2f0] sm:$0xff]  ;;  %v1379_v27 = vld [vmem:[#allocation9 + $0x2e8] sm:$0xff]  ;;  %v1378_v28 = vld [vmem:[#allocation9 + $0x2e0] sm:$0xff] }
  0xb8   : > { %3469 = vmatprep.subr.mxu1 %v767_v29  ;;  %3432 = vmatpush3.msra.mxu0 %v719_v30  ;;  %v1377_v29 = vld [vmem:[#allocation9 + $0x2d8] sm:$0xff]  ;;  %v1376_v30 = vld [vmem:[#allocation9 + $0x2d0] sm:$0xff] }
  0xb9   : > { %3470 = vmatpush3.msra.mxu1 %v751_v31  ;;  %3433 = vmatprep.subr.mxu0 %v734_v32  ;;  %v1375_v31 = vld [vmem:[#allocation9 + $0x2c8] sm:$0xff]  ;;  %v1374_v32 = vld [vmem:[#allocation9 + $0x2c0] sm:$0xff] }
  0xba   : > { %3471 = vmatprep.subr.mxu1 %v766_v33  ;;  %3434 = vmatpush3.msra.mxu0 %v718_v34  ;;  %v1373_v33 = vld [vmem:[#allocation9 + $0x2b8] sm:$0xff]  ;;  %v1372_v34 = vld [vmem:[#allocation9 + $0x2b0] sm:$0xff] }
  0xbb   : > { %3472 = vmatpush3.msra.mxu1 %v750_v35  ;;  %3435 = vmatprep.subr.mxu0 %v733_v36  ;;  %v1371_v35 = vld [vmem:[#allocation9 + $0x2a8] sm:$0xff]  ;;  %v1370_v36 = vld [vmem:[#allocation9 + $0x2a0] sm:$0xff] }
  0xbc   : > { %3473 = vmatprep.subr.mxu1 %v765_v37  ;;  %3436 = vmatpush3.msra.mxu0 %v717_v38  ;;  %v1369_v37 = vld [vmem:[#allocation9 + $0x298] sm:$0xff]  ;;  %v1368_v38 = vld [vmem:[#allocation9 + $0x290] sm:$0xff] }
  0xbd   : > { %3474 = vmatpush3.msra.mxu1 %v749_v39  ;;  %3437 = vmatprep.subr.mxu0 %v732_v40  ;;  %v1367_v39 = vld [vmem:[#allocation9 + $0x288] sm:$0xff]  ;;  %v1366_v40 = vld [vmem:[#allocation9 + $0x280] sm:$0xff] }
  0xbe   : > { %3475 = vmatprep.subr.mxu1 %v764_v41  ;;  %3438 = vmatpush3.msra.mxu0 %v716_v42  ;;  %v1365_v41 = vld [vmem:[#allocation9 + $0x278] sm:$0xff]  ;;  %v1364_v42 = vld [vmem:[#allocation9 + $0x270] sm:$0xff] }
  0xbf   : > { %3476 = vmatpush3.msra.mxu1 %v748_v43  ;;  %3439 = vmatprep.subr.mxu0 %v731_v44  ;;  %v1363_v43 = vld [vmem:[#allocation9 + $0x268] sm:$0xff] }
  0xc0   : > { %3477 = vmatprep.subr.mxu1 %v763_v45  ;;  %3440 = vmatpush3.msra.mxu0 %v715_v46  ;;  %v1362_v46 = vld [vmem:[#allocation9 + $0x260] sm:$0xff] }
  0xc1   : > { %3478 = vmatpush3.msra.mxu1 %v747_v47  ;;  %3441 = vmatprep.subr.mxu0 %v730_v48  ;;  %v1361_v47 = vld [vmem:[#allocation9 + $0x258] sm:$0xff] }
  0xc2   : > { %3479 = vmatprep.subr.mxu1 %v762_v49  ;;  %3442 = vmatpush3.msra.mxu0 %v714_v50  ;;  %v1360_v50 = vld [vmem:[#allocation9 + $0x250] sm:$0xff] }
  0xc3   : > { %3480 = vmatpush3.msra.mxu1 %v746_v51  ;;  %3443 = vmatprep.subr.mxu0 %v729_v52  ;;  %v1359_v51 = vld [vmem:[#allocation9 + $0x248] sm:$0xff] }
  0xc4   : > { %3481 = vmatprep.subr.mxu1 %v761_v53  ;;  %3444 = vmatpush3.msra.mxu0 %v713_v54  ;;  %v1358_v54 = vld [vmem:[#allocation9 + $0x240] sm:$0xff] }
  0xc5   : > { %3482 = vmatpush3.msra.mxu1 %v745_v55  ;;  %3445 = vmatprep.subr.mxu0 %v728_v56 }
  0xc6   : > { %3483 = vmatprep.subr.mxu1 %v760_v57  ;;  %3446 = vmatpush3.msra.mxu0 %v712_v58  ;;  %v1357_v57 = vld [vmem:[#allocation9 + $0x238] sm:$0xff] }
  0xc7   : > { %3484 = vmatpush3.msra.mxu1 %v744_v59  ;;  %3447 = vmatprep.subr.mxu0 %v727_v60  ;;  %v1356_v60 = vld [vmem:[#allocation9 + $0x230] sm:$0xff] }
  0xc8   : > { %3485 = vmatprep.subr.mxu1 %v759_v61  ;;  %3448 = vmatpush3.msra.mxu0 %v711_v62 }
  0xc9   : > { %3486 = vmatpush3.msra.mxu1 %v743_v0  ;;  %3449 = vmatprep.subr.mxu0 %v726_v4  ;;  %v1355_v0 = vld [vmem:[#allocation9 + $0x228] sm:$0xff]  ;;  %v1354_v4 = vld [vmem:[#allocation9 + $0x220] sm:$0xff] }
  0xca   : > { %3487 = vmatprep.subr.mxu1 %v758_v5  ;;  %3450 = vmatpush3.msra.mxu0 %v710_v6 }
  0xcb   : > { %3488 = vmatpush3.msra.mxu1 %v742_v7  ;;  %3451 = vmatprep.subr.mxu0 %v725_v8  ;;  %v1353_v7 = vld [vmem:[#allocation9 + $0x218] sm:$0xff]  ;;  %v1352_v8 = vld [vmem:[#allocation9 + $0x210] sm:$0xff] }
  0xcc   : > { %3489 = vmatprep.subr.mxu1 %v757_v9  ;;  %3452 = vmatpush3.msra.mxu0 %v709_v12  ;;  %v1351_v12 = vld [vmem:[#allocation9 + $0x208] sm:$0xff] }
  0xcd   : > { %837 = vmatprep.mubr.f32.mxu0 %v4174_v63  ;;  %3490 = vmatpush3.msra.mxu1 %v741_v13  ;;  %v1350_v13 = vld [vmem:[#allocation9 + $0x200] sm:$0xff] }
  0xce   : > { %912 = vmatprep.mubr.f32.mxu1 %v4177_v1  ;;  %838 = vmatmul.mubr.f32.vlgmr.msra.gmra.mxu0 %v4180_v2 }
  0xcf   : > { %913 = vmatmul.mubr.f32.vlgmr.msra.gmra.mxu1 %v4183_v3  ;;  %842 = vmatprep.mubr.f32.mxu0 %v4190_v10 }
  0xd0   : > { %917 = vmatprep.mubr.f32.mxu1 %v4193_v11  ;;  %3528 = vmatprep.subr.mxu1 %v3953_v16 }
  0xd1   : > { %3521 = vmatprep.subr.mxu0 %v3953_v16 }
  0xd2   : > { %843 = vmatmul.mubr.f32.gmra.mxu0 %v4196_v14 }
  0xd3   : > { %918 = vmatmul.mubr.f32.gmra.mxu1 %v4199_v15  ;;  %3525 = vmatprep.mubr.msk.f32.mxu0 %vm3954_vm0, %v3953_v16 }
  0xd4   : > { %3532 = vmatprep.mubr.msk.f32.mxu1 %vm3954_vm0, %v3953_v16 }
 0x16a   : > { %v3377_v63 = vpop.f32.mrf.mxu0 }
 0x16b   : > { %v3415_v1 = vpop.f32.mrf.mxu1 }
 0x16c   : > { %v3378_v2 = vpop.f32.mrf.mxu0 }
 0x16d   : > { %v3416_v3 = vpop.f32.mrf.mxu1  ;;  %v3379_v17 = vadd.f32 %v3378_v2, %v3377_v63  ;;  %v1412_v2 = vld [vmem:[#allocation9 + $0x3f0] sm:$0xff] }
 0x16e   : > { %v3417_v18 = vadd.f32 %v3416_v3, %v3415_v1  ;;  %v1413_v1 = vld [vmem:[#allocation9 + $0x3f8] sm:$0xff] }
 0x16f   : > { %v1246_v3 = vld [vmem:[#allocation9 + $0xf8] sm:$0xff] }
 0x170   : > { %v3380_v10 = vpop.f32.mrf.mxu0  ;;  %v701_v22 = vadd.f32 %v3417_v18, %v3379_v17  ;;  %v1243_v17 = vld [vmem:[#allocation9 + $0xe0] sm:$0xff]  ;;  %v1409_v18 = vld [vmem:[#allocation9 + $0x3d8] sm:$0xff] }
 0x171   : > { %v3418_v11 = vpop.f32.mrf.mxu1 }
 0x172   : > { %v3381_v14 = vpop.f32.mrf.mxu0 }
 0x173   : > { %v3419_v15 = vpop.f32.mrf.mxu1  ;;  %v3382_v19 = vadd.f32 %v3381_v14, %v3380_v10  ;;  %v1245_v10 = vld [vmem:[#allocation9 + $0xf0] sm:$0xff]  ;;  %v1244_v14 = vld [vmem:[#allocation9 + $0xe8] sm:$0xff] }
 0x174   : > { %v3420_v20 = vadd.f32 %v3419_v15, %v3418_v11  ;;  %v1411_v11 = vld [vmem:[#allocation9 + $0x3e8] sm:$0xff]  ;;  %v1410_v15 = vld [vmem:[#allocation9 + $0x3e0] sm:$0xff] }
 0x176   : > { %v706_v21 = vadd.f32 %v3420_v20, %v3382_v19  ;;  %v1242_v19 = vld [vmem:[#allocation9 + $0xd8] sm:$0xff]  ;;  %v1408_v20 = vld [vmem:[#allocation9 + $0x3d0] sm:$0xff] }
 0x178   : > { %3529 = vmatpush3.msra.mxu1 %v706_v21 }
 0x179   : > { %3530 = vmatprep.subr.mxu1 %v3953_v16 }
 0x17a   : > { %3531 = vmatpush3.msra.mxu1 %v701_v22 }
 0x17b   : > { %3542 = vmatprep.subr.mxu1 %v3953_v16  ;;  %3533 = vmatmul.mubr.msk.f32.vlgmr.msra.gmra.mxu1 %vm927_vm1, %v4219_v23 }
 0x17c   : > { %3543 = vmatpush3.msra.mxu1 %v706_v21  ;;  %3546 = vmatprep.mubr.msk.f32.mxu1 %vm3954_vm0, %v3953_v16  ;;  %v1241_v21 = vld [vmem:[#allocation9 + $0xd0] sm:$0xff] }
 0x17d   : > { %3544 = vmatprep.subr.mxu1 %v3953_v16 }
 0x17e   : > { %3545 = vmatpush3.msra.mxu1 %v701_v22  ;;  %v1407_v22 = vld [vmem:[#allocation9 + $0x3c8] sm:$0xff] }
 0x17f   : > { %3547 = vmatmul.mubr.msk.f32.vlgmr.msra.gmra.mxu1 %vm927_vm1, %v4228_v26  ;;  %1420 = vmatprep.subr.mxu1 %v1381_v24  ;;  %v1240_v24 = vld [vmem:[#allocation9 + $0xc8] sm:$0xff] }
 0x180   : > { %1421 = vmatpush1.msra.mxu1 %v1380_v25  ;;  %v1406_v25 = vld [vmem:[#allocation9 + $0x3c0] sm:$0xff] }
 0x181   : > { %1422 = vmatprep.subr.mxu1 %v1379_v27  ;;  %v1405_v27 = vld [vmem:[#allocation9 + $0x3b8] sm:$0xff] }
 0x182   : > { %1423 = vmatpush1.msra.mxu1 %v1378_v28  ;;  %v1404_v28 = vld [vmem:[#allocation9 + $0x3b0] sm:$0xff] }
 0x183   : > { %1424 = vmatprep.subr.mxu1 %v1377_v29  ;;  %v1237_v29 = vld [vmem:[#allocation9 + $0xb0] sm:$0xff] }
 0x184   : > { %1425 = vmatpush1.msra.mxu1 %v1376_v30  ;;  %v1403_v30 = vld [vmem:[#allocation9 + $0x3a8] sm:$0xff] }
 0x185   : > { %1426 = vmatprep.subr.mxu1 %v1375_v31  ;;  %v1236_v31 = vld [vmem:[#allocation9 + $0xa8] sm:$0xff] }
 0x186   : > { %1427 = vmatpush1.msra.mxu1 %v1374_v32  ;;  %v1402_v32 = vld [vmem:[#allocation9 + $0x3a0] sm:$0xff] }
 0x187   : > { %1428 = vmatprep.subr.mxu1 %v1373_v33  ;;  %v1235_v33 = vld [vmem:[#allocation9 + $0xa0] sm:$0xff] }
 0x188   : > { %1429 = vmatpush1.msra.mxu1 %v1372_v34  ;;  %v1401_v34 = vld [vmem:[#allocation9 + $0x398] sm:$0xff] }
 0x189   : > { %1430 = vmatprep.subr.mxu1 %v1371_v35  ;;  %v1234_v35 = vld [vmem:[#allocation9 + $0x98] sm:$0xff] }
 0x18a   : > { %1431 = vmatpush1.msra.mxu1 %v1370_v36  ;;  %v1400_v36 = vld [vmem:[#allocation9 + $0x390] sm:$0xff] }
 0x18b   : > { %1432 = vmatprep.subr.mxu1 %v1369_v37  ;;  %v1233_v37 = vld [vmem:[#allocation9 + $0x90] sm:$0xff] }
 0x18c   : > { %1433 = vmatpush1.msra.mxu1 %v1368_v38  ;;  %v1399_v38 = vld [vmem:[#allocation9 + $0x388] sm:$0xff] }
 0x18d   : > { %1434 = vmatprep.subr.mxu1 %v1367_v39  ;;  %v1232_v39 = vld [vmem:[#allocation9 + $0x88] sm:$0xff] }
 0x18e   : > { %1435 = vmatpush1.msra.mxu1 %v1366_v40  ;;  %v3453_v44 = vpop.f32.mrf.mxu0  ;;  %v1398_v40 = vld [vmem:[#allocation9 + $0x380] sm:$0xff] }
 0x18f   : > { %v3491_v45 = vpop.f32.mrf.mxu1  ;;  %1436 = vmatprep.subr.mxu1 %v1365_v41  ;;  %v1231_v41 = vld [vmem:[#allocation9 + $0x80] sm:$0xff] }
 0x190   : > { %1437 = vmatpush1.msra.mxu1 %v1364_v42  ;;  %v3454_v48 = vpop.f32.mrf.mxu0  ;;  %v1397_v42 = vld [vmem:[#allocation9 + $0x378] sm:$0xff] }
 0x191   : > { %v3492_v49 = vpop.f32.mrf.mxu1  ;;  %1438 = vmatprep.subr.mxu1 %v1363_v43  ;;  %v3455_v55 = vadd.f32 %v3454_v48, %v3453_v44  ;;  %v1230_v43 = vld [vmem:[#allocation9 + $0x78] sm:$0xff]  ;;  %v1396_v44 = vld [vmem:[#allocation9 + $0x370] sm:$0xff]  ;;  %v1394_v48 = vld [vmem:[#allocation9 + $0x360] sm:$0xff] }
 0x192   : > { %1439 = vmatpush1.msra.mxu1 %v1362_v46  ;;  %v3456_v52 = vpop.f32.mrf.mxu0  ;;  %v3493_v56 = vadd.f32 %v3492_v49, %v3491_v45  ;;  %v1229_v45 = vld [vmem:[#allocation9 + $0x70] sm:$0xff]  ;;  %v1395_v46 = vld [vmem:[#allocation9 + $0x368] sm:$0xff]  ;;  %v1227_v49 = vld [vmem:[#allocation9 + $0x60] sm:$0xff] }
 0x193   : > { %v3494_v53 = vpop.f32.mrf.mxu1  ;;  %1440 = vmatprep.subr.mxu1 %v1361_v47  ;;  %v1228_v47 = vld [vmem:[#allocation9 + $0x68] sm:$0xff] }
 0x194   : > { %1441 = vmatpush1.msra.mxu1 %v1360_v50  ;;  %v3457_v58 = vpop.f32.mrf.mxu0  ;;  %v915_v5 = vadd.f32 %v3493_v56, %v3455_v55  ;;  %v1393_v50 = vld [vmem:[#allocation9 + $0x358] sm:$0xff]  ;;  %v1224_v55 = vld [vmem:[#allocation9 + $0x48] sm:$0xff]  ;;  %v1223_v56 = vld [vmem:[#allocation9 + $0x40] sm:$0xff] }
 0x195   : > { %v3495_v59 = vpop.f32.mrf.mxu1  ;;  %1442 = vmatprep.subr.mxu1 %v1359_v51  ;;  %v3458_v61 = vadd.f32 %v3457_v58, %v3456_v52  ;;  %v1226_v51 = vld [vmem:[#allocation9 + $0x58] sm:$0xff]  ;;  %v1392_v52 = vld [vmem:[#allocation9 + $0x350] sm:$0xff] }
 0x196   : > { %v3496_v62 = vadd.f32 %v3495_v59, %v3494_v53  ;;  %1443 = vmatpush1.msra.mxu1 %v1358_v54  ;;  %v923_v63 = vsub.f32 0.0, %v915_v5  ;;  %v1225_v53 = vld [vmem:[#allocation9 + $0x50] sm:$0xff]  ;;  %v1391_v54 = vld [vmem:[#allocation9 + $0x348] sm:$0xff]  ;;  %v1278_v5 = vld [vmem:[#allocation9 + $0x1f8] sm:$0xff] }
 0x197   : > { %1444 = vmatprep.subr.mxu1 %v1357_v57  ;;  %v1222_v57 = vld [vmem:[#allocation9 + $0x38] sm:$0xff]  ;;  %v1221_v58 = vld [vmem:[#allocation9 + $0x30] sm:$0xff]  ;;  %v1220_v59 = vld [vmem:[#allocation9 + $0x28] sm:$0xff] }
 0x198   : > { %v920_v6 = vadd.f32 %v3496_v62, %v3458_v61  ;;  %1445 = vmatpush1.msra.mxu1 %v1356_v60  ;;  %v1219_v60 = vld [vmem:[#allocation9 + $0x20] sm:$0xff]  ;;  %v1218_v61 = vld [vmem:[#allocation9 + $0x18] sm:$0xff]  ;;  %v1217_v62 = vld [vmem:[#allocation9 + $0x10] sm:$0xff] }
 0x199   : > { %1446 = vmatprep.subr.mxu1 %v1355_v0  ;;  %v1216_v0 = vld [vmem:[#allocation9 + $0x8] sm:$0xff] }
 0x19a   : > { %v924_v9 = vsub.f32 0.0, %v920_v6  ;;  %1447 = vmatpush1.msra.mxu1 %v1354_v4  ;;  %v1215_v4 = vld [vmem:[#allocation9] sm:$0xff]  ;;  %v1277_v6 = vld [vmem:[#allocation9 + $0x1f0] sm:$0xff] }
 0x19b   : > { %1448 = vmatprep.subr.mxu1 %v1353_v7  ;;  %v1276_v7 = vld [vmem:[#allocation9 + $0x1e8] sm:$0xff] }
 0x19c   : > { %3522 = vmatpush3.msra.mxu0 %v924_v9  ;;  %1449 = vmatpush1.msra.mxu1 %v1352_v8  ;;  %v1275_v8 = vld [vmem:[#allocation9 + $0x1e0] sm:$0xff] }
 0x19d   : > { %3523 = vmatprep.subr.mxu0 %v3953_v16  ;;  %1450 = vmatprep.subr.mxu1 %v1351_v12  ;;  %v1273_v12 = vld [vmem:[#allocation9 + $0x1d0] sm:$0xff] }
 0x19e   : > { %3524 = vmatpush3.msra.mxu0 %v923_v63  ;;  %1451 = vmatpush1.msra.mxu1 %v1350_v13  ;;  %v1272_v13 = vld [vmem:[#allocation9 + $0x1c8] sm:$0xff] }
 0x19f   : > { %3526 = vmatmul.mubr.msk.f32.vlgmr.msra.gmra.mxu0 %vm927_vm1, %v4228_v26  ;;  %3535 = vmatprep.subr.mxu0 %v3953_v16  ;;  %v1239_v26 = vld [vmem:[#allocation9 + $0xc0] sm:$0xff] }
 0x1a0   : > { %3536 = vmatpush3.msra.mxu0 %v924_v9  ;;  %3539 = vmatprep.mubr.msk.f32.mxu0 %vm3954_vm0, %v3953_v16  ;;  %v1274_v9 = vld [vmem:[#allocation9 + $0x1d8] sm:$0xff] }
 0x1a1   : > { %3537 = vmatprep.subr.mxu0 %v3953_v16  ;;  %1452 = vmatprep.subr.mxu1 %v1413_v1  ;;  %v1270_v1 = vld [vmem:[#allocation9 + $0x1b8] sm:$0xff] }
 0x1a2   : > { %3538 = vmatpush3.msra.mxu0 %v923_v63  ;;  %1453 = vmatpush2.msra.mxu1 %v1412_v2  ;;  %v1271_v63 = vld [vmem:[#allocation9 + $0x1c0] sm:$0xff]  ;;  %v1269_v2 = vld [vmem:[#allocation9 + $0x1b0] sm:$0xff] }
 0x1a3   : > { %3540 = vmatmul.mubr.msk.f32.vlgmr.msra.gmra.mxu0 %vm927_vm1, %v4219_v23  ;;  %1279 = vmatprep.subr.mxu0 %v1246_v3  ;;  %v1238_v23 = vld [vmem:[#allocation9 + $0xb8] sm:$0xff]  ;;  %v1268_v3 = vld [vmem:[#allocation9 + $0x1a8] sm:$0xff] }
 0x1a4   : > { %1280 = vmatpush1.msra.mxu0 %v1245_v10  ;;  %1454 = vmatprep.subr.mxu1 %v1411_v11  ;;  %v1267_v10 = vld [vmem:[#allocation9 + $0x1a0] sm:$0xff]  ;;  %v1266_v11 = vld [vmem:[#allocation9 + $0x198] sm:$0xff] }
 0x1a5   : > { %1281 = vmatprep.subr.mxu0 %v1244_v14  ;;  %1455 = vmatpush2.msra.mxu1 %v1410_v15  ;;  %v1265_v14 = vld [vmem:[#allocation9 + $0x190] sm:$0xff]  ;;  %v1264_v15 = vld [vmem:[#allocation9 + $0x188] sm:$0xff] }
 0x1a6   : > { %1282 = vmatpush1.msra.mxu0 %v1243_v17  ;;  %1456 = vmatprep.subr.mxu1 %v1409_v18  ;;  %v1263_v17 = vld [vmem:[#allocation9 + $0x180] sm:$0xff]  ;;  %v1262_v18 = vld [vmem:[#allocation9 + $0x178] sm:$0xff] }
 0x1a7   : > { %1283 = vmatprep.subr.mxu0 %v1242_v19  ;;  %1457 = vmatpush2.msra.mxu1 %v1408_v20  ;;  %v1261_v19 = vld [vmem:[#allocation9 + $0x170] sm:$0xff]  ;;  %v1260_v20 = vld [vmem:[#allocation9 + $0x168] sm:$0xff] }
 0x1a8   : > { %1284 = vmatpush1.msra.mxu0 %v1241_v21  ;;  %1458 = vmatprep.subr.mxu1 %v1407_v22  ;;  %v1259_v21 = vld [vmem:[#allocation9 + $0x160] sm:$0xff]  ;;  %v1258_v22 = vld [vmem:[#allocation9 + $0x158] sm:$0xff] }
 0x1a9   : > { %1285 = vmatprep.subr.mxu0 %v1240_v24  ;;  %1459 = vmatpush2.msra.mxu1 %v1406_v25  ;;  %v1257_v24 = vld [vmem:[#allocation9 + $0x150] sm:$0xff]  ;;  %v1256_v25 = vld [vmem:[#allocation9 + $0x148] sm:$0xff] }
 0x1aa   : > { %1286 = vmatpush1.msra.mxu0 %v1239_v26  ;;  %1460 = vmatprep.subr.mxu1 %v1405_v27  ;;  %v1255_v26 = vld [vmem:[#allocation9 + $0x140] sm:$0xff]  ;;  %v1254_v27 = vld [vmem:[#allocation9 + $0x138] sm:$0xff] }
 0x1ab   : > { %1287 = vmatprep.subr.mxu0 %v1238_v23  ;;  %1461 = vmatpush2.msra.mxu1 %v1404_v28  ;;  %v1253_v23 = vld [vmem:[#allocation9 + $0x130] sm:$0xff]  ;;  %v1390_v28 = vld [vmem:[#allocation9 + $0x340] sm:$0xff] }
 0x1ac   : > { %1288 = vmatpush1.msra.mxu0 %v1237_v29  ;;  %1462 = vmatprep.subr.mxu1 %v1403_v30  ;;  %v1252_v29 = vld [vmem:[#allocation9 + $0x128] sm:$0xff]  ;;  %v1389_v30 = vld [vmem:[#allocation9 + $0x338] sm:$0xff] }
 0x1ad   : > { %1289 = vmatprep.subr.mxu0 %v1236_v31  ;;  %1463 = vmatpush2.msra.mxu1 %v1402_v32  ;;  %v1251_v31 = vld [vmem:[#allocation9 + $0x120] sm:$0xff]  ;;  %v1388_v32 = vld [vmem:[#allocation9 + $0x330] sm:$0xff] }
 0x1ae   : > { %1290 = vmatpush1.msra.mxu0 %v1235_v33  ;;  %1464 = vmatprep.subr.mxu1 %v1401_v34  ;;  %v1250_v33 = vld [vmem:[#allocation9 + $0x118] sm:$0xff]  ;;  %v1387_v34 = vld [vmem:[#allocation9 + $0x328] sm:$0xff] }
 0x1af   : > { %1291 = vmatprep.subr.mxu0 %v1234_v35  ;;  %1465 = vmatpush2.msra.mxu1 %v1400_v36  ;;  %v1249_v35 = vld [vmem:[#allocation9 + $0x110] sm:$0xff]  ;;  %v1386_v36 = vld [vmem:[#allocation9 + $0x320] sm:$0xff] }
 0x1b0   : > { %1292 = vmatpush1.msra.mxu0 %v1233_v37  ;;  %1466 = vmatprep.subr.mxu1 %v1399_v38  ;;  %v1248_v37 = vld [vmem:[#allocation9 + $0x108] sm:$0xff]  ;;  %v1385_v38 = vld [vmem:[#allocation9 + $0x318] sm:$0xff] }
 0x1b1   : > { %1293 = vmatprep.subr.mxu0 %v1232_v39  ;;  %1467 = vmatpush2.msra.mxu1 %v1398_v40  ;;  %v1247_v39 = vld [vmem:[#allocation9 + $0x100] sm:$0xff]  ;;  %v1384_v40 = vld [vmem:[#allocation9 + $0x310] sm:$0xff] }
 0x1b2   : > { %1294 = vmatpush1.msra.mxu0 %v1231_v41  ;;  %1468 = vmatprep.subr.mxu1 %v1397_v42  ;;  %v1383_v41 = vld [vmem:[#allocation9 + $0x308] sm:$0xff]  ;;  %v1522_v42 = vld [vmem:[#allocation9 + $0x4f8] sm:$0xff] }
 0x1b3   : > { %1295 = vmatprep.subr.mxu0 %v1230_v43  ;;  %1469 = vmatpush2.msra.mxu1 %v1396_v44  ;;  %v1382_v43 = vld [vmem:[#allocation9 + $0x300] sm:$0xff]  ;;  %v1661_v44 = vld [vmem:[#allocation9 + $0x6f8] sm:$0xff] }
 0x1b4   : > { %1296 = vmatpush1.msra.mxu0 %v1229_v45  ;;  %1470 = vmatprep.subr.mxu1 %v1395_v46 }
 0x1b5   : > { %1297 = vmatprep.subr.mxu0 %v1228_v47  ;;  %1471 = vmatpush2.msra.mxu1 %v1394_v48 }
 0x1b6   : > { %1298 = vmatpush1.msra.mxu0 %v1227_v49  ;;  %1472 = vmatprep.subr.mxu1 %v1393_v50 }
 0x1b7   : > { %1299 = vmatprep.subr.mxu0 %v1226_v51  ;;  %1473 = vmatpush2.msra.mxu1 %v1392_v52 }
 0x1b8   : > { %1300 = vmatpush1.msra.mxu0 %v1225_v53  ;;  %1474 = vmatprep.subr.mxu1 %v1391_v54 }
 0x1b9   : > { %1301 = vmatprep.subr.mxu0 %v1224_v55  ;;  %1475 = vmatpush2.msra.mxu1 %v1390_v28  ;;  %v1521_v55 = vld [vmem:[#allocation9 + $0x4f0] sm:$0xff]  ;;  %v1504_v28 = vld [vmem:[#allocation9 + $0x468] sm:$0xff] }
 0x1ba   : > { %1302 = vmatpush1.msra.mxu0 %v1223_v56  ;;  %1476 = vmatprep.subr.mxu1 %v1389_v30  ;;  %v1503_v30 = vld [vmem:[#allocation9 + $0x460] sm:$0xff] }
 0x1bb   : > { %1303 = vmatprep.subr.mxu0 %v1222_v57  ;;  %1477 = vmatpush2.msra.mxu1 %v1388_v32  ;;  %v1520_v57 = vld [vmem:[#allocation9 + $0x4e8] sm:$0xff]  ;;  %v1502_v32 = vld [vmem:[#allocation9 + $0x458] sm:$0xff] }
 0x1bc   : > { %1304 = vmatpush1.msra.mxu0 %v1221_v58  ;;  %1478 = vmatprep.subr.mxu1 %v1387_v34  ;;  %v1501_v34 = vld [vmem:[#allocation9 + $0x450] sm:$0xff] }
 0x1bd   : > { %1305 = vmatprep.subr.mxu0 %v1220_v59  ;;  %1479 = vmatpush2.msra.mxu1 %v1386_v36  ;;  %v1519_v59 = vld [vmem:[#allocation9 + $0x4e0] sm:$0xff]  ;;  %v1500_v36 = vld [vmem:[#allocation9 + $0x448] sm:$0xff] }
 0x1be   : > { %1306 = vmatpush1.msra.mxu0 %v1219_v60  ;;  %1480 = vmatprep.subr.mxu1 %v1385_v38  ;;  %v1660_v60 = vld [vmem:[#allocation9 + $0x6f0] sm:$0xff]  ;;  %v1499_v38 = vld [vmem:[#allocation9 + $0x440] sm:$0xff] }
 0x1bf   : > { %1307 = vmatprep.subr.mxu0 %v1218_v61  ;;  %1481 = vmatpush2.msra.mxu1 %v1384_v40  ;;  %v1498_v40 = vld [vmem:[#allocation9 + $0x438] sm:$0xff] }
 0x1c0   : > { %1308 = vmatpush1.msra.mxu0 %v1217_v62  ;;  %1482 = vmatprep.subr.mxu1 %v1383_v41  ;;  %v1518_v62 = vld [vmem:[#allocation9 + $0x4d8] sm:$0xff]  ;;  %v1639_v41 = vld [vmem:[#allocation9 + $0x648] sm:$0xff] }
 0x1c1   : > { %1309 = vmatprep.subr.mxu0 %v1216_v0  ;;  %1483 = vmatpush2.msra.mxu1 %v1382_v43  ;;  %v1659_v0 = vld [vmem:[#allocation9 + $0x6e8] sm:$0xff]  ;;  %v1638_v43 = vld [vmem:[#allocation9 + $0x640] sm:$0xff] }
 0x1c2   : > { %1310 = vmatpush1.msra.mxu0 %v1215_v4  ;;  %1698 = vmatprep.subr.mxu1 %v1661_v44  ;;  %v1496_v44 = vld [vmem:[#allocation9 + $0x428] sm:$0xff] }
 0x1c3   : > { %1311 = vmatprep.subr.mxu0 %v1278_v5  ;;  %v1517_v5 = vld [vmem:[#allocation9 + $0x4d0] sm:$0xff] }
 0x1c4   : > { %1312 = vmatpush2.msra.mxu0 %v1277_v6  ;;  %v1658_v6 = vld [vmem:[#allocation9 + $0x6e0] sm:$0xff] }
 0x1c5   : > { %1313 = vmatprep.subr.mxu0 %v1276_v7  ;;  %v1516_v7 = vld [vmem:[#allocation9 + $0x4c8] sm:$0xff] }
 0x1c6   : > { %1314 = vmatpush2.msra.mxu0 %v1275_v8  ;;  %v1657_v8 = vld [vmem:[#allocation9 + $0x6d8] sm:$0xff] }
 0x1c7   : > { %1315 = vmatprep.subr.mxu0 %v1274_v9  ;;  %v1515_v9 = vld [vmem:[#allocation9 + $0x4c0] sm:$0xff] }
 0x1c8   : > { %1316 = vmatpush2.msra.mxu0 %v1273_v12  ;;  %v1656_v12 = vld [vmem:[#allocation9 + $0x6d0] sm:$0xff] }
 0x1c9   : > { %1317 = vmatprep.subr.mxu0 %v1272_v13  ;;  %v1514_v13 = vld [vmem:[#allocation9 + $0x4b8] sm:$0xff] }
 0x1ca   : > { %1318 = vmatpush2.msra.mxu0 %v1271_v63  ;;  %v1655_v63 = vld [vmem:[#allocation9 + $0x6c8] sm:$0xff] }
 0x1cb   : > { %1319 = vmatprep.subr.mxu0 %v1270_v1  ;;  %v1513_v1 = vld [vmem:[#allocation9 + $0x4b0] sm:$0xff] }
 0x1cc   : > { %1320 = vmatpush2.msra.mxu0 %v1269_v2  ;;  %v1654_v2 = vld [vmem:[#allocation9 + $0x6c0] sm:$0xff] }
 0x1cd   : > { %1321 = vmatprep.subr.mxu0 %v1268_v3  ;;  %v1512_v3 = vld [vmem:[#allocation9 + $0x4a8] sm:$0xff] }
 0x1ce   : > { %1322 = vmatpush2.msra.mxu0 %v1267_v10  ;;  %v1653_v10 = vld [vmem:[#allocation9 + $0x6b8] sm:$0xff] }
 0x1cf   : > { %1323 = vmatprep.subr.mxu0 %v1266_v11  ;;  %v1511_v11 = vld [vmem:[#allocation9 + $0x4a0] sm:$0xff] }
 0x1d0   : > { %1324 = vmatpush2.msra.mxu0 %v1265_v14  ;;  %v1652_v14 = vld [vmem:[#allocation9 + $0x6b0] sm:$0xff] }
 0x1d1   : > { %1325 = vmatprep.subr.mxu0 %v1264_v15  ;;  %v1510_v15 = vld [vmem:[#allocation9 + $0x498] sm:$0xff] }
 0x1d2   : > { %1326 = vmatpush2.msra.mxu0 %v1263_v17  ;;  %v1651_v17 = vld [vmem:[#allocation9 + $0x6a8] sm:$0xff] }
 0x1d3   : > { %1327 = vmatprep.subr.mxu0 %v1262_v18  ;;  %v1509_v18 = vld [vmem:[#allocation9 + $0x490] sm:$0xff] }
 0x1d4   : > { %1328 = vmatpush2.msra.mxu0 %v1261_v19  ;;  %v1650_v19 = vld [vmem:[#allocation9 + $0x6a0] sm:$0xff] }
 0x1d5   : > { %1329 = vmatprep.subr.mxu0 %v1260_v20  ;;  %v1508_v20 = vld [vmem:[#allocation9 + $0x488] sm:$0xff] }
 0x1d6   : > { %1330 = vmatpush2.msra.mxu0 %v1259_v21  ;;  %v1649_v21 = vld [vmem:[#allocation9 + $0x698] sm:$0xff] }
 0x1d7   : > { %1331 = vmatprep.subr.mxu0 %v1258_v22  ;;  %v1507_v22 = vld [vmem:[#allocation9 + $0x480] sm:$0xff] }
 0x1d8   : > { %1332 = vmatpush2.msra.mxu0 %v1257_v24  ;;  %v1648_v24 = vld [vmem:[#allocation9 + $0x690] sm:$0xff] }
 0x1d9   : > { %1333 = vmatprep.subr.mxu0 %v1256_v25  ;;  %v1506_v25 = vld [vmem:[#allocation9 + $0x478] sm:$0xff] }
 0x1da   : > { %1334 = vmatpush2.msra.mxu0 %v1255_v26  ;;  %v1647_v26 = vld [vmem:[#allocation9 + $0x688] sm:$0xff] }
 0x1db   : > { %1335 = vmatprep.subr.mxu0 %v1254_v27  ;;  %v1505_v27 = vld [vmem:[#allocation9 + $0x470] sm:$0xff] }
 0x1dc   : > { %1336 = vmatpush2.msra.mxu0 %v1253_v23  ;;  %v1646_v23 = vld [vmem:[#allocation9 + $0x680] sm:$0xff] }
 0x1dd   : > { %1337 = vmatprep.subr.mxu0 %v1252_v29  ;;  %v1645_v29 = vld [vmem:[#allocation9 + $0x678] sm:$0xff] }
 0x1de   : > { %1338 = vmatpush2.msra.mxu0 %v1251_v31  ;;  %v1644_v31 = vld [vmem:[#allocation9 + $0x670] sm:$0xff] }
 0x1df   : > { %1339 = vmatprep.subr.mxu0 %v1250_v33  ;;  %v1643_v33 = vld [vmem:[#allocation9 + $0x668] sm:$0xff] }
 0x1e0   : > { %1340 = vmatpush2.msra.mxu0 %v1249_v35  ;;  %v1642_v35 = vld [vmem:[#allocation9 + $0x660] sm:$0xff] }
 0x1e1   : > { %1341 = vmatprep.subr.mxu0 %v1248_v37  ;;  %v1641_v37 = vld [vmem:[#allocation9 + $0x658] sm:$0xff] }
 0x1e2   : > { %1342 = vmatpush2.msra.mxu0 %v1247_v39  ;;  %v1640_v39 = vld [vmem:[#allocation9 + $0x650] sm:$0xff] }
 0x1e3   : > { %1559 = vmatprep.subr.mxu0 %v1522_v42  ;;  %v1497_v42 = vld [vmem:[#allocation9 + $0x430] sm:$0xff] }
 0x23b   : > { %v1070_v45 = vpop.f32.mrf.mxu1 }
 0x23d   : > { %v3534_v46 = vpop.f32.mrf.mxu1 }
 0x23e   : > { %v1495_v46 = vld [vmem:[#allocation9 + $0x420] sm:$0xff] }
 0x23f   : > { %v1210_v47 = vpop.f32.mrf.mxu1 }
 0x241   : > { %v3548_v48 = vpop.f32.mrf.mxu1 }
 0x242   : > { %v1494_v48 = vld [vmem:[#allocation9 + $0x418] sm:$0xff] }
 0x25f   : > { %v997_v49 = vpop.f32.mrf.mxu0 }
 0x260   : > { %v4241_v51 = vadd.f32 %v1070_v45, %v997_v49  ;;  %v1637_v45 = vld [vmem:[#allocation9 + $0x638] sm:$0xff]  ;;  %v1635_v49 = vld [vmem:[#allocation9 + $0x628] sm:$0xff] }
 0x261   : > { %v3527_v50 = vpop.f32.mrf.mxu0 }
 0x262   : > { %v1416_v58 = vrot.slane %v4241_v51, 1  ;;  %v1493_v50 = vld [vmem:[#allocation9 + $0x410] sm:$0xff] }
 0x263   : > { %v1140_v52 = vpop.f32.mrf.mxu0 }
 0x264   : > { %v4243_v53 = vsub.f32 %v1140_v52, %v1210_v47  ;;  %v1636_v47 = vld [vmem:[#allocation9 + $0x630] sm:$0xff]  ;;  %v1634_v52 = vld [vmem:[#allocation9 + $0x620] sm:$0xff] }
 0x265   : > { %v3541_v54 = vpop.f32.mrf.mxu0 }
 0x266   : > { %1343 = vmatprep.mubr.f32.mxu0 %v4243_v53  ;;  %v1417_v56 = vrot.slane %v4243_v53, 1  ;;  %v1556_v61 = vrot.slane %v4243_v53, 2  ;;  %v1695_v4 = vrot.slane %v4243_v53, 3  ;;  %v1492_v54 = vld [vmem:[#allocation9 + $0x408] sm:$0xff] }
 0x267   : > { %1344 = vmatmul.mubr.f32.vlgmr.msra.gmra.mxu0 %v4241_v51 }
 0x268   : > { %1560 = vmatpush1.msra.mxu0 %v1521_v55  ;;  %1484 = vmatprep.mubr.f32.mxu1 %v1417_v56  ;;  %v1633_v55 = vld [vmem:[#allocation9 + $0x618] sm:$0xff]  ;;  %v1491_v56 = vld [vmem:[#allocation9 + $0x400] sm:$0xff] }
 0x269   : > { %1561 = vmatprep.subr.mxu0 %v1520_v57  ;;  %1485 = vmatmul.mubr.f32.vlgmr.msra.gmra.mxu1 %v1416_v58  ;;  %v1632_v57 = vld [vmem:[#allocation9 + $0x610] sm:$0xff]  ;;  %v1554_v58 = vld [vmem:[#allocation9 + $0x5f8] sm:$0xff] }
 0x26a   : > { %1562 = vmatpush1.msra.mxu0 %v1519_v59  ;;  %1699 = vmatpush1.msra.mxu1 %v1660_v60  ;;  %v1631_v59 = vld [vmem:[#allocation9 + $0x608] sm:$0xff]  ;;  %v1553_v60 = vld [vmem:[#allocation9 + $0x5f0] sm:$0xff] }
 0x26b   : > { %1563 = vmatprep.subr.mxu0 %v1518_v62  ;;  %1623 = vmatprep.mubr.f32.mxu0 %v1556_v61  ;;  %v1630_v61 = vld [vmem:[#allocation9 + $0x600] sm:$0xff]  ;;  %v1552_v62 = vld [vmem:[#allocation9 + $0x5e8] sm:$0xff] }
 0x26c   : > { %1700 = vmatprep.subr.mxu1 %v1659_v0  ;;  %1762 = vmatprep.mubr.f32.mxu1 %v1695_v4  ;;  %v1693_v0 = vld [vmem:[#allocation9 + $0x7f8] sm:$0xff]  ;;  %v1551_v4 = vld [vmem:[#allocation9 + $0x5e0] sm:$0xff] }
 0x26d   : > { %1564 = vmatpush1.msra.mxu0 %v1517_v5  ;;  %1701 = vmatpush1.msra.mxu1 %v1658_v6  ;;  %v1692_v5 = vld [vmem:[#allocation9 + $0x7f0] sm:$0xff]  ;;  %v1550_v6 = vld [vmem:[#allocation9 + $0x5d8] sm:$0xff] }
 0x26e   : > { %1565 = vmatprep.subr.mxu0 %v1516_v7  ;;  %1702 = vmatprep.subr.mxu1 %v1657_v8  ;;  %v1691_v7 = vld [vmem:[#allocation9 + $0x7e8] sm:$0xff]  ;;  %v1549_v8 = vld [vmem:[#allocation9 + $0x5d0] sm:$0xff] }
 0x26f   : > { %1566 = vmatpush1.msra.mxu0 %v1515_v9  ;;  %1703 = vmatpush1.msra.mxu1 %v1656_v12  ;;  %v1690_v9 = vld [vmem:[#allocation9 + $0x7e0] sm:$0xff]  ;;  %v1548_v12 = vld [vmem:[#allocation9 + $0x5c8] sm:$0xff] }
 0x270   : > { %1567 = vmatprep.subr.mxu0 %v1514_v13  ;;  %1704 = vmatprep.subr.mxu1 %v1655_v63  ;;  %v1689_v13 = vld [vmem:[#allocation9 + $0x7d8] sm:$0xff]  ;;  %v1547_v63 = vld [vmem:[#allocation9 + $0x5c0] sm:$0xff] }
 0x271   : > { %1568 = vmatpush1.msra.mxu0 %v1513_v1  ;;  %1705 = vmatpush1.msra.mxu1 %v1654_v2  ;;  %v1688_v1 = vld [vmem:[#allocation9 + $0x7d0] sm:$0xff]  ;;  %v1546_v2 = vld [vmem:[#allocation9 + $0x5b8] sm:$0xff] }
 0x272   : > { %1569 = vmatprep.subr.mxu0 %v1512_v3  ;;  %1706 = vmatprep.subr.mxu1 %v1653_v10  ;;  %v1687_v3 = vld [vmem:[#allocation9 + $0x7c8] sm:$0xff]  ;;  %v1545_v10 = vld [vmem:[#allocation9 + $0x5b0] sm:$0xff] }
 0x273   : > { %1570 = vmatpush1.msra.mxu0 %v1511_v11  ;;  %1707 = vmatpush1.msra.mxu1 %v1652_v14  ;;  %v1686_v11 = vld [vmem:[#allocation9 + $0x7c0] sm:$0xff]  ;;  %v1544_v14 = vld [vmem:[#allocation9 + $0x5a8] sm:$0xff] }
 0x274   : > { %1571 = vmatprep.subr.mxu0 %v1510_v15  ;;  %1708 = vmatprep.subr.mxu1 %v1651_v17  ;;  %v1685_v15 = vld [vmem:[#allocation9 + $0x7b8] sm:$0xff]  ;;  %v1543_v17 = vld [vmem:[#allocation9 + $0x5a0] sm:$0xff] }
 0x275   : > { %1572 = vmatpush1.msra.mxu0 %v1509_v18  ;;  %1709 = vmatpush1.msra.mxu1 %v1650_v19  ;;  %v1684_v18 = vld [vmem:[#allocation9 + $0x7b0] sm:$0xff]  ;;  %v1542_v19 = vld [vmem:[#allocation9 + $0x598] sm:$0xff] }
 0x276   : > { %1573 = vmatprep.subr.mxu0 %v1508_v20  ;;  %1710 = vmatprep.subr.mxu1 %v1649_v21  ;;  %v1683_v20 = vld [vmem:[#allocation9 + $0x7a8] sm:$0xff]  ;;  %v1541_v21 = vld [vmem:[#allocation9 + $0x590] sm:$0xff] }
 0x277   : > { %1574 = vmatpush1.msra.mxu0 %v1507_v22  ;;  %1711 = vmatpush1.msra.mxu1 %v1648_v24  ;;  %v1682_v22 = vld [vmem:[#allocation9 + $0x7a0] sm:$0xff]  ;;  %v1540_v24 = vld [vmem:[#allocation9 + $0x588] sm:$0xff] }
 0x278   : > { %1575 = vmatprep.subr.mxu0 %v1506_v25  ;;  %1712 = vmatprep.subr.mxu1 %v1647_v26  ;;  %v1681_v25 = vld [vmem:[#allocation9 + $0x798] sm:$0xff]  ;;  %v1539_v26 = vld [vmem:[#allocation9 + $0x580] sm:$0xff] }
 0x279   : > { %1576 = vmatpush1.msra.mxu0 %v1505_v27  ;;  %1713 = vmatpush1.msra.mxu1 %v1646_v23  ;;  %v1680_v27 = vld [vmem:[#allocation9 + $0x790] sm:$0xff]  ;;  %v1538_v23 = vld [vmem:[#allocation9 + $0x578] sm:$0xff] }
 0x27a   : > { %1577 = vmatprep.subr.mxu0 %v1504_v28  ;;  %1714 = vmatprep.subr.mxu1 %v1645_v29  ;;  %v1679_v28 = vld [vmem:[#allocation9 + $0x788] sm:$0xff]  ;;  %v1537_v29 = vld [vmem:[#allocation9 + $0x570] sm:$0xff] }
 0x27b   : > { %1578 = vmatpush1.msra.mxu0 %v1503_v30  ;;  %1715 = vmatpush1.msra.mxu1 %v1644_v31  ;;  %v1678_v30 = vld [vmem:[#allocation9 + $0x780] sm:$0xff]  ;;  %v1536_v31 = vld [vmem:[#allocation9 + $0x568] sm:$0xff] }
 0x27c   : > { %1579 = vmatprep.subr.mxu0 %v1502_v32  ;;  %1716 = vmatprep.subr.mxu1 %v1643_v33  ;;  %v1677_v32 = vld [vmem:[#allocation9 + $0x778] sm:$0xff]  ;;  %v1535_v33 = vld [vmem:[#allocation9 + $0x560] sm:$0xff] }
 0x27d   : > { %1580 = vmatpush1.msra.mxu0 %v1501_v34  ;;  %1717 = vmatpush1.msra.mxu1 %v1642_v35  ;;  %v1676_v34 = vld [vmem:[#allocation9 + $0x770] sm:$0xff]  ;;  %v1534_v35 = vld [vmem:[#allocation9 + $0x558] sm:$0xff] }
 0x27e   : > { %1581 = vmatprep.subr.mxu0 %v1500_v36  ;;  %1718 = vmatprep.subr.mxu1 %v1641_v37  ;;  %v1675_v36 = vld [vmem:[#allocation9 + $0x768] sm:$0xff]  ;;  %v1533_v37 = vld [vmem:[#allocation9 + $0x550] sm:$0xff] }
 0x27f   : > { %1582 = vmatpush1.msra.mxu0 %v1499_v38  ;;  %1719 = vmatpush1.msra.mxu1 %v1640_v39  ;;  %v1674_v38 = vld [vmem:[#allocation9 + $0x760] sm:$0xff]  ;;  %v1532_v39 = vld [vmem:[#allocation9 + $0x548] sm:$0xff] }
 0x280   : > { %1583 = vmatprep.subr.mxu0 %v1498_v40  ;;  %1720 = vmatprep.subr.mxu1 %v1639_v41  ;;  %v1673_v40 = vld [vmem:[#allocation9 + $0x758] sm:$0xff]  ;;  %v1531_v41 = vld [vmem:[#allocation9 + $0x540] sm:$0xff] }
 0x281   : > { %1584 = vmatpush1.msra.mxu0 %v1497_v42  ;;  %1721 = vmatpush1.msra.mxu1 %v1638_v43  ;;  %v1672_v42 = vld [vmem:[#allocation9 + $0x750] sm:$0xff]  ;;  %v1530_v43 = vld [vmem:[#allocation9 + $0x538] sm:$0xff] }
 0x282   : > { %1585 = vmatprep.subr.mxu0 %v1496_v44  ;;  %1722 = vmatprep.subr.mxu1 %v1637_v45  ;;  %v1671_v44 = vld [vmem:[#allocation9 + $0x748] sm:$0xff]  ;;  %v1529_v45 = vld [vmem:[#allocation9 + $0x530] sm:$0xff] }
 0x283   : > { %1586 = vmatpush1.msra.mxu0 %v1495_v46  ;;  %1723 = vmatpush1.msra.mxu1 %v1636_v47  ;;  %v1670_v46 = vld [vmem:[#allocation9 + $0x740] sm:$0xff]  ;;  %v1528_v47 = vld [vmem:[#allocation9 + $0x528] sm:$0xff] }
 0x284   : > { %1587 = vmatprep.subr.mxu0 %v1494_v48  ;;  %1724 = vmatprep.subr.mxu1 %v1635_v49  ;;  %v1669_v48 = vld [vmem:[#allocation9 + $0x738] sm:$0xff]  ;;  %v1527_v49 = vld [vmem:[#allocation9 + $0x520] sm:$0xff] }
 0x285   : > { %1588 = vmatpush1.msra.mxu0 %v1493_v50  ;;  %1725 = vmatpush1.msra.mxu1 %v1634_v52  ;;  %v1668_v50 = vld [vmem:[#allocation9 + $0x730] sm:$0xff]  ;;  %v1526_v52 = vld [vmem:[#allocation9 + $0x518] sm:$0xff] }
 0x286   : > { %1589 = vmatprep.subr.mxu0 %v1492_v54  ;;  %1726 = vmatprep.subr.mxu1 %v1633_v55  ;;  %v1667_v54 = vld [vmem:[#allocation9 + $0x728] sm:$0xff]  ;;  %v1525_v55 = vld [vmem:[#allocation9 + $0x510] sm:$0xff] }
 0x287   : > { %1590 = vmatpush1.msra.mxu0 %v1491_v56  ;;  %1727 = vmatpush1.msra.mxu1 %v1632_v57  ;;  %v1666_v56 = vld [vmem:[#allocation9 + $0x720] sm:$0xff]  ;;  %v1524_v57 = vld [vmem:[#allocation9 + $0x508] sm:$0xff] }
 0x288   : > { %1591 = vmatprep.subr.mxu0 %v1554_v58  ;;  %1728 = vmatprep.subr.mxu1 %v1631_v59  ;;  %v1665_v58 = vld [vmem:[#allocation9 + $0x718] sm:$0xff]  ;;  %v1523_v59 = vld [vmem:[#allocation9 + $0x500] sm:$0xff] }
 0x289   : > { %1592 = vmatpush2.msra.mxu0 %v1553_v60  ;;  %1729 = vmatpush1.msra.mxu1 %v1630_v61  ;;  %v1664_v60 = vld [vmem:[#allocation9 + $0x710] sm:$0xff]  ;;  %v1663_v61 = vld [vmem:[#allocation9 + $0x708] sm:$0xff] }
 0x28a   : > { %1593 = vmatprep.subr.mxu0 %v1552_v62  ;;  %1730 = vmatprep.subr.mxu1 %v1693_v0  ;;  %v1555_v62 = vrot.slane %v4241_v51, 2  ;;  %v1800_v0 = vld [vmem:[#allocation9 + $0x8f8] sm:$0xff] }
 0x28b   : > { %1594 = vmatpush2.msra.mxu0 %v1551_v4  ;;  %1731 = vmatpush2.msra.mxu1 %v1692_v5  ;;  %v1662_v4 = vld [vmem:[#allocation9 + $0x700] sm:$0xff]  ;;  %v1799_v5 = vld [vmem:[#allocation9 + $0x8f0] sm:$0xff] }
 0x28c   : > { %1595 = vmatprep.subr.mxu0 %v1550_v6  ;;  %1732 = vmatprep.subr.mxu1 %v1691_v7  ;;  %v1834_v6 = vrot.slane %v4243_v53, 4  ;;  %v1798_v7 = vld [vmem:[#allocation9 + $0x8e8] sm:$0xff] }
 0x28d   : > { %1596 = vmatpush2.msra.mxu0 %v1549_v8  ;;  %1733 = vmatpush2.msra.mxu1 %v1690_v9  ;;  %v1694_v8 = vrot.slane %v4241_v51, 3  ;;  %v1939_v9 = vld [vmem:[#allocation9 + $0xaf8] sm:$0xff] }
 0x28e   : > { %1597 = vmatprep.subr.mxu0 %v1548_v12  ;;  %1734 = vmatprep.subr.mxu1 %v1689_v13  ;;  %v1797_v12 = vld [vmem:[#allocation9 + $0x8e0] sm:$0xff]  ;;  %v1938_v13 = vld [vmem:[#allocation9 + $0xaf0] sm:$0xff] }
 0x28f   : > { %1598 = vmatpush2.msra.mxu0 %v1547_v63  ;;  %1735 = vmatpush2.msra.mxu1 %v1688_v1  ;;  %v1973_v63 = vrot.slane %v4243_v53, 5  ;;  %v1796_v1 = vld [vmem:[#allocation9 + $0x8d8] sm:$0xff] }
 0x290   : > { %1599 = vmatprep.subr.mxu0 %v1546_v2  ;;  %1736 = vmatprep.subr.mxu1 %v1687_v3  ;;  %v1937_v2 = vld [vmem:[#allocation9 + $0xae8] sm:$0xff]  ;;  %v1795_v3 = vld [vmem:[#allocation9 + $0x8d0] sm:$0xff] }
 0x291   : > { %1600 = vmatpush2.msra.mxu0 %v1545_v10  ;;  %1737 = vmatpush2.msra.mxu1 %v1686_v11  ;;  %v1936_v10 = vld [vmem:[#allocation9 + $0xae0] sm:$0xff]  ;;  %v1794_v11 = vld [vmem:[#allocation9 + $0x8c8] sm:$0xff] }
 0x292   : > { %1601 = vmatprep.subr.mxu0 %v1544_v14  ;;  %1738 = vmatprep.subr.mxu1 %v1685_v15  ;;  %v1935_v14 = vld [vmem:[#allocation9 + $0xad8] sm:$0xff]  ;;  %v1793_v15 = vld [vmem:[#allocation9 + $0x8c0] sm:$0xff] }
 0x293   : > { %1602 = vmatpush2.msra.mxu0 %v1543_v17  ;;  %1739 = vmatpush2.msra.mxu1 %v1684_v18  ;;  %v1934_v17 = vld [vmem:[#allocation9 + $0xad0] sm:$0xff]  ;;  %v1792_v18 = vld [vmem:[#allocation9 + $0x8b8] sm:$0xff] }
 0x294   : > { %1603 = vmatprep.subr.mxu0 %v1542_v19  ;;  %1740 = vmatprep.subr.mxu1 %v1683_v20  ;;  %v1933_v19 = vld [vmem:[#allocation9 + $0xac8] sm:$0xff]  ;;  %v1791_v20 = vld [vmem:[#allocation9 + $0x8b0] sm:$0xff] }
 0x295   : > { %1604 = vmatpush2.msra.mxu0 %v1541_v21  ;;  %1741 = vmatpush2.msra.mxu1 %v1682_v22  ;;  %v1932_v21 = vld [vmem:[#allocation9 + $0xac0] sm:$0xff]  ;;  %v1790_v22 = vld [vmem:[#allocation9 + $0x8a8] sm:$0xff] }
 0x296   : > { %1605 = vmatprep.subr.mxu0 %v1540_v24  ;;  %1742 = vmatprep.subr.mxu1 %v1681_v25  ;;  %v1931_v24 = vld [vmem:[#allocation9 + $0xab8] sm:$0xff]  ;;  %v1789_v25 = vld [vmem:[#allocation9 + $0x8a0] sm:$0xff] }
 0x297   : > { %1606 = vmatpush2.msra.mxu0 %v1539_v26  ;;  %1743 = vmatpush2.msra.mxu1 %v1680_v27  ;;  %v1930_v26 = vld [vmem:[#allocation9 + $0xab0] sm:$0xff]  ;;  %v1788_v27 = vld [vmem:[#allocation9 + $0x898] sm:$0xff] }
 0x298   : > { %1607 = vmatprep.subr.mxu0 %v1538_v23  ;;  %1744 = vmatprep.subr.mxu1 %v1679_v28  ;;  %v1929_v23 = vld [vmem:[#allocation9 + $0xaa8] sm:$0xff]  ;;  %v1787_v28 = vld [vmem:[#allocation9 + $0x890] sm:$0xff] }
 0x299   : > { %1608 = vmatpush2.msra.mxu0 %v1537_v29  ;;  %1745 = vmatpush2.msra.mxu1 %v1678_v30  ;;  %v1928_v29 = vld [vmem:[#allocation9 + $0xaa0] sm:$0xff]  ;;  %v1786_v30 = vld [vmem:[#allocation9 + $0x888] sm:$0xff] }
 0x29a   : > { %1609 = vmatprep.subr.mxu0 %v1536_v31  ;;  %1746 = vmatprep.subr.mxu1 %v1677_v32  ;;  %v1927_v31 = vld [vmem:[#allocation9 + $0xa98] sm:$0xff]  ;;  %v1785_v32 = vld [vmem:[#allocation9 + $0x880] sm:$0xff] }
 0x29b   : > { %1610 = vmatpush2.msra.mxu0 %v1535_v33  ;;  %1747 = vmatpush2.msra.mxu1 %v1676_v34  ;;  %v1926_v33 = vld [vmem:[#allocation9 + $0xa90] sm:$0xff]  ;;  %v1784_v34 = vld [vmem:[#allocation9 + $0x878] sm:$0xff] }
 0x29c   : > { %1611 = vmatprep.subr.mxu0 %v1534_v35  ;;  %1748 = vmatprep.subr.mxu1 %v1675_v36  ;;  %v1925_v35 = vld [vmem:[#allocation9 + $0xa88] sm:$0xff]  ;;  %v1783_v36 = vld [vmem:[#allocation9 + $0x870] sm:$0xff] }
 0x29d   : > { %1612 = vmatpush2.msra.mxu0 %v1533_v37  ;;  %1749 = vmatpush2.msra.mxu1 %v1674_v38  ;;  %v1924_v37 = vld [vmem:[#allocation9 + $0xa80] sm:$0xff]  ;;  %v1782_v38 = vld [vmem:[#allocation9 + $0x868] sm:$0xff] }
 0x29e   : > { %1613 = vmatprep.subr.mxu0 %v1532_v39  ;;  %1750 = vmatprep.subr.mxu1 %v1673_v40  ;;  %v1923_v39 = vld [vmem:[#allocation9 + $0xa78] sm:$0xff]  ;;  %v1781_v40 = vld [vmem:[#allocation9 + $0x860] sm:$0xff] }
 0x29f   : > { %1614 = vmatpush2.msra.mxu0 %v1531_v41  ;;  %1751 = vmatpush2.msra.mxu1 %v1672_v42  ;;  %v1922_v41 = vld [vmem:[#allocation9 + $0xa70] sm:$0xff]  ;;  %v1780_v42 = vld [vmem:[#allocation9 + $0x858] sm:$0xff] }
 0x2a0   : > { %1615 = vmatprep.subr.mxu0 %v1530_v43  ;;  %1752 = vmatprep.subr.mxu1 %v1671_v44  ;;  %v1921_v43 = vld [vmem:[#allocation9 + $0xa68] sm:$0xff]  ;;  %v1779_v44 = vld [vmem:[#allocation9 + $0x850] sm:$0xff] }
 0x2a1   : > { %1616 = vmatpush2.msra.mxu0 %v1529_v45  ;;  %1753 = vmatpush2.msra.mxu1 %v1670_v46  ;;  %v1920_v45 = vld [vmem:[#allocation9 + $0xa60] sm:$0xff]  ;;  %v1778_v46 = vld [vmem:[#allocation9 + $0x848] sm:$0xff] }
 0x2a2   : > { %1617 = vmatprep.subr.mxu0 %v1528_v47  ;;  %1754 = vmatprep.subr.mxu1 %v1669_v48  ;;  %v1919_v47 = vld [vmem:[#allocation9 + $0xa58] sm:$0xff]  ;;  %v1777_v48 = vld [vmem:[#allocation9 + $0x840] sm:$0xff] }
 0x2a3   : > { %1618 = vmatpush2.msra.mxu0 %v1527_v49  ;;  %1755 = vmatpush2.msra.mxu1 %v1668_v50  ;;  %v1918_v49 = vld [vmem:[#allocation9 + $0xa50] sm:$0xff]  ;;  %v1776_v50 = vld [vmem:[#allocation9 + $0x838] sm:$0xff] }
 0x2a4   : > { %1619 = vmatprep.subr.mxu0 %v1526_v52  ;;  %1756 = vmatprep.subr.mxu1 %v1667_v54  ;;  %v1917_v52 = vld [vmem:[#allocation9 + $0xa48] sm:$0xff]  ;;  %v1775_v54 = vld [vmem:[#allocation9 + $0x830] sm:$0xff] }
 0x2a5   : > { %1620 = vmatpush2.msra.mxu0 %v1525_v55  ;;  %1757 = vmatpush2.msra.mxu1 %v1666_v56  ;;  %v1916_v55 = vld [vmem:[#allocation9 + $0xa40] sm:$0xff]  ;;  %v1774_v56 = vld [vmem:[#allocation9 + $0x828] sm:$0xff] }
 0x2a6   : > { %1621 = vmatprep.subr.mxu0 %v1524_v57  ;;  %1758 = vmatprep.subr.mxu1 %v1665_v58  ;;  %v1915_v57 = vld [vmem:[#allocation9 + $0xa38] sm:$0xff]  ;;  %v1773_v58 = vld [vmem:[#allocation9 + $0x820] sm:$0xff] }
 0x2a7   : > { %1622 = vmatpush2.msra.mxu0 %v1523_v59  ;;  %1759 = vmatpush2.msra.mxu1 %v1664_v60  ;;  %v1914_v59 = vld [vmem:[#allocation9 + $0xa30] sm:$0xff]  ;;  %v1772_v60 = vld [vmem:[#allocation9 + $0x818] sm:$0xff] }
 0x2a8   : > { %1624 = vmatmul.mubr.f32.vlgmr.msra.gmra.mxu0 %v1555_v62  ;;  %1760 = vmatprep.subr.mxu1 %v1663_v61  ;;  %v1913_v61 = vld [vmem:[#allocation9 + $0xa28] sm:$0xff]  ;;  %v1771_v62 = vld [vmem:[#allocation9 + $0x810] sm:$0xff] }
 0x2a9   : > { %1837 = vmatprep.subr.mxu0 %v1800_v0  ;;  %1761 = vmatpush2.msra.mxu1 %v1662_v4  ;;  %v1912_v0 = vld [vmem:[#allocation9 + $0xa20] sm:$0xff]  ;;  %v1770_v4 = vld [vmem:[#allocation9 + $0x808] sm:$0xff] }
 0x2aa   : > { %1838 = vmatpush1.msra.mxu0 %v1799_v5  ;;  %1901 = vmatprep.mubr.f32.mxu0 %v1834_v6  ;;  %v1911_v5 = vld [vmem:[#allocation9 + $0xa18] sm:$0xff]  ;;  %v1769_v6 = vld [vmem:[#allocation9 + $0x800] sm:$0xff] }
 0x2ab   : > { %1763 = vmatmul.mubr.f32.vlgmr.msra.gmra.mxu1 %v1694_v8  ;;  %1839 = vmatprep.subr.mxu0 %v1798_v7  ;;  %v1910_v7 = vld [vmem:[#allocation9 + $0xa10] sm:$0xff]  ;;  %v1832_v8 = vld [vmem:[#allocation9 + $0x9f8] sm:$0xff] }
 0x2ac   : > { %1976 = vmatprep.subr.mxu1 %v1939_v9  ;;  %1840 = vmatpush1.msra.mxu0 %v1797_v12  ;;  %v1909_v9 = vld [vmem:[#allocation9 + $0xa08] sm:$0xff]  ;;  %v1831_v12 = vld [vmem:[#allocation9 + $0x9f0] sm:$0xff] }
 0x2ad   : > { %1977 = vmatpush1.msra.mxu1 %v1938_v13  ;;  %2040 = vmatprep.mubr.f32.mxu1 %v1973_v63  ;;  %v1908_v13 = vld [vmem:[#allocation9 + $0xa00] sm:$0xff]  ;;  %v1830_v63 = vld [vmem:[#allocation9 + $0x9e8] sm:$0xff] }
 0x2ae   : > { %1841 = vmatprep.subr.mxu0 %v1796_v1  ;;  %1978 = vmatprep.subr.mxu1 %v1937_v2  ;;  %v1971_v1 = vld [vmem:[#allocation9 + $0xbf8] sm:$0xff]  ;;  %v1829_v2 = vld [vmem:[#allocation9 + $0x9e0] sm:$0xff] }
 0x2af   : > { %1842 = vmatpush1.msra.mxu0 %v1795_v3  ;;  %1979 = vmatpush1.msra.mxu1 %v1936_v10  ;;  %v1970_v3 = vld [vmem:[#allocation9 + $0xbf0] sm:$0xff]  ;;  %v1828_v10 = vld [vmem:[#allocation9 + $0x9d8] sm:$0xff] }
 0x2b0   : > { %1843 = vmatprep.subr.mxu0 %v1794_v11  ;;  %1980 = vmatprep.subr.mxu1 %v1935_v14  ;;  %v1969_v11 = vld [vmem:[#allocation9 + $0xbe8] sm:$0xff]  ;;  %v1827_v14 = vld [vmem:[#allocation9 + $0x9d0] sm:$0xff] }
 0x2b1   : > { %1844 = vmatpush1.msra.mxu0 %v1793_v15  ;;  %1981 = vmatpush1.msra.mxu1 %v1934_v17  ;;  %v1968_v15 = vld [vmem:[#allocation9 + $0xbe0] sm:$0xff]  ;;  %v1826_v17 = vld [vmem:[#allocation9 + $0x9c8] sm:$0xff] }
 0x2b2   : > { %1845 = vmatprep.subr.mxu0 %v1792_v18  ;;  %1982 = vmatprep.subr.mxu1 %v1933_v19  ;;  %v1967_v18 = vld [vmem:[#allocation9 + $0xbd8] sm:$0xff]  ;;  %v1825_v19 = vld [vmem:[#allocation9 + $0x9c0] sm:$0xff] }
 0x2b3   : > { %1846 = vmatpush1.msra.mxu0 %v1791_v20  ;;  %1983 = vmatpush1.msra.mxu1 %v1932_v21  ;;  %v1966_v20 = vld [vmem:[#allocation9 + $0xbd0] sm:$0xff]  ;;  %v1824_v21 = vld [vmem:[#allocation9 + $0x9b8] sm:$0xff] }
 0x2b4   : > { %1847 = vmatprep.subr.mxu0 %v1790_v22  ;;  %1984 = vmatprep.subr.mxu1 %v1931_v24  ;;  %v1965_v22 = vld [vmem:[#allocation9 + $0xbc8] sm:$0xff]  ;;  %v1823_v24 = vld [vmem:[#allocation9 + $0x9b0] sm:$0xff] }
 0x2b5   : > { %1848 = vmatpush1.msra.mxu0 %v1789_v25  ;;  %1985 = vmatpush1.msra.mxu1 %v1930_v26  ;;  %v1964_v25 = vld [vmem:[#allocation9 + $0xbc0] sm:$0xff]  ;;  %v1822_v26 = vld [vmem:[#allocation9 + $0x9a8] sm:$0xff] }
 0x2b6   : > { %1849 = vmatprep.subr.mxu0 %v1788_v27  ;;  %1986 = vmatprep.subr.mxu1 %v1929_v23  ;;  %v1963_v27 = vld [vmem:[#allocation9 + $0xbb8] sm:$0xff]  ;;  %v1821_v23 = vld [vmem:[#allocation9 + $0x9a0] sm:$0xff] }
 0x2b7   : > { %1850 = vmatpush1.msra.mxu0 %v1787_v28  ;;  %1987 = vmatpush1.msra.mxu1 %v1928_v29  ;;  %v1962_v28 = vld [vmem:[#allocation9 + $0xbb0] sm:$0xff]  ;;  %v1820_v29 = vld [vmem:[#allocation9 + $0x998] sm:$0xff] }
 0x2b8   : > { %1851 = vmatprep.subr.mxu0 %v1786_v30  ;;  %1988 = vmatprep.subr.mxu1 %v1927_v31  ;;  %v1961_v30 = vld [vmem:[#allocation9 + $0xba8] sm:$0xff]  ;;  %v1819_v31 = vld [vmem:[#allocation9 + $0x990] sm:$0xff] }
 0x2b9   : > { %1852 = vmatpush1.msra.mxu0 %v1785_v32  ;;  %1989 = vmatpush1.msra.mxu1 %v1926_v33  ;;  %v1960_v32 = vld [vmem:[#allocation9 + $0xba0] sm:$0xff]  ;;  %v1818_v33 = vld [vmem:[#allocation9 + $0x988] sm:$0xff] }
 0x2ba   : > { %1853 = vmatprep.subr.mxu0 %v1784_v34  ;;  %1990 = vmatprep.subr.mxu1 %v1925_v35  ;;  %v1959_v34 = vld [vmem:[#allocation9 + $0xb98] sm:$0xff]  ;;  %v1817_v35 = vld [vmem:[#allocation9 + $0x980] sm:$0xff] }
 0x2bb   : > { %1854 = vmatpush1.msra.mxu0 %v1783_v36  ;;  %1991 = vmatpush1.msra.mxu1 %v1924_v37  ;;  %v1958_v36 = vld [vmem:[#allocation9 + $0xb90] sm:$0xff]  ;;  %v1816_v37 = vld [vmem:[#allocation9 + $0x978] sm:$0xff] }
 0x2bc   : > { %1855 = vmatprep.subr.mxu0 %v1782_v38  ;;  %1992 = vmatprep.subr.mxu1 %v1923_v39  ;;  %v1957_v38 = vld [vmem:[#allocation9 + $0xb88] sm:$0xff]  ;;  %v1815_v39 = vld [vmem:[#allocation9 + $0x970] sm:$0xff] }
 0x2bd   : > { %1856 = vmatpush1.msra.mxu0 %v1781_v40  ;;  %1993 = vmatpush1.msra.mxu1 %v1922_v41  ;;  %v1956_v40 = vld [vmem:[#allocation9 + $0xb80] sm:$0xff]  ;;  %v1814_v41 = vld [vmem:[#allocation9 + $0x968] sm:$0xff] }
 0x2be   : > { %1857 = vmatprep.subr.mxu0 %v1780_v42  ;;  %1994 = vmatprep.subr.mxu1 %v1921_v43  ;;  %v1955_v42 = vld [vmem:[#allocation9 + $0xb78] sm:$0xff]  ;;  %v1813_v43 = vld [vmem:[#allocation9 + $0x960] sm:$0xff] }
 0x2bf   : > { %1858 = vmatpush1.msra.mxu0 %v1779_v44  ;;  %1995 = vmatpush1.msra.mxu1 %v1920_v45  ;;  %v1954_v44 = vld [vmem:[#allocation9 + $0xb70] sm:$0xff]  ;;  %v1812_v45 = vld [vmem:[#allocation9 + $0x958] sm:$0xff] }
 0x2c0   : > { %1859 = vmatprep.subr.mxu0 %v1778_v46  ;;  %1996 = vmatprep.subr.mxu1 %v1919_v47  ;;  %v1953_v46 = vld [vmem:[#allocation9 + $0xb68] sm:$0xff]  ;;  %v1811_v47 = vld [vmem:[#allocation9 + $0x950] sm:$0xff] }
 0x2c1   : > { %1860 = vmatpush1.msra.mxu0 %v1777_v48  ;;  %1997 = vmatpush1.msra.mxu1 %v1918_v49  ;;  %v1952_v48 = vld [vmem:[#allocation9 + $0xb60] sm:$0xff]  ;;  %v1810_v49 = vld [vmem:[#allocation9 + $0x948] sm:$0xff] }
 0x2c2   : > { %1861 = vmatprep.subr.mxu0 %v1776_v50  ;;  %1998 = vmatprep.subr.mxu1 %v1917_v52  ;;  %v1951_v50 = vld [vmem:[#allocation9 + $0xb58] sm:$0xff]  ;;  %v1809_v52 = vld [vmem:[#allocation9 + $0x940] sm:$0xff] }
 0x2c3   : > { %1862 = vmatpush1.msra.mxu0 %v1775_v54  ;;  %1999 = vmatpush1.msra.mxu1 %v1916_v55  ;;  %v1950_v54 = vld [vmem:[#allocation9 + $0xb50] sm:$0xff]  ;;  %v1808_v55 = vld [vmem:[#allocation9 + $0x938] sm:$0xff] }
 0x2c4   : > { %1863 = vmatprep.subr.mxu0 %v1774_v56  ;;  %2000 = vmatprep.subr.mxu1 %v1915_v57  ;;  %v1949_v56 = vld [vmem:[#allocation9 + $0xb48] sm:$0xff]  ;;  %v1807_v57 = vld [vmem:[#allocation9 + $0x930] sm:$0xff] }
 0x2c5   : > { %1864 = vmatpush1.msra.mxu0 %v1773_v58  ;;  %2001 = vmatpush1.msra.mxu1 %v1914_v59  ;;  %v1948_v58 = vld [vmem:[#allocation9 + $0xb40] sm:$0xff]  ;;  %v1806_v59 = vld [vmem:[#allocation9 + $0x928] sm:$0xff] }
 0x2c6   : > { %1865 = vmatprep.subr.mxu0 %v1772_v60  ;;  %2002 = vmatprep.subr.mxu1 %v1913_v61  ;;  %v1947_v60 = vld [vmem:[#allocation9 + $0xb38] sm:$0xff]  ;;  %v1805_v61 = vld [vmem:[#allocation9 + $0x920] sm:$0xff] }
 0x2c7   : > { %1866 = vmatpush1.msra.mxu0 %v1771_v62  ;;  %2003 = vmatpush1.msra.mxu1 %v1912_v0  ;;  %v1946_v62 = vld [vmem:[#allocation9 + $0xb30] sm:$0xff]  ;;  %v1804_v0 = vld [vmem:[#allocation9 + $0x918] sm:$0xff] }
 0x2c8   : > { %1867 = vmatprep.subr.mxu0 %v1770_v4  ;;  %2004 = vmatprep.subr.mxu1 %v1911_v5  ;;  %v1945_v4 = vld [vmem:[#allocation9 + $0xb28] sm:$0xff]  ;;  %v1803_v5 = vld [vmem:[#allocation9 + $0x910] sm:$0xff] }
 0x2c9   : > { %1868 = vmatpush1.msra.mxu0 %v1769_v6  ;;  %2005 = vmatpush1.msra.mxu1 %v1910_v7  ;;  %v1944_v6 = vld [vmem:[#allocation9 + $0xb20] sm:$0xff]  ;;  %v1802_v7 = vld [vmem:[#allocation9 + $0x908] sm:$0xff] }
 0x2ca   : > { %1869 = vmatprep.subr.mxu0 %v1832_v8  ;;  %2006 = vmatprep.subr.mxu1 %v1909_v9  ;;  %v1943_v8 = vld [vmem:[#allocation9 + $0xb18] sm:$0xff]  ;;  %v1801_v9 = vld [vmem:[#allocation9 + $0x900] sm:$0xff] }
 0x2cb   : > { %1870 = vmatpush2.msra.mxu0 %v1831_v12  ;;  %2007 = vmatpush1.msra.mxu1 %v1908_v13  ;;  %v1942_v12 = vld [vmem:[#allocation9 + $0xb10] sm:$0xff]  ;;  %v1941_v13 = vld [vmem:[#allocation9 + $0xb08] sm:$0xff] }
 0x2cc   : > { %1871 = vmatprep.subr.mxu0 %v1830_v63  ;;  %2008 = vmatprep.subr.mxu1 %v1971_v1  ;;  %v1833_v63 = vrot.slane %v4241_v51, 4  ;;  %v2078_v1 = vld [vmem:[#allocation9 + $0xcf8] sm:$0xff] }
 0x2cd   : > { %1872 = vmatpush2.msra.mxu0 %v1829_v2  ;;  %2009 = vmatpush2.msra.mxu1 %v1970_v3  ;;  %v1940_v2 = vld [vmem:[#allocation9 + $0xb00] sm:$0xff]  ;;  %v2077_v3 = vld [vmem:[#allocation9 + $0xcf0] sm:$0xff] }
 0x2ce   : > { %1873 = vmatprep.subr.mxu0 %v1828_v10  ;;  %2010 = vmatprep.subr.mxu1 %v1969_v11  ;;  %v2112_v10 = vrot.slane %v4243_v53, 6  ;;  %v2076_v11 = vld [vmem:[#allocation9 + $0xce8] sm:$0xff] }
 0x2cf   : > { %1874 = vmatpush2.msra.mxu0 %v1827_v14  ;;  %2011 = vmatpush2.msra.mxu1 %v1968_v15  ;;  %v1972_v14 = vrot.slane %v4241_v51, 5  ;;  %v2217_v15 = vld [vmem:[#allocation9 + $0xef8] sm:$0xff] }
 0x2d0   : > { %1875 = vmatprep.subr.mxu0 %v1826_v17  ;;  %2012 = vmatprep.subr.mxu1 %v1967_v18  ;;  %v2075_v17 = vld [vmem:[#allocation9 + $0xce0] sm:$0xff]  ;;  %v2216_v18 = vld [vmem:[#allocation9 + $0xef0] sm:$0xff] }
 0x2d1   : > { %1876 = vmatpush2.msra.mxu0 %v1825_v19  ;;  %2013 = vmatpush2.msra.mxu1 %v1966_v20  ;;  %v2251_v19 = vrot.slane %v4243_v53, 7  ;;  %v2074_v20 = vld [vmem:[#allocation9 + $0xcd8] sm:$0xff]  ;;  %v2069_v53 = vld [vmem:[#allocation9 + $0xcb0] sm:$0xff] }
 0x2d2   : > { %1877 = vmatprep.subr.mxu0 %v1824_v21  ;;  %2014 = vmatprep.subr.mxu1 %v1965_v22  ;;  %v2215_v21 = vld [vmem:[#allocation9 + $0xee8] sm:$0xff]  ;;  %v2073_v22 = vld [vmem:[#allocation9 + $0xcd0] sm:$0xff] }
 0x2d3   : > { %1878 = vmatpush2.msra.mxu0 %v1823_v24  ;;  %2015 = vmatpush2.msra.mxu1 %v1964_v25  ;;  %v2214_v24 = vld [vmem:[#allocation9 + $0xee0] sm:$0xff]  ;;  %v2072_v25 = vld [vmem:[#allocation9 + $0xcc8] sm:$0xff] }
 0x2d4   : > { %1879 = vmatprep.subr.mxu0 %v1822_v26  ;;  %2016 = vmatprep.subr.mxu1 %v1963_v27  ;;  %v2213_v26 = vld [vmem:[#allocation9 + $0xed8] sm:$0xff]  ;;  %v2071_v27 = vld [vmem:[#allocation9 + $0xcc0] sm:$0xff] }
 0x2d5   : > { %1880 = vmatpush2.msra.mxu0 %v1821_v23  ;;  %2017 = vmatpush2.msra.mxu1 %v1962_v28  ;;  %v2212_v23 = vld [vmem:[#allocation9 + $0xed0] sm:$0xff]  ;;  %v2070_v28 = vld [vmem:[#allocation9 + $0xcb8] sm:$0xff] }
 0x2d6   : > { %1881 = vmatprep.subr.mxu0 %v1820_v29  ;;  %2018 = vmatprep.subr.mxu1 %v1961_v30  ;;  %v2211_v29 = vld [vmem:[#allocation9 + $0xec8] sm:$0xff]  ;;  %v2210_v30 = vld [vmem:[#allocation9 + $0xec0] sm:$0xff] }
 0x2d7   : > { %1882 = vmatpush2.msra.mxu0 %v1819_v31  ;;  %2019 = vmatpush2.msra.mxu1 %v1960_v32  ;;  %v2068_v31 = vld [vmem:[#allocation9 + $0xca8] sm:$0xff]  ;;  %v2209_v32 = vld [vmem:[#allocation9 + $0xeb8] sm:$0xff] }
 0x2d8   : > { %1883 = vmatprep.subr.mxu0 %v1818_v33  ;;  %2020 = vmatprep.subr.mxu1 %v1959_v34  ;;  %v2067_v33 = vld [vmem:[#allocation9 + $0xca0] sm:$0xff]  ;;  %v2208_v34 = vld [vmem:[#allocation9 + $0xeb0] sm:$0xff] }
 0x2d9   : > { %1884 = vmatpush2.msra.mxu0 %v1817_v35  ;;  %2021 = vmatpush2.msra.mxu1 %v1958_v36  ;;  %v2066_v35 = vld [vmem:[#allocation9 + $0xc98] sm:$0xff]  ;;  %v2207_v36 = vld [vmem:[#allocation9 + $0xea8] sm:$0xff] }
 0x2da   : > { %1885 = vmatprep.subr.mxu0 %v1816_v37  ;;  %2022 = vmatprep.subr.mxu1 %v1957_v38  ;;  %v2065_v37 = vld [vmem:[#allocation9 + $0xc90] sm:$0xff]  ;;  %v2206_v38 = vld [vmem:[#allocation9 + $0xea0] sm:$0xff] }
 0x2db   : > { %1886 = vmatpush2.msra.mxu0 %v1815_v39  ;;  %2023 = vmatpush2.msra.mxu1 %v1956_v40  ;;  %v2064_v39 = vld [vmem:[#allocation9 + $0xc88] sm:$0xff]  ;;  %v2205_v40 = vld [vmem:[#allocation9 + $0xe98] sm:$0xff] }
 0x2dc   : > { %1887 = vmatprep.subr.mxu0 %v1814_v41  ;;  %2024 = vmatprep.subr.mxu1 %v1955_v42  ;;  %v2063_v41 = vld [vmem:[#allocation9 + $0xc80] sm:$0xff]  ;;  %v2204_v42 = vld [vmem:[#allocation9 + $0xe90] sm:$0xff] }
 0x2dd   : > { %1888 = vmatpush2.msra.mxu0 %v1813_v43  ;;  %2025 = vmatpush2.msra.mxu1 %v1954_v44  ;;  %v2062_v43 = vld [vmem:[#allocation9 + $0xc78] sm:$0xff]  ;;  %v2203_v44 = vld [vmem:[#allocation9 + $0xe88] sm:$0xff] }
 0x2de   : > { %1889 = vmatprep.subr.mxu0 %v1812_v45  ;;  %2026 = vmatprep.subr.mxu1 %v1953_v46  ;;  %v2061_v45 = vld [vmem:[#allocation9 + $0xc70] sm:$0xff]  ;;  %v2202_v46 = vld [vmem:[#allocation9 + $0xe80] sm:$0xff] }
 0x2df   : > { %1890 = vmatpush2.msra.mxu0 %v1811_v47  ;;  %2027 = vmatpush2.msra.mxu1 %v1952_v48  ;;  %v2060_v47 = vld [vmem:[#allocation9 + $0xc68] sm:$0xff]  ;;  %v2201_v48 = vld [vmem:[#allocation9 + $0xe78] sm:$0xff] }
 0x2e0   : > { %1891 = vmatprep.subr.mxu0 %v1810_v49  ;;  %2028 = vmatprep.subr.mxu1 %v1951_v50  ;;  %v2059_v49 = vld [vmem:[#allocation9 + $0xc60] sm:$0xff]  ;;  %v2200_v50 = vld [vmem:[#allocation9 + $0xe70] sm:$0xff] }
 0x2e1   : > { %1892 = vmatpush2.msra.mxu0 %v1809_v52  ;;  %2029 = vmatpush2.msra.mxu1 %v1950_v54  ;;  %v2058_v52 = vld [vmem:[#allocation9 + $0xc58] sm:$0xff]  ;;  %v2199_v54 = vld [vmem:[#allocation9 + $0xe68] sm:$0xff] }
 0x2e2   : > { %1893 = vmatprep.subr.mxu0 %v1808_v55  ;;  %2030 = vmatprep.subr.mxu1 %v1949_v56  ;;  %v2057_v55 = vld [vmem:[#allocation9 + $0xc50] sm:$0xff]  ;;  %v2198_v56 = vld [vmem:[#allocation9 + $0xe60] sm:$0xff] }
 0x2e3   : > { %1894 = vmatpush2.msra.mxu0 %v1807_v57  ;;  %2031 = vmatpush2.msra.mxu1 %v1948_v58  ;;  %v2056_v57 = vld [vmem:[#allocation9 + $0xc48] sm:$0xff]  ;;  %v2197_v58 = vld [vmem:[#allocation9 + $0xe58] sm:$0xff] }
 0x2e4   : > { %1895 = vmatprep.subr.mxu0 %v1806_v59  ;;  %2032 = vmatprep.subr.mxu1 %v1947_v60  ;;  %v2055_v59 = vld [vmem:[#allocation9 + $0xc40] sm:$0xff]  ;;  %v2196_v60 = vld [vmem:[#allocation9 + $0xe50] sm:$0xff] }
 0x2e5   : > { %1896 = vmatpush2.msra.mxu0 %v1805_v61  ;;  %2033 = vmatpush2.msra.mxu1 %v1946_v62  ;;  %v2054_v61 = vld [vmem:[#allocation9 + $0xc38] sm:$0xff]  ;;  %v2195_v62 = vld [vmem:[#allocation9 + $0xe48] sm:$0xff] }
 0x2e6   : > { %1897 = vmatprep.subr.mxu0 %v1804_v0  ;;  %2034 = vmatprep.subr.mxu1 %v1945_v4  ;;  %v2053_v0 = vld [vmem:[#allocation9 + $0xc30] sm:$0xff]  ;;  %v2194_v4 = vld [vmem:[#allocation9 + $0xe40] sm:$0xff] }
 0x2e7   : > { %1898 = vmatpush2.msra.mxu0 %v1803_v5  ;;  %2035 = vmatpush2.msra.mxu1 %v1944_v6  ;;  %v2052_v5 = vld [vmem:[#allocation9 + $0xc28] sm:$0xff]  ;;  %v2193_v6 = vld [vmem:[#allocation9 + $0xe38] sm:$0xff] }
 0x2e8   : > { %1899 = vmatprep.subr.mxu0 %v1802_v7  ;;  %2036 = vmatprep.subr.mxu1 %v1943_v8  ;;  %v2051_v7 = vld [vmem:[#allocation9 + $0xc20] sm:$0xff]  ;;  %v2192_v8 = vld [vmem:[#allocation9 + $0xe30] sm:$0xff] }
 0x2e9   : > { %1900 = vmatpush2.msra.mxu0 %v1801_v9  ;;  %2037 = vmatpush2.msra.mxu1 %v1942_v12  ;;  %v2050_v9 = vld [vmem:[#allocation9 + $0xc18] sm:$0xff]  ;;  %v2191_v12 = vld [vmem:[#allocation9 + $0xe28] sm:$0xff] }
 0x2ea   : > { %1902 = vmatmul.mubr.f32.vlgmr.msra.gmra.mxu0 %v1833_v63  ;;  %2038 = vmatprep.subr.mxu1 %v1941_v13  ;;  %v2049_v13 = vld [vmem:[#allocation9 + $0xc10] sm:$0xff]  ;;  %v2190_v63 = vld [vmem:[#allocation9 + $0xe20] sm:$0xff] }
 0x2eb   : > { %2115 = vmatprep.subr.mxu0 %v2078_v1  ;;  %2039 = vmatpush2.msra.mxu1 %v1940_v2  ;;  %v2048_v1 = vld [vmem:[#allocation9 + $0xc08] sm:$0xff]  ;;  %v2189_v2 = vld [vmem:[#allocation9 + $0xe18] sm:$0xff] }
 0x2ec   : > { %2116 = vmatpush1.msra.mxu0 %v2077_v3  ;;  %2179 = vmatprep.mubr.f32.mxu0 %v2112_v10  ;;  %v2047_v3 = vld [vmem:[#allocation9 + $0xc00] sm:$0xff]  ;;  %v2188_v10 = vld [vmem:[#allocation9 + $0xe10] sm:$0xff] }
 0x2ed   : > { %2041 = vmatmul.mubr.f32.vlgmr.msra.gmra.mxu1 %v1972_v14  ;;  %2117 = vmatprep.subr.mxu0 %v2076_v11  ;;  %v2110_v11 = vld [vmem:[#allocation9 + $0xdf8] sm:$0xff]  ;;  %v2187_v14 = vld [vmem:[#allocation9 + $0xe08] sm:$0xff] }
 0x2ee   : > { %2254 = vmatprep.subr.mxu1 %v2217_v15  ;;  %2118 = vmatpush1.msra.mxu0 %v2075_v17  ;;  %v2109_v15 = vld [vmem:[#allocation9 + $0xdf0] sm:$0xff]  ;;  %v2186_v17 = vld [vmem:[#allocation9 + $0xe00] sm:$0xff] }
 0x2ef   : > { %2255 = vmatpush1.msra.mxu1 %v2216_v18  ;;  %2318 = vmatprep.mubr.f32.mxu1 %v2251_v19  ;;  %v2108_v18 = vld [vmem:[#allocation9 + $0xde8] sm:$0xff]  ;;  %v2249_v19 = vld [vmem:[#allocation9 + $0xff8] sm:$0xff] }
 0x2f0   : > { %2119 = vmatprep.subr.mxu0 %v2074_v20  ;;  %2256 = vmatprep.subr.mxu1 %v2215_v21  ;;  %v2107_v20 = vld [vmem:[#allocation9 + $0xde0] sm:$0xff]  ;;  %v2248_v21 = vld [vmem:[#allocation9 + $0xff0] sm:$0xff] }
 0x2f1   : > { %2120 = vmatpush1.msra.mxu0 %v2073_v22  ;;  %2257 = vmatpush1.msra.mxu1 %v2214_v24  ;;  %v2106_v22 = vld [vmem:[#allocation9 + $0xdd8] sm:$0xff]  ;;  %v2247_v24 = vld [vmem:[#allocation9 + $0xfe8] sm:$0xff] }
 0x2f2   : > { %2121 = vmatprep.subr.mxu0 %v2072_v25  ;;  %2258 = vmatprep.subr.mxu1 %v2213_v26  ;;  %v2105_v25 = vld [vmem:[#allocation9 + $0xdd0] sm:$0xff]  ;;  %v2246_v26 = vld [vmem:[#allocation9 + $0xfe0] sm:$0xff] }
 0x2f3   : > { %2122 = vmatpush1.msra.mxu0 %v2071_v27  ;;  %2259 = vmatpush1.msra.mxu1 %v2212_v23  ;;  %v2104_v27 = vld [vmem:[#allocation9 + $0xdc8] sm:$0xff]  ;;  %v2245_v23 = vld [vmem:[#allocation9 + $0xfd8] sm:$0xff] }
 0x2f4   : > { %2123 = vmatprep.subr.mxu0 %v2070_v28  ;;  %2260 = vmatprep.subr.mxu1 %v2211_v29  ;;  %v2103_v28 = vld [vmem:[#allocation9 + $0xdc0] sm:$0xff]  ;;  %v2244_v29 = vld [vmem:[#allocation9 + $0xfd0] sm:$0xff] }
 0x2f5   : > { %2124 = vmatpush1.msra.mxu0 %v2069_v53  ;;  %2261 = vmatpush1.msra.mxu1 %v2210_v30  ;;  %v2102_v53 = vld [vmem:[#allocation9 + $0xdb8] sm:$0xff]  ;;  %v2243_v30 = vld [vmem:[#allocation9 + $0xfc8] sm:$0xff] }
 0x2f6   : > { %2125 = vmatprep.subr.mxu0 %v2068_v31  ;;  %2262 = vmatprep.subr.mxu1 %v2209_v32  ;;  %v2101_v31 = vld [vmem:[#allocation9 + $0xdb0] sm:$0xff]  ;;  %v2242_v32 = vld [vmem:[#allocation9 + $0xfc0] sm:$0xff] }
 0x2f7   : > { %2126 = vmatpush1.msra.mxu0 %v2067_v33  ;;  %2263 = vmatpush1.msra.mxu1 %v2208_v34  ;;  %v2100_v33 = vld [vmem:[#allocation9 + $0xda8] sm:$0xff]  ;;  %v2241_v34 = vld [vmem:[#allocation9 + $0xfb8] sm:$0xff] }
 0x2f8   : > { %2127 = vmatprep.subr.mxu0 %v2066_v35  ;;  %2264 = vmatprep.subr.mxu1 %v2207_v36  ;;  %v2099_v35 = vld [vmem:[#allocation9 + $0xda0] sm:$0xff]  ;;  %v2240_v36 = vld [vmem:[#allocation9 + $0xfb0] sm:$0xff] }
 0x2f9   : > { %2128 = vmatpush1.msra.mxu0 %v2065_v37  ;;  %2265 = vmatpush1.msra.mxu1 %v2206_v38  ;;  %v2098_v37 = vld [vmem:[#allocation9 + $0xd98] sm:$0xff]  ;;  %v2239_v38 = vld [vmem:[#allocation9 + $0xfa8] sm:$0xff] }
 0x2fa   : > { %2129 = vmatprep.subr.mxu0 %v2064_v39  ;;  %2266 = vmatprep.subr.mxu1 %v2205_v40  ;;  %v2097_v39 = vld [vmem:[#allocation9 + $0xd90] sm:$0xff]  ;;  %v2238_v40 = vld [vmem:[#allocation9 + $0xfa0] sm:$0xff] }
 0x2fb   : > { %2130 = vmatpush1.msra.mxu0 %v2063_v41  ;;  %2267 = vmatpush1.msra.mxu1 %v2204_v42  ;;  %v2096_v41 = vld [vmem:[#allocation9 + $0xd88] sm:$0xff]  ;;  %v2237_v42 = vld [vmem:[#allocation9 + $0xf98] sm:$0xff] }
 0x2fc   : > { %2131 = vmatprep.subr.mxu0 %v2062_v43  ;;  %2268 = vmatprep.subr.mxu1 %v2203_v44  ;;  %v2095_v43 = vld [vmem:[#allocation9 + $0xd80] sm:$0xff]  ;;  %v2236_v44 = vld [vmem:[#allocation9 + $0xf90] sm:$0xff] }
 0x2fd   : > { %2132 = vmatpush1.msra.mxu0 %v2061_v45  ;;  %2269 = vmatpush1.msra.mxu1 %v2202_v46  ;;  %v2094_v45 = vld [vmem:[#allocation9 + $0xd78] sm:$0xff]  ;;  %v2235_v46 = vld [vmem:[#allocation9 + $0xf88] sm:$0xff] }
 0x2fe   : > { %2133 = vmatprep.subr.mxu0 %v2060_v47  ;;  %2270 = vmatprep.subr.mxu1 %v2201_v48  ;;  %v2093_v47 = vld [vmem:[#allocation9 + $0xd70] sm:$0xff]  ;;  %v2234_v48 = vld [vmem:[#allocation9 + $0xf80] sm:$0xff] }
 0x2ff   : > { %2134 = vmatpush1.msra.mxu0 %v2059_v49  ;;  %2271 = vmatpush1.msra.mxu1 %v2200_v50  ;;  %v2092_v49 = vld [vmem:[#allocation9 + $0xd68] sm:$0xff]  ;;  %v2233_v50 = vld [vmem:[#allocation9 + $0xf78] sm:$0xff] }
 0x300   : > { %2135 = vmatprep.subr.mxu0 %v2058_v52  ;;  %2272 = vmatprep.subr.mxu1 %v2199_v54  ;;  %v2091_v52 = vld [vmem:[#allocation9 + $0xd60] sm:$0xff]  ;;  %v2232_v54 = vld [vmem:[#allocation9 + $0xf70] sm:$0xff] }
 0x301   : > { %2136 = vmatpush1.msra.mxu0 %v2057_v55  ;;  %2273 = vmatpush1.msra.mxu1 %v2198_v56  ;;  %v2090_v55 = vld [vmem:[#allocation9 + $0xd58] sm:$0xff]  ;;  %v2231_v56 = vld [vmem:[#allocation9 + $0xf68] sm:$0xff] }
 0x302   : > { %2137 = vmatprep.subr.mxu0 %v2056_v57  ;;  %2274 = vmatprep.subr.mxu1 %v2197_v58  ;;  %v2089_v57 = vld [vmem:[#allocation9 + $0xd50] sm:$0xff]  ;;  %v2230_v58 = vld [vmem:[#allocation9 + $0xf60] sm:$0xff] }
 0x303   : > { %2138 = vmatpush1.msra.mxu0 %v2055_v59  ;;  %2275 = vmatpush1.msra.mxu1 %v2196_v60  ;;  %v2088_v59 = vld [vmem:[#allocation9 + $0xd48] sm:$0xff]  ;;  %v2229_v60 = vld [vmem:[#allocation9 + $0xf58] sm:$0xff] }
 0x304   : > { %2139 = vmatprep.subr.mxu0 %v2054_v61  ;;  %2276 = vmatprep.subr.mxu1 %v2195_v62  ;;  %v2087_v61 = vld [vmem:[#allocation9 + $0xd40] sm:$0xff]  ;;  %v2228_v62 = vld [vmem:[#allocation9 + $0xf50] sm:$0xff] }
 0x305   : > { %2140 = vmatpush1.msra.mxu0 %v2053_v0  ;;  %2277 = vmatpush1.msra.mxu1 %v2194_v4  ;;  %v2086_v0 = vld [vmem:[#allocation9 + $0xd38] sm:$0xff]  ;;  %v2227_v4 = vld [vmem:[#allocation9 + $0xf48] sm:$0xff] }
 0x306   : > { %2141 = vmatprep.subr.mxu0 %v2052_v5  ;;  %2278 = vmatprep.subr.mxu1 %v2193_v6  ;;  %v2085_v5 = vld [vmem:[#allocation9 + $0xd30] sm:$0xff]  ;;  %v2226_v6 = vld [vmem:[#allocation9 + $0xf40] sm:$0xff] }
 0x307   : > { %2142 = vmatpush1.msra.mxu0 %v2051_v7  ;;  %2279 = vmatpush1.msra.mxu1 %v2192_v8  ;;  %v2084_v7 = vld [vmem:[#allocation9 + $0xd28] sm:$0xff]  ;;  %v2225_v8 = vld [vmem:[#allocation9 + $0xf38] sm:$0xff] }
 0x308   : > { %2143 = vmatprep.subr.mxu0 %v2050_v9  ;;  %2280 = vmatprep.subr.mxu1 %v2191_v12  ;;  %v2083_v9 = vld [vmem:[#allocation9 + $0xd20] sm:$0xff]  ;;  %v2224_v12 = vld [vmem:[#allocation9 + $0xf30] sm:$0xff] }
 0x309   : > { %2144 = vmatpush1.msra.mxu0 %v2049_v13  ;;  %2281 = vmatpush1.msra.mxu1 %v2190_v63  ;;  %v2082_v13 = vld [vmem:[#allocation9 + $0xd18] sm:$0xff]  ;;  %v2223_v63 = vld [vmem:[#allocation9 + $0xf28] sm:$0xff] }
 0x30a   : > { %2145 = vmatprep.subr.mxu0 %v2048_v1  ;;  %2282 = vmatprep.subr.mxu1 %v2189_v2  ;;  %v2081_v1 = vld [vmem:[#allocation9 + $0xd10] sm:$0xff]  ;;  %v2222_v2 = vld [vmem:[#allocation9 + $0xf20] sm:$0xff] }
 0x30b   : > { %2146 = vmatpush1.msra.mxu0 %v2047_v3  ;;  %2283 = vmatpush1.msra.mxu1 %v2188_v10  ;;  %v2080_v3 = vld [vmem:[#allocation9 + $0xd08] sm:$0xff]  ;;  %v2221_v10 = vld [vmem:[#allocation9 + $0xf18] sm:$0xff] }
 0x30c   : > { %2147 = vmatprep.subr.mxu0 %v2110_v11  ;;  %2284 = vmatprep.subr.mxu1 %v2187_v14  ;;  %v2079_v11 = vld [vmem:[#allocation9 + $0xd00] sm:$0xff]  ;;  %v2220_v14 = vld [vmem:[#allocation9 + $0xf10] sm:$0xff] }
 0x30d   : > { %2148 = vmatpush2.msra.mxu0 %v2109_v15  ;;  %2285 = vmatpush1.msra.mxu1 %v2186_v17  ;;  %v2219_v15 = vld [vmem:[#allocation9 + $0xf08] sm:$0xff]  ;;  %v2111_v17 = vrot.slane %v4241_v51, 6 }
 0x30e   : > { %2149 = vmatprep.subr.mxu0 %v2108_v18  ;;  %2286 = vmatprep.subr.mxu1 %v2249_v19  ;;  %v2218_v18 = vld [vmem:[#allocation9 + $0xf00] sm:$0xff]  ;;  %v2250_v19 = vrot.slane %v4241_v51, 7 }
 0x30f   : > { %2150 = vmatpush2.msra.mxu0 %v2107_v20  ;;  %2287 = vmatpush2.msra.mxu1 %v2248_v21  ;;  %v4261_v20 = vld [vmem:[#allocation10] sm:$0xff]  ;;  %v4265_v21 = vld [vmem:[#allocation12] sm:$0xff] }
 0x310   : > { %2151 = vmatprep.subr.mxu0 %v2106_v22  ;;  %2288 = vmatprep.subr.mxu1 %v2247_v24 }
 0x311   : > { %2152 = vmatpush2.msra.mxu0 %v2105_v25  ;;  %2289 = vmatpush2.msra.mxu1 %v2246_v26 }
 0x312   : > { %2153 = vmatprep.subr.mxu0 %v2104_v27  ;;  %2290 = vmatprep.subr.mxu1 %v2245_v23 }
 0x313   : > { %2154 = vmatpush2.msra.mxu0 %v2103_v28  ;;  %2291 = vmatpush2.msra.mxu1 %v2244_v29 }
 0x314   : > { %2155 = vmatprep.subr.mxu0 %v2102_v53  ;;  %2292 = vmatprep.subr.mxu1 %v2243_v30 }
 0x315   : > { %2156 = vmatpush2.msra.mxu0 %v2101_v31  ;;  %2293 = vmatpush2.msra.mxu1 %v2242_v32 }
 0x316   : > { %2157 = vmatprep.subr.mxu0 %v2100_v33  ;;  %2294 = vmatprep.subr.mxu1 %v2241_v34 }
 0x317   : > { %2158 = vmatpush2.msra.mxu0 %v2099_v35  ;;  %2295 = vmatpush2.msra.mxu1 %v2240_v36 }
 0x318   : > { %2159 = vmatprep.subr.mxu0 %v2098_v37  ;;  %2296 = vmatprep.subr.mxu1 %v2239_v38 }
 0x319   : > { %2160 = vmatpush2.msra.mxu0 %v2097_v39  ;;  %2297 = vmatpush2.msra.mxu1 %v2238_v40 }
 0x31a   : > { %2161 = vmatprep.subr.mxu0 %v2096_v41  ;;  %2298 = vmatprep.subr.mxu1 %v2237_v42 }
 0x31b   : > { %2162 = vmatpush2.msra.mxu0 %v2095_v43  ;;  %2299 = vmatpush2.msra.mxu1 %v2236_v44 }
 0x31c   : > { %2163 = vmatprep.subr.mxu0 %v2094_v45  ;;  %2300 = vmatprep.subr.mxu1 %v2235_v46 }
 0x31d   : > { %2164 = vmatpush2.msra.mxu0 %v2093_v47  ;;  %2301 = vmatpush2.msra.mxu1 %v2234_v48 }
 0x31e   : > { %2165 = vmatprep.subr.mxu0 %v2092_v49  ;;  %2302 = vmatprep.subr.mxu1 %v2233_v50 }
 0x31f   : > { %2166 = vmatpush2.msra.mxu0 %v2091_v52  ;;  %2303 = vmatpush2.msra.mxu1 %v2232_v54 }
 0x320   : > { %2167 = vmatprep.subr.mxu0 %v2090_v55  ;;  %2304 = vmatprep.subr.mxu1 %v2231_v56 }
 0x321   : > { %2168 = vmatpush2.msra.mxu0 %v2089_v57  ;;  %2305 = vmatpush2.msra.mxu1 %v2230_v58 }
 0x322   : > { %2169 = vmatprep.subr.mxu0 %v2088_v59  ;;  %2306 = vmatprep.subr.mxu1 %v2229_v60 }
 0x323   : > { %2170 = vmatpush2.msra.mxu0 %v2087_v61  ;;  %2307 = vmatpush2.msra.mxu1 %v2228_v62 }
 0x324   : > { %2171 = vmatprep.subr.mxu0 %v2086_v0  ;;  %2308 = vmatprep.subr.mxu1 %v2227_v4 }
 0x325   : > { %2172 = vmatpush2.msra.mxu0 %v2085_v5  ;;  %2309 = vmatpush2.msra.mxu1 %v2226_v6  ;;  %v2389_v5 = vld [vmem:[#allocation10 + $0x8] sm:$0xff] }
 0x326   : > { %2173 = vmatprep.subr.mxu0 %v2084_v7  ;;  %2310 = vmatprep.subr.mxu1 %v2225_v8  ;;  %v2391_v7 = vld [vmem:[#allocation12 + $0x8] sm:$0xff]  ;;  %v2768_v8 = vld [vmem:[#allocation13 + $0x1e8] sm:$0xff] }
 0x327   : > { %2174 = vmatpush2.msra.mxu0 %v2083_v9  ;;  %2311 = vmatpush2.msra.mxu1 %v2224_v12  ;;  %v1345_v22 = vpop.f32.mrf.mxu0  ;;  %v2770_v9 = vld [vmem:[#allocation13 + $0x1f8] sm:$0xff]  ;;  %v2767_v12 = vld [vmem:[#allocation13 + $0x1e0] sm:$0xff] }
 0x328   : > { %2175 = vmatprep.subr.mxu0 %v2082_v13  ;;  %2312 = vmatprep.subr.mxu1 %v2223_v63  ;;  %v2769_v13 = vld [vmem:[#allocation13 + $0x1f0] sm:$0xff]  ;;  %v2764_v63 = vld [vmem:[#allocation13 + $0x1c8] sm:$0xff] }
 0x329   : > { %2176 = vmatpush2.msra.mxu0 %v2081_v1  ;;  %2313 = vmatpush2.msra.mxu1 %v2222_v2  ;;  %v1486_v24 = vpop.f32.mrf.mxu1  ;;  %v1347_v25 = vpop.f32.mrf.mxu0  ;;  %v2766_v1 = vld [vmem:[#allocation13 + $0x1d8] sm:$0xff]  ;;  %v2763_v2 = vld [vmem:[#allocation13 + $0x1c0] sm:$0xff] }
 0x32a   : > { %2177 = vmatprep.subr.mxu0 %v2080_v3  ;;  %2314 = vmatprep.subr.mxu1 %v2221_v10  ;;  %v2327_v28 = vrot.slane %v1486_v24, 7  ;;  %v2765_v3 = vld [vmem:[#allocation13 + $0x1d0] sm:$0xff]  ;;  %v2760_v10 = vld [vmem:[#allocation13 + $0x1a8] sm:$0xff]  ;;  %v2751_v24 = vld [vmem:[#allocation13 + $0x160] sm:$0xff] }
 0x32b   : > { %2178 = vmatpush2.msra.mxu0 %v2079_v11  ;;  %2315 = vmatpush2.msra.mxu1 %v2220_v14  ;;  %v1488_v27 = vpop.f32.mrf.mxu1  ;;  %v2762_v11 = vld [vmem:[#allocation13 + $0x1b8] sm:$0xff]  ;;  %v2759_v14 = vld [vmem:[#allocation13 + $0x1a0] sm:$0xff] }
 0x32c   : > { %2180 = vmatmul.mubr.f32.vlgmr.msra.gmra.mxu0 %v2111_v17  ;;  %2316 = vmatprep.subr.mxu1 %v2219_v15  ;;  %v2328_v31 = vrot.slane %v1488_v27, 7  ;;  %v2368_v34 = vsel %vm2367_vm3, %v1345_v22, %v2327_v28  ;;  %v2761_v15 = vld [vmem:[#allocation13 + $0x1b0] sm:$0xff]  ;;  %v2756_v17 = vld [vmem:[#allocation13 + $0x188] sm:$0xff]  ;;  %v2754_v22 = vld [vmem:[#allocation13 + $0x178] sm:$0xff] }
 0x32d   : > { %2317 = vmatpush2.msra.mxu1 %v2218_v18  ;;  %3551 = vmatprep.mubr.msk.f32.mxu0 %vm2392_vm2, %v4261_v20  ;;  %v2758_v18 = vld [vmem:[#allocation13 + $0x198] sm:$0xff]  ;;  %v2744_v28 = vld [vmem:[#allocation13 + $0x128] sm:$0xff] }
 0x32e   : > { %2319 = vmatmul.mubr.f32.vlgmr.msra.gmra.mxu1 %v2250_v19  ;;  %v2369_v39 = vsel %vm2367_vm3, %v1347_v25, %v2328_v31  ;;  %v2755_v19 = vld [vmem:[#allocation13 + $0x180] sm:$0xff]  ;;  %v2753_v25 = vld [vmem:[#allocation13 + $0x170] sm:$0xff]  ;;  %v2750_v27 = vld [vmem:[#allocation13 + $0x158] sm:$0xff] }
 0x32f   : > { %3556 = vmatprep.mubr.msk.f32.mxu1 %vm2392_vm2, %v4265_v21  ;;  %v2740_v31 = vld [vmem:[#allocation13 + $0x108] sm:$0xff] }
 0x368   : > { %v1625_v26 = vpop.f32.mrf.mxu0 }
 0x369   : > { %v2333_v53 = vrot.slane %v1625_v26, 6  ;;  %v2748_v26 = vld [vmem:[#allocation13 + $0x148] sm:$0xff] }
 0x36a   : > { %v1627_v51 = vpop.f32.mrf.mxu0 }
 0x36b   : > { %v1764_v23 = vpop.f32.mrf.mxu1  ;;  %v2334_v32 = vrot.slane %v1627_v51, 6  ;;  %v2371_v37 = vsel %vm2370_vm4, %v2368_v34, %v2333_v53  ;;  %v2749_v51 = vld [vmem:[#allocation13 + $0x150] sm:$0xff]  ;;  %v2743_v53 = vld [vmem:[#allocation13 + $0x120] sm:$0xff] }
 0x36c   : > { %v2339_v35 = vrot.slane %v1764_v23, 5  ;;  %v2747_v23 = vld [vmem:[#allocation13 + $0x140] sm:$0xff]  ;;  %v2741_v34 = vld [vmem:[#allocation13 + $0x110] sm:$0xff] }
 0x36d   : > { %v1766_v30 = vpop.f32.mrf.mxu1  ;;  %v2372_v41 = vsel %vm2370_vm4, %v2369_v39, %v2334_v32  ;;  %v2742_v32 = vld [vmem:[#allocation13 + $0x118] sm:$0xff]  ;;  %v2732_v39 = vld [vmem:[#allocation13 + $0xc8] sm:$0xff] }
 0x36e   : > { %v2340_v40 = vrot.slane %v1766_v30, 5  ;;  %v2374_v44 = vsel %vm2373_vm5, %v2371_v37, %v2339_v35  ;;  %v2745_v30 = vld [vmem:[#allocation13 + $0x130] sm:$0xff]  ;;  %v2736_v35 = vld [vmem:[#allocation13 + $0xe8] sm:$0xff]  ;;  %v2735_v37 = vld [vmem:[#allocation13 + $0xe0] sm:$0xff] }
 0x370   : > { %v2375_v47 = vsel %vm2373_vm5, %v2372_v41, %v2340_v40  ;;  %v2734_v40 = vld [vmem:[#allocation13 + $0xd8] sm:$0xff]  ;;  %v2731_v41 = vld [vmem:[#allocation13 + $0xc0] sm:$0xff] }
 0x3aa   : > { %v1903_v29 = vpop.f32.mrf.mxu0 }
 0x3ab   : > { %v2345_v38 = vrot.slane %v1903_v29, 4  ;;  %v2746_v29 = vld [vmem:[#allocation13 + $0x138] sm:$0xff] }
 0x3ac   : > { %v1905_v36 = vpop.f32.mrf.mxu0 }
 0x3ad   : > { %v2042_v33 = vpop.f32.mrf.mxu1  ;;  %v2346_v42 = vrot.slane %v1905_v36, 4  ;;  %v2377_v46 = vsel %vm2376_vm6, %v2374_v44, %v2345_v38  ;;  %v2738_v36 = vld [vmem:[#allocation13 + $0xf8] sm:$0xff]  ;;  %v2737_v38 = vld [vmem:[#allocation13 + $0xf0] sm:$0xff] }
 0x3ae   : > { %v2351_v45 = vrot.slane %v2042_v33, 3  ;;  %v2739_v33 = vld [vmem:[#allocation13 + $0x100] sm:$0xff]  ;;  %v2730_v44 = vld [vmem:[#allocation13 + $0xb8] sm:$0xff] }
 0x3af   : > { %v2044_v43 = vpop.f32.mrf.mxu1  ;;  %v2378_v50 = vsel %vm2376_vm6, %v2375_v47, %v2346_v42  ;;  %v2733_v42 = vld [vmem:[#allocation13 + $0xd0] sm:$0xff]  ;;  %v2724_v47 = vld [vmem:[#allocation13 + $0x88] sm:$0xff] }
 0x3b0   : > { %v2352_v48 = vrot.slane %v2044_v43, 3  ;;  %v2380_v54 = vsel %vm2379_vm7, %v2377_v46, %v2351_v45  ;;  %v2728_v43 = vld [vmem:[#allocation13 + $0xa8] sm:$0xff]  ;;  %v2727_v45 = vld [vmem:[#allocation13 + $0xa0] sm:$0xff]  ;;  %v2729_v46 = vld [vmem:[#allocation13 + $0xb0] sm:$0xff] }
 0x3b2   : > { %v2381_v60 = vsel %vm2379_vm7, %v2378_v50, %v2352_v48  ;;  %v2726_v48 = vld [vmem:[#allocation13 + $0x98] sm:$0xff]  ;;  %v2725_v50 = vld [vmem:[#allocation13 + $0x90] sm:$0xff] }
 0x3ec   : > { %v2181_v49 = vpop.f32.mrf.mxu0 }
 0x3ed   : > { %v2357_v52 = vrot.slane %v2181_v49, 2  ;;  %v2723_v49 = vld [vmem:[#allocation13 + $0x80] sm:$0xff] }
 0x3ee   : > { %v2183_v55 = vpop.f32.mrf.mxu0  ;;  %v2320_v56 = vpop.f32.mrf.mxu1 }
 0x3ef   : > { %v2383_v57 = vsel %vm2382_vm8, %v2380_v54, %v2357_v52  ;;  %v2358_v58 = vrot.slane %v2183_v55, 2  ;;  %v2363_v59 = vrot.slane %v2320_v56, 1  ;;  %v2720_v52 = vld [vmem:[#allocation13 + $0x68] sm:$0xff]  ;;  %v2722_v54 = vld [vmem:[#allocation13 + $0x78] sm:$0xff]  ;;  %v2719_v55 = vld [vmem:[#allocation13 + $0x60] sm:$0xff] }
 0x3f0   : > { %v2322_v61 = vpop.f32.mrf.mxu1  ;;  %v2721_v56 = vld [vmem:[#allocation13 + $0x70] sm:$0xff] }
 0x3f1   : > { %v2384_v62 = vsel %vm2382_vm8, %v2381_v60, %v2358_v58  ;;  %v2364_v0 = vrot.slane %v2322_v61, 1  ;;  %v2386_v4 = vsel %vm2385_vm9, %v2383_v57, %v2363_v59  ;;  %v2716_v57 = vld [vmem:[#allocation13 + $0x48] sm:$0xff]  ;;  %v2718_v58 = vld [vmem:[#allocation13 + $0x58] sm:$0xff]  ;;  %v2715_v59 = vld [vmem:[#allocation13 + $0x40] sm:$0xff] }
 0x3f2   : > { %3549 = vmatprep.subr.mxu0 %v2386_v4  ;;  %v2717_v60 = vld [vmem:[#allocation13 + $0x50] sm:$0xff]  ;;  %v2712_v61 = vld [vmem:[#allocation13 + $0x28] sm:$0xff] }
 0x3f3   : > { %3550 = vmatpush3.msra.mxu0 %v2386_v4  ;;  %v2387_v6 = vsel %vm2385_vm9, %v2384_v62, %v2364_v0  ;;  %v2714_v62 = vld [vmem:[#allocation13 + $0x38] sm:$0xff]  ;;  %v2711_v0 = vld [vmem:[#allocation13 + $0x20] sm:$0xff] }
 0x3f4   : > { %3554 = vmatprep.subr.mxu1 %v2387_v6  ;;  %3559 = vmatprep.subr.mxu0 %v2387_v6 }
 0x3f5   : > { %3552 = vmatmul.mubr.msk.f32.vlgmr.msra.gmra.mxu0 %vm2392_vm2, %v2389_v5  ;;  %3555 = vmatpush3.msra.mxu1 %v2387_v6 }
 0x3f6   : > { %3560 = vmatpush3.msra.mxu0 %v2387_v6  ;;  %3557 = vmatmul.mubr.msk.f32.vlgmr.msra.gmra.mxu1 %vm2392_vm2, %v2391_v7  ;;  %v2710_v6 = vld [vmem:[#allocation13 + $0x18] sm:$0xff] }
 0x3f7   : > { %3564 = vmatprep.subr.mxu1 %v2386_v4  ;;  %3561 = vmatprep.mubr.msk.f32.mxu0 %vm2392_vm2, %v4261_v20  ;;  %v2757_v20 = vld [vmem:[#allocation13 + $0x190] sm:$0xff] }
 0x3f8   : > { %3565 = vmatpush3.msra.mxu1 %v2386_v4  ;;  %3566 = vmatprep.mubr.msk.f32.mxu1 %vm2392_vm2, %v4265_v21  ;;  %v2752_v21 = vld [vmem:[#allocation13 + $0x168] sm:$0xff]  ;;  %v2713_v4 = vld [vmem:[#allocation13 + $0x30] sm:$0xff] }
 0x3f9   : > { %3562 = vmatmul.mubr.msk.f32.vlgmr.msra.gmra.mxu0 %vm2392_vm2, %v2389_v5  ;;  %2771 = vmatprep.subr.mxu0 %v2768_v8  ;;  %v2708_v5 = vld [vmem:[#allocation13 + $0x8] sm:$0xff]  ;;  %v2709_v8 = vld [vmem:[#allocation13 + $0x10] sm:$0xff] }
 0x3fa   : > { %3567 = vmatmul.mubr.msk.f32.vlgmr.msra.gmra.mxu1 %vm2392_vm2, %v2391_v7  ;;  %2848 = vmatprep.subr.mxu1 %v2770_v9  ;;  %v2707_v7 = vld [vmem:[#allocation13] sm:$0xff]  ;;  %v2986_v9 = vld [vmem:[#allocation15 + $0x1e8] sm:$0xff] }
 0x3fb   : > { %2772 = vmatpush1.msra.mxu0 %v2767_v12  ;;  %2849 = vmatpush1.msra.mxu1 %v2769_v13  ;;  %v2988_v12 = vld [vmem:[#allocation15 + $0x1f8] sm:$0xff] }
 0x3fc   : > { %2773 = vmatprep.subr.mxu0 %v2764_v63  ;;  %2850 = vmatprep.subr.mxu1 %v2766_v1 }
 0x3fd   : > { %2774 = vmatpush1.msra.mxu0 %v2763_v2  ;;  %2851 = vmatpush1.msra.mxu1 %v2765_v3 }
 0x3fe   : > { %2775 = vmatprep.subr.mxu0 %v2760_v10  ;;  %2852 = vmatprep.subr.mxu1 %v2762_v11  ;;  %v2985_v10 = vld [vmem:[#allocation15 + $0x1e0] sm:$0xff]  ;;  %v2987_v11 = vld [vmem:[#allocation15 + $0x1f0] sm:$0xff] }
 0x3ff   : > { %2776 = vmatpush1.msra.mxu0 %v2759_v14  ;;  %2853 = vmatpush1.msra.mxu1 %v2761_v15  ;;  %v2982_v14 = vld [vmem:[#allocation15 + $0x1c8] sm:$0xff]  ;;  %v2984_v15 = vld [vmem:[#allocation15 + $0x1d8] sm:$0xff] }
 0x400   : > { %2777 = vmatprep.subr.mxu0 %v2756_v17  ;;  %2854 = vmatprep.subr.mxu1 %v2758_v18  ;;  %v2981_v17 = vld [vmem:[#allocation15 + $0x1c0] sm:$0xff]  ;;  %v2983_v18 = vld [vmem:[#allocation15 + $0x1d0] sm:$0xff] }
 0x401   : > { %2778 = vmatpush1.msra.mxu0 %v2755_v19  ;;  %2855 = vmatpush1.msra.mxu1 %v2757_v20  ;;  %v2978_v19 = vld [vmem:[#allocation15 + $0x1a8] sm:$0xff]  ;;  %v2980_v20 = vld [vmem:[#allocation15 + $0x1b8] sm:$0xff] }
 0x402   : > { %2779 = vmatprep.subr.mxu0 %v2752_v21  ;;  %2856 = vmatprep.subr.mxu1 %v2754_v22  ;;  %v2977_v22 = vld [vmem:[#allocation15 + $0x1a0] sm:$0xff] }
 0x403   : > { %2780 = vmatpush1.msra.mxu0 %v2751_v24  ;;  %2857 = vmatpush1.msra.mxu1 %v2753_v25  ;;  %v2979_v24 = vld [vmem:[#allocation15 + $0x1b0] sm:$0xff]  ;;  %v2974_v25 = vld [vmem:[#allocation15 + $0x188] sm:$0xff] }
 0x404   : > { %2781 = vmatprep.subr.mxu0 %v2748_v26  ;;  %2858 = vmatprep.subr.mxu1 %v2750_v27  ;;  %v2976_v26 = vld [vmem:[#allocation15 + $0x198] sm:$0xff]  ;;  %v2973_v27 = vld [vmem:[#allocation15 + $0x180] sm:$0xff] }
 0x405   : > { %2782 = vmatpush1.msra.mxu0 %v2747_v23  ;;  %2859 = vmatpush1.msra.mxu1 %v2749_v51  ;;  %v2975_v23 = vld [vmem:[#allocation15 + $0x190] sm:$0xff]  ;;  %v2970_v51 = vld [vmem:[#allocation15 + $0x168] sm:$0xff] }
 0x406   : > { %2783 = vmatprep.subr.mxu0 %v2744_v28  ;;  %2860 = vmatprep.subr.mxu1 %v2746_v29  ;;  %v2972_v28 = vld [vmem:[#allocation15 + $0x178] sm:$0xff]  ;;  %v2969_v29 = vld [vmem:[#allocation15 + $0x160] sm:$0xff] }
 0x407   : > { %2784 = vmatpush1.msra.mxu0 %v2743_v53  ;;  %2861 = vmatpush1.msra.mxu1 %v2745_v30  ;;  %v2971_v53 = vld [vmem:[#allocation15 + $0x170] sm:$0xff]  ;;  %v2966_v30 = vld [vmem:[#allocation15 + $0x148] sm:$0xff] }
 0x408   : > { %2785 = vmatprep.subr.mxu0 %v2740_v31  ;;  %2862 = vmatprep.subr.mxu1 %v2742_v32  ;;  %v2968_v31 = vld [vmem:[#allocation15 + $0x158] sm:$0xff]  ;;  %v2965_v32 = vld [vmem:[#allocation15 + $0x140] sm:$0xff] }
 0x409   : > { %2786 = vmatpush1.msra.mxu0 %v2739_v33  ;;  %2863 = vmatpush1.msra.mxu1 %v2741_v34  ;;  %v2967_v33 = vld [vmem:[#allocation15 + $0x150] sm:$0xff]  ;;  %v2962_v34 = vld [vmem:[#allocation15 + $0x128] sm:$0xff] }
 0x40a   : > { %2787 = vmatprep.subr.mxu0 %v2736_v35  ;;  %2864 = vmatprep.subr.mxu1 %v2738_v36  ;;  %v2964_v35 = vld [vmem:[#allocation15 + $0x138] sm:$0xff]  ;;  %v2961_v36 = vld [vmem:[#allocation15 + $0x120] sm:$0xff] }
 0x40b   : > { %2788 = vmatpush1.msra.mxu0 %v2735_v37  ;;  %2865 = vmatpush1.msra.mxu1 %v2737_v38  ;;  %v2963_v37 = vld [vmem:[#allocation15 + $0x130] sm:$0xff]  ;;  %v2958_v38 = vld [vmem:[#allocation15 + $0x108] sm:$0xff] }
 0x40c   : > { %2789 = vmatprep.subr.mxu0 %v2732_v39  ;;  %2866 = vmatprep.subr.mxu1 %v2734_v40  ;;  %v2960_v39 = vld [vmem:[#allocation15 + $0x118] sm:$0xff]  ;;  %v2957_v40 = vld [vmem:[#allocation15 + $0x100] sm:$0xff] }
 0x40d   : > { %2790 = vmatpush1.msra.mxu0 %v2731_v41  ;;  %2867 = vmatpush1.msra.mxu1 %v2733_v42  ;;  %v2959_v41 = vld [vmem:[#allocation15 + $0x110] sm:$0xff]  ;;  %v2954_v42 = vld [vmem:[#allocation15 + $0xe8] sm:$0xff] }
 0x40e   : > { %2791 = vmatprep.subr.mxu0 %v2728_v43  ;;  %2868 = vmatprep.subr.mxu1 %v2730_v44  ;;  %v2956_v43 = vld [vmem:[#allocation15 + $0xf8] sm:$0xff]  ;;  %v2953_v44 = vld [vmem:[#allocation15 + $0xe0] sm:$0xff] }
 0x40f   : > { %2792 = vmatpush1.msra.mxu0 %v2727_v45  ;;  %2869 = vmatpush1.msra.mxu1 %v2729_v46  ;;  %v2955_v45 = vld [vmem:[#allocation15 + $0xf0] sm:$0xff]  ;;  %v2950_v46 = vld [vmem:[#allocation15 + $0xc8] sm:$0xff] }
 0x410   : > { %2793 = vmatprep.subr.mxu0 %v2724_v47  ;;  %2870 = vmatprep.subr.mxu1 %v2726_v48  ;;  %v2952_v47 = vld [vmem:[#allocation15 + $0xd8] sm:$0xff]  ;;  %v2949_v48 = vld [vmem:[#allocation15 + $0xc0] sm:$0xff] }
 0x411   : > { %2794 = vmatpush1.msra.mxu0 %v2723_v49  ;;  %2871 = vmatpush1.msra.mxu1 %v2725_v50  ;;  %v2951_v49 = vld [vmem:[#allocation15 + $0xd0] sm:$0xff]  ;;  %v2946_v50 = vld [vmem:[#allocation15 + $0xa8] sm:$0xff] }
 0x412   : > { %2795 = vmatprep.subr.mxu0 %v2720_v52  ;;  %2872 = vmatprep.subr.mxu1 %v2722_v54  ;;  %v2948_v52 = vld [vmem:[#allocation15 + $0xb8] sm:$0xff]  ;;  %v2945_v54 = vld [vmem:[#allocation15 + $0xa0] sm:$0xff] }
 0x413   : > { %2796 = vmatpush1.msra.mxu0 %v2719_v55  ;;  %2873 = vmatpush1.msra.mxu1 %v2721_v56  ;;  %v2947_v55 = vld [vmem:[#allocation15 + $0xb0] sm:$0xff]  ;;  %v2942_v56 = vld [vmem:[#allocation15 + $0x88] sm:$0xff] }
 0x414   : > { %2797 = vmatprep.subr.mxu0 %v2716_v57  ;;  %2874 = vmatprep.subr.mxu1 %v2718_v58  ;;  %v2944_v57 = vld [vmem:[#allocation15 + $0x98] sm:$0xff]  ;;  %v2941_v58 = vld [vmem:[#allocation15 + $0x80] sm:$0xff] }
 0x415   : > { %2798 = vmatpush1.msra.mxu0 %v2715_v59  ;;  %2875 = vmatpush1.msra.mxu1 %v2717_v60  ;;  %v2943_v59 = vld [vmem:[#allocation15 + $0x90] sm:$0xff]  ;;  %v2938_v60 = vld [vmem:[#allocation15 + $0x68] sm:$0xff] }
 0x416   : > { %2835 = vmatprep.mubr.f32.mxu0 %v3953_v16  ;;  %2912 = vmatprep.mubr.f32.mxu1 %v3953_v16 }
 0x417   : > { %2799 = vmatprep.subr.mxu0 %v2712_v61  ;;  %2876 = vmatprep.subr.mxu1 %v2714_v62  ;;  %v2940_v61 = vld [vmem:[#allocation15 + $0x78] sm:$0xff]  ;;  %v2937_v62 = vld [vmem:[#allocation15 + $0x60] sm:$0xff] }
 0x418   : > { %2800 = vmatpush1.msra.mxu0 %v2711_v0  ;;  %2877 = vmatpush1.msra.mxu1 %v2713_v4  ;;  %v2939_v0 = vld [vmem:[#allocation15 + $0x70] sm:$0xff]  ;;  %v2934_v4 = vld [vmem:[#allocation15 + $0x48] sm:$0xff] }
 0x419   : > { %2801 = vmatprep.subr.mxu0 %v2708_v5  ;;  %2878 = vmatprep.subr.mxu1 %v2710_v6  ;;  %v2936_v5 = vld [vmem:[#allocation15 + $0x58] sm:$0xff] }
 0x41a   : > { %2802 = vmatpush1.msra.mxu0 %v2707_v7  ;;  %2879 = vmatpush1.msra.mxu1 %v2709_v8  ;;  %v2933_v8 = vld [vmem:[#allocation15 + $0x40] sm:$0xff] }
 0x41b   : > { %2989 = vmatprep.subr.mxu0 %v2986_v9  ;;  %3066 = vmatprep.subr.mxu1 %v2988_v12  ;;  %v2935_v9 = vld [vmem:[#allocation15 + $0x50] sm:$0xff]  ;;  %v2930_v12 = vld [vmem:[#allocation15 + $0x28] sm:$0xff] }
 0x4b5   : > { %v3553_v13 = vpop.f32.mrf.mxu0 }
 0x4b6   : > { %v3558_v63 = vpop.f32.mrf.mxu1 }
 0x4b7   : > { %v2465_v1 = vpop.f32.mrf.mxu0  ;;  %v2556_v21 = vsub.f32 %v3553_v13, %v3558_v63  ;;  %v2932_v13 = vld [vmem:[#allocation15 + $0x38] sm:$0xff]  ;;  %v2929_v63 = vld [vmem:[#allocation15 + $0x20] sm:$0xff] }
 0x4b8   : > { %v2546_v2 = vpop.f32.mrf.mxu1 }
 0x4b9   : > { %v2555_v3 = vsub.f32 %v2465_v1, %v2546_v2  ;;  %v3563_v6 = vpop.f32.mrf.mxu0  ;;  %v2931_v1 = vld [vmem:[#allocation15 + $0x30] sm:$0xff]  ;;  %v2926_v2 = vld [vmem:[#allocation15 + $0x8] sm:$0xff] }
 0x4ba   : > { %v3568_v7 = vpop.f32.mrf.mxu1 }
 0x4bb   : > { %2836 = vmatmul.mubr.f32.vlgmr.msra.gmra.mxu0 %v2555_v3  ;;  %2913 = vmatmul.mubr.f32.vlgmr.msra.gmra.mxu1 %v2555_v3  ;;  %v2928_v3 = vld [vmem:[#allocation15 + $0x18] sm:$0xff] }
 0x4bc   : > { %2990 = vmatpush1.msra.mxu0 %v2985_v10  ;;  %3067 = vmatpush1.msra.mxu1 %v2987_v11  ;;  %v2623_v10 = vpop.f32.mrf.mxu0  ;;  %v2698_v11 = vpop.f32.mrf.mxu1 }
 0x4bd   : > { %2991 = vmatprep.subr.mxu0 %v2982_v14  ;;  %3068 = vmatprep.subr.mxu1 %v2984_v15  ;;  %v2925_v14 = vld [vmem:[#allocation15] sm:$0xff]  ;;  %v2927_v15 = vld [vmem:[#allocation15 + $0x10] sm:$0xff] }
 0x4be   : > { %2992 = vmatpush1.msra.mxu0 %v2981_v17  ;;  %3069 = vmatpush1.msra.mxu1 %v2983_v18  ;;  %v2699_v17 = vadd.f32 %v2698_v11, %v2623_v10  ;;  %v2704_v18 = vadd.f32 %v3568_v7, %v3563_v6 }
 0x4bf   : > { %2841 = vmatprep.mubr.f32.mxu0 %v3953_v16  ;;  %2918 = vmatprep.mubr.f32.mxu1 %v3953_v16 }
 0x4c0   : > { %2993 = vmatprep.subr.mxu0 %v2978_v19  ;;  %3070 = vmatprep.subr.mxu1 %v2980_v20 }
 0x4c1   : > { %2842 = vmatmul.mubr.f32.gmra.mxu0 %v2556_v21  ;;  %2919 = vmatmul.mubr.f32.gmra.mxu1 %v2556_v21 }
 0x4c2   : > { %2994 = vmatpush1.msra.mxu0 %v2977_v22  ;;  %3071 = vmatpush1.msra.mxu1 %v2979_v24 }
 0x4c3   : > { %2995 = vmatprep.subr.mxu0 %v2974_v25  ;;  %3072 = vmatprep.subr.mxu1 %v2976_v26 }
 0x4c4   : > { %2996 = vmatpush1.msra.mxu0 %v2973_v27  ;;  %3073 = vmatpush1.msra.mxu1 %v2975_v23 }
 0x4c5   : > { %2997 = vmatprep.subr.mxu0 %v2970_v51  ;;  %3074 = vmatprep.subr.mxu1 %v2972_v28 }
 0x4c6   : > { %2998 = vmatpush1.msra.mxu0 %v2969_v29  ;;  %3075 = vmatpush1.msra.mxu1 %v2971_v53 }
 0x4c7   : > { %2999 = vmatprep.subr.mxu0 %v2966_v30  ;;  %3076 = vmatprep.subr.mxu1 %v2968_v31 }
 0x4c8   : > { %3000 = vmatpush1.msra.mxu0 %v2965_v32  ;;  %3077 = vmatpush1.msra.mxu1 %v2967_v33 }
 0x4c9   : > { %3001 = vmatprep.subr.mxu0 %v2962_v34  ;;  %3078 = vmatprep.subr.mxu1 %v2964_v35 }
 0x4ca   : > { %3002 = vmatpush1.msra.mxu0 %v2961_v36  ;;  %3079 = vmatpush1.msra.mxu1 %v2963_v37 }
 0x4cb   : > { %3003 = vmatprep.subr.mxu0 %v2958_v38  ;;  %3080 = vmatprep.subr.mxu1 %v2960_v39 }
 0x4cc   : > { %3004 = vmatpush1.msra.mxu0 %v2957_v40  ;;  %3081 = vmatpush1.msra.mxu1 %v2959_v41 }
 0x4cd   : > { %3005 = vmatprep.subr.mxu0 %v2954_v42  ;;  %3082 = vmatprep.subr.mxu1 %v2956_v43 }
 0x4ce   : > { %3006 = vmatpush1.msra.mxu0 %v2953_v44  ;;  %3083 = vmatpush1.msra.mxu1 %v2955_v45 }
 0x4cf   : > { %3007 = vmatprep.subr.mxu0 %v2950_v46  ;;  %3084 = vmatprep.subr.mxu1 %v2952_v47 }
 0x4d0   : > { %3008 = vmatpush1.msra.mxu0 %v2949_v48  ;;  %3085 = vmatpush1.msra.mxu1 %v2951_v49 }
 0x4d1   : > { %3009 = vmatprep.subr.mxu0 %v2946_v50  ;;  %3086 = vmatprep.subr.mxu1 %v2948_v52 }
 0x4d2   : > { %3010 = vmatpush1.msra.mxu0 %v2945_v54  ;;  %3087 = vmatpush1.msra.mxu1 %v2947_v55 }
 0x4d3   : > { %3011 = vmatprep.subr.mxu0 %v2942_v56  ;;  %3088 = vmatprep.subr.mxu1 %v2944_v57 }
 0x4d4   : > { %3012 = vmatpush1.msra.mxu0 %v2941_v58  ;;  %3089 = vmatpush1.msra.mxu1 %v2943_v59 }
 0x4d5   : > { %3013 = vmatprep.subr.mxu0 %v2938_v60  ;;  %3090 = vmatprep.subr.mxu1 %v2940_v61 }
 0x4d6   : > { %3014 = vmatpush1.msra.mxu0 %v2937_v62  ;;  %3091 = vmatpush1.msra.mxu1 %v2939_v0 }
 0x4d7   : > { %3015 = vmatprep.subr.mxu0 %v2934_v4  ;;  %3092 = vmatprep.subr.mxu1 %v2936_v5 }
 0x4d8   : > { %3016 = vmatpush1.msra.mxu0 %v2933_v8  ;;  %3093 = vmatpush1.msra.mxu1 %v2935_v9 }
 0x4d9   : > { %3017 = vmatprep.subr.mxu0 %v2930_v12  ;;  %3094 = vmatprep.subr.mxu1 %v2932_v13 }
 0x4da   : > { %3018 = vmatpush1.msra.mxu0 %v2929_v63  ;;  %3095 = vmatpush1.msra.mxu1 %v2931_v1 }
 0x4db   : > { %3019 = vmatprep.subr.mxu0 %v2926_v2  ;;  %3096 = vmatprep.subr.mxu1 %v2928_v3 }
 0x4dc   : > { %3020 = vmatpush1.msra.mxu0 %v2925_v14  ;;  %3053 = vmatprep.mubr.f32.mxu0 %v3953_v16 }
 0x4dd   : > { %3097 = vmatpush1.msra.mxu1 %v2927_v15  ;;  %3130 = vmatprep.mubr.f32.mxu1 %v3953_v16 }
 0x4de   : > { %3054 = vmatmul.mubr.f32.vlgmr.msra.gmra.mxu0 %v2699_v17  ;;  %3131 = vmatmul.mubr.f32.vlgmr.msra.gmra.mxu1 %v2699_v17 }
 0x4df   : > { %3059 = vmatprep.mubr.f32.mxu0 %v3953_v16  ;;  %3136 = vmatprep.mubr.f32.mxu1 %v3953_v16 }
 0x4e2   : > { %3060 = vmatmul.mubr.f32.gmra.mxu0 %v2704_v18  ;;  %3137 = vmatmul.mubr.f32.gmra.mxu1 %v2704_v18 }
 0x57b   : > { %v2837_v19 = vpop.f32.mrf.mxu0  ;;  %v2914_v20 = vpop.f32.mrf.mxu1 }
 0x57d   : > { %v2839_v21 = vpop.f32.mrf.mxu0  ;;  %v2916_v22 = vpop.f32.mrf.mxu1 }
 0x581   : > { %v2843_v24 = vpop.f32.mrf.mxu0  ;;  %v2920_v25 = vpop.f32.mrf.mxu1 }
 0x583   : > { %v2845_v26 = vpop.f32.mrf.mxu0  ;;  %v2922_v27 = vpop.f32.mrf.mxu1 }
 0x59e   : > { %v3055_v23 = vpop.f32.mrf.mxu0  ;;  %v3132_v51 = vpop.f32.mrf.mxu1 }
 0x59f   : > { %v3143_v28 = vsub.f32 %v2837_v19, %v3055_v23  ;;  %v3145_v16 = vsub.f32 %v2914_v20, %v3132_v51 }
 0x5a0   : > { %v3057_v29 = vpop.f32.mrf.mxu0  ;;  %v3134_v53 = vpop.f32.mrf.mxu1 }
 0x5a1   : > { %3151 = vst [vmem:[%s486_s26] sm:$0xff] %v3143_v28  ;;  %3153 = vst [vmem:[%s486_s26 + $0x10] sm:$0xff] %v3145_v16  ;;  %v3144_v30 = vsub.f32 %v2839_v21, %v3057_v29  ;;  %v3146_v31 = vsub.f32 %v2916_v22, %v3134_v53 }
 0x5a2   : > { %v3061_v32 = vpop.f32.mrf.mxu0  ;;  %v3138_v33 = vpop.f32.mrf.mxu1 }
 0x5a3   : > { %3152 = vst [vmem:[%s486_s26 + $0x8] sm:$0xff] %v3144_v30  ;;  %3154 = vst [vmem:[%s486_s26 + $0x18] sm:$0xff] %v3146_v31  ;;  %v3147_v34 = vsub.f32 %v2843_v24, %v3061_v32  ;;  %v3149_v35 = vsub.f32 %v2920_v25, %v3138_v33 }
 0x5a4   : > { %v3063_v36 = vpop.f32.mrf.mxu0  ;;  %v3140_v37 = vpop.f32.mrf.mxu1 }
 0x5a5   : > { %3155 = vst [vmem:[%s486_s26 + $0x20] sm:$0xff] %v3147_v34  ;;  %3157 = vst [vmem:[%s486_s26 + $0x30] sm:$0xff] %v3149_v35  ;;  %v3148_v38 = vsub.f32 %v2845_v26, %v3063_v36  ;;  %v3150_v39 = vsub.f32 %v2922_v27, %v3140_v37 }
 0x5a7   : > { %3156 = vst [vmem:[%s486_s26 + $0x28] sm:$0xff] %v3148_v38  ;;  %3158 = vst [vmem:[%s486_s26 + $0x38] sm:$0xff] %v3150_v39 }
 0x5a8 PF: > { %s25_s13 = sadd.s32 1, %s3936_s13  }
 0x5a9   : > { %p22_p3 = scmp.ge.s32.totalorder %s25_s13, 4  }
 0x5ab   :  { %24 = sbr.rel (!%p22_p3) target bundleno = 5 (0x5), region = 127 }
 0x5b0   :  { %3180 = vsyncpa [#allocation3], 1 }
 0x5b1   :  { %3182 = vsyncpa [#allocation3 + $0x1], 1 }
 0x5b2   :  { %3183 = vsyncpa [#allocation5], 1 }
 0x5b3   :  { %3184 = vsyncpa [#allocation8], 1 }
 0x5b4   :  { %3185 = vsyncpa [#allocation11], 1 }
 0x5b5   :  { %3186 = vsyncpa [#allocation14], 1 }

// kernel: fno2d_forward.13
= control target key start
LH: loop header
LB: loop body
LE: loop exit
PB: predicated region body
PF: predicated region fallthrough
CT: control target
= control target key end

     0   :  { %s3411_s13 = smov 0   ;;  %s5881_s0 = inlined_call_operand.vmem [shape: f32[2,16,512], index: 0, kind: input, shape index: {}]   ;;  %s5882_s1 = inlined_call_operand.vmem [shape: f32[512,128], index: 1, kind: input, shape index: {}]   ;;  %s5883_s2 = inlined_call_operand.vmem [shape: f32[512,128], index: 2, kind: input, shape index: {}]   ;;  %s5884_s3 = inlined_call_operand.vmem [shape: f32[8,16], index: 3, kind: input, shape index: {}]   ;;  %s5885_s4 = inlined_call_operand.vmem [shape: f32[8,16], index: 4, kind: input, shape index: {}]   ;;  %s5886_s5 = inlined_call_operand.vmem [shape: f32[2048,256], index: 5, kind: input, shape index: {}]   ;;  %s5887_s6 = inlined_call_operand.vmem [shape: f32[16,8], index: 6, kind: input, shape index: {}]   ;;  %s5888_s7 = inlined_call_operand.vmem [shape: f32[16,8], index: 7, kind: input, shape index: {}]   ;;  %s5889_s8 = inlined_call_operand.vmem [shape: f32[128,512], index: 8, kind: input, shape index: {}]   ;;  %s5890_s9 = inlined_call_operand.vmem [shape: f32[128,512], index: 9, kind: input, shape index: {}]   ;;  %s5891_s10 = inlined_call_operand.vmem [shape: f32[2,16,512], index: 10, kind: output, shape index: {}]  }
   0x1 LB: > { %s3087_s14 = sadd.s32 4294967295, %s3352_s13   ;;  %p3091_p0 = scmp.ge.s32.totalorder %s3352_s13, 1  ;;  %s3352_s13 = sphi %s3411_s13, %s20_s13  }
   0x2   : > { %p312_p1 = scmp.lt.s32.totalorder %s3352_s13, 3 }
   0x4   : > { %p313_p2 = pnand %p3091_p0, %p312_p1 }
   0x5   : > { %p3529_p3 = scmp.lt.s32.totalorder (!%p313_p2), %s3087_s14, 1 }
   0x6   : > { %316 = sbr.rel (%p313_p2) target bundleno = 1324 (0x52c), region = 60 }
   0xb   : > { %v399_v0 = vld [vmem:[%s5882_s1 + $0xf8] sm:$0xff]  ;;  %v398_v4 = vld [vmem:[%s5882_s1 + $0xf0] sm:$0xff]  ;;  %v397_v8 = vld [vmem:[%s5882_s1 + $0xe8] sm:$0xff]  ;;  %s5894_s14 = smov (!%p3529_p3, %s3087_s14), 1  ;;  %vm3355_vm0 = vmmov 0   ;;  %vm800_vm1 = vcmask 130048  }
   0xc   : > { %v431_v1 = vld [vmem:[%s5882_s1 + $0x1f8] sm:$0xff]  ;;  %3112 = vmatprep.subr.mxu0 %v399_v0  ;;  %v430_v5 = vld [vmem:[%s5882_s1 + $0x1f0] sm:$0xff]  ;;  %v429_v9 = vld [vmem:[%s5882_s1 + $0x1e8] sm:$0xff]  ;;  %s3110_s30 = sshll.u32 %s5894_s14, 6  ;;  %vm2265_vm2 = vcmask 64512   ;;  %vm2240_vm3 = vcmask 1040384  }
   0xd   : > { %v383_v2 = vld [vmem:[%s5882_s1 + $0x78] sm:$0xff]  ;;  %3150 = vmatprep.subr.mxu1 %v431_v1  ;;  %v382_v6 = vld [vmem:[%s5882_s1 + $0x70] sm:$0xff]  ;;  %v381_v10 = vld [vmem:[%s5882_s1 + $0x68] sm:$0xff]  ;;  %s3611_s27 = scalar_lea.vmem %s5881_s0, %s3110_s30  ;;  %vm2243_vm4 = vcmask 1041408   ;;  %vm2246_vm5 = vcmask 1042432   ;;  %vm2249_vm6 = vcmask 1043456   ;;  %s359_s19 = scalar_lea.vmem %s5891_s10, %s3110_s30 }
   0xe   : > { %v415_v3 = vld [vmem:[%s5882_s1 + $0x178] sm:$0xff]  ;;  %3113 = vmatpush3.msra.mxu0 %v383_v2  ;;  %v414_v7 = vld [vmem:[%s5882_s1 + $0x170] sm:$0xff]  ;;  %v413_v11 = vld [vmem:[%s5882_s1 + $0x168] sm:$0xff]  ;;  %vm2252_vm7 = vcmask 1044480   ;;  %vm2255_vm8 = vcmask 1045504   ;;  %vm2258_vm9 = vcmask 1046528  }
   0xf   : > { %3151 = vmatpush3.msra.mxu1 %v415_v3  ;;  %3114 = vmatprep.subr.mxu0 %v398_v4  ;;  %v396_v12 = vld [vmem:[%s5882_s1 + $0xe0] sm:$0xff]  ;;  %v395_v16 = vld [vmem:[%s5882_s1 + $0xd8] sm:$0xff]  ;;  %v394_v20 = vld [vmem:[%s5882_s1 + $0xd0] sm:$0xff] }
  0x10   : > { %3152 = vmatprep.subr.mxu1 %v430_v5  ;;  %3115 = vmatpush3.msra.mxu0 %v382_v6  ;;  %v428_v13 = vld [vmem:[%s5882_s1 + $0x1e0] sm:$0xff]  ;;  %v427_v17 = vld [vmem:[%s5882_s1 + $0x1d8] sm:$0xff]  ;;  %v426_v21 = vld [vmem:[%s5882_s1 + $0x1d0] sm:$0xff] }
  0x11   : > { %3153 = vmatpush3.msra.mxu1 %v414_v7  ;;  %3116 = vmatprep.subr.mxu0 %v397_v8  ;;  %v380_v14 = vld [vmem:[%s5882_s1 + $0x60] sm:$0xff]  ;;  %v379_v18 = vld [vmem:[%s5882_s1 + $0x58] sm:$0xff]  ;;  %v378_v22 = vld [vmem:[%s5882_s1 + $0x50] sm:$0xff] }
  0x12   : > { %3154 = vmatprep.subr.mxu1 %v429_v9  ;;  %v412_v15 = vld [vmem:[%s5882_s1 + $0x160] sm:$0xff]  ;;  %3117 = vmatpush3.msra.mxu0 %v381_v10  ;;  %v411_v19 = vld [vmem:[%s5882_s1 + $0x158] sm:$0xff]  ;;  %v410_v23 = vld [vmem:[%s5882_s1 + $0x150] sm:$0xff] }
  0x13   : > { %3155 = vmatpush3.msra.mxu1 %v413_v11  ;;  %3118 = vmatprep.subr.mxu0 %v396_v12  ;;  %v393_v24 = vld [vmem:[%s5882_s1 + $0xc8] sm:$0xff]  ;;  %v392_v28 = vld [vmem:[%s5882_s1 + $0xc0] sm:$0xff]  ;;  %v391_v32 = vld [vmem:[%s5882_s1 + $0xb8] sm:$0xff] }
  0x14   : > { %3156 = vmatprep.subr.mxu1 %v428_v13  ;;  %3119 = vmatpush3.msra.mxu0 %v380_v14  ;;  %v425_v25 = vld [vmem:[%s5882_s1 + $0x1c8] sm:$0xff]  ;;  %v424_v29 = vld [vmem:[%s5882_s1 + $0x1c0] sm:$0xff]  ;;  %v423_v33 = vld [vmem:[%s5882_s1 + $0x1b8] sm:$0xff] }
  0x15   : > { %3157 = vmatpush3.msra.mxu1 %v412_v15  ;;  %3120 = vmatprep.subr.mxu0 %v395_v16  ;;  %v377_v26 = vld [vmem:[%s5882_s1 + $0x48] sm:$0xff]  ;;  %v376_v30 = vld [vmem:[%s5882_s1 + $0x40] sm:$0xff]  ;;  %v375_v34 = vld [vmem:[%s5882_s1 + $0x38] sm:$0xff] }
  0x16   : > { %3158 = vmatprep.subr.mxu1 %v427_v17  ;;  %3121 = vmatpush3.msra.mxu0 %v379_v18  ;;  %v409_v27 = vld [vmem:[%s5882_s1 + $0x148] sm:$0xff]  ;;  %v408_v31 = vld [vmem:[%s5882_s1 + $0x140] sm:$0xff]  ;;  %v407_v35 = vld [vmem:[%s5882_s1 + $0x138] sm:$0xff] }
  0x17   : > { %3159 = vmatpush3.msra.mxu1 %v411_v19  ;;  %3122 = vmatprep.subr.mxu0 %v394_v20  ;;  %v390_v36 = vld [vmem:[%s5882_s1 + $0xb0] sm:$0xff]  ;;  %v389_v40 = vld [vmem:[%s5882_s1 + $0xa8] sm:$0xff]  ;;  %v388_v44 = vld [vmem:[%s5882_s1 + $0xa0] sm:$0xff] }
  0x18   : > { %3160 = vmatprep.subr.mxu1 %v426_v21  ;;  %3123 = vmatpush3.msra.mxu0 %v378_v22  ;;  %v422_v37 = vld [vmem:[%s5882_s1 + $0x1b0] sm:$0xff]  ;;  %v421_v41 = vld [vmem:[%s5882_s1 + $0x1a8] sm:$0xff]  ;;  %v420_v45 = vld [vmem:[%s5882_s1 + $0x1a0] sm:$0xff] }
  0x19   : > { %3161 = vmatpush3.msra.mxu1 %v410_v23  ;;  %3124 = vmatprep.subr.mxu0 %v393_v24  ;;  %v374_v38 = vld [vmem:[%s5882_s1 + $0x30] sm:$0xff]  ;;  %v373_v42 = vld [vmem:[%s5882_s1 + $0x28] sm:$0xff]  ;;  %v372_v46 = vld [vmem:[%s5882_s1 + $0x20] sm:$0xff] }
  0x1a   : > { %3162 = vmatprep.subr.mxu1 %v425_v25  ;;  %3125 = vmatpush3.msra.mxu0 %v377_v26  ;;  %v406_v39 = vld [vmem:[%s5882_s1 + $0x130] sm:$0xff]  ;;  %v405_v43 = vld [vmem:[%s5882_s1 + $0x128] sm:$0xff]  ;;  %v404_v47 = vld [vmem:[%s5882_s1 + $0x120] sm:$0xff] }
  0x1b   : > { %3163 = vmatpush3.msra.mxu1 %v409_v27  ;;  %3126 = vmatprep.subr.mxu0 %v392_v28  ;;  %v387_v48 = vld [vmem:[%s5882_s1 + $0x98] sm:$0xff]  ;;  %v386_v52 = vld [vmem:[%s5882_s1 + $0x90] sm:$0xff]  ;;  %v385_v56 = vld [vmem:[%s5882_s1 + $0x88] sm:$0xff] }
  0x1c   : > { %3164 = vmatprep.subr.mxu1 %v424_v29  ;;  %3127 = vmatpush3.msra.mxu0 %v376_v30  ;;  %v419_v49 = vld [vmem:[%s5882_s1 + $0x198] sm:$0xff]  ;;  %v418_v53 = vld [vmem:[%s5882_s1 + $0x190] sm:$0xff]  ;;  %v417_v57 = vld [vmem:[%s5882_s1 + $0x188] sm:$0xff] }
  0x1d   : > { %3165 = vmatpush3.msra.mxu1 %v408_v31  ;;  %3128 = vmatprep.subr.mxu0 %v391_v32  ;;  %v371_v50 = vld [vmem:[%s5882_s1 + $0x18] sm:$0xff]  ;;  %v370_v54 = vld [vmem:[%s5882_s1 + $0x10] sm:$0xff]  ;;  %v369_v58 = vld [vmem:[%s5882_s1 + $0x8] sm:$0xff] }
  0x1e   : > { %3166 = vmatprep.subr.mxu1 %v423_v33  ;;  %3129 = vmatpush3.msra.mxu0 %v375_v34  ;;  %v403_v51 = vld [vmem:[%s5882_s1 + $0x118] sm:$0xff]  ;;  %v402_v55 = vld [vmem:[%s5882_s1 + $0x110] sm:$0xff]  ;;  %v401_v59 = vld [vmem:[%s5882_s1 + $0x108] sm:$0xff] }
  0x1f   : > { %3167 = vmatpush3.msra.mxu1 %v407_v35  ;;  %3130 = vmatprep.subr.mxu0 %v390_v36  ;;  %v384_v60 = vld [vmem:[%s5882_s1 + $0x80] sm:$0xff]  ;;  %v3629_v63 = vld [vmem:[%s3611_s27 + $0x8] sm:$0xff]  ;;  %v3635_v1 = vld [vmem:[%s3611_s27 + $0x18] sm:$0xff] }
  0x20   : > { %3168 = vmatprep.subr.mxu1 %v422_v37  ;;  %3131 = vmatpush3.msra.mxu0 %v374_v38  ;;  %v416_v61 = vld [vmem:[%s5882_s1 + $0x180] sm:$0xff]  ;;  %v3641_v3 = vld [vmem:[%s3611_s27 + $0x10] sm:$0xff]  ;;  %v613_v4 = vld [vmem:[%s5883_s2 + $0xf8] sm:$0xff] }
  0x21   : > { %3169 = vmatpush3.msra.mxu1 %v406_v39  ;;  %3132 = vmatprep.subr.mxu0 %v389_v40  ;;  %v368_v62 = vld [vmem:[%s5882_s1] sm:$0xff]  ;;  %v645_v5 = vld [vmem:[%s5883_s2 + $0x1f8] sm:$0xff]  ;;  %v612_v8 = vld [vmem:[%s5883_s2 + $0xf0] sm:$0xff] }
  0x22   : > { %3170 = vmatprep.subr.mxu1 %v421_v41  ;;  %3133 = vmatpush3.msra.mxu0 %v373_v42  ;;  %v400_v0 = vld [vmem:[%s5882_s1 + $0x100] sm:$0xff]  ;;  %v597_v6 = vld [vmem:[%s5883_s2 + $0x78] sm:$0xff]  ;;  %v644_v9 = vld [vmem:[%s5883_s2 + $0x1f0] sm:$0xff] }
  0x23   : > { %3171 = vmatpush3.msra.mxu1 %v405_v43  ;;  %3134 = vmatprep.subr.mxu0 %v388_v44  ;;  %v3638_v2 = vld [vmem:[%s3611_s27] sm:$0xff]  ;;  %v629_v7 = vld [vmem:[%s5883_s2 + $0x178] sm:$0xff]  ;;  %v3666_v10 = vld [vmem:[%s3611_s27 + $0x28] sm:$0xff] }
  0x24   : > { %3172 = vmatprep.subr.mxu1 %v420_v45  ;;  %3135 = vmatpush3.msra.mxu0 %v372_v46  ;;  %v3669_v11 = vld [vmem:[%s3611_s27 + $0x38] sm:$0xff]  ;;  %v596_v12 = vld [vmem:[%s5883_s2 + $0x70] sm:$0xff]  ;;  %v3678_v14 = vld [vmem:[%s3611_s27 + $0x20] sm:$0xff] }
  0x25   : > { %3173 = vmatpush3.msra.mxu1 %v404_v47  ;;  %3136 = vmatprep.subr.mxu0 %v387_v48  ;;  %v628_v13 = vld [vmem:[%s5883_s2 + $0x170] sm:$0xff]  ;;  %v611_v16 = vld [vmem:[%s5883_s2 + $0xe8] sm:$0xff]  ;;  %v610_v20 = vld [vmem:[%s5883_s2 + $0xe0] sm:$0xff] }
  0x26   : > { %3174 = vmatprep.subr.mxu1 %v419_v49  ;;  %3137 = vmatpush3.msra.mxu0 %v371_v50  ;;  %v3681_v15 = vld [vmem:[%s3611_s27 + $0x30] sm:$0xff]  ;;  %v643_v17 = vld [vmem:[%s5883_s2 + $0x1e8] sm:$0xff]  ;;  %v642_v21 = vld [vmem:[%s5883_s2 + $0x1e0] sm:$0xff] }
  0x27   : > { %3175 = vmatpush3.msra.mxu1 %v403_v51  ;;  %3138 = vmatprep.subr.mxu0 %v386_v52  ;;  %v595_v18 = vld [vmem:[%s5883_s2 + $0x68] sm:$0xff]  ;;  %v594_v22 = vld [vmem:[%s5883_s2 + $0x60] sm:$0xff]  ;;  %v609_v24 = vld [vmem:[%s5883_s2 + $0xd8] sm:$0xff] }
  0x28   : > { %3176 = vmatprep.subr.mxu1 %v418_v53  ;;  %3139 = vmatpush3.msra.mxu0 %v370_v54  ;;  %v627_v19 = vld [vmem:[%s5883_s2 + $0x168] sm:$0xff]  ;;  %v626_v23 = vld [vmem:[%s5883_s2 + $0x160] sm:$0xff]  ;;  %v641_v25 = vld [vmem:[%s5883_s2 + $0x1d8] sm:$0xff] }
  0x29   : > { %3177 = vmatpush3.msra.mxu1 %v402_v55  ;;  %3140 = vmatprep.subr.mxu0 %v385_v56  ;;  %v593_v26 = vld [vmem:[%s5883_s2 + $0x58] sm:$0xff]  ;;  %v608_v28 = vld [vmem:[%s5883_s2 + $0xd0] sm:$0xff]  ;;  %v607_v32 = vld [vmem:[%s5883_s2 + $0xc8] sm:$0xff] }
  0x2a   : > { %3178 = vmatprep.subr.mxu1 %v417_v57  ;;  %3141 = vmatpush3.msra.mxu0 %v369_v58  ;;  %v625_v27 = vld [vmem:[%s5883_s2 + $0x158] sm:$0xff]  ;;  %v640_v29 = vld [vmem:[%s5883_s2 + $0x1d0] sm:$0xff]  ;;  %v639_v33 = vld [vmem:[%s5883_s2 + $0x1c8] sm:$0xff] }
  0x2b   : > { %3179 = vmatpush3.msra.mxu1 %v401_v59  ;;  %3142 = vmatprep.subr.mxu0 %v384_v60  ;;  %v592_v30 = vld [vmem:[%s5883_s2 + $0x50] sm:$0xff]  ;;  %v591_v34 = vld [vmem:[%s5883_s2 + $0x48] sm:$0xff]  ;;  %v606_v36 = vld [vmem:[%s5883_s2 + $0xc0] sm:$0xff] }
  0x2c   : > { %3180 = vmatprep.subr.mxu1 %v416_v61  ;;  %3143 = vmatpush3.msra.mxu0 %v368_v62  ;;  %v624_v31 = vld [vmem:[%s5883_s2 + $0x150] sm:$0xff]  ;;  %v623_v35 = vld [vmem:[%s5883_s2 + $0x148] sm:$0xff]  ;;  %v638_v37 = vld [vmem:[%s5883_s2 + $0x1c0] sm:$0xff] }
  0x2d   : > { %496 = vmatprep.mubr.f32.mxu0 %v3629_v63  ;;  %3181 = vmatpush3.msra.mxu1 %v400_v0  ;;  %v590_v38 = vld [vmem:[%s5883_s2 + $0x40] sm:$0xff]  ;;  %v605_v40 = vld [vmem:[%s5883_s2 + $0xb8] sm:$0xff]  ;;  %v604_v44 = vld [vmem:[%s5883_s2 + $0xb0] sm:$0xff] }
  0x2e   : > { %571 = vmatprep.mubr.f32.mxu1 %v3635_v1  ;;  %497 = vmatmul.mubr.f32.vlgmr.msra.gmra.mxu0 %v3638_v2  ;;  %v622_v39 = vld [vmem:[%s5883_s2 + $0x140] sm:$0xff]  ;;  %v637_v41 = vld [vmem:[%s5883_s2 + $0x1b8] sm:$0xff]  ;;  %v636_v45 = vld [vmem:[%s5883_s2 + $0x1b0] sm:$0xff] }
  0x2f   : > { %572 = vmatmul.mubr.f32.vlgmr.msra.gmra.mxu1 %v3641_v3  ;;  %3188 = vmatprep.subr.mxu0 %v613_v4  ;;  %v589_v42 = vld [vmem:[%s5883_s2 + $0x38] sm:$0xff]  ;;  %v588_v46 = vld [vmem:[%s5883_s2 + $0x30] sm:$0xff]  ;;  %v603_v48 = vld [vmem:[%s5883_s2 + $0xa8] sm:$0xff] }
  0x30   : > { %3226 = vmatprep.subr.mxu1 %v645_v5  ;;  %3189 = vmatpush3.msra.mxu0 %v597_v6  ;;  %v621_v43 = vld [vmem:[%s5883_s2 + $0x138] sm:$0xff]  ;;  %v620_v47 = vld [vmem:[%s5883_s2 + $0x130] sm:$0xff]  ;;  %v635_v49 = vld [vmem:[%s5883_s2 + $0x1a8] sm:$0xff] }
  0x31   : > { %3227 = vmatpush3.msra.mxu1 %v629_v7  ;;  %3190 = vmatprep.subr.mxu0 %v612_v8  ;;  %v587_v50 = vld [vmem:[%s5883_s2 + $0x28] sm:$0xff]  ;;  %v602_v52 = vld [vmem:[%s5883_s2 + $0xa0] sm:$0xff]  ;;  %v601_v56 = vld [vmem:[%s5883_s2 + $0x98] sm:$0xff] }
  0x32   : > { %3228 = vmatprep.subr.mxu1 %v644_v9  ;;  %501 = vmatprep.mubr.f32.mxu0 %v3666_v10  ;;  %v619_v51 = vld [vmem:[%s5883_s2 + $0x128] sm:$0xff]  ;;  %v634_v53 = vld [vmem:[%s5883_s2 + $0x1a0] sm:$0xff]  ;;  %v633_v57 = vld [vmem:[%s5883_s2 + $0x198] sm:$0xff] }
  0x33   : > { %576 = vmatprep.mubr.f32.mxu1 %v3669_v11  ;;  %3191 = vmatpush3.msra.mxu0 %v596_v12  ;;  %v586_v54 = vld [vmem:[%s5883_s2 + $0x20] sm:$0xff]  ;;  %v585_v58 = vld [vmem:[%s5883_s2 + $0x18] sm:$0xff]  ;;  %v600_v60 = vld [vmem:[%s5883_s2 + $0x90] sm:$0xff] }
  0x34   : > { %3229 = vmatpush3.msra.mxu1 %v628_v13  ;;  %502 = vmatmul.mubr.f32.gmra.mxu0 %v3678_v14  ;;  %v618_v55 = vld [vmem:[%s5883_s2 + $0x120] sm:$0xff]  ;;  %v617_v59 = vld [vmem:[%s5883_s2 + $0x118] sm:$0xff]  ;;  %v632_v61 = vld [vmem:[%s5883_s2 + $0x190] sm:$0xff] }
  0x35   : > { %577 = vmatmul.mubr.f32.gmra.mxu1 %v3681_v15  ;;  %3192 = vmatprep.subr.mxu0 %v611_v16  ;;  %v584_v62 = vld [vmem:[%s5883_s2 + $0x10] sm:$0xff]  ;;  %v599_v4 = vld [vmem:[%s5883_s2 + $0x88] sm:$0xff]  ;;  %v598_v8 = vld [vmem:[%s5883_s2 + $0x80] sm:$0xff]  ;;  %v3354_v16 = vmov 0.0  }
  0x36   : > { %3230 = vmatprep.subr.mxu1 %v643_v17  ;;  %3193 = vmatpush3.msra.mxu0 %v595_v18  ;;  %v616_v0 = vld [vmem:[%s5883_s2 + $0x110] sm:$0xff]  ;;  %v631_v5 = vld [vmem:[%s5883_s2 + $0x188] sm:$0xff]  ;;  %v630_v9 = vld [vmem:[%s5883_s2 + $0x180] sm:$0xff] }
  0x37   : > { %3231 = vmatpush3.msra.mxu1 %v627_v19  ;;  %3194 = vmatprep.subr.mxu0 %v610_v20  ;;  %v583_v6 = vld [vmem:[%s5883_s2 + $0x8] sm:$0xff]  ;;  %v582_v12 = vld [vmem:[%s5883_s2] sm:$0xff] }
  0x38   : > { %3232 = vmatprep.subr.mxu1 %v642_v21  ;;  %3195 = vmatpush3.msra.mxu0 %v594_v22  ;;  %v615_v7 = vld [vmem:[%s5883_s2 + $0x108] sm:$0xff]  ;;  %v614_v13 = vld [vmem:[%s5883_s2 + $0x100] sm:$0xff] }
  0x39   : > { %3233 = vmatpush3.msra.mxu1 %v626_v23  ;;  %3196 = vmatprep.subr.mxu0 %v609_v24  ;;  %v3872_v23 = vld [vmem:[%s5884_s3] sm:$0xff]  ;;  %v1254_v24 = vld [vmem:[%s5886_s5 + $0x2f8] sm:$0xff] }
  0x3a   : > { %3234 = vmatprep.subr.mxu1 %v641_v25  ;;  %3197 = vmatpush3.msra.mxu0 %v593_v26  ;;  %v1253_v25 = vld [vmem:[%s5886_s5 + $0x2f0] sm:$0xff]  ;;  %v3890_v26 = vld [vmem:[%s5885_s4] sm:$0xff] }
  0x3b   : > { %3235 = vmatpush3.msra.mxu1 %v625_v27  ;;  %3198 = vmatprep.subr.mxu0 %v608_v28  ;;  %v1252_v27 = vld [vmem:[%s5886_s5 + $0x2e8] sm:$0xff]  ;;  %v1251_v28 = vld [vmem:[%s5886_s5 + $0x2e0] sm:$0xff] }
  0x3c   : > { %3236 = vmatprep.subr.mxu1 %v640_v29  ;;  %3199 = vmatpush3.msra.mxu0 %v592_v30  ;;  %v1250_v29 = vld [vmem:[%s5886_s5 + $0x2d8] sm:$0xff]  ;;  %v1249_v30 = vld [vmem:[%s5886_s5 + $0x2d0] sm:$0xff] }
  0x3d   : > { %3237 = vmatpush3.msra.mxu1 %v624_v31  ;;  %3200 = vmatprep.subr.mxu0 %v607_v32  ;;  %v1248_v31 = vld [vmem:[%s5886_s5 + $0x2c8] sm:$0xff]  ;;  %v1247_v32 = vld [vmem:[%s5886_s5 + $0x2c0] sm:$0xff] }
  0x3e   : > { %3238 = vmatprep.subr.mxu1 %v639_v33  ;;  %3201 = vmatpush3.msra.mxu0 %v591_v34  ;;  %v1246_v33 = vld [vmem:[%s5886_s5 + $0x2b8] sm:$0xff]  ;;  %v1245_v34 = vld [vmem:[%s5886_s5 + $0x2b0] sm:$0xff] }
  0x3f   : > { %3239 = vmatpush3.msra.mxu1 %v623_v35  ;;  %3202 = vmatprep.subr.mxu0 %v606_v36  ;;  %v1244_v35 = vld [vmem:[%s5886_s5 + $0x2a8] sm:$0xff]  ;;  %v1243_v36 = vld [vmem:[%s5886_s5 + $0x2a0] sm:$0xff] }
  0x40   : > { %3240 = vmatprep.subr.mxu1 %v638_v37  ;;  %3203 = vmatpush3.msra.mxu0 %v590_v38  ;;  %v1242_v37 = vld [vmem:[%s5886_s5 + $0x298] sm:$0xff]  ;;  %v1241_v38 = vld [vmem:[%s5886_s5 + $0x290] sm:$0xff] }
  0x41   : > { %3241 = vmatpush3.msra.mxu1 %v622_v39  ;;  %3204 = vmatprep.subr.mxu0 %v605_v40  ;;  %v1240_v39 = vld [vmem:[%s5886_s5 + $0x288] sm:$0xff]  ;;  %v1239_v40 = vld [vmem:[%s5886_s5 + $0x280] sm:$0xff] }
  0x42   : > { %3242 = vmatprep.subr.mxu1 %v637_v41  ;;  %3205 = vmatpush3.msra.mxu0 %v589_v42  ;;  %v1238_v41 = vld [vmem:[%s5886_s5 + $0x278] sm:$0xff]  ;;  %v1237_v42 = vld [vmem:[%s5886_s5 + $0x270] sm:$0xff] }
  0x43   : > { %3243 = vmatpush3.msra.mxu1 %v621_v43  ;;  %3206 = vmatprep.subr.mxu0 %v604_v44  ;;  %v1236_v43 = vld [vmem:[%s5886_s5 + $0x268] sm:$0xff] }
  0x44   : > { %3244 = vmatprep.subr.mxu1 %v636_v45  ;;  %3207 = vmatpush3.msra.mxu0 %v588_v46  ;;  %v1235_v46 = vld [vmem:[%s5886_s5 + $0x260] sm:$0xff] }
  0x45   : > { %3245 = vmatpush3.msra.mxu1 %v620_v47  ;;  %3208 = vmatprep.subr.mxu0 %v603_v48  ;;  %v1234_v47 = vld [vmem:[%s5886_s5 + $0x258] sm:$0xff] }
  0x46   : > { %3246 = vmatprep.subr.mxu1 %v635_v49  ;;  %3209 = vmatpush3.msra.mxu0 %v587_v50  ;;  %v1233_v50 = vld [vmem:[%s5886_s5 + $0x250] sm:$0xff] }
  0x47   : > { %3247 = vmatpush3.msra.mxu1 %v619_v51  ;;  %3210 = vmatprep.subr.mxu0 %v602_v52  ;;  %v1232_v51 = vld [vmem:[%s5886_s5 + $0x248] sm:$0xff] }
  0x48   : > { %3248 = vmatprep.subr.mxu1 %v634_v53  ;;  %3211 = vmatpush3.msra.mxu0 %v586_v54  ;;  %v1231_v54 = vld [vmem:[%s5886_s5 + $0x240] sm:$0xff] }
  0x49   : > { %3249 = vmatpush3.msra.mxu1 %v618_v55  ;;  %3212 = vmatprep.subr.mxu0 %v601_v56 }
  0x4a   : > { %3250 = vmatprep.subr.mxu1 %v633_v57  ;;  %3213 = vmatpush3.msra.mxu0 %v585_v58  ;;  %v1230_v57 = vld [vmem:[%s5886_s5 + $0x238] sm:$0xff] }
  0x4b   : > { %3251 = vmatpush3.msra.mxu1 %v617_v59  ;;  %3214 = vmatprep.subr.mxu0 %v600_v60  ;;  %v1229_v60 = vld [vmem:[%s5886_s5 + $0x230] sm:$0xff] }
  0x4c   : > { %3252 = vmatprep.subr.mxu1 %v632_v61  ;;  %3215 = vmatpush3.msra.mxu0 %v584_v62 }
  0x4d   : > { %3253 = vmatpush3.msra.mxu1 %v616_v0  ;;  %3216 = vmatprep.subr.mxu0 %v599_v4  ;;  %v1228_v0 = vld [vmem:[%s5886_s5 + $0x228] sm:$0xff]  ;;  %v1227_v4 = vld [vmem:[%s5886_s5 + $0x220] sm:$0xff] }
  0x4e   : > { %3254 = vmatprep.subr.mxu1 %v631_v5  ;;  %3217 = vmatpush3.msra.mxu0 %v583_v6 }
  0x4f   : > { %3255 = vmatpush3.msra.mxu1 %v615_v7  ;;  %3218 = vmatprep.subr.mxu0 %v598_v8  ;;  %v1226_v7 = vld [vmem:[%s5886_s5 + $0x218] sm:$0xff]  ;;  %v1225_v8 = vld [vmem:[%s5886_s5 + $0x210] sm:$0xff] }
  0x50   : > { %3256 = vmatprep.subr.mxu1 %v630_v9  ;;  %3219 = vmatpush3.msra.mxu0 %v582_v12  ;;  %v1224_v12 = vld [vmem:[%s5886_s5 + $0x208] sm:$0xff] }
  0x51   : > { %710 = vmatprep.mubr.f32.mxu0 %v3629_v63  ;;  %3257 = vmatpush3.msra.mxu1 %v614_v13  ;;  %v1223_v13 = vld [vmem:[%s5886_s5 + $0x200] sm:$0xff] }
  0x52   : > { %785 = vmatprep.mubr.f32.mxu1 %v3635_v1  ;;  %711 = vmatmul.mubr.f32.vlgmr.msra.gmra.mxu0 %v3638_v2 }
  0x53   : > { %786 = vmatmul.mubr.f32.vlgmr.msra.gmra.mxu1 %v3641_v3  ;;  %715 = vmatprep.mubr.f32.mxu0 %v3666_v10 }
  0x54   : > { %790 = vmatprep.mubr.f32.mxu1 %v3669_v11  ;;  %3295 = vmatprep.subr.mxu1 %v3354_v16 }
  0x55   : > { %3288 = vmatprep.subr.mxu0 %v3354_v16 }
  0x56   : > { %716 = vmatmul.mubr.f32.gmra.mxu0 %v3678_v14 }
  0x57   : > { %791 = vmatmul.mubr.f32.gmra.mxu1 %v3681_v15  ;;  %3292 = vmatprep.mubr.msk.f32.mxu0 %vm3355_vm0, %v3354_v16 }
  0x58   : > { %3299 = vmatprep.mubr.msk.f32.mxu1 %vm3355_vm0, %v3354_v16 }
  0xee   : > { %v3144_v63 = vpop.f32.mrf.mxu0 }
  0xef   : > { %v3182_v1 = vpop.f32.mrf.mxu1 }
  0xf0   : > { %v3145_v2 = vpop.f32.mrf.mxu0 }
  0xf1   : > { %v3183_v3 = vpop.f32.mrf.mxu1  ;;  %v3146_v17 = vadd.f32 %v3145_v2, %v3144_v63  ;;  %v1285_v2 = vld [vmem:[%s5886_s5 + $0x3f0] sm:$0xff] }
  0xf2   : > { %v3184_v18 = vadd.f32 %v3183_v3, %v3182_v1  ;;  %v1286_v1 = vld [vmem:[%s5886_s5 + $0x3f8] sm:$0xff] }
  0xf3   : > { %v1119_v3 = vld [vmem:[%s5886_s5 + $0xf8] sm:$0xff] }
  0xf4   : > { %v3147_v10 = vpop.f32.mrf.mxu0  ;;  %v574_v22 = vadd.f32 %v3184_v18, %v3146_v17  ;;  %v1116_v17 = vld [vmem:[%s5886_s5 + $0xe0] sm:$0xff]  ;;  %v1282_v18 = vld [vmem:[%s5886_s5 + $0x3d8] sm:$0xff] }
  0xf5   : > { %v3185_v11 = vpop.f32.mrf.mxu1 }
  0xf6   : > { %v3148_v14 = vpop.f32.mrf.mxu0 }
  0xf7   : > { %v3186_v15 = vpop.f32.mrf.mxu1  ;;  %v3149_v19 = vadd.f32 %v3148_v14, %v3147_v10  ;;  %v1118_v10 = vld [vmem:[%s5886_s5 + $0xf0] sm:$0xff]  ;;  %v1117_v14 = vld [vmem:[%s5886_s5 + $0xe8] sm:$0xff] }
  0xf8   : > { %v3187_v20 = vadd.f32 %v3186_v15, %v3185_v11  ;;  %v1284_v11 = vld [vmem:[%s5886_s5 + $0x3e8] sm:$0xff]  ;;  %v1283_v15 = vld [vmem:[%s5886_s5 + $0x3e0] sm:$0xff] }
  0xfa   : > { %v579_v21 = vadd.f32 %v3187_v20, %v3149_v19  ;;  %v1115_v19 = vld [vmem:[%s5886_s5 + $0xd8] sm:$0xff]  ;;  %v1281_v20 = vld [vmem:[%s5886_s5 + $0x3d0] sm:$0xff] }
  0xfc   : > { %3296 = vmatpush3.msra.mxu1 %v579_v21 }
  0xfd   : > { %3297 = vmatprep.subr.mxu1 %v3354_v16 }
  0xfe   : > { %3298 = vmatpush3.msra.mxu1 %v574_v22 }
  0xff   : > { %3309 = vmatprep.subr.mxu1 %v3354_v16  ;;  %3300 = vmatmul.mubr.msk.f32.vlgmr.msra.gmra.mxu1 %vm800_vm1, %v3872_v23 }
 0x100   : > { %3310 = vmatpush3.msra.mxu1 %v579_v21  ;;  %3313 = vmatprep.mubr.msk.f32.mxu1 %vm3355_vm0, %v3354_v16  ;;  %v1114_v21 = vld [vmem:[%s5886_s5 + $0xd0] sm:$0xff] }
 0x101   : > { %3311 = vmatprep.subr.mxu1 %v3354_v16 }
 0x102   : > { %3312 = vmatpush3.msra.mxu1 %v574_v22  ;;  %v1280_v22 = vld [vmem:[%s5886_s5 + $0x3c8] sm:$0xff] }
 0x103   : > { %3314 = vmatmul.mubr.msk.f32.vlgmr.msra.gmra.mxu1 %vm800_vm1, %v3890_v26  ;;  %1293 = vmatprep.subr.mxu1 %v1254_v24  ;;  %v1279_v24 = vld [vmem:[%s5886_s5 + $0x3c0] sm:$0xff] }
 0x104   : > { %1294 = vmatpush1.msra.mxu1 %v1253_v25  ;;  %v1112_v25 = vld [vmem:[%s5886_s5 + $0xc0] sm:$0xff] }
 0x105   : > { %1295 = vmatprep.subr.mxu1 %v1252_v27  ;;  %v1111_v27 = vld [vmem:[%s5886_s5 + $0xb8] sm:$0xff] }
 0x106   : > { %1296 = vmatpush1.msra.mxu1 %v1251_v28  ;;  %v1277_v28 = vld [vmem:[%s5886_s5 + $0x3b0] sm:$0xff] }
 0x107   : > { %1297 = vmatprep.subr.mxu1 %v1250_v29  ;;  %v1110_v29 = vld [vmem:[%s5886_s5 + $0xb0] sm:$0xff] }
 0x108   : > { %1298 = vmatpush1.msra.mxu1 %v1249_v30  ;;  %v1276_v30 = vld [vmem:[%s5886_s5 + $0x3a8] sm:$0xff] }
 0x109   : > { %1299 = vmatprep.subr.mxu1 %v1248_v31  ;;  %v1109_v31 = vld [vmem:[%s5886_s5 + $0xa8] sm:$0xff] }
 0x10a   : > { %1300 = vmatpush1.msra.mxu1 %v1247_v32  ;;  %v1275_v32 = vld [vmem:[%s5886_s5 + $0x3a0] sm:$0xff] }
 0x10b   : > { %1301 = vmatprep.subr.mxu1 %v1246_v33  ;;  %v1108_v33 = vld [vmem:[%s5886_s5 + $0xa0] sm:$0xff] }
 0x10c   : > { %1302 = vmatpush1.msra.mxu1 %v1245_v34  ;;  %v1274_v34 = vld [vmem:[%s5886_s5 + $0x398] sm:$0xff] }
 0x10d   : > { %1303 = vmatprep.subr.mxu1 %v1244_v35  ;;  %v1107_v35 = vld [vmem:[%s5886_s5 + $0x98] sm:$0xff] }
 0x10e   : > { %1304 = vmatpush1.msra.mxu1 %v1243_v36  ;;  %v1273_v36 = vld [vmem:[%s5886_s5 + $0x390] sm:$0xff] }
 0x10f   : > { %1305 = vmatprep.subr.mxu1 %v1242_v37  ;;  %v1106_v37 = vld [vmem:[%s5886_s5 + $0x90] sm:$0xff] }
 0x110   : > { %1306 = vmatpush1.msra.mxu1 %v1241_v38  ;;  %v1272_v38 = vld [vmem:[%s5886_s5 + $0x388] sm:$0xff] }
 0x111   : > { %1307 = vmatprep.subr.mxu1 %v1240_v39  ;;  %v1105_v39 = vld [vmem:[%s5886_s5 + $0x88] sm:$0xff] }
 0x112   : > { %1308 = vmatpush1.msra.mxu1 %v1239_v40  ;;  %v3220_v44 = vpop.f32.mrf.mxu0  ;;  %v1271_v40 = vld [vmem:[%s5886_s5 + $0x380] sm:$0xff] }
 0x113   : > { %v3258_v45 = vpop.f32.mrf.mxu1  ;;  %1309 = vmatprep.subr.mxu1 %v1238_v41  ;;  %v1104_v41 = vld [vmem:[%s5886_s5 + $0x80] sm:$0xff] }
 0x114   : > { %1310 = vmatpush1.msra.mxu1 %v1237_v42  ;;  %v3221_v48 = vpop.f32.mrf.mxu0  ;;  %v1270_v42 = vld [vmem:[%s5886_s5 + $0x378] sm:$0xff] }
 0x115   : > { %v3259_v49 = vpop.f32.mrf.mxu1  ;;  %1311 = vmatprep.subr.mxu1 %v1236_v43  ;;  %v3222_v55 = vadd.f32 %v3221_v48, %v3220_v44  ;;  %v1103_v43 = vld [vmem:[%s5886_s5 + $0x78] sm:$0xff]  ;;  %v1269_v44 = vld [vmem:[%s5886_s5 + $0x370] sm:$0xff]  ;;  %v1267_v48 = vld [vmem:[%s5886_s5 + $0x360] sm:$0xff] }
 0x116   : > { %1312 = vmatpush1.msra.mxu1 %v1235_v46  ;;  %v3223_v52 = vpop.f32.mrf.mxu0  ;;  %v3260_v56 = vadd.f32 %v3259_v49, %v3258_v45  ;;  %v1102_v45 = vld [vmem:[%s5886_s5 + $0x70] sm:$0xff]  ;;  %v1268_v46 = vld [vmem:[%s5886_s5 + $0x368] sm:$0xff]  ;;  %v1100_v49 = vld [vmem:[%s5886_s5 + $0x60] sm:$0xff] }
 0x117   : > { %v3261_v53 = vpop.f32.mrf.mxu1  ;;  %1313 = vmatprep.subr.mxu1 %v1234_v47  ;;  %v1101_v47 = vld [vmem:[%s5886_s5 + $0x68] sm:$0xff] }
 0x118   : > { %1314 = vmatpush1.msra.mxu1 %v1233_v50  ;;  %v3224_v58 = vpop.f32.mrf.mxu0  ;;  %v788_v5 = vadd.f32 %v3260_v56, %v3222_v55  ;;  %v1266_v50 = vld [vmem:[%s5886_s5 + $0x358] sm:$0xff]  ;;  %v1097_v55 = vld [vmem:[%s5886_s5 + $0x48] sm:$0xff]  ;;  %v1096_v56 = vld [vmem:[%s5886_s5 + $0x40] sm:$0xff] }
 0x119   : > { %v3262_v59 = vpop.f32.mrf.mxu1  ;;  %1315 = vmatprep.subr.mxu1 %v1232_v51  ;;  %v3225_v61 = vadd.f32 %v3224_v58, %v3223_v52  ;;  %v1099_v51 = vld [vmem:[%s5886_s5 + $0x58] sm:$0xff]  ;;  %v1265_v52 = vld [vmem:[%s5886_s5 + $0x350] sm:$0xff] }
 0x11a   : > { %v3263_v62 = vadd.f32 %v3262_v59, %v3261_v53  ;;  %1316 = vmatpush1.msra.mxu1 %v1231_v54  ;;  %v796_v63 = vsub.f32 0.0, %v788_v5  ;;  %v1098_v53 = vld [vmem:[%s5886_s5 + $0x50] sm:$0xff]  ;;  %v1264_v54 = vld [vmem:[%s5886_s5 + $0x348] sm:$0xff]  ;;  %v1151_v5 = vld [vmem:[%s5886_s5 + $0x1f8] sm:$0xff] }
 0x11b   : > { %1317 = vmatprep.subr.mxu1 %v1230_v57  ;;  %v1095_v57 = vld [vmem:[%s5886_s5 + $0x38] sm:$0xff]  ;;  %v1094_v58 = vld [vmem:[%s5886_s5 + $0x30] sm:$0xff]  ;;  %v1093_v59 = vld [vmem:[%s5886_s5 + $0x28] sm:$0xff] }
 0x11c   : > { %v793_v6 = vadd.f32 %v3263_v62, %v3225_v61  ;;  %1318 = vmatpush1.msra.mxu1 %v1229_v60  ;;  %v1092_v60 = vld [vmem:[%s5886_s5 + $0x20] sm:$0xff]  ;;  %v1091_v61 = vld [vmem:[%s5886_s5 + $0x18] sm:$0xff]  ;;  %v1090_v62 = vld [vmem:[%s5886_s5 + $0x10] sm:$0xff] }
 0x11d   : > { %1319 = vmatprep.subr.mxu1 %v1228_v0  ;;  %v1089_v0 = vld [vmem:[%s5886_s5 + $0x8] sm:$0xff] }
 0x11e   : > { %v797_v9 = vsub.f32 0.0, %v793_v6  ;;  %1320 = vmatpush1.msra.mxu1 %v1227_v4  ;;  %v1088_v4 = vld [vmem:[%s5886_s5] sm:$0xff]  ;;  %v1150_v6 = vld [vmem:[%s5886_s5 + $0x1f0] sm:$0xff] }
 0x11f   : > { %1321 = vmatprep.subr.mxu1 %v1226_v7  ;;  %v1149_v7 = vld [vmem:[%s5886_s5 + $0x1e8] sm:$0xff] }
 0x120   : > { %3289 = vmatpush3.msra.mxu0 %v797_v9  ;;  %1322 = vmatpush1.msra.mxu1 %v1225_v8  ;;  %v1148_v8 = vld [vmem:[%s5886_s5 + $0x1e0] sm:$0xff] }
 0x121   : > { %3290 = vmatprep.subr.mxu0 %v3354_v16  ;;  %1323 = vmatprep.subr.mxu1 %v1224_v12  ;;  %v1146_v12 = vld [vmem:[%s5886_s5 + $0x1d0] sm:$0xff] }
 0x122   : > { %3291 = vmatpush3.msra.mxu0 %v796_v63  ;;  %1324 = vmatpush1.msra.mxu1 %v1223_v13  ;;  %v1145_v13 = vld [vmem:[%s5886_s5 + $0x1c8] sm:$0xff] }
 0x123   : > { %3293 = vmatmul.mubr.msk.f32.vlgmr.msra.gmra.mxu0 %vm800_vm1, %v3890_v26  ;;  %3302 = vmatprep.subr.mxu0 %v3354_v16  ;;  %v1278_v26 = vld [vmem:[%s5886_s5 + $0x3b8] sm:$0xff] }
 0x124   : > { %3303 = vmatpush3.msra.mxu0 %v797_v9  ;;  %3306 = vmatprep.mubr.msk.f32.mxu0 %vm3355_vm0, %v3354_v16  ;;  %v1147_v9 = vld [vmem:[%s5886_s5 + $0x1d8] sm:$0xff] }
 0x125   : > { %3304 = vmatprep.subr.mxu0 %v3354_v16  ;;  %1325 = vmatprep.subr.mxu1 %v1286_v1  ;;  %v1143_v1 = vld [vmem:[%s5886_s5 + $0x1b8] sm:$0xff] }
 0x126   : > { %3305 = vmatpush3.msra.mxu0 %v796_v63  ;;  %1326 = vmatpush2.msra.mxu1 %v1285_v2  ;;  %v1144_v63 = vld [vmem:[%s5886_s5 + $0x1c0] sm:$0xff]  ;;  %v1142_v2 = vld [vmem:[%s5886_s5 + $0x1b0] sm:$0xff] }
 0x127   : > { %3307 = vmatmul.mubr.msk.f32.vlgmr.msra.gmra.mxu0 %vm800_vm1, %v3872_v23  ;;  %1152 = vmatprep.subr.mxu0 %v1119_v3  ;;  %v1113_v23 = vld [vmem:[%s5886_s5 + $0xc8] sm:$0xff] }
 0x128   : > { %1153 = vmatpush1.msra.mxu0 %v1118_v10  ;;  %1327 = vmatprep.subr.mxu1 %v1284_v11  ;;  %v1141_v3 = vld [vmem:[%s5886_s5 + $0x1a8] sm:$0xff]  ;;  %v1140_v10 = vld [vmem:[%s5886_s5 + $0x1a0] sm:$0xff]  ;;  %v1139_v11 = vld [vmem:[%s5886_s5 + $0x198] sm:$0xff] }
 0x129   : > { %1154 = vmatprep.subr.mxu0 %v1117_v14  ;;  %1328 = vmatpush2.msra.mxu1 %v1283_v15  ;;  %v1138_v14 = vld [vmem:[%s5886_s5 + $0x190] sm:$0xff]  ;;  %v1137_v15 = vld [vmem:[%s5886_s5 + $0x188] sm:$0xff] }
 0x12a   : > { %1155 = vmatpush1.msra.mxu0 %v1116_v17  ;;  %1329 = vmatprep.subr.mxu1 %v1282_v18  ;;  %v1136_v17 = vld [vmem:[%s5886_s5 + $0x180] sm:$0xff]  ;;  %v1135_v18 = vld [vmem:[%s5886_s5 + $0x178] sm:$0xff] }
 0x12b   : > { %1156 = vmatprep.subr.mxu0 %v1115_v19  ;;  %1330 = vmatpush2.msra.mxu1 %v1281_v20  ;;  %v1134_v19 = vld [vmem:[%s5886_s5 + $0x170] sm:$0xff]  ;;  %v1133_v20 = vld [vmem:[%s5886_s5 + $0x168] sm:$0xff] }
 0x12c   : > { %1157 = vmatpush1.msra.mxu0 %v1114_v21  ;;  %1331 = vmatprep.subr.mxu1 %v1280_v22  ;;  %v1132_v21 = vld [vmem:[%s5886_s5 + $0x160] sm:$0xff]  ;;  %v1131_v22 = vld [vmem:[%s5886_s5 + $0x158] sm:$0xff] }
 0x12d   : > { %1158 = vmatprep.subr.mxu0 %v1113_v23  ;;  %1332 = vmatpush2.msra.mxu1 %v1279_v24  ;;  %v1130_v23 = vld [vmem:[%s5886_s5 + $0x150] sm:$0xff]  ;;  %v1129_v24 = vld [vmem:[%s5886_s5 + $0x148] sm:$0xff] }
 0x12e   : > { %1159 = vmatpush1.msra.mxu0 %v1112_v25  ;;  %1333 = vmatprep.subr.mxu1 %v1278_v26  ;;  %v1128_v25 = vld [vmem:[%s5886_s5 + $0x140] sm:$0xff]  ;;  %v1127_v26 = vld [vmem:[%s5886_s5 + $0x138] sm:$0xff] }
 0x12f   : > { %1160 = vmatprep.subr.mxu0 %v1111_v27  ;;  %1334 = vmatpush2.msra.mxu1 %v1277_v28  ;;  %v1126_v27 = vld [vmem:[%s5886_s5 + $0x130] sm:$0xff]  ;;  %v1263_v28 = vld [vmem:[%s5886_s5 + $0x340] sm:$0xff] }
 0x130   : > { %1161 = vmatpush1.msra.mxu0 %v1110_v29  ;;  %1335 = vmatprep.subr.mxu1 %v1276_v30  ;;  %v1125_v29 = vld [vmem:[%s5886_s5 + $0x128] sm:$0xff]  ;;  %v1262_v30 = vld [vmem:[%s5886_s5 + $0x338] sm:$0xff] }
 0x131   : > { %1162 = vmatprep.subr.mxu0 %v1109_v31  ;;  %1336 = vmatpush2.msra.mxu1 %v1275_v32  ;;  %v1124_v31 = vld [vmem:[%s5886_s5 + $0x120] sm:$0xff]  ;;  %v1261_v32 = vld [vmem:[%s5886_s5 + $0x330] sm:$0xff] }
 0x132   : > { %1163 = vmatpush1.msra.mxu0 %v1108_v33  ;;  %1337 = vmatprep.subr.mxu1 %v1274_v34  ;;  %v1123_v33 = vld [vmem:[%s5886_s5 + $0x118] sm:$0xff]  ;;  %v1260_v34 = vld [vmem:[%s5886_s5 + $0x328] sm:$0xff] }
 0x133   : > { %1164 = vmatprep.subr.mxu0 %v1107_v35  ;;  %1338 = vmatpush2.msra.mxu1 %v1273_v36  ;;  %v1122_v35 = vld [vmem:[%s5886_s5 + $0x110] sm:$0xff]  ;;  %v1259_v36 = vld [vmem:[%s5886_s5 + $0x320] sm:$0xff] }
 0x134   : > { %1165 = vmatpush1.msra.mxu0 %v1106_v37  ;;  %1339 = vmatprep.subr.mxu1 %v1272_v38  ;;  %v1121_v37 = vld [vmem:[%s5886_s5 + $0x108] sm:$0xff]  ;;  %v1258_v38 = vld [vmem:[%s5886_s5 + $0x318] sm:$0xff] }
 0x135   : > { %1166 = vmatprep.subr.mxu0 %v1105_v39  ;;  %1340 = vmatpush2.msra.mxu1 %v1271_v40  ;;  %v1120_v39 = vld [vmem:[%s5886_s5 + $0x100] sm:$0xff]  ;;  %v1257_v40 = vld [vmem:[%s5886_s5 + $0x310] sm:$0xff] }
 0x136   : > { %1167 = vmatpush1.msra.mxu0 %v1104_v41  ;;  %1341 = vmatprep.subr.mxu1 %v1270_v42  ;;  %v1256_v41 = vld [vmem:[%s5886_s5 + $0x308] sm:$0xff]  ;;  %v1395_v42 = vld [vmem:[%s5886_s5 + $0x4f8] sm:$0xff] }
 0x137   : > { %1168 = vmatprep.subr.mxu0 %v1103_v43  ;;  %1342 = vmatpush2.msra.mxu1 %v1269_v44  ;;  %v1255_v43 = vld [vmem:[%s5886_s5 + $0x300] sm:$0xff]  ;;  %v1534_v44 = vld [vmem:[%s5886_s5 + $0x6f8] sm:$0xff] }
 0x138   : > { %1169 = vmatpush1.msra.mxu0 %v1102_v45  ;;  %1343 = vmatprep.subr.mxu1 %v1268_v46 }
 0x139   : > { %1170 = vmatprep.subr.mxu0 %v1101_v47  ;;  %1344 = vmatpush2.msra.mxu1 %v1267_v48 }
 0x13a   : > { %1171 = vmatpush1.msra.mxu0 %v1100_v49  ;;  %1345 = vmatprep.subr.mxu1 %v1266_v50 }
 0x13b   : > { %1172 = vmatprep.subr.mxu0 %v1099_v51  ;;  %1346 = vmatpush2.msra.mxu1 %v1265_v52 }
 0x13c   : > { %1173 = vmatpush1.msra.mxu0 %v1098_v53  ;;  %1347 = vmatprep.subr.mxu1 %v1264_v54 }
 0x13d   : > { %1174 = vmatprep.subr.mxu0 %v1097_v55  ;;  %1348 = vmatpush2.msra.mxu1 %v1263_v28  ;;  %v1394_v55 = vld [vmem:[%s5886_s5 + $0x4f0] sm:$0xff]  ;;  %v1377_v28 = vld [vmem:[%s5886_s5 + $0x468] sm:$0xff] }
 0x13e   : > { %1175 = vmatpush1.msra.mxu0 %v1096_v56  ;;  %1349 = vmatprep.subr.mxu1 %v1262_v30  ;;  %v1376_v30 = vld [vmem:[%s5886_s5 + $0x460] sm:$0xff] }
 0x13f   : > { %1176 = vmatprep.subr.mxu0 %v1095_v57  ;;  %1350 = vmatpush2.msra.mxu1 %v1261_v32  ;;  %v1393_v57 = vld [vmem:[%s5886_s5 + $0x4e8] sm:$0xff]  ;;  %v1375_v32 = vld [vmem:[%s5886_s5 + $0x458] sm:$0xff] }
 0x140   : > { %1177 = vmatpush1.msra.mxu0 %v1094_v58  ;;  %1351 = vmatprep.subr.mxu1 %v1260_v34  ;;  %v1374_v34 = vld [vmem:[%s5886_s5 + $0x450] sm:$0xff] }
 0x141   : > { %1178 = vmatprep.subr.mxu0 %v1093_v59  ;;  %1352 = vmatpush2.msra.mxu1 %v1259_v36  ;;  %v1392_v59 = vld [vmem:[%s5886_s5 + $0x4e0] sm:$0xff]  ;;  %v1373_v36 = vld [vmem:[%s5886_s5 + $0x448] sm:$0xff] }
 0x142   : > { %1179 = vmatpush1.msra.mxu0 %v1092_v60  ;;  %1353 = vmatprep.subr.mxu1 %v1258_v38  ;;  %v1533_v60 = vld [vmem:[%s5886_s5 + $0x6f0] sm:$0xff]  ;;  %v1372_v38 = vld [vmem:[%s5886_s5 + $0x440] sm:$0xff] }
 0x143   : > { %1180 = vmatprep.subr.mxu0 %v1091_v61  ;;  %1354 = vmatpush2.msra.mxu1 %v1257_v40  ;;  %v1371_v40 = vld [vmem:[%s5886_s5 + $0x438] sm:$0xff] }
 0x144   : > { %1181 = vmatpush1.msra.mxu0 %v1090_v62  ;;  %1355 = vmatprep.subr.mxu1 %v1256_v41  ;;  %v1391_v62 = vld [vmem:[%s5886_s5 + $0x4d8] sm:$0xff]  ;;  %v1512_v41 = vld [vmem:[%s5886_s5 + $0x648] sm:$0xff] }
 0x145   : > { %1182 = vmatprep.subr.mxu0 %v1089_v0  ;;  %1356 = vmatpush2.msra.mxu1 %v1255_v43  ;;  %v1532_v0 = vld [vmem:[%s5886_s5 + $0x6e8] sm:$0xff]  ;;  %v1511_v43 = vld [vmem:[%s5886_s5 + $0x640] sm:$0xff] }
 0x146   : > { %1183 = vmatpush1.msra.mxu0 %v1088_v4  ;;  %1571 = vmatprep.subr.mxu1 %v1534_v44  ;;  %v1369_v44 = vld [vmem:[%s5886_s5 + $0x428] sm:$0xff] }
 0x147   : > { %1184 = vmatprep.subr.mxu0 %v1151_v5  ;;  %v1390_v5 = vld [vmem:[%s5886_s5 + $0x4d0] sm:$0xff] }
 0x148   : > { %1185 = vmatpush2.msra.mxu0 %v1150_v6  ;;  %v1531_v6 = vld [vmem:[%s5886_s5 + $0x6e0] sm:$0xff] }
 0x149   : > { %1186 = vmatprep.subr.mxu0 %v1149_v7  ;;  %v1389_v7 = vld [vmem:[%s5886_s5 + $0x4c8] sm:$0xff] }
 0x14a   : > { %1187 = vmatpush2.msra.mxu0 %v1148_v8  ;;  %v1530_v8 = vld [vmem:[%s5886_s5 + $0x6d8] sm:$0xff] }
 0x14b   : > { %1188 = vmatprep.subr.mxu0 %v1147_v9  ;;  %v1388_v9 = vld [vmem:[%s5886_s5 + $0x4c0] sm:$0xff] }
 0x14c   : > { %1189 = vmatpush2.msra.mxu0 %v1146_v12  ;;  %v1529_v12 = vld [vmem:[%s5886_s5 + $0x6d0] sm:$0xff] }
 0x14d   : > { %1190 = vmatprep.subr.mxu0 %v1145_v13  ;;  %v1387_v13 = vld [vmem:[%s5886_s5 + $0x4b8] sm:$0xff] }
 0x14e   : > { %1191 = vmatpush2.msra.mxu0 %v1144_v63  ;;  %v1528_v63 = vld [vmem:[%s5886_s5 + $0x6c8] sm:$0xff] }
 0x14f   : > { %1192 = vmatprep.subr.mxu0 %v1143_v1  ;;  %v1386_v1 = vld [vmem:[%s5886_s5 + $0x4b0] sm:$0xff] }
 0x150   : > { %1193 = vmatpush2.msra.mxu0 %v1142_v2  ;;  %v1527_v2 = vld [vmem:[%s5886_s5 + $0x6c0] sm:$0xff] }
 0x151   : > { %1194 = vmatprep.subr.mxu0 %v1141_v3  ;;  %v1385_v3 = vld [vmem:[%s5886_s5 + $0x4a8] sm:$0xff] }
 0x152   : > { %1195 = vmatpush2.msra.mxu0 %v1140_v10  ;;  %v1526_v10 = vld [vmem:[%s5886_s5 + $0x6b8] sm:$0xff] }
 0x153   : > { %1196 = vmatprep.subr.mxu0 %v1139_v11  ;;  %v1384_v11 = vld [vmem:[%s5886_s5 + $0x4a0] sm:$0xff] }
 0x154   : > { %1197 = vmatpush2.msra.mxu0 %v1138_v14  ;;  %v1525_v14 = vld [vmem:[%s5886_s5 + $0x6b0] sm:$0xff] }
 0x155   : > { %1198 = vmatprep.subr.mxu0 %v1137_v15  ;;  %v1383_v15 = vld [vmem:[%s5886_s5 + $0x498] sm:$0xff] }
 0x156   : > { %1199 = vmatpush2.msra.mxu0 %v1136_v17  ;;  %v1524_v17 = vld [vmem:[%s5886_s5 + $0x6a8] sm:$0xff] }
 0x157   : > { %1200 = vmatprep.subr.mxu0 %v1135_v18  ;;  %v1382_v18 = vld [vmem:[%s5886_s5 + $0x490] sm:$0xff] }
 0x158   : > { %1201 = vmatpush2.msra.mxu0 %v1134_v19  ;;  %v1523_v19 = vld [vmem:[%s5886_s5 + $0x6a0] sm:$0xff] }
 0x159   : > { %1202 = vmatprep.subr.mxu0 %v1133_v20  ;;  %v1381_v20 = vld [vmem:[%s5886_s5 + $0x488] sm:$0xff] }
 0x15a   : > { %1203 = vmatpush2.msra.mxu0 %v1132_v21  ;;  %v1522_v21 = vld [vmem:[%s5886_s5 + $0x698] sm:$0xff] }
 0x15b   : > { %1204 = vmatprep.subr.mxu0 %v1131_v22  ;;  %v1380_v22 = vld [vmem:[%s5886_s5 + $0x480] sm:$0xff] }
 0x15c   : > { %1205 = vmatpush2.msra.mxu0 %v1130_v23  ;;  %v1521_v23 = vld [vmem:[%s5886_s5 + $0x690] sm:$0xff] }
 0x15d   : > { %1206 = vmatprep.subr.mxu0 %v1129_v24  ;;  %v1379_v24 = vld [vmem:[%s5886_s5 + $0x478] sm:$0xff] }
 0x15e   : > { %1207 = vmatpush2.msra.mxu0 %v1128_v25  ;;  %v1520_v25 = vld [vmem:[%s5886_s5 + $0x688] sm:$0xff] }
 0x15f   : > { %1208 = vmatprep.subr.mxu0 %v1127_v26  ;;  %v1378_v26 = vld [vmem:[%s5886_s5 + $0x470] sm:$0xff] }
 0x160   : > { %1209 = vmatpush2.msra.mxu0 %v1126_v27  ;;  %v1519_v27 = vld [vmem:[%s5886_s5 + $0x680] sm:$0xff] }
 0x161   : > { %1210 = vmatprep.subr.mxu0 %v1125_v29  ;;  %v1518_v29 = vld [vmem:[%s5886_s5 + $0x678] sm:$0xff] }
 0x162   : > { %1211 = vmatpush2.msra.mxu0 %v1124_v31  ;;  %v1517_v31 = vld [vmem:[%s5886_s5 + $0x670] sm:$0xff] }
 0x163   : > { %1212 = vmatprep.subr.mxu0 %v1123_v33  ;;  %v1516_v33 = vld [vmem:[%s5886_s5 + $0x668] sm:$0xff] }
 0x164   : > { %1213 = vmatpush2.msra.mxu0 %v1122_v35  ;;  %v1515_v35 = vld [vmem:[%s5886_s5 + $0x660] sm:$0xff] }
 0x165   : > { %1214 = vmatprep.subr.mxu0 %v1121_v37  ;;  %v1514_v37 = vld [vmem:[%s5886_s5 + $0x658] sm:$0xff] }
 0x166   : > { %1215 = vmatpush2.msra.mxu0 %v1120_v39  ;;  %v1513_v39 = vld [vmem:[%s5886_s5 + $0x650] sm:$0xff] }
 0x167   : > { %1432 = vmatprep.subr.mxu0 %v1395_v42  ;;  %v1370_v42 = vld [vmem:[%s5886_s5 + $0x430] sm:$0xff] }
 0x1bf   : > { %v943_v45 = vpop.f32.mrf.mxu1 }
 0x1c1   : > { %v3301_v46 = vpop.f32.mrf.mxu1 }
 0x1c2   : > { %v1368_v46 = vld [vmem:[%s5886_s5 + $0x420] sm:$0xff] }
 0x1c3   : > { %v1083_v47 = vpop.f32.mrf.mxu1 }
 0x1c5   : > { %v3315_v48 = vpop.f32.mrf.mxu1 }
 0x1c6   : > { %v1367_v48 = vld [vmem:[%s5886_s5 + $0x418] sm:$0xff] }
 0x1e3   : > { %v870_v49 = vpop.f32.mrf.mxu0 }
 0x1e4   : > { %v4287_v51 = vadd.f32 %v943_v45, %v870_v49  ;;  %v1510_v45 = vld [vmem:[%s5886_s5 + $0x638] sm:$0xff]  ;;  %v1508_v49 = vld [vmem:[%s5886_s5 + $0x628] sm:$0xff] }
 0x1e5   : > { %v3294_v50 = vpop.f32.mrf.mxu0 }
 0x1e6   : > { %v1289_v58 = vrot.slane %v4287_v51, 1  ;;  %v1366_v50 = vld [vmem:[%s5886_s5 + $0x410] sm:$0xff] }
 0x1e7   : > { %v1013_v52 = vpop.f32.mrf.mxu0 }
 0x1e8   : > { %v4289_v53 = vsub.f32 %v1013_v52, %v1083_v47  ;;  %v1509_v47 = vld [vmem:[%s5886_s5 + $0x630] sm:$0xff]  ;;  %v1507_v52 = vld [vmem:[%s5886_s5 + $0x620] sm:$0xff] }
 0x1e9   : > { %v3308_v54 = vpop.f32.mrf.mxu0 }
 0x1ea   : > { %1216 = vmatprep.mubr.f32.mxu0 %v4289_v53  ;;  %v1290_v56 = vrot.slane %v4289_v53, 1  ;;  %v1429_v61 = vrot.slane %v4289_v53, 2  ;;  %v1568_v4 = vrot.slane %v4289_v53, 3  ;;  %v1365_v54 = vld [vmem:[%s5886_s5 + $0x408] sm:$0xff] }
 0x1eb   : > { %1217 = vmatmul.mubr.f32.vlgmr.msra.gmra.mxu0 %v4287_v51 }
 0x1ec   : > { %1433 = vmatpush1.msra.mxu0 %v1394_v55  ;;  %1357 = vmatprep.mubr.f32.mxu1 %v1290_v56  ;;  %v1506_v55 = vld [vmem:[%s5886_s5 + $0x618] sm:$0xff]  ;;  %v1364_v56 = vld [vmem:[%s5886_s5 + $0x400] sm:$0xff] }
 0x1ed   : > { %1434 = vmatprep.subr.mxu0 %v1393_v57  ;;  %1358 = vmatmul.mubr.f32.vlgmr.msra.gmra.mxu1 %v1289_v58  ;;  %v1505_v57 = vld [vmem:[%s5886_s5 + $0x610] sm:$0xff]  ;;  %v1427_v58 = vld [vmem:[%s5886_s5 + $0x5f8] sm:$0xff] }
 0x1ee   : > { %1435 = vmatpush1.msra.mxu0 %v1392_v59  ;;  %1572 = vmatpush1.msra.mxu1 %v1533_v60  ;;  %v1504_v59 = vld [vmem:[%s5886_s5 + $0x608] sm:$0xff]  ;;  %v1426_v60 = vld [vmem:[%s5886_s5 + $0x5f0] sm:$0xff] }
 0x1ef   : > { %1436 = vmatprep.subr.mxu0 %v1391_v62  ;;  %1496 = vmatprep.mubr.f32.mxu0 %v1429_v61  ;;  %v1503_v61 = vld [vmem:[%s5886_s5 + $0x600] sm:$0xff]  ;;  %v1425_v62 = vld [vmem:[%s5886_s5 + $0x5e8] sm:$0xff] }
 0x1f0   : > { %1573 = vmatprep.subr.mxu1 %v1532_v0  ;;  %1635 = vmatprep.mubr.f32.mxu1 %v1568_v4  ;;  %v1566_v0 = vld [vmem:[%s5886_s5 + $0x7f8] sm:$0xff]  ;;  %v1424_v4 = vld [vmem:[%s5886_s5 + $0x5e0] sm:$0xff] }
 0x1f1   : > { %1437 = vmatpush1.msra.mxu0 %v1390_v5  ;;  %1574 = vmatpush1.msra.mxu1 %v1531_v6  ;;  %v1565_v5 = vld [vmem:[%s5886_s5 + $0x7f0] sm:$0xff]  ;;  %v1423_v6 = vld [vmem:[%s5886_s5 + $0x5d8] sm:$0xff] }
 0x1f2   : > { %1438 = vmatprep.subr.mxu0 %v1389_v7  ;;  %1575 = vmatprep.subr.mxu1 %v1530_v8  ;;  %v1564_v7 = vld [vmem:[%s5886_s5 + $0x7e8] sm:$0xff]  ;;  %v1422_v8 = vld [vmem:[%s5886_s5 + $0x5d0] sm:$0xff] }
 0x1f3   : > { %1439 = vmatpush1.msra.mxu0 %v1388_v9  ;;  %1576 = vmatpush1.msra.mxu1 %v1529_v12  ;;  %v1563_v9 = vld [vmem:[%s5886_s5 + $0x7e0] sm:$0xff]  ;;  %v1421_v12 = vld [vmem:[%s5886_s5 + $0x5c8] sm:$0xff] }
 0x1f4   : > { %1440 = vmatprep.subr.mxu0 %v1387_v13  ;;  %1577 = vmatprep.subr.mxu1 %v1528_v63  ;;  %v1562_v13 = vld [vmem:[%s5886_s5 + $0x7d8] sm:$0xff]  ;;  %v1420_v63 = vld [vmem:[%s5886_s5 + $0x5c0] sm:$0xff] }
 0x1f5   : > { %1441 = vmatpush1.msra.mxu0 %v1386_v1  ;;  %1578 = vmatpush1.msra.mxu1 %v1527_v2  ;;  %v1561_v1 = vld [vmem:[%s5886_s5 + $0x7d0] sm:$0xff]  ;;  %v1419_v2 = vld [vmem:[%s5886_s5 + $0x5b8] sm:$0xff] }
 0x1f6   : > { %1442 = vmatprep.subr.mxu0 %v1385_v3  ;;  %1579 = vmatprep.subr.mxu1 %v1526_v10  ;;  %v1560_v3 = vld [vmem:[%s5886_s5 + $0x7c8] sm:$0xff]  ;;  %v1418_v10 = vld [vmem:[%s5886_s5 + $0x5b0] sm:$0xff] }
 0x1f7   : > { %1443 = vmatpush1.msra.mxu0 %v1384_v11  ;;  %1580 = vmatpush1.msra.mxu1 %v1525_v14  ;;  %v1559_v11 = vld [vmem:[%s5886_s5 + $0x7c0] sm:$0xff]  ;;  %v1417_v14 = vld [vmem:[%s5886_s5 + $0x5a8] sm:$0xff] }
 0x1f8   : > { %1444 = vmatprep.subr.mxu0 %v1383_v15  ;;  %1581 = vmatprep.subr.mxu1 %v1524_v17  ;;  %v1558_v15 = vld [vmem:[%s5886_s5 + $0x7b8] sm:$0xff]  ;;  %v1416_v17 = vld [vmem:[%s5886_s5 + $0x5a0] sm:$0xff] }
 0x1f9   : > { %1445 = vmatpush1.msra.mxu0 %v1382_v18  ;;  %1582 = vmatpush1.msra.mxu1 %v1523_v19  ;;  %v1557_v18 = vld [vmem:[%s5886_s5 + $0x7b0] sm:$0xff]  ;;  %v1415_v19 = vld [vmem:[%s5886_s5 + $0x598] sm:$0xff] }
 0x1fa   : > { %1446 = vmatprep.subr.mxu0 %v1381_v20  ;;  %1583 = vmatprep.subr.mxu1 %v1522_v21  ;;  %v1556_v20 = vld [vmem:[%s5886_s5 + $0x7a8] sm:$0xff]  ;;  %v1414_v21 = vld [vmem:[%s5886_s5 + $0x590] sm:$0xff] }
 0x1fb   : > { %1447 = vmatpush1.msra.mxu0 %v1380_v22  ;;  %1584 = vmatpush1.msra.mxu1 %v1521_v23  ;;  %v1555_v22 = vld [vmem:[%s5886_s5 + $0x7a0] sm:$0xff]  ;;  %v1413_v23 = vld [vmem:[%s5886_s5 + $0x588] sm:$0xff] }
 0x1fc   : > { %1448 = vmatprep.subr.mxu0 %v1379_v24  ;;  %1585 = vmatprep.subr.mxu1 %v1520_v25  ;;  %v1554_v24 = vld [vmem:[%s5886_s5 + $0x798] sm:$0xff]  ;;  %v1412_v25 = vld [vmem:[%s5886_s5 + $0x580] sm:$0xff] }
 0x1fd   : > { %1449 = vmatpush1.msra.mxu0 %v1378_v26  ;;  %1586 = vmatpush1.msra.mxu1 %v1519_v27  ;;  %v1553_v26 = vld [vmem:[%s5886_s5 + $0x790] sm:$0xff]  ;;  %v1411_v27 = vld [vmem:[%s5886_s5 + $0x578] sm:$0xff] }
 0x1fe   : > { %1450 = vmatprep.subr.mxu0 %v1377_v28  ;;  %1587 = vmatprep.subr.mxu1 %v1518_v29  ;;  %v1552_v28 = vld [vmem:[%s5886_s5 + $0x788] sm:$0xff]  ;;  %v1410_v29 = vld [vmem:[%s5886_s5 + $0x570] sm:$0xff] }
 0x1ff   : > { %1451 = vmatpush1.msra.mxu0 %v1376_v30  ;;  %1588 = vmatpush1.msra.mxu1 %v1517_v31  ;;  %v1551_v30 = vld [vmem:[%s5886_s5 + $0x780] sm:$0xff]  ;;  %v1409_v31 = vld [vmem:[%s5886_s5 + $0x568] sm:$0xff] }
 0x200   : > { %1452 = vmatprep.subr.mxu0 %v1375_v32  ;;  %1589 = vmatprep.subr.mxu1 %v1516_v33  ;;  %v1550_v32 = vld [vmem:[%s5886_s5 + $0x778] sm:$0xff]  ;;  %v1408_v33 = vld [vmem:[%s5886_s5 + $0x560] sm:$0xff] }
 0x201   : > { %1453 = vmatpush1.msra.mxu0 %v1374_v34  ;;  %1590 = vmatpush1.msra.mxu1 %v1515_v35  ;;  %v1549_v34 = vld [vmem:[%s5886_s5 + $0x770] sm:$0xff]  ;;  %v1407_v35 = vld [vmem:[%s5886_s5 + $0x558] sm:$0xff] }
 0x202   : > { %1454 = vmatprep.subr.mxu0 %v1373_v36  ;;  %1591 = vmatprep.subr.mxu1 %v1514_v37  ;;  %v1548_v36 = vld [vmem:[%s5886_s5 + $0x768] sm:$0xff]  ;;  %v1406_v37 = vld [vmem:[%s5886_s5 + $0x550] sm:$0xff] }
 0x203   : > { %1455 = vmatpush1.msra.mxu0 %v1372_v38  ;;  %1592 = vmatpush1.msra.mxu1 %v1513_v39  ;;  %v1547_v38 = vld [vmem:[%s5886_s5 + $0x760] sm:$0xff]  ;;  %v1405_v39 = vld [vmem:[%s5886_s5 + $0x548] sm:$0xff] }
 0x204   : > { %1456 = vmatprep.subr.mxu0 %v1371_v40  ;;  %1593 = vmatprep.subr.mxu1 %v1512_v41  ;;  %v1546_v40 = vld [vmem:[%s5886_s5 + $0x758] sm:$0xff]  ;;  %v1404_v41 = vld [vmem:[%s5886_s5 + $0x540] sm:$0xff] }
 0x205   : > { %1457 = vmatpush1.msra.mxu0 %v1370_v42  ;;  %1594 = vmatpush1.msra.mxu1 %v1511_v43  ;;  %v1545_v42 = vld [vmem:[%s5886_s5 + $0x750] sm:$0xff]  ;;  %v1403_v43 = vld [vmem:[%s5886_s5 + $0x538] sm:$0xff] }
 0x206   : > { %1458 = vmatprep.subr.mxu0 %v1369_v44  ;;  %1595 = vmatprep.subr.mxu1 %v1510_v45  ;;  %v1544_v44 = vld [vmem:[%s5886_s5 + $0x748] sm:$0xff]  ;;  %v1402_v45 = vld [vmem:[%s5886_s5 + $0x530] sm:$0xff] }
 0x207   : > { %1459 = vmatpush1.msra.mxu0 %v1368_v46  ;;  %1596 = vmatpush1.msra.mxu1 %v1509_v47  ;;  %v1543_v46 = vld [vmem:[%s5886_s5 + $0x740] sm:$0xff]  ;;  %v1401_v47 = vld [vmem:[%s5886_s5 + $0x528] sm:$0xff] }
 0x208   : > { %1460 = vmatprep.subr.mxu0 %v1367_v48  ;;  %1597 = vmatprep.subr.mxu1 %v1508_v49  ;;  %v1542_v48 = vld [vmem:[%s5886_s5 + $0x738] sm:$0xff]  ;;  %v1400_v49 = vld [vmem:[%s5886_s5 + $0x520] sm:$0xff] }
 0x209   : > { %1461 = vmatpush1.msra.mxu0 %v1366_v50  ;;  %1598 = vmatpush1.msra.mxu1 %v1507_v52  ;;  %v1541_v50 = vld [vmem:[%s5886_s5 + $0x730] sm:$0xff]  ;;  %v1399_v52 = vld [vmem:[%s5886_s5 + $0x518] sm:$0xff] }
 0x20a   : > { %1462 = vmatprep.subr.mxu0 %v1365_v54  ;;  %1599 = vmatprep.subr.mxu1 %v1506_v55  ;;  %v1540_v54 = vld [vmem:[%s5886_s5 + $0x728] sm:$0xff]  ;;  %v1398_v55 = vld [vmem:[%s5886_s5 + $0x510] sm:$0xff] }
 0x20b   : > { %1463 = vmatpush1.msra.mxu0 %v1364_v56  ;;  %1600 = vmatpush1.msra.mxu1 %v1505_v57  ;;  %v1539_v56 = vld [vmem:[%s5886_s5 + $0x720] sm:$0xff]  ;;  %v1397_v57 = vld [vmem:[%s5886_s5 + $0x508] sm:$0xff] }
 0x20c   : > { %1464 = vmatprep.subr.mxu0 %v1427_v58  ;;  %1601 = vmatprep.subr.mxu1 %v1504_v59  ;;  %v1538_v58 = vld [vmem:[%s5886_s5 + $0x718] sm:$0xff]  ;;  %v1396_v59 = vld [vmem:[%s5886_s5 + $0x500] sm:$0xff] }
 0x20d   : > { %1465 = vmatpush2.msra.mxu0 %v1426_v60  ;;  %1602 = vmatpush1.msra.mxu1 %v1503_v61  ;;  %v1537_v60 = vld [vmem:[%s5886_s5 + $0x710] sm:$0xff]  ;;  %v1536_v61 = vld [vmem:[%s5886_s5 + $0x708] sm:$0xff] }
 0x20e   : > { %1466 = vmatprep.subr.mxu0 %v1425_v62  ;;  %1603 = vmatprep.subr.mxu1 %v1566_v0  ;;  %v1428_v62 = vrot.slane %v4287_v51, 2  ;;  %v1673_v0 = vld [vmem:[%s5886_s5 + $0x8f8] sm:$0xff] }
 0x20f   : > { %1467 = vmatpush2.msra.mxu0 %v1424_v4  ;;  %1604 = vmatpush2.msra.mxu1 %v1565_v5  ;;  %v1535_v4 = vld [vmem:[%s5886_s5 + $0x700] sm:$0xff]  ;;  %v1672_v5 = vld [vmem:[%s5886_s5 + $0x8f0] sm:$0xff] }
 0x210   : > { %1468 = vmatprep.subr.mxu0 %v1423_v6  ;;  %1605 = vmatprep.subr.mxu1 %v1564_v7  ;;  %v1707_v6 = vrot.slane %v4289_v53, 4  ;;  %v1671_v7 = vld [vmem:[%s5886_s5 + $0x8e8] sm:$0xff] }
 0x211   : > { %1469 = vmatpush2.msra.mxu0 %v1422_v8  ;;  %1606 = vmatpush2.msra.mxu1 %v1563_v9  ;;  %v1567_v8 = vrot.slane %v4287_v51, 3  ;;  %v1812_v9 = vld [vmem:[%s5886_s5 + $0xaf8] sm:$0xff] }
 0x212   : > { %1470 = vmatprep.subr.mxu0 %v1421_v12  ;;  %1607 = vmatprep.subr.mxu1 %v1562_v13  ;;  %v1670_v12 = vld [vmem:[%s5886_s5 + $0x8e0] sm:$0xff]  ;;  %v1811_v13 = vld [vmem:[%s5886_s5 + $0xaf0] sm:$0xff] }
 0x213   : > { %1471 = vmatpush2.msra.mxu0 %v1420_v63  ;;  %1608 = vmatpush2.msra.mxu1 %v1561_v1  ;;  %v1846_v63 = vrot.slane %v4289_v53, 5  ;;  %v1669_v1 = vld [vmem:[%s5886_s5 + $0x8d8] sm:$0xff] }
 0x214   : > { %1472 = vmatprep.subr.mxu0 %v1419_v2  ;;  %1609 = vmatprep.subr.mxu1 %v1560_v3  ;;  %v1810_v2 = vld [vmem:[%s5886_s5 + $0xae8] sm:$0xff]  ;;  %v1668_v3 = vld [vmem:[%s5886_s5 + $0x8d0] sm:$0xff] }
 0x215   : > { %1473 = vmatpush2.msra.mxu0 %v1418_v10  ;;  %1610 = vmatpush2.msra.mxu1 %v1559_v11  ;;  %v1809_v10 = vld [vmem:[%s5886_s5 + $0xae0] sm:$0xff]  ;;  %v1667_v11 = vld [vmem:[%s5886_s5 + $0x8c8] sm:$0xff] }
 0x216   : > { %1474 = vmatprep.subr.mxu0 %v1417_v14  ;;  %1611 = vmatprep.subr.mxu1 %v1558_v15  ;;  %v1808_v14 = vld [vmem:[%s5886_s5 + $0xad8] sm:$0xff]  ;;  %v1666_v15 = vld [vmem:[%s5886_s5 + $0x8c0] sm:$0xff] }
 0x217   : > { %1475 = vmatpush2.msra.mxu0 %v1416_v17  ;;  %1612 = vmatpush2.msra.mxu1 %v1557_v18  ;;  %v1807_v17 = vld [vmem:[%s5886_s5 + $0xad0] sm:$0xff]  ;;  %v1665_v18 = vld [vmem:[%s5886_s5 + $0x8b8] sm:$0xff] }
 0x218   : > { %1476 = vmatprep.subr.mxu0 %v1415_v19  ;;  %1613 = vmatprep.subr.mxu1 %v1556_v20  ;;  %v1806_v19 = vld [vmem:[%s5886_s5 + $0xac8] sm:$0xff]  ;;  %v1664_v20 = vld [vmem:[%s5886_s5 + $0x8b0] sm:$0xff] }
 0x219   : > { %1477 = vmatpush2.msra.mxu0 %v1414_v21  ;;  %1614 = vmatpush2.msra.mxu1 %v1555_v22  ;;  %v1805_v21 = vld [vmem:[%s5886_s5 + $0xac0] sm:$0xff]  ;;  %v1663_v22 = vld [vmem:[%s5886_s5 + $0x8a8] sm:$0xff] }
 0x21a   : > { %1478 = vmatprep.subr.mxu0 %v1413_v23  ;;  %1615 = vmatprep.subr.mxu1 %v1554_v24  ;;  %v1804_v23 = vld [vmem:[%s5886_s5 + $0xab8] sm:$0xff]  ;;  %v1662_v24 = vld [vmem:[%s5886_s5 + $0x8a0] sm:$0xff] }
 0x21b   : > { %1479 = vmatpush2.msra.mxu0 %v1412_v25  ;;  %1616 = vmatpush2.msra.mxu1 %v1553_v26  ;;  %v1803_v25 = vld [vmem:[%s5886_s5 + $0xab0] sm:$0xff]  ;;  %v1661_v26 = vld [vmem:[%s5886_s5 + $0x898] sm:$0xff] }
 0x21c   : > { %1480 = vmatprep.subr.mxu0 %v1411_v27  ;;  %1617 = vmatprep.subr.mxu1 %v1552_v28  ;;  %v1802_v27 = vld [vmem:[%s5886_s5 + $0xaa8] sm:$0xff]  ;;  %v1660_v28 = vld [vmem:[%s5886_s5 + $0x890] sm:$0xff] }
 0x21d   : > { %1481 = vmatpush2.msra.mxu0 %v1410_v29  ;;  %1618 = vmatpush2.msra.mxu1 %v1551_v30  ;;  %v1801_v29 = vld [vmem:[%s5886_s5 + $0xaa0] sm:$0xff]  ;;  %v1659_v30 = vld [vmem:[%s5886_s5 + $0x888] sm:$0xff] }
 0x21e   : > { %1482 = vmatprep.subr.mxu0 %v1409_v31  ;;  %1619 = vmatprep.subr.mxu1 %v1550_v32  ;;  %v1800_v31 = vld [vmem:[%s5886_s5 + $0xa98] sm:$0xff]  ;;  %v1658_v32 = vld [vmem:[%s5886_s5 + $0x880] sm:$0xff] }
 0x21f   : > { %1483 = vmatpush2.msra.mxu0 %v1408_v33  ;;  %1620 = vmatpush2.msra.mxu1 %v1549_v34  ;;  %v1799_v33 = vld [vmem:[%s5886_s5 + $0xa90] sm:$0xff]  ;;  %v1657_v34 = vld [vmem:[%s5886_s5 + $0x878] sm:$0xff] }
 0x220   : > { %1484 = vmatprep.subr.mxu0 %v1407_v35  ;;  %1621 = vmatprep.subr.mxu1 %v1548_v36  ;;  %v1798_v35 = vld [vmem:[%s5886_s5 + $0xa88] sm:$0xff]  ;;  %v1656_v36 = vld [vmem:[%s5886_s5 + $0x870] sm:$0xff] }
 0x221   : > { %1485 = vmatpush2.msra.mxu0 %v1406_v37  ;;  %1622 = vmatpush2.msra.mxu1 %v1547_v38  ;;  %v1797_v37 = vld [vmem:[%s5886_s5 + $0xa80] sm:$0xff]  ;;  %v1655_v38 = vld [vmem:[%s5886_s5 + $0x868] sm:$0xff] }
 0x222   : > { %1486 = vmatprep.subr.mxu0 %v1405_v39  ;;  %1623 = vmatprep.subr.mxu1 %v1546_v40  ;;  %v1796_v39 = vld [vmem:[%s5886_s5 + $0xa78] sm:$0xff]  ;;  %v1654_v40 = vld [vmem:[%s5886_s5 + $0x860] sm:$0xff] }
 0x223   : > { %1487 = vmatpush2.msra.mxu0 %v1404_v41  ;;  %1624 = vmatpush2.msra.mxu1 %v1545_v42  ;;  %v1795_v41 = vld [vmem:[%s5886_s5 + $0xa70] sm:$0xff]  ;;  %v1653_v42 = vld [vmem:[%s5886_s5 + $0x858] sm:$0xff] }
 0x224   : > { %1488 = vmatprep.subr.mxu0 %v1403_v43  ;;  %1625 = vmatprep.subr.mxu1 %v1544_v44  ;;  %v1794_v43 = vld [vmem:[%s5886_s5 + $0xa68] sm:$0xff]  ;;  %v1652_v44 = vld [vmem:[%s5886_s5 + $0x850] sm:$0xff] }
 0x225   : > { %1489 = vmatpush2.msra.mxu0 %v1402_v45  ;;  %1626 = vmatpush2.msra.mxu1 %v1543_v46  ;;  %v1793_v45 = vld [vmem:[%s5886_s5 + $0xa60] sm:$0xff]  ;;  %v1651_v46 = vld [vmem:[%s5886_s5 + $0x848] sm:$0xff] }
 0x226   : > { %1490 = vmatprep.subr.mxu0 %v1401_v47  ;;  %1627 = vmatprep.subr.mxu1 %v1542_v48  ;;  %v1792_v47 = vld [vmem:[%s5886_s5 + $0xa58] sm:$0xff]  ;;  %v1650_v48 = vld [vmem:[%s5886_s5 + $0x840] sm:$0xff] }
 0x227   : > { %1491 = vmatpush2.msra.mxu0 %v1400_v49  ;;  %1628 = vmatpush2.msra.mxu1 %v1541_v50  ;;  %v1791_v49 = vld [vmem:[%s5886_s5 + $0xa50] sm:$0xff]  ;;  %v1649_v50 = vld [vmem:[%s5886_s5 + $0x838] sm:$0xff] }
 0x228   : > { %1492 = vmatprep.subr.mxu0 %v1399_v52  ;;  %1629 = vmatprep.subr.mxu1 %v1540_v54  ;;  %v1790_v52 = vld [vmem:[%s5886_s5 + $0xa48] sm:$0xff]  ;;  %v1648_v54 = vld [vmem:[%s5886_s5 + $0x830] sm:$0xff] }
 0x229   : > { %1493 = vmatpush2.msra.mxu0 %v1398_v55  ;;  %1630 = vmatpush2.msra.mxu1 %v1539_v56  ;;  %v1789_v55 = vld [vmem:[%s5886_s5 + $0xa40] sm:$0xff]  ;;  %v1647_v56 = vld [vmem:[%s5886_s5 + $0x828] sm:$0xff] }
 0x22a   : > { %1494 = vmatprep.subr.mxu0 %v1397_v57  ;;  %1631 = vmatprep.subr.mxu1 %v1538_v58  ;;  %v1788_v57 = vld [vmem:[%s5886_s5 + $0xa38] sm:$0xff]  ;;  %v1646_v58 = vld [vmem:[%s5886_s5 + $0x820] sm:$0xff] }
 0x22b   : > { %1495 = vmatpush2.msra.mxu0 %v1396_v59  ;;  %1632 = vmatpush2.msra.mxu1 %v1537_v60  ;;  %v1787_v59 = vld [vmem:[%s5886_s5 + $0xa30] sm:$0xff]  ;;  %v1645_v60 = vld [vmem:[%s5886_s5 + $0x818] sm:$0xff] }
 0x22c   : > { %1497 = vmatmul.mubr.f32.vlgmr.msra.gmra.mxu0 %v1428_v62  ;;  %1633 = vmatprep.subr.mxu1 %v1536_v61  ;;  %v1786_v61 = vld [vmem:[%s5886_s5 + $0xa28] sm:$0xff]  ;;  %v1644_v62 = vld [vmem:[%s5886_s5 + $0x810] sm:$0xff] }
 0x22d   : > { %1710 = vmatprep.subr.mxu0 %v1673_v0  ;;  %1634 = vmatpush2.msra.mxu1 %v1535_v4  ;;  %v1785_v0 = vld [vmem:[%s5886_s5 + $0xa20] sm:$0xff]  ;;  %v1643_v4 = vld [vmem:[%s5886_s5 + $0x808] sm:$0xff] }
 0x22e   : > { %1711 = vmatpush1.msra.mxu0 %v1672_v5  ;;  %1774 = vmatprep.mubr.f32.mxu0 %v1707_v6  ;;  %v1784_v5 = vld [vmem:[%s5886_s5 + $0xa18] sm:$0xff]  ;;  %v1642_v6 = vld [vmem:[%s5886_s5 + $0x800] sm:$0xff] }
 0x22f   : > { %1636 = vmatmul.mubr.f32.vlgmr.msra.gmra.mxu1 %v1567_v8  ;;  %1712 = vmatprep.subr.mxu0 %v1671_v7  ;;  %v1783_v7 = vld [vmem:[%s5886_s5 + $0xa10] sm:$0xff]  ;;  %v1705_v8 = vld [vmem:[%s5886_s5 + $0x9f8] sm:$0xff] }
 0x230   : > { %1849 = vmatprep.subr.mxu1 %v1812_v9  ;;  %1713 = vmatpush1.msra.mxu0 %v1670_v12  ;;  %v1782_v9 = vld [vmem:[%s5886_s5 + $0xa08] sm:$0xff]  ;;  %v1704_v12 = vld [vmem:[%s5886_s5 + $0x9f0] sm:$0xff] }
 0x231   : > { %1850 = vmatpush1.msra.mxu1 %v1811_v13  ;;  %1913 = vmatprep.mubr.f32.mxu1 %v1846_v63  ;;  %v1781_v13 = vld [vmem:[%s5886_s5 + $0xa00] sm:$0xff]  ;;  %v1703_v63 = vld [vmem:[%s5886_s5 + $0x9e8] sm:$0xff] }
 0x232   : > { %1714 = vmatprep.subr.mxu0 %v1669_v1  ;;  %1851 = vmatprep.subr.mxu1 %v1810_v2  ;;  %v1844_v1 = vld [vmem:[%s5886_s5 + $0xbf8] sm:$0xff]  ;;  %v1702_v2 = vld [vmem:[%s5886_s5 + $0x9e0] sm:$0xff] }
 0x233   : > { %1715 = vmatpush1.msra.mxu0 %v1668_v3  ;;  %1852 = vmatpush1.msra.mxu1 %v1809_v10  ;;  %v1843_v3 = vld [vmem:[%s5886_s5 + $0xbf0] sm:$0xff]  ;;  %v1701_v10 = vld [vmem:[%s5886_s5 + $0x9d8] sm:$0xff] }
 0x234   : > { %1716 = vmatprep.subr.mxu0 %v1667_v11  ;;  %1853 = vmatprep.subr.mxu1 %v1808_v14  ;;  %v1842_v11 = vld [vmem:[%s5886_s5 + $0xbe8] sm:$0xff]  ;;  %v1700_v14 = vld [vmem:[%s5886_s5 + $0x9d0] sm:$0xff] }
 0x235   : > { %1717 = vmatpush1.msra.mxu0 %v1666_v15  ;;  %1854 = vmatpush1.msra.mxu1 %v1807_v17  ;;  %v1841_v15 = vld [vmem:[%s5886_s5 + $0xbe0] sm:$0xff]  ;;  %v1699_v17 = vld [vmem:[%s5886_s5 + $0x9c8] sm:$0xff] }
 0x236   : > { %1718 = vmatprep.subr.mxu0 %v1665_v18  ;;  %1855 = vmatprep.subr.mxu1 %v1806_v19  ;;  %v1840_v18 = vld [vmem:[%s5886_s5 + $0xbd8] sm:$0xff]  ;;  %v1698_v19 = vld [vmem:[%s5886_s5 + $0x9c0] sm:$0xff] }
 0x237   : > { %1719 = vmatpush1.msra.mxu0 %v1664_v20  ;;  %1856 = vmatpush1.msra.mxu1 %v1805_v21  ;;  %v1839_v20 = vld [vmem:[%s5886_s5 + $0xbd0] sm:$0xff]  ;;  %v1697_v21 = vld [vmem:[%s5886_s5 + $0x9b8] sm:$0xff] }
 0x238   : > { %1720 = vmatprep.subr.mxu0 %v1663_v22  ;;  %1857 = vmatprep.subr.mxu1 %v1804_v23  ;;  %v1838_v22 = vld [vmem:[%s5886_s5 + $0xbc8] sm:$0xff]  ;;  %v1696_v23 = vld [vmem:[%s5886_s5 + $0x9b0] sm:$0xff] }
 0x239   : > { %1721 = vmatpush1.msra.mxu0 %v1662_v24  ;;  %1858 = vmatpush1.msra.mxu1 %v1803_v25  ;;  %v1837_v24 = vld [vmem:[%s5886_s5 + $0xbc0] sm:$0xff]  ;;  %v1695_v25 = vld [vmem:[%s5886_s5 + $0x9a8] sm:$0xff] }
 0x23a   : > { %1722 = vmatprep.subr.mxu0 %v1661_v26  ;;  %1859 = vmatprep.subr.mxu1 %v1802_v27  ;;  %v1836_v26 = vld [vmem:[%s5886_s5 + $0xbb8] sm:$0xff]  ;;  %v1694_v27 = vld [vmem:[%s5886_s5 + $0x9a0] sm:$0xff] }
 0x23b   : > { %1723 = vmatpush1.msra.mxu0 %v1660_v28  ;;  %1860 = vmatpush1.msra.mxu1 %v1801_v29  ;;  %v1835_v28 = vld [vmem:[%s5886_s5 + $0xbb0] sm:$0xff]  ;;  %v1693_v29 = vld [vmem:[%s5886_s5 + $0x998] sm:$0xff] }
 0x23c   : > { %1724 = vmatprep.subr.mxu0 %v1659_v30  ;;  %1861 = vmatprep.subr.mxu1 %v1800_v31  ;;  %v1834_v30 = vld [vmem:[%s5886_s5 + $0xba8] sm:$0xff]  ;;  %v1692_v31 = vld [vmem:[%s5886_s5 + $0x990] sm:$0xff] }
 0x23d   : > { %1725 = vmatpush1.msra.mxu0 %v1658_v32  ;;  %1862 = vmatpush1.msra.mxu1 %v1799_v33  ;;  %v1833_v32 = vld [vmem:[%s5886_s5 + $0xba0] sm:$0xff]  ;;  %v1691_v33 = vld [vmem:[%s5886_s5 + $0x988] sm:$0xff] }
 0x23e   : > { %1726 = vmatprep.subr.mxu0 %v1657_v34  ;;  %1863 = vmatprep.subr.mxu1 %v1798_v35  ;;  %v1832_v34 = vld [vmem:[%s5886_s5 + $0xb98] sm:$0xff]  ;;  %v1690_v35 = vld [vmem:[%s5886_s5 + $0x980] sm:$0xff] }
 0x23f   : > { %1727 = vmatpush1.msra.mxu0 %v1656_v36  ;;  %1864 = vmatpush1.msra.mxu1 %v1797_v37  ;;  %v1831_v36 = vld [vmem:[%s5886_s5 + $0xb90] sm:$0xff]  ;;  %v1689_v37 = vld [vmem:[%s5886_s5 + $0x978] sm:$0xff] }
 0x240   : > { %1728 = vmatprep.subr.mxu0 %v1655_v38  ;;  %1865 = vmatprep.subr.mxu1 %v1796_v39  ;;  %v1830_v38 = vld [vmem:[%s5886_s5 + $0xb88] sm:$0xff]  ;;  %v1688_v39 = vld [vmem:[%s5886_s5 + $0x970] sm:$0xff] }
 0x241   : > { %1729 = vmatpush1.msra.mxu0 %v1654_v40  ;;  %1866 = vmatpush1.msra.mxu1 %v1795_v41  ;;  %v1829_v40 = vld [vmem:[%s5886_s5 + $0xb80] sm:$0xff]  ;;  %v1687_v41 = vld [vmem:[%s5886_s5 + $0x968] sm:$0xff] }
 0x242   : > { %1730 = vmatprep.subr.mxu0 %v1653_v42  ;;  %1867 = vmatprep.subr.mxu1 %v1794_v43  ;;  %v1828_v42 = vld [vmem:[%s5886_s5 + $0xb78] sm:$0xff]  ;;  %v1686_v43 = vld [vmem:[%s5886_s5 + $0x960] sm:$0xff] }
 0x243   : > { %1731 = vmatpush1.msra.mxu0 %v1652_v44  ;;  %1868 = vmatpush1.msra.mxu1 %v1793_v45  ;;  %v1827_v44 = vld [vmem:[%s5886_s5 + $0xb70] sm:$0xff]  ;;  %v1685_v45 = vld [vmem:[%s5886_s5 + $0x958] sm:$0xff] }
 0x244   : > { %1732 = vmatprep.subr.mxu0 %v1651_v46  ;;  %1869 = vmatprep.subr.mxu1 %v1792_v47  ;;  %v1826_v46 = vld [vmem:[%s5886_s5 + $0xb68] sm:$0xff]  ;;  %v1684_v47 = vld [vmem:[%s5886_s5 + $0x950] sm:$0xff] }
 0x245   : > { %1733 = vmatpush1.msra.mxu0 %v1650_v48  ;;  %1870 = vmatpush1.msra.mxu1 %v1791_v49  ;;  %v1825_v48 = vld [vmem:[%s5886_s5 + $0xb60] sm:$0xff]  ;;  %v1683_v49 = vld [vmem:[%s5886_s5 + $0x948] sm:$0xff] }
 0x246   : > { %1734 = vmatprep.subr.mxu0 %v1649_v50  ;;  %1871 = vmatprep.subr.mxu1 %v1790_v52  ;;  %v1824_v50 = vld [vmem:[%s5886_s5 + $0xb58] sm:$0xff]  ;;  %v1682_v52 = vld [vmem:[%s5886_s5 + $0x940] sm:$0xff] }
 0x247   : > { %1735 = vmatpush1.msra.mxu0 %v1648_v54  ;;  %1872 = vmatpush1.msra.mxu1 %v1789_v55  ;;  %v1823_v54 = vld [vmem:[%s5886_s5 + $0xb50] sm:$0xff]  ;;  %v1681_v55 = vld [vmem:[%s5886_s5 + $0x938] sm:$0xff] }
 0x248   : > { %1736 = vmatprep.subr.mxu0 %v1647_v56  ;;  %1873 = vmatprep.subr.mxu1 %v1788_v57  ;;  %v1822_v56 = vld [vmem:[%s5886_s5 + $0xb48] sm:$0xff]  ;;  %v1680_v57 = vld [vmem:[%s5886_s5 + $0x930] sm:$0xff] }
 0x249   : > { %1737 = vmatpush1.msra.mxu0 %v1646_v58  ;;  %1874 = vmatpush1.msra.mxu1 %v1787_v59  ;;  %v1821_v58 = vld [vmem:[%s5886_s5 + $0xb40] sm:$0xff]  ;;  %v1679_v59 = vld [vmem:[%s5886_s5 + $0x928] sm:$0xff] }
 0x24a   : > { %1738 = vmatprep.subr.mxu0 %v1645_v60  ;;  %1875 = vmatprep.subr.mxu1 %v1786_v61  ;;  %v1820_v60 = vld [vmem:[%s5886_s5 + $0xb38] sm:$0xff]  ;;  %v1678_v61 = vld [vmem:[%s5886_s5 + $0x920] sm:$0xff] }
 0x24b   : > { %1739 = vmatpush1.msra.mxu0 %v1644_v62  ;;  %1876 = vmatpush1.msra.mxu1 %v1785_v0  ;;  %v1819_v62 = vld [vmem:[%s5886_s5 + $0xb30] sm:$0xff]  ;;  %v1677_v0 = vld [vmem:[%s5886_s5 + $0x918] sm:$0xff] }
 0x24c   : > { %1740 = vmatprep.subr.mxu0 %v1643_v4  ;;  %1877 = vmatprep.subr.mxu1 %v1784_v5  ;;  %v1818_v4 = vld [vmem:[%s5886_s5 + $0xb28] sm:$0xff]  ;;  %v1676_v5 = vld [vmem:[%s5886_s5 + $0x910] sm:$0xff] }
 0x24d   : > { %1741 = vmatpush1.msra.mxu0 %v1642_v6  ;;  %1878 = vmatpush1.msra.mxu1 %v1783_v7  ;;  %v1817_v6 = vld [vmem:[%s5886_s5 + $0xb20] sm:$0xff]  ;;  %v1675_v7 = vld [vmem:[%s5886_s5 + $0x908] sm:$0xff] }
 0x24e   : > { %1742 = vmatprep.subr.mxu0 %v1705_v8  ;;  %1879 = vmatprep.subr.mxu1 %v1782_v9  ;;  %v1816_v8 = vld [vmem:[%s5886_s5 + $0xb18] sm:$0xff]  ;;  %v1674_v9 = vld [vmem:[%s5886_s5 + $0x900] sm:$0xff] }
 0x24f   : > { %1743 = vmatpush2.msra.mxu0 %v1704_v12  ;;  %1880 = vmatpush1.msra.mxu1 %v1781_v13  ;;  %v1815_v12 = vld [vmem:[%s5886_s5 + $0xb10] sm:$0xff]  ;;  %v1814_v13 = vld [vmem:[%s5886_s5 + $0xb08] sm:$0xff] }
 0x250   : > { %1744 = vmatprep.subr.mxu0 %v1703_v63  ;;  %1881 = vmatprep.subr.mxu1 %v1844_v1  ;;  %v1706_v63 = vrot.slane %v4287_v51, 4  ;;  %v1951_v1 = vld [vmem:[%s5886_s5 + $0xcf8] sm:$0xff] }
 0x251   : > { %1745 = vmatpush2.msra.mxu0 %v1702_v2  ;;  %1882 = vmatpush2.msra.mxu1 %v1843_v3  ;;  %v1813_v2 = vld [vmem:[%s5886_s5 + $0xb00] sm:$0xff]  ;;  %v1950_v3 = vld [vmem:[%s5886_s5 + $0xcf0] sm:$0xff] }
 0x252   : > { %1746 = vmatprep.subr.mxu0 %v1701_v10  ;;  %1883 = vmatprep.subr.mxu1 %v1842_v11  ;;  %v1985_v10 = vrot.slane %v4289_v53, 6  ;;  %v1949_v11 = vld [vmem:[%s5886_s5 + $0xce8] sm:$0xff] }
 0x253   : > { %1747 = vmatpush2.msra.mxu0 %v1700_v14  ;;  %1884 = vmatpush2.msra.mxu1 %v1841_v15  ;;  %v1845_v14 = vrot.slane %v4287_v51, 5  ;;  %v2090_v15 = vld [vmem:[%s5886_s5 + $0xef8] sm:$0xff] }
 0x254   : > { %1748 = vmatprep.subr.mxu0 %v1699_v17  ;;  %1885 = vmatprep.subr.mxu1 %v1840_v18  ;;  %v1948_v17 = vld [vmem:[%s5886_s5 + $0xce0] sm:$0xff]  ;;  %v2089_v18 = vld [vmem:[%s5886_s5 + $0xef0] sm:$0xff] }
 0x255   : > { %1749 = vmatpush2.msra.mxu0 %v1698_v19  ;;  %1886 = vmatpush2.msra.mxu1 %v1839_v20  ;;  %v2124_v19 = vrot.slane %v4289_v53, 7  ;;  %v1947_v20 = vld [vmem:[%s5886_s5 + $0xcd8] sm:$0xff]  ;;  %v1945_v53 = vld [vmem:[%s5886_s5 + $0xcc8] sm:$0xff] }
 0x256   : > { %1750 = vmatprep.subr.mxu0 %v1697_v21  ;;  %1887 = vmatprep.subr.mxu1 %v1838_v22  ;;  %v2088_v21 = vld [vmem:[%s5886_s5 + $0xee8] sm:$0xff]  ;;  %v1946_v22 = vld [vmem:[%s5886_s5 + $0xcd0] sm:$0xff] }
 0x257   : > { %1751 = vmatpush2.msra.mxu0 %v1696_v23  ;;  %1888 = vmatpush2.msra.mxu1 %v1837_v24  ;;  %v2087_v23 = vld [vmem:[%s5886_s5 + $0xee0] sm:$0xff]  ;;  %v2086_v24 = vld [vmem:[%s5886_s5 + $0xed8] sm:$0xff] }
 0x258   : > { %1752 = vmatprep.subr.mxu0 %v1695_v25  ;;  %1889 = vmatprep.subr.mxu1 %v1836_v26  ;;  %v1944_v25 = vld [vmem:[%s5886_s5 + $0xcc0] sm:$0xff]  ;;  %v2085_v26 = vld [vmem:[%s5886_s5 + $0xed0] sm:$0xff] }
 0x259   : > { %1753 = vmatpush2.msra.mxu0 %v1694_v27  ;;  %1890 = vmatpush2.msra.mxu1 %v1835_v28  ;;  %v1943_v27 = vld [vmem:[%s5886_s5 + $0xcb8] sm:$0xff]  ;;  %v2084_v28 = vld [vmem:[%s5886_s5 + $0xec8] sm:$0xff] }
 0x25a   : > { %1754 = vmatprep.subr.mxu0 %v1693_v29  ;;  %1891 = vmatprep.subr.mxu1 %v1834_v30  ;;  %v1942_v29 = vld [vmem:[%s5886_s5 + $0xcb0] sm:$0xff]  ;;  %v2083_v30 = vld [vmem:[%s5886_s5 + $0xec0] sm:$0xff] }
 0x25b   : > { %1755 = vmatpush2.msra.mxu0 %v1692_v31  ;;  %1892 = vmatpush2.msra.mxu1 %v1833_v32  ;;  %v1941_v31 = vld [vmem:[%s5886_s5 + $0xca8] sm:$0xff]  ;;  %v2082_v32 = vld [vmem:[%s5886_s5 + $0xeb8] sm:$0xff] }
 0x25c   : > { %1756 = vmatprep.subr.mxu0 %v1691_v33  ;;  %1893 = vmatprep.subr.mxu1 %v1832_v34  ;;  %v1940_v33 = vld [vmem:[%s5886_s5 + $0xca0] sm:$0xff]  ;;  %v2081_v34 = vld [vmem:[%s5886_s5 + $0xeb0] sm:$0xff] }
 0x25d   : > { %1757 = vmatpush2.msra.mxu0 %v1690_v35  ;;  %1894 = vmatpush2.msra.mxu1 %v1831_v36  ;;  %v1939_v35 = vld [vmem:[%s5886_s5 + $0xc98] sm:$0xff]  ;;  %v2080_v36 = vld [vmem:[%s5886_s5 + $0xea8] sm:$0xff] }
 0x25e   : > { %1758 = vmatprep.subr.mxu0 %v1689_v37  ;;  %1895 = vmatprep.subr.mxu1 %v1830_v38  ;;  %v1938_v37 = vld [vmem:[%s5886_s5 + $0xc90] sm:$0xff]  ;;  %v2079_v38 = vld [vmem:[%s5886_s5 + $0xea0] sm:$0xff] }
 0x25f   : > { %1759 = vmatpush2.msra.mxu0 %v1688_v39  ;;  %1896 = vmatpush2.msra.mxu1 %v1829_v40  ;;  %v1937_v39 = vld [vmem:[%s5886_s5 + $0xc88] sm:$0xff]  ;;  %v2078_v40 = vld [vmem:[%s5886_s5 + $0xe98] sm:$0xff] }
 0x260   : > { %1760 = vmatprep.subr.mxu0 %v1687_v41  ;;  %1897 = vmatprep.subr.mxu1 %v1828_v42  ;;  %v1936_v41 = vld [vmem:[%s5886_s5 + $0xc80] sm:$0xff]  ;;  %v2077_v42 = vld [vmem:[%s5886_s5 + $0xe90] sm:$0xff] }
 0x261   : > { %1761 = vmatpush2.msra.mxu0 %v1686_v43  ;;  %1898 = vmatpush2.msra.mxu1 %v1827_v44  ;;  %v1935_v43 = vld [vmem:[%s5886_s5 + $0xc78] sm:$0xff]  ;;  %v2076_v44 = vld [vmem:[%s5886_s5 + $0xe88] sm:$0xff] }
 0x262   : > { %1762 = vmatprep.subr.mxu0 %v1685_v45  ;;  %1899 = vmatprep.subr.mxu1 %v1826_v46  ;;  %v1934_v45 = vld [vmem:[%s5886_s5 + $0xc70] sm:$0xff]  ;;  %v2075_v46 = vld [vmem:[%s5886_s5 + $0xe80] sm:$0xff] }
 0x263   : > { %1763 = vmatpush2.msra.mxu0 %v1684_v47  ;;  %1900 = vmatpush2.msra.mxu1 %v1825_v48  ;;  %v1933_v47 = vld [vmem:[%s5886_s5 + $0xc68] sm:$0xff]  ;;  %v2074_v48 = vld [vmem:[%s5886_s5 + $0xe78] sm:$0xff] }
 0x264   : > { %1764 = vmatprep.subr.mxu0 %v1683_v49  ;;  %1901 = vmatprep.subr.mxu1 %v1824_v50  ;;  %v1932_v49 = vld [vmem:[%s5886_s5 + $0xc60] sm:$0xff]  ;;  %v2073_v50 = vld [vmem:[%s5886_s5 + $0xe70] sm:$0xff] }
 0x265   : > { %1765 = vmatpush2.msra.mxu0 %v1682_v52  ;;  %1902 = vmatpush2.msra.mxu1 %v1823_v54  ;;  %v1931_v52 = vld [vmem:[%s5886_s5 + $0xc58] sm:$0xff]  ;;  %v2072_v54 = vld [vmem:[%s5886_s5 + $0xe68] sm:$0xff] }
 0x266   : > { %1766 = vmatprep.subr.mxu0 %v1681_v55  ;;  %1903 = vmatprep.subr.mxu1 %v1822_v56  ;;  %v1930_v55 = vld [vmem:[%s5886_s5 + $0xc50] sm:$0xff]  ;;  %v2071_v56 = vld [vmem:[%s5886_s5 + $0xe60] sm:$0xff] }
 0x267   : > { %1767 = vmatpush2.msra.mxu0 %v1680_v57  ;;  %1904 = vmatpush2.msra.mxu1 %v1821_v58  ;;  %v1929_v57 = vld [vmem:[%s5886_s5 + $0xc48] sm:$0xff]  ;;  %v2070_v58 = vld [vmem:[%s5886_s5 + $0xe58] sm:$0xff] }
 0x268   : > { %1768 = vmatprep.subr.mxu0 %v1679_v59  ;;  %1905 = vmatprep.subr.mxu1 %v1820_v60  ;;  %v1928_v59 = vld [vmem:[%s5886_s5 + $0xc40] sm:$0xff]  ;;  %v2069_v60 = vld [vmem:[%s5886_s5 + $0xe50] sm:$0xff] }
 0x269   : > { %1769 = vmatpush2.msra.mxu0 %v1678_v61  ;;  %1906 = vmatpush2.msra.mxu1 %v1819_v62  ;;  %v1927_v61 = vld [vmem:[%s5886_s5 + $0xc38] sm:$0xff]  ;;  %v2068_v62 = vld [vmem:[%s5886_s5 + $0xe48] sm:$0xff] }
 0x26a   : > { %1770 = vmatprep.subr.mxu0 %v1677_v0  ;;  %1907 = vmatprep.subr.mxu1 %v1818_v4  ;;  %v1926_v0 = vld [vmem:[%s5886_s5 + $0xc30] sm:$0xff]  ;;  %v2067_v4 = vld [vmem:[%s5886_s5 + $0xe40] sm:$0xff] }
 0x26b   : > { %1771 = vmatpush2.msra.mxu0 %v1676_v5  ;;  %1908 = vmatpush2.msra.mxu1 %v1817_v6  ;;  %v1925_v5 = vld [vmem:[%s5886_s5 + $0xc28] sm:$0xff]  ;;  %v2066_v6 = vld [vmem:[%s5886_s5 + $0xe38] sm:$0xff] }
 0x26c   : > { %1772 = vmatprep.subr.mxu0 %v1675_v7  ;;  %1909 = vmatprep.subr.mxu1 %v1816_v8  ;;  %v1924_v7 = vld [vmem:[%s5886_s5 + $0xc20] sm:$0xff]  ;;  %v2065_v8 = vld [vmem:[%s5886_s5 + $0xe30] sm:$0xff] }
 0x26d   : > { %1773 = vmatpush2.msra.mxu0 %v1674_v9  ;;  %1910 = vmatpush2.msra.mxu1 %v1815_v12  ;;  %v1923_v9 = vld [vmem:[%s5886_s5 + $0xc18] sm:$0xff]  ;;  %v2064_v12 = vld [vmem:[%s5886_s5 + $0xe28] sm:$0xff] }
 0x26e   : > { %1775 = vmatmul.mubr.f32.vlgmr.msra.gmra.mxu0 %v1706_v63  ;;  %1911 = vmatprep.subr.mxu1 %v1814_v13  ;;  %v1922_v13 = vld [vmem:[%s5886_s5 + $0xc10] sm:$0xff]  ;;  %v2063_v63 = vld [vmem:[%s5886_s5 + $0xe20] sm:$0xff] }
 0x26f   : > { %1988 = vmatprep.subr.mxu0 %v1951_v1  ;;  %1912 = vmatpush2.msra.mxu1 %v1813_v2  ;;  %v1921_v1 = vld [vmem:[%s5886_s5 + $0xc08] sm:$0xff]  ;;  %v2062_v2 = vld [vmem:[%s5886_s5 + $0xe18] sm:$0xff] }
 0x270   : > { %1989 = vmatpush1.msra.mxu0 %v1950_v3  ;;  %2052 = vmatprep.mubr.f32.mxu0 %v1985_v10  ;;  %v1920_v3 = vld [vmem:[%s5886_s5 + $0xc00] sm:$0xff]  ;;  %v2061_v10 = vld [vmem:[%s5886_s5 + $0xe10] sm:$0xff] }
 0x271   : > { %1914 = vmatmul.mubr.f32.vlgmr.msra.gmra.mxu1 %v1845_v14  ;;  %1990 = vmatprep.subr.mxu0 %v1949_v11  ;;  %v1983_v11 = vld [vmem:[%s5886_s5 + $0xdf8] sm:$0xff]  ;;  %v2060_v14 = vld [vmem:[%s5886_s5 + $0xe08] sm:$0xff] }
 0x272   : > { %2127 = vmatprep.subr.mxu1 %v2090_v15  ;;  %1991 = vmatpush1.msra.mxu0 %v1948_v17  ;;  %v1982_v15 = vld [vmem:[%s5886_s5 + $0xdf0] sm:$0xff]  ;;  %v2059_v17 = vld [vmem:[%s5886_s5 + $0xe00] sm:$0xff] }
 0x273   : > { %2128 = vmatpush1.msra.mxu1 %v2089_v18  ;;  %2191 = vmatprep.mubr.f32.mxu1 %v2124_v19  ;;  %v1981_v18 = vld [vmem:[%s5886_s5 + $0xde8] sm:$0xff]  ;;  %v2122_v19 = vld [vmem:[%s5886_s5 + $0xff8] sm:$0xff] }
 0x274   : > { %1992 = vmatprep.subr.mxu0 %v1947_v20  ;;  %2129 = vmatprep.subr.mxu1 %v2088_v21  ;;  %v1980_v20 = vld [vmem:[%s5886_s5 + $0xde0] sm:$0xff]  ;;  %v2121_v21 = vld [vmem:[%s5886_s5 + $0xff0] sm:$0xff] }
 0x275   : > { %1993 = vmatpush1.msra.mxu0 %v1946_v22  ;;  %2130 = vmatpush1.msra.mxu1 %v2087_v23  ;;  %v1979_v22 = vld [vmem:[%s5886_s5 + $0xdd8] sm:$0xff]  ;;  %v2120_v23 = vld [vmem:[%s5886_s5 + $0xfe8] sm:$0xff] }
 0x276   : > { %1994 = vmatprep.subr.mxu0 %v1945_v53  ;;  %2131 = vmatprep.subr.mxu1 %v2086_v24  ;;  %v1978_v53 = vld [vmem:[%s5886_s5 + $0xdd0] sm:$0xff]  ;;  %v2119_v24 = vld [vmem:[%s5886_s5 + $0xfe0] sm:$0xff] }
 0x277   : > { %1995 = vmatpush1.msra.mxu0 %v1944_v25  ;;  %2132 = vmatpush1.msra.mxu1 %v2085_v26  ;;  %v1977_v25 = vld [vmem:[%s5886_s5 + $0xdc8] sm:$0xff]  ;;  %v2118_v26 = vld [vmem:[%s5886_s5 + $0xfd8] sm:$0xff] }
 0x278   : > { %1996 = vmatprep.subr.mxu0 %v1943_v27  ;;  %2133 = vmatprep.subr.mxu1 %v2084_v28  ;;  %v1976_v27 = vld [vmem:[%s5886_s5 + $0xdc0] sm:$0xff]  ;;  %v2117_v28 = vld [vmem:[%s5886_s5 + $0xfd0] sm:$0xff] }
 0x279   : > { %1997 = vmatpush1.msra.mxu0 %v1942_v29  ;;  %2134 = vmatpush1.msra.mxu1 %v2083_v30  ;;  %v1975_v29 = vld [vmem:[%s5886_s5 + $0xdb8] sm:$0xff]  ;;  %v2116_v30 = vld [vmem:[%s5886_s5 + $0xfc8] sm:$0xff] }
 0x27a   : > { %1998 = vmatprep.subr.mxu0 %v1941_v31  ;;  %2135 = vmatprep.subr.mxu1 %v2082_v32  ;;  %v1974_v31 = vld [vmem:[%s5886_s5 + $0xdb0] sm:$0xff]  ;;  %v2115_v32 = vld [vmem:[%s5886_s5 + $0xfc0] sm:$0xff] }
 0x27b   : > { %1999 = vmatpush1.msra.mxu0 %v1940_v33  ;;  %2136 = vmatpush1.msra.mxu1 %v2081_v34  ;;  %v1973_v33 = vld [vmem:[%s5886_s5 + $0xda8] sm:$0xff]  ;;  %v2114_v34 = vld [vmem:[%s5886_s5 + $0xfb8] sm:$0xff] }
 0x27c   : > { %2000 = vmatprep.subr.mxu0 %v1939_v35  ;;  %2137 = vmatprep.subr.mxu1 %v2080_v36  ;;  %v1972_v35 = vld [vmem:[%s5886_s5 + $0xda0] sm:$0xff]  ;;  %v2113_v36 = vld [vmem:[%s5886_s5 + $0xfb0] sm:$0xff] }
 0x27d   : > { %2001 = vmatpush1.msra.mxu0 %v1938_v37  ;;  %2138 = vmatpush1.msra.mxu1 %v2079_v38  ;;  %v1971_v37 = vld [vmem:[%s5886_s5 + $0xd98] sm:$0xff]  ;;  %v2112_v38 = vld [vmem:[%s5886_s5 + $0xfa8] sm:$0xff] }
 0x27e   : > { %2002 = vmatprep.subr.mxu0 %v1937_v39  ;;  %2139 = vmatprep.subr.mxu1 %v2078_v40  ;;  %v1970_v39 = vld [vmem:[%s5886_s5 + $0xd90] sm:$0xff]  ;;  %v2111_v40 = vld [vmem:[%s5886_s5 + $0xfa0] sm:$0xff] }
 0x27f   : > { %2003 = vmatpush1.msra.mxu0 %v1936_v41  ;;  %2140 = vmatpush1.msra.mxu1 %v2077_v42  ;;  %v1969_v41 = vld [vmem:[%s5886_s5 + $0xd88] sm:$0xff]  ;;  %v2110_v42 = vld [vmem:[%s5886_s5 + $0xf98] sm:$0xff] }
 0x280   : > { %2004 = vmatprep.subr.mxu0 %v1935_v43  ;;  %2141 = vmatprep.subr.mxu1 %v2076_v44  ;;  %v1968_v43 = vld [vmem:[%s5886_s5 + $0xd80] sm:$0xff]  ;;  %v2109_v44 = vld [vmem:[%s5886_s5 + $0xf90] sm:$0xff] }
 0x281   : > { %2005 = vmatpush1.msra.mxu0 %v1934_v45  ;;  %2142 = vmatpush1.msra.mxu1 %v2075_v46  ;;  %v1967_v45 = vld [vmem:[%s5886_s5 + $0xd78] sm:$0xff]  ;;  %v2108_v46 = vld [vmem:[%s5886_s5 + $0xf88] sm:$0xff] }
 0x282   : > { %2006 = vmatprep.subr.mxu0 %v1933_v47  ;;  %2143 = vmatprep.subr.mxu1 %v2074_v48  ;;  %v1966_v47 = vld [vmem:[%s5886_s5 + $0xd70] sm:$0xff]  ;;  %v2107_v48 = vld [vmem:[%s5886_s5 + $0xf80] sm:$0xff] }
 0x283   : > { %2007 = vmatpush1.msra.mxu0 %v1932_v49  ;;  %2144 = vmatpush1.msra.mxu1 %v2073_v50  ;;  %v1965_v49 = vld [vmem:[%s5886_s5 + $0xd68] sm:$0xff]  ;;  %v2106_v50 = vld [vmem:[%s5886_s5 + $0xf78] sm:$0xff] }
 0x284   : > { %2008 = vmatprep.subr.mxu0 %v1931_v52  ;;  %2145 = vmatprep.subr.mxu1 %v2072_v54  ;;  %v1964_v52 = vld [vmem:[%s5886_s5 + $0xd60] sm:$0xff]  ;;  %v2105_v54 = vld [vmem:[%s5886_s5 + $0xf70] sm:$0xff] }
 0x285   : > { %2009 = vmatpush1.msra.mxu0 %v1930_v55  ;;  %2146 = vmatpush1.msra.mxu1 %v2071_v56  ;;  %v1963_v55 = vld [vmem:[%s5886_s5 + $0xd58] sm:$0xff]  ;;  %v2104_v56 = vld [vmem:[%s5886_s5 + $0xf68] sm:$0xff] }
 0x286   : > { %2010 = vmatprep.subr.mxu0 %v1929_v57  ;;  %2147 = vmatprep.subr.mxu1 %v2070_v58  ;;  %v1962_v57 = vld [vmem:[%s5886_s5 + $0xd50] sm:$0xff]  ;;  %v2103_v58 = vld [vmem:[%s5886_s5 + $0xf60] sm:$0xff] }
 0x287   : > { %2011 = vmatpush1.msra.mxu0 %v1928_v59  ;;  %2148 = vmatpush1.msra.mxu1 %v2069_v60  ;;  %v1961_v59 = vld [vmem:[%s5886_s5 + $0xd48] sm:$0xff]  ;;  %v2102_v60 = vld [vmem:[%s5886_s5 + $0xf58] sm:$0xff] }
 0x288   : > { %2012 = vmatprep.subr.mxu0 %v1927_v61  ;;  %2149 = vmatprep.subr.mxu1 %v2068_v62  ;;  %v1960_v61 = vld [vmem:[%s5886_s5 + $0xd40] sm:$0xff]  ;;  %v2101_v62 = vld [vmem:[%s5886_s5 + $0xf50] sm:$0xff] }
 0x289   : > { %2013 = vmatpush1.msra.mxu0 %v1926_v0  ;;  %2150 = vmatpush1.msra.mxu1 %v2067_v4  ;;  %v1959_v0 = vld [vmem:[%s5886_s5 + $0xd38] sm:$0xff]  ;;  %v2100_v4 = vld [vmem:[%s5886_s5 + $0xf48] sm:$0xff] }
 0x28a   : > { %2014 = vmatprep.subr.mxu0 %v1925_v5  ;;  %2151 = vmatprep.subr.mxu1 %v2066_v6  ;;  %v1958_v5 = vld [vmem:[%s5886_s5 + $0xd30] sm:$0xff]  ;;  %v2099_v6 = vld [vmem:[%s5886_s5 + $0xf40] sm:$0xff] }
 0x28b   : > { %2015 = vmatpush1.msra.mxu0 %v1924_v7  ;;  %2152 = vmatpush1.msra.mxu1 %v2065_v8  ;;  %v1957_v7 = vld [vmem:[%s5886_s5 + $0xd28] sm:$0xff]  ;;  %v2098_v8 = vld [vmem:[%s5886_s5 + $0xf38] sm:$0xff] }
 0x28c   : > { %2016 = vmatprep.subr.mxu0 %v1923_v9  ;;  %2153 = vmatprep.subr.mxu1 %v2064_v12  ;;  %v1956_v9 = vld [vmem:[%s5886_s5 + $0xd20] sm:$0xff]  ;;  %v2097_v12 = vld [vmem:[%s5886_s5 + $0xf30] sm:$0xff] }
 0x28d   : > { %2017 = vmatpush1.msra.mxu0 %v1922_v13  ;;  %2154 = vmatpush1.msra.mxu1 %v2063_v63  ;;  %v1955_v13 = vld [vmem:[%s5886_s5 + $0xd18] sm:$0xff]  ;;  %v2096_v63 = vld [vmem:[%s5886_s5 + $0xf28] sm:$0xff] }
 0x28e   : > { %2018 = vmatprep.subr.mxu0 %v1921_v1  ;;  %2155 = vmatprep.subr.mxu1 %v2062_v2  ;;  %v1954_v1 = vld [vmem:[%s5886_s5 + $0xd10] sm:$0xff]  ;;  %v2095_v2 = vld [vmem:[%s5886_s5 + $0xf20] sm:$0xff] }
 0x28f   : > { %2019 = vmatpush1.msra.mxu0 %v1920_v3  ;;  %2156 = vmatpush1.msra.mxu1 %v2061_v10  ;;  %v1953_v3 = vld [vmem:[%s5886_s5 + $0xd08] sm:$0xff]  ;;  %v2094_v10 = vld [vmem:[%s5886_s5 + $0xf18] sm:$0xff] }
 0x290   : > { %2020 = vmatprep.subr.mxu0 %v1983_v11  ;;  %2157 = vmatprep.subr.mxu1 %v2060_v14  ;;  %v1952_v11 = vld [vmem:[%s5886_s5 + $0xd00] sm:$0xff]  ;;  %v2093_v14 = vld [vmem:[%s5886_s5 + $0xf10] sm:$0xff] }
 0x291   : > { %2021 = vmatpush2.msra.mxu0 %v1982_v15  ;;  %2158 = vmatpush1.msra.mxu1 %v2059_v17  ;;  %v2092_v15 = vld [vmem:[%s5886_s5 + $0xf08] sm:$0xff]  ;;  %v1984_v17 = vrot.slane %v4287_v51, 6 }
 0x292   : > { %2022 = vmatprep.subr.mxu0 %v1981_v18  ;;  %2159 = vmatprep.subr.mxu1 %v2122_v19  ;;  %v2091_v18 = vld [vmem:[%s5886_s5 + $0xf00] sm:$0xff]  ;;  %v2123_v19 = vrot.slane %v4287_v51, 7 }
 0x293   : > { %2023 = vmatpush2.msra.mxu0 %v1980_v20  ;;  %2160 = vmatpush2.msra.mxu1 %v2121_v21  ;;  %v5456_v20 = vld [vmem:[%s5887_s6] sm:$0xff] }
 0x294   : > { %2024 = vmatprep.subr.mxu0 %v1979_v22  ;;  %2161 = vmatprep.subr.mxu1 %v2120_v23  ;;  %v5463_v21 = vld [vmem:[%s5888_s7] sm:$0xff] }
 0x295   : > { %2025 = vmatpush2.msra.mxu0 %v1978_v53  ;;  %2162 = vmatpush2.msra.mxu1 %v2119_v24 }
 0x296   : > { %2026 = vmatprep.subr.mxu0 %v1977_v25  ;;  %2163 = vmatprep.subr.mxu1 %v2118_v26 }
 0x297   : > { %2027 = vmatpush2.msra.mxu0 %v1976_v27  ;;  %2164 = vmatpush2.msra.mxu1 %v2117_v28 }
 0x298   : > { %2028 = vmatprep.subr.mxu0 %v1975_v29  ;;  %2165 = vmatprep.subr.mxu1 %v2116_v30 }
 0x299   : > { %2029 = vmatpush2.msra.mxu0 %v1974_v31  ;;  %2166 = vmatpush2.msra.mxu1 %v2115_v32 }
 0x29a   : > { %2030 = vmatprep.subr.mxu0 %v1973_v33  ;;  %2167 = vmatprep.subr.mxu1 %v2114_v34 }
 0x29b   : > { %2031 = vmatpush2.msra.mxu0 %v1972_v35  ;;  %2168 = vmatpush2.msra.mxu1 %v2113_v36 }
 0x29c   : > { %2032 = vmatprep.subr.mxu0 %v1971_v37  ;;  %2169 = vmatprep.subr.mxu1 %v2112_v38 }
 0x29d   : > { %2033 = vmatpush2.msra.mxu0 %v1970_v39  ;;  %2170 = vmatpush2.msra.mxu1 %v2111_v40 }
 0x29e   : > { %2034 = vmatprep.subr.mxu0 %v1969_v41  ;;  %2171 = vmatprep.subr.mxu1 %v2110_v42 }
 0x29f   : > { %2035 = vmatpush2.msra.mxu0 %v1968_v43  ;;  %2172 = vmatpush2.msra.mxu1 %v2109_v44 }
 0x2a0   : > { %2036 = vmatprep.subr.mxu0 %v1967_v45  ;;  %2173 = vmatprep.subr.mxu1 %v2108_v46 }
 0x2a1   : > { %2037 = vmatpush2.msra.mxu0 %v1966_v47  ;;  %2174 = vmatpush2.msra.mxu1 %v2107_v48 }
 0x2a2   : > { %2038 = vmatprep.subr.mxu0 %v1965_v49  ;;  %2175 = vmatprep.subr.mxu1 %v2106_v50 }
 0x2a3   : > { %2039 = vmatpush2.msra.mxu0 %v1964_v52  ;;  %2176 = vmatpush2.msra.mxu1 %v2105_v54 }
 0x2a4   : > { %2040 = vmatprep.subr.mxu0 %v1963_v55  ;;  %2177 = vmatprep.subr.mxu1 %v2104_v56 }
 0x2a5   : > { %2041 = vmatpush2.msra.mxu0 %v1962_v57  ;;  %2178 = vmatpush2.msra.mxu1 %v2103_v58 }
 0x2a6   : > { %2042 = vmatprep.subr.mxu0 %v1961_v59  ;;  %2179 = vmatprep.subr.mxu1 %v2102_v60 }
 0x2a7   : > { %2043 = vmatpush2.msra.mxu0 %v1960_v61  ;;  %2180 = vmatpush2.msra.mxu1 %v2101_v62 }
 0x2a8   : > { %2044 = vmatprep.subr.mxu0 %v1959_v0  ;;  %2181 = vmatprep.subr.mxu1 %v2100_v4 }
 0x2a9   : > { %2045 = vmatpush2.msra.mxu0 %v1958_v5  ;;  %2182 = vmatpush2.msra.mxu1 %v2099_v6  ;;  %v2262_v5 = vld [vmem:[%s5887_s6 + $0x8] sm:$0xff] }
 0x2aa   : > { %2046 = vmatprep.subr.mxu0 %v1957_v7  ;;  %2183 = vmatprep.subr.mxu1 %v2098_v8  ;;  %v2264_v7 = vld [vmem:[%s5888_s7 + $0x8] sm:$0xff] }
 0x2ab   : > { %2047 = vmatpush2.msra.mxu0 %v1956_v9  ;;  %2184 = vmatpush2.msra.mxu1 %v2097_v12  ;;  %v1218_v51 = vpop.f32.mrf.mxu0  ;;  %v2641_v8 = vld [vmem:[%s5889_s8 + $0x1e8] sm:$0xff]  ;;  %v2643_v9 = vld [vmem:[%s5889_s8 + $0x1f8] sm:$0xff]  ;;  %v2640_v12 = vld [vmem:[%s5889_s8 + $0x1e0] sm:$0xff] }
 0x2ac   : > { %2048 = vmatprep.subr.mxu0 %v1955_v13  ;;  %2185 = vmatprep.subr.mxu1 %v2096_v63  ;;  %v2642_v13 = vld [vmem:[%s5889_s8 + $0x1f0] sm:$0xff]  ;;  %v2637_v63 = vld [vmem:[%s5889_s8 + $0x1c8] sm:$0xff] }
 0x2ad   : > { %2049 = vmatpush2.msra.mxu0 %v1954_v1  ;;  %2186 = vmatpush2.msra.mxu1 %v2095_v2  ;;  %v1359_v22 = vpop.f32.mrf.mxu1  ;;  %v1220_v23 = vpop.f32.mrf.mxu0  ;;  %v2639_v1 = vld [vmem:[%s5889_s8 + $0x1d8] sm:$0xff]  ;;  %v2636_v2 = vld [vmem:[%s5889_s8 + $0x1c0] sm:$0xff] }
 0x2ae   : > { %2050 = vmatprep.subr.mxu0 %v1953_v3  ;;  %2187 = vmatprep.subr.mxu1 %v2094_v10  ;;  %v2200_v27 = vrot.slane %v1359_v22, 7  ;;  %v2638_v3 = vld [vmem:[%s5889_s8 + $0x1d0] sm:$0xff]  ;;  %v2633_v10 = vld [vmem:[%s5889_s8 + $0x1a8] sm:$0xff]  ;;  %v2624_v22 = vld [vmem:[%s5889_s8 + $0x160] sm:$0xff] }
 0x2af   : > { %2051 = vmatpush2.msra.mxu0 %v1952_v11  ;;  %2188 = vmatpush2.msra.mxu1 %v2093_v14  ;;  %v1361_v24 = vpop.f32.mrf.mxu1  ;;  %v2635_v11 = vld [vmem:[%s5889_s8 + $0x1b8] sm:$0xff]  ;;  %v2632_v14 = vld [vmem:[%s5889_s8 + $0x1a0] sm:$0xff] }
 0x2b0   : > { %2053 = vmatmul.mubr.f32.vlgmr.msra.gmra.mxu0 %v1984_v17  ;;  %2189 = vmatprep.subr.mxu1 %v2092_v15  ;;  %v2201_v31 = vrot.slane %v1361_v24, 7  ;;  %v2241_v34 = vsel %vm2240_vm3, %v1218_v51, %v2200_v27  ;;  %v2634_v15 = vld [vmem:[%s5889_s8 + $0x1b0] sm:$0xff]  ;;  %v2629_v17 = vld [vmem:[%s5889_s8 + $0x188] sm:$0xff]  ;;  %v2627_v51 = vld [vmem:[%s5889_s8 + $0x178] sm:$0xff] }
 0x2b1   : > { %2190 = vmatpush2.msra.mxu1 %v2091_v18  ;;  %3318 = vmatprep.mubr.msk.f32.mxu0 %vm2265_vm2, %v5456_v20  ;;  %v2631_v18 = vld [vmem:[%s5889_s8 + $0x198] sm:$0xff]  ;;  %v2617_v27 = vld [vmem:[%s5889_s8 + $0x128] sm:$0xff] }
 0x2b2   : > { %2192 = vmatmul.mubr.f32.vlgmr.msra.gmra.mxu1 %v2123_v19  ;;  %v2242_v39 = vsel %vm2240_vm3, %v1220_v23, %v2201_v31  ;;  %v2628_v19 = vld [vmem:[%s5889_s8 + $0x180] sm:$0xff]  ;;  %v2626_v23 = vld [vmem:[%s5889_s8 + $0x170] sm:$0xff]  ;;  %v2623_v24 = vld [vmem:[%s5889_s8 + $0x158] sm:$0xff] }
 0x2b3   : > { %3323 = vmatprep.mubr.msk.f32.mxu1 %vm2265_vm2, %v5463_v21  ;;  %v2613_v31 = vld [vmem:[%s5889_s8 + $0x108] sm:$0xff] }
 0x2ec   : > { %v1498_v53 = vpop.f32.mrf.mxu0 }
 0x2ed   : > { %v2206_v29 = vrot.slane %v1498_v53, 6  ;;  %v2621_v53 = vld [vmem:[%s5889_s8 + $0x148] sm:$0xff] }
 0x2ee   : > { %v1500_v26 = vpop.f32.mrf.mxu0 }
 0x2ef   : > { %v1637_v25 = vpop.f32.mrf.mxu1  ;;  %v2207_v32 = vrot.slane %v1500_v26, 6  ;;  %v2244_v37 = vsel %vm2243_vm4, %v2241_v34, %v2206_v29  ;;  %v2622_v26 = vld [vmem:[%s5889_s8 + $0x150] sm:$0xff]  ;;  %v2616_v29 = vld [vmem:[%s5889_s8 + $0x120] sm:$0xff] }
 0x2f0   : > { %v2212_v35 = vrot.slane %v1637_v25, 5  ;;  %v2620_v25 = vld [vmem:[%s5889_s8 + $0x140] sm:$0xff]  ;;  %v2614_v34 = vld [vmem:[%s5889_s8 + $0x110] sm:$0xff] }
 0x2f1   : > { %v1639_v30 = vpop.f32.mrf.mxu1  ;;  %v2245_v41 = vsel %vm2243_vm4, %v2242_v39, %v2207_v32  ;;  %v2615_v32 = vld [vmem:[%s5889_s8 + $0x118] sm:$0xff]  ;;  %v2605_v39 = vld [vmem:[%s5889_s8 + $0xc8] sm:$0xff] }
 0x2f2   : > { %v2213_v40 = vrot.slane %v1639_v30, 5  ;;  %v2247_v44 = vsel %vm2246_vm5, %v2244_v37, %v2212_v35  ;;  %v2618_v30 = vld [vmem:[%s5889_s8 + $0x130] sm:$0xff]  ;;  %v2609_v35 = vld [vmem:[%s5889_s8 + $0xe8] sm:$0xff]  ;;  %v2608_v37 = vld [vmem:[%s5889_s8 + $0xe0] sm:$0xff] }
 0x2f4   : > { %v2248_v47 = vsel %vm2246_vm5, %v2245_v41, %v2213_v40  ;;  %v2607_v40 = vld [vmem:[%s5889_s8 + $0xd8] sm:$0xff]  ;;  %v2604_v41 = vld [vmem:[%s5889_s8 + $0xc0] sm:$0xff] }
 0x32e   : > { %v1776_v28 = vpop.f32.mrf.mxu0 }
 0x32f   : > { %v2218_v38 = vrot.slane %v1776_v28, 4  ;;  %v2619_v28 = vld [vmem:[%s5889_s8 + $0x138] sm:$0xff] }
 0x330   : > { %v1778_v36 = vpop.f32.mrf.mxu0 }
 0x331   : > { %v1915_v33 = vpop.f32.mrf.mxu1  ;;  %v2219_v42 = vrot.slane %v1778_v36, 4  ;;  %v2250_v46 = vsel %vm2249_vm6, %v2247_v44, %v2218_v38  ;;  %v2611_v36 = vld [vmem:[%s5889_s8 + $0xf8] sm:$0xff]  ;;  %v2610_v38 = vld [vmem:[%s5889_s8 + $0xf0] sm:$0xff] }
 0x332   : > { %v2224_v45 = vrot.slane %v1915_v33, 3  ;;  %v2612_v33 = vld [vmem:[%s5889_s8 + $0x100] sm:$0xff]  ;;  %v2603_v44 = vld [vmem:[%s5889_s8 + $0xb8] sm:$0xff] }
 0x333   : > { %v1917_v43 = vpop.f32.mrf.mxu1  ;;  %v2251_v50 = vsel %vm2249_vm6, %v2248_v47, %v2219_v42  ;;  %v2606_v42 = vld [vmem:[%s5889_s8 + $0xd0] sm:$0xff]  ;;  %v2597_v47 = vld [vmem:[%s5889_s8 + $0x88] sm:$0xff] }
 0x334   : > { %v2225_v48 = vrot.slane %v1917_v43, 3  ;;  %v2253_v54 = vsel %vm2252_vm7, %v2250_v46, %v2224_v45  ;;  %v2601_v43 = vld [vmem:[%s5889_s8 + $0xa8] sm:$0xff]  ;;  %v2600_v45 = vld [vmem:[%s5889_s8 + $0xa0] sm:$0xff]  ;;  %v2602_v46 = vld [vmem:[%s5889_s8 + $0xb0] sm:$0xff] }
 0x336   : > { %v2254_v60 = vsel %vm2252_vm7, %v2251_v50, %v2225_v48  ;;  %v2599_v48 = vld [vmem:[%s5889_s8 + $0x98] sm:$0xff]  ;;  %v2598_v50 = vld [vmem:[%s5889_s8 + $0x90] sm:$0xff] }
 0x370   : > { %v2054_v49 = vpop.f32.mrf.mxu0 }
 0x371   : > { %v2230_v52 = vrot.slane %v2054_v49, 2  ;;  %v2596_v49 = vld [vmem:[%s5889_s8 + $0x80] sm:$0xff] }
 0x372   : > { %v2056_v55 = vpop.f32.mrf.mxu0  ;;  %v2193_v56 = vpop.f32.mrf.mxu1 }
 0x373   : > { %v2256_v57 = vsel %vm2255_vm8, %v2253_v54, %v2230_v52  ;;  %v2231_v58 = vrot.slane %v2056_v55, 2  ;;  %v2236_v59 = vrot.slane %v2193_v56, 1  ;;  %v2593_v52 = vld [vmem:[%s5889_s8 + $0x68] sm:$0xff]  ;;  %v2595_v54 = vld [vmem:[%s5889_s8 + $0x78] sm:$0xff]  ;;  %v2592_v55 = vld [vmem:[%s5889_s8 + $0x60] sm:$0xff] }
 0x374   : > { %v2195_v61 = vpop.f32.mrf.mxu1  ;;  %v2594_v56 = vld [vmem:[%s5889_s8 + $0x70] sm:$0xff] }
 0x375   : > { %v2257_v62 = vsel %vm2255_vm8, %v2254_v60, %v2231_v58  ;;  %v2237_v0 = vrot.slane %v2195_v61, 1  ;;  %v2259_v4 = vsel %vm2258_vm9, %v2256_v57, %v2236_v59  ;;  %v2589_v57 = vld [vmem:[%s5889_s8 + $0x48] sm:$0xff]  ;;  %v2591_v58 = vld [vmem:[%s5889_s8 + $0x58] sm:$0xff]  ;;  %v2588_v59 = vld [vmem:[%s5889_s8 + $0x40] sm:$0xff] }
 0x376   : > { %3316 = vmatprep.subr.mxu0 %v2259_v4  ;;  %v2590_v60 = vld [vmem:[%s5889_s8 + $0x50] sm:$0xff]  ;;  %v2585_v61 = vld [vmem:[%s5889_s8 + $0x28] sm:$0xff] }
 0x377   : > { %3317 = vmatpush3.msra.mxu0 %v2259_v4  ;;  %v2260_v6 = vsel %vm2258_vm9, %v2257_v62, %v2237_v0  ;;  %v2587_v62 = vld [vmem:[%s5889_s8 + $0x38] sm:$0xff]  ;;  %v2584_v0 = vld [vmem:[%s5889_s8 + $0x20] sm:$0xff] }
 0x378   : > { %3321 = vmatprep.subr.mxu1 %v2260_v6  ;;  %3326 = vmatprep.subr.mxu0 %v2260_v6 }
 0x379   : > { %3319 = vmatmul.mubr.msk.f32.vlgmr.msra.gmra.mxu0 %vm2265_vm2, %v2262_v5  ;;  %3322 = vmatpush3.msra.mxu1 %v2260_v6 }
 0x37a   : > { %3327 = vmatpush3.msra.mxu0 %v2260_v6  ;;  %3324 = vmatmul.mubr.msk.f32.vlgmr.msra.gmra.mxu1 %vm2265_vm2, %v2264_v7  ;;  %v2583_v6 = vld [vmem:[%s5889_s8 + $0x18] sm:$0xff] }
 0x37b   : > { %3331 = vmatprep.subr.mxu1 %v2259_v4  ;;  %3328 = vmatprep.mubr.msk.f32.mxu0 %vm2265_vm2, %v5456_v20  ;;  %v2630_v20 = vld [vmem:[%s5889_s8 + $0x190] sm:$0xff] }
 0x37c   : > { %3332 = vmatpush3.msra.mxu1 %v2259_v4  ;;  %3333 = vmatprep.mubr.msk.f32.mxu1 %vm2265_vm2, %v5463_v21  ;;  %v2625_v21 = vld [vmem:[%s5889_s8 + $0x168] sm:$0xff]  ;;  %v2586_v4 = vld [vmem:[%s5889_s8 + $0x30] sm:$0xff] }
 0x37d   : > { %3329 = vmatmul.mubr.msk.f32.vlgmr.msra.gmra.mxu0 %vm2265_vm2, %v2262_v5  ;;  %2644 = vmatprep.subr.mxu0 %v2641_v8  ;;  %v2581_v5 = vld [vmem:[%s5889_s8 + $0x8] sm:$0xff]  ;;  %v2582_v8 = vld [vmem:[%s5889_s8 + $0x10] sm:$0xff] }
 0x37e   : > { %3334 = vmatmul.mubr.msk.f32.vlgmr.msra.gmra.mxu1 %vm2265_vm2, %v2264_v7  ;;  %2721 = vmatprep.subr.mxu1 %v2643_v9  ;;  %v2580_v7 = vld [vmem:[%s5889_s8] sm:$0xff]  ;;  %v2859_v9 = vld [vmem:[%s5890_s9 + $0x1e8] sm:$0xff] }
 0x37f   : > { %2645 = vmatpush1.msra.mxu0 %v2640_v12  ;;  %2722 = vmatpush1.msra.mxu1 %v2642_v13  ;;  %v2861_v12 = vld [vmem:[%s5890_s9 + $0x1f8] sm:$0xff] }
 0x380   : > { %2646 = vmatprep.subr.mxu0 %v2637_v63  ;;  %2723 = vmatprep.subr.mxu1 %v2639_v1 }
 0x381   : > { %2647 = vmatpush1.msra.mxu0 %v2636_v2  ;;  %2724 = vmatpush1.msra.mxu1 %v2638_v3 }
 0x382   : > { %2648 = vmatprep.subr.mxu0 %v2633_v10  ;;  %2725 = vmatprep.subr.mxu1 %v2635_v11  ;;  %v2858_v10 = vld [vmem:[%s5890_s9 + $0x1e0] sm:$0xff]  ;;  %v2860_v11 = vld [vmem:[%s5890_s9 + $0x1f0] sm:$0xff] }
 0x383   : > { %2649 = vmatpush1.msra.mxu0 %v2632_v14  ;;  %2726 = vmatpush1.msra.mxu1 %v2634_v15  ;;  %v2855_v14 = vld [vmem:[%s5890_s9 + $0x1c8] sm:$0xff]  ;;  %v2857_v15 = vld [vmem:[%s5890_s9 + $0x1d8] sm:$0xff] }
 0x384   : > { %2650 = vmatprep.subr.mxu0 %v2629_v17  ;;  %2727 = vmatprep.subr.mxu1 %v2631_v18  ;;  %v2854_v17 = vld [vmem:[%s5890_s9 + $0x1c0] sm:$0xff]  ;;  %v2856_v18 = vld [vmem:[%s5890_s9 + $0x1d0] sm:$0xff] }
 0x385   : > { %2651 = vmatpush1.msra.mxu0 %v2628_v19  ;;  %2728 = vmatpush1.msra.mxu1 %v2630_v20  ;;  %v2851_v19 = vld [vmem:[%s5890_s9 + $0x1a8] sm:$0xff]  ;;  %v2853_v20 = vld [vmem:[%s5890_s9 + $0x1b8] sm:$0xff] }
 0x386   : > { %2652 = vmatprep.subr.mxu0 %v2625_v21  ;;  %2729 = vmatprep.subr.mxu1 %v2627_v51  ;;  %v2850_v51 = vld [vmem:[%s5890_s9 + $0x1a0] sm:$0xff] }
 0x387   : > { %2653 = vmatpush1.msra.mxu0 %v2624_v22  ;;  %2730 = vmatpush1.msra.mxu1 %v2626_v23  ;;  %v2852_v22 = vld [vmem:[%s5890_s9 + $0x1b0] sm:$0xff]  ;;  %v2847_v23 = vld [vmem:[%s5890_s9 + $0x188] sm:$0xff] }
 0x388   : > { %2654 = vmatprep.subr.mxu0 %v2621_v53  ;;  %2731 = vmatprep.subr.mxu1 %v2623_v24  ;;  %v2849_v53 = vld [vmem:[%s5890_s9 + $0x198] sm:$0xff]  ;;  %v2846_v24 = vld [vmem:[%s5890_s9 + $0x180] sm:$0xff] }
 0x389   : > { %2655 = vmatpush1.msra.mxu0 %v2620_v25  ;;  %2732 = vmatpush1.msra.mxu1 %v2622_v26  ;;  %v2848_v25 = vld [vmem:[%s5890_s9 + $0x190] sm:$0xff]  ;;  %v2843_v26 = vld [vmem:[%s5890_s9 + $0x168] sm:$0xff] }
 0x38a   : > { %2656 = vmatprep.subr.mxu0 %v2617_v27  ;;  %2733 = vmatprep.subr.mxu1 %v2619_v28  ;;  %v2845_v27 = vld [vmem:[%s5890_s9 + $0x178] sm:$0xff]  ;;  %v2842_v28 = vld [vmem:[%s5890_s9 + $0x160] sm:$0xff] }
 0x38b   : > { %2657 = vmatpush1.msra.mxu0 %v2616_v29  ;;  %2734 = vmatpush1.msra.mxu1 %v2618_v30  ;;  %v2844_v29 = vld [vmem:[%s5890_s9 + $0x170] sm:$0xff]  ;;  %v2839_v30 = vld [vmem:[%s5890_s9 + $0x148] sm:$0xff] }
 0x38c   : > { %2658 = vmatprep.subr.mxu0 %v2613_v31  ;;  %2735 = vmatprep.subr.mxu1 %v2615_v32  ;;  %v2841_v31 = vld [vmem:[%s5890_s9 + $0x158] sm:$0xff]  ;;  %v2838_v32 = vld [vmem:[%s5890_s9 + $0x140] sm:$0xff] }
 0x38d   : > { %2659 = vmatpush1.msra.mxu0 %v2612_v33  ;;  %2736 = vmatpush1.msra.mxu1 %v2614_v34  ;;  %v2840_v33 = vld [vmem:[%s5890_s9 + $0x150] sm:$0xff]  ;;  %v2835_v34 = vld [vmem:[%s5890_s9 + $0x128] sm:$0xff] }
 0x38e   : > { %2660 = vmatprep.subr.mxu0 %v2609_v35  ;;  %2737 = vmatprep.subr.mxu1 %v2611_v36  ;;  %v2837_v35 = vld [vmem:[%s5890_s9 + $0x138] sm:$0xff]  ;;  %v2834_v36 = vld [vmem:[%s5890_s9 + $0x120] sm:$0xff] }
 0x38f   : > { %2661 = vmatpush1.msra.mxu0 %v2608_v37  ;;  %2738 = vmatpush1.msra.mxu1 %v2610_v38  ;;  %v2836_v37 = vld [vmem:[%s5890_s9 + $0x130] sm:$0xff]  ;;  %v2831_v38 = vld [vmem:[%s5890_s9 + $0x108] sm:$0xff] }
 0x390   : > { %2662 = vmatprep.subr.mxu0 %v2605_v39  ;;  %2739 = vmatprep.subr.mxu1 %v2607_v40  ;;  %v2833_v39 = vld [vmem:[%s5890_s9 + $0x118] sm:$0xff]  ;;  %v2830_v40 = vld [vmem:[%s5890_s9 + $0x100] sm:$0xff] }
 0x391   : > { %2663 = vmatpush1.msra.mxu0 %v2604_v41  ;;  %2740 = vmatpush1.msra.mxu1 %v2606_v42  ;;  %v2832_v41 = vld [vmem:[%s5890_s9 + $0x110] sm:$0xff]  ;;  %v2827_v42 = vld [vmem:[%s5890_s9 + $0xe8] sm:$0xff] }
 0x392   : > { %2664 = vmatprep.subr.mxu0 %v2601_v43  ;;  %2741 = vmatprep.subr.mxu1 %v2603_v44  ;;  %v2829_v43 = vld [vmem:[%s5890_s9 + $0xf8] sm:$0xff]  ;;  %v2826_v44 = vld [vmem:[%s5890_s9 + $0xe0] sm:$0xff] }
 0x393   : > { %2665 = vmatpush1.msra.mxu0 %v2600_v45  ;;  %2742 = vmatpush1.msra.mxu1 %v2602_v46  ;;  %v2828_v45 = vld [vmem:[%s5890_s9 + $0xf0] sm:$0xff]  ;;  %v2823_v46 = vld [vmem:[%s5890_s9 + $0xc8] sm:$0xff] }
 0x394   : > { %2666 = vmatprep.subr.mxu0 %v2597_v47  ;;  %2743 = vmatprep.subr.mxu1 %v2599_v48  ;;  %v2825_v47 = vld [vmem:[%s5890_s9 + $0xd8] sm:$0xff]  ;;  %v2822_v48 = vld [vmem:[%s5890_s9 + $0xc0] sm:$0xff] }
 0x395   : > { %2667 = vmatpush1.msra.mxu0 %v2596_v49  ;;  %2744 = vmatpush1.msra.mxu1 %v2598_v50  ;;  %v2824_v49 = vld [vmem:[%s5890_s9 + $0xd0] sm:$0xff]  ;;  %v2819_v50 = vld [vmem:[%s5890_s9 + $0xa8] sm:$0xff] }
 0x396   : > { %2668 = vmatprep.subr.mxu0 %v2593_v52  ;;  %2745 = vmatprep.subr.mxu1 %v2595_v54  ;;  %v2821_v52 = vld [vmem:[%s5890_s9 + $0xb8] sm:$0xff]  ;;  %v2818_v54 = vld [vmem:[%s5890_s9 + $0xa0] sm:$0xff] }
 0x397   : > { %2669 = vmatpush1.msra.mxu0 %v2592_v55  ;;  %2746 = vmatpush1.msra.mxu1 %v2594_v56  ;;  %v2820_v55 = vld [vmem:[%s5890_s9 + $0xb0] sm:$0xff]  ;;  %v2815_v56 = vld [vmem:[%s5890_s9 + $0x88] sm:$0xff] }
 0x398   : > { %2670 = vmatprep.subr.mxu0 %v2589_v57  ;;  %2747 = vmatprep.subr.mxu1 %v2591_v58  ;;  %v2817_v57 = vld [vmem:[%s5890_s9 + $0x98] sm:$0xff]  ;;  %v2814_v58 = vld [vmem:[%s5890_s9 + $0x80] sm:$0xff] }
 0x399   : > { %2671 = vmatpush1.msra.mxu0 %v2588_v59  ;;  %2748 = vmatpush1.msra.mxu1 %v2590_v60  ;;  %v2816_v59 = vld [vmem:[%s5890_s9 + $0x90] sm:$0xff]  ;;  %v2811_v60 = vld [vmem:[%s5890_s9 + $0x68] sm:$0xff] }
 0x39a   : > { %2708 = vmatprep.mubr.f32.mxu0 %v3354_v16  ;;  %2785 = vmatprep.mubr.f32.mxu1 %v3354_v16 }
 0x39b   : > { %2672 = vmatprep.subr.mxu0 %v2585_v61  ;;  %2749 = vmatprep.subr.mxu1 %v2587_v62  ;;  %v2813_v61 = vld [vmem:[%s5890_s9 + $0x78] sm:$0xff]  ;;  %v2810_v62 = vld [vmem:[%s5890_s9 + $0x60] sm:$0xff] }
 0x39c   : > { %2673 = vmatpush1.msra.mxu0 %v2584_v0  ;;  %2750 = vmatpush1.msra.mxu1 %v2586_v4  ;;  %v2812_v0 = vld [vmem:[%s5890_s9 + $0x70] sm:$0xff]  ;;  %v2807_v4 = vld [vmem:[%s5890_s9 + $0x48] sm:$0xff] }
 0x39d   : > { %2674 = vmatprep.subr.mxu0 %v2581_v5  ;;  %2751 = vmatprep.subr.mxu1 %v2583_v6  ;;  %v2809_v5 = vld [vmem:[%s5890_s9 + $0x58] sm:$0xff] }
 0x39e   : > { %2675 = vmatpush1.msra.mxu0 %v2580_v7  ;;  %2752 = vmatpush1.msra.mxu1 %v2582_v8  ;;  %v2806_v8 = vld [vmem:[%s5890_s9 + $0x40] sm:$0xff] }
 0x39f   : > { %2862 = vmatprep.subr.mxu0 %v2859_v9  ;;  %2939 = vmatprep.subr.mxu1 %v2861_v12  ;;  %v2808_v9 = vld [vmem:[%s5890_s9 + $0x50] sm:$0xff]  ;;  %v2803_v12 = vld [vmem:[%s5890_s9 + $0x28] sm:$0xff] }
 0x439   : > { %v3320_v13 = vpop.f32.mrf.mxu0 }
 0x43a   : > { %v3325_v63 = vpop.f32.mrf.mxu1 }
 0x43b   : > { %v2338_v1 = vpop.f32.mrf.mxu0  ;;  %v2429_v21 = vsub.f32 %v3320_v13, %v3325_v63  ;;  %v2805_v13 = vld [vmem:[%s5890_s9 + $0x38] sm:$0xff]  ;;  %v2802_v63 = vld [vmem:[%s5890_s9 + $0x20] sm:$0xff] }
 0x43c   : > { %v2419_v2 = vpop.f32.mrf.mxu1 }
 0x43d   : > { %v2428_v3 = vsub.f32 %v2338_v1, %v2419_v2  ;;  %v3330_v6 = vpop.f32.mrf.mxu0  ;;  %v2804_v1 = vld [vmem:[%s5890_s9 + $0x30] sm:$0xff]  ;;  %v2799_v2 = vld [vmem:[%s5890_s9 + $0x8] sm:$0xff] }
 0x43e   : > { %v3335_v7 = vpop.f32.mrf.mxu1 }
 0x43f   : > { %2709 = vmatmul.mubr.f32.vlgmr.msra.gmra.mxu0 %v2428_v3  ;;  %2786 = vmatmul.mubr.f32.vlgmr.msra.gmra.mxu1 %v2428_v3  ;;  %v2801_v3 = vld [vmem:[%s5890_s9 + $0x18] sm:$0xff] }
 0x440   : > { %2863 = vmatpush1.msra.mxu0 %v2858_v10  ;;  %2940 = vmatpush1.msra.mxu1 %v2860_v11  ;;  %v2496_v10 = vpop.f32.mrf.mxu0  ;;  %v2571_v11 = vpop.f32.mrf.mxu1 }
 0x441   : > { %2864 = vmatprep.subr.mxu0 %v2855_v14  ;;  %2941 = vmatprep.subr.mxu1 %v2857_v15  ;;  %v2798_v14 = vld [vmem:[%s5890_s9] sm:$0xff]  ;;  %v2800_v15 = vld [vmem:[%s5890_s9 + $0x10] sm:$0xff] }
 0x442   : > { %2865 = vmatpush1.msra.mxu0 %v2854_v17  ;;  %2942 = vmatpush1.msra.mxu1 %v2856_v18  ;;  %v2572_v17 = vadd.f32 %v2571_v11, %v2496_v10  ;;  %v2577_v18 = vadd.f32 %v3335_v7, %v3330_v6 }
 0x443   : > { %2714 = vmatprep.mubr.f32.mxu0 %v3354_v16  ;;  %2791 = vmatprep.mubr.f32.mxu1 %v3354_v16 }
 0x444   : > { %2866 = vmatprep.subr.mxu0 %v2851_v19  ;;  %2943 = vmatprep.subr.mxu1 %v2853_v20 }
 0x445   : > { %2715 = vmatmul.mubr.f32.gmra.mxu0 %v2429_v21  ;;  %2792 = vmatmul.mubr.f32.gmra.mxu1 %v2429_v21 }
 0x446   : > { %2867 = vmatpush1.msra.mxu0 %v2850_v51  ;;  %2944 = vmatpush1.msra.mxu1 %v2852_v22 }
 0x447   : > { %2868 = vmatprep.subr.mxu0 %v2847_v23  ;;  %2945 = vmatprep.subr.mxu1 %v2849_v53 }
 0x448   : > { %2869 = vmatpush1.msra.mxu0 %v2846_v24  ;;  %2946 = vmatpush1.msra.mxu1 %v2848_v25 }
 0x449   : > { %2870 = vmatprep.subr.mxu0 %v2843_v26  ;;  %2947 = vmatprep.subr.mxu1 %v2845_v27 }
 0x44a   : > { %2871 = vmatpush1.msra.mxu0 %v2842_v28  ;;  %2948 = vmatpush1.msra.mxu1 %v2844_v29 }
 0x44b   : > { %2872 = vmatprep.subr.mxu0 %v2839_v30  ;;  %2949 = vmatprep.subr.mxu1 %v2841_v31 }
 0x44c   : > { %2873 = vmatpush1.msra.mxu0 %v2838_v32  ;;  %2950 = vmatpush1.msra.mxu1 %v2840_v33 }
 0x44d   : > { %2874 = vmatprep.subr.mxu0 %v2835_v34  ;;  %2951 = vmatprep.subr.mxu1 %v2837_v35 }
 0x44e   : > { %2875 = vmatpush1.msra.mxu0 %v2834_v36  ;;  %2952 = vmatpush1.msra.mxu1 %v2836_v37 }
 0x44f   : > { %2876 = vmatprep.subr.mxu0 %v2831_v38  ;;  %2953 = vmatprep.subr.mxu1 %v2833_v39 }
 0x450   : > { %2877 = vmatpush1.msra.mxu0 %v2830_v40  ;;  %2954 = vmatpush1.msra.mxu1 %v2832_v41 }
 0x451   : > { %2878 = vmatprep.subr.mxu0 %v2827_v42  ;;  %2955 = vmatprep.subr.mxu1 %v2829_v43 }
 0x452   : > { %2879 = vmatpush1.msra.mxu0 %v2826_v44  ;;  %2956 = vmatpush1.msra.mxu1 %v2828_v45 }
 0x453   : > { %2880 = vmatprep.subr.mxu0 %v2823_v46  ;;  %2957 = vmatprep.subr.mxu1 %v2825_v47 }
 0x454   : > { %2881 = vmatpush1.msra.mxu0 %v2822_v48  ;;  %2958 = vmatpush1.msra.mxu1 %v2824_v49 }
 0x455   : > { %2882 = vmatprep.subr.mxu0 %v2819_v50  ;;  %2959 = vmatprep.subr.mxu1 %v2821_v52 }
 0x456   : > { %2883 = vmatpush1.msra.mxu0 %v2818_v54  ;;  %2960 = vmatpush1.msra.mxu1 %v2820_v55 }
 0x457   : > { %2884 = vmatprep.subr.mxu0 %v2815_v56  ;;  %2961 = vmatprep.subr.mxu1 %v2817_v57 }
 0x458   : > { %2885 = vmatpush1.msra.mxu0 %v2814_v58  ;;  %2962 = vmatpush1.msra.mxu1 %v2816_v59 }
 0x459   : > { %2886 = vmatprep.subr.mxu0 %v2811_v60  ;;  %2963 = vmatprep.subr.mxu1 %v2813_v61 }
 0x45a   : > { %2887 = vmatpush1.msra.mxu0 %v2810_v62  ;;  %2964 = vmatpush1.msra.mxu1 %v2812_v0 }
 0x45b   : > { %2888 = vmatprep.subr.mxu0 %v2807_v4  ;;  %2965 = vmatprep.subr.mxu1 %v2809_v5 }
 0x45c   : > { %2889 = vmatpush1.msra.mxu0 %v2806_v8  ;;  %2966 = vmatpush1.msra.mxu1 %v2808_v9 }
 0x45d   : > { %2890 = vmatprep.subr.mxu0 %v2803_v12  ;;  %2967 = vmatprep.subr.mxu1 %v2805_v13 }
 0x45e   : > { %2891 = vmatpush1.msra.mxu0 %v2802_v63  ;;  %2968 = vmatpush1.msra.mxu1 %v2804_v1 }
 0x45f   : > { %2892 = vmatprep.subr.mxu0 %v2799_v2  ;;  %2969 = vmatprep.subr.mxu1 %v2801_v3 }
 0x460   : > { %2893 = vmatpush1.msra.mxu0 %v2798_v14  ;;  %2926 = vmatprep.mubr.f32.mxu0 %v3354_v16 }
 0x461   : > { %2970 = vmatpush1.msra.mxu1 %v2800_v15  ;;  %3003 = vmatprep.mubr.f32.mxu1 %v3354_v16 }
 0x462   : > { %2927 = vmatmul.mubr.f32.vlgmr.msra.gmra.mxu0 %v2572_v17  ;;  %3004 = vmatmul.mubr.f32.vlgmr.msra.gmra.mxu1 %v2572_v17 }
 0x463   : > { %2932 = vmatprep.mubr.f32.mxu0 %v3354_v16  ;;  %3009 = vmatprep.mubr.f32.mxu1 %v3354_v16 }
 0x466   : > { %2933 = vmatmul.mubr.f32.gmra.mxu0 %v2577_v18  ;;  %3010 = vmatmul.mubr.f32.gmra.mxu1 %v2577_v18 }
 0x4ff   : > { %v2710_v19 = vpop.f32.mrf.mxu0  ;;  %v2787_v20 = vpop.f32.mrf.mxu1 }
 0x501   : > { %v2712_v21 = vpop.f32.mrf.mxu0  ;;  %v2789_v51 = vpop.f32.mrf.mxu1 }
 0x505   : > { %v2716_v22 = vpop.f32.mrf.mxu0  ;;  %v2793_v23 = vpop.f32.mrf.mxu1 }
 0x507   : > { %v2718_v53 = vpop.f32.mrf.mxu0  ;;  %v2795_v24 = vpop.f32.mrf.mxu1 }
 0x522   : > { %v2928_v25 = vpop.f32.mrf.mxu0  ;;  %v3005_v26 = vpop.f32.mrf.mxu1 }
 0x523   : > { %v3016_v27 = vsub.f32 %v2710_v19, %v2928_v25  ;;  %v3018_v16 = vsub.f32 %v2787_v20, %v3005_v26 }
 0x524   : > { %v2930_v28 = vpop.f32.mrf.mxu0  ;;  %v3007_v29 = vpop.f32.mrf.mxu1 }
 0x525   : > { %3024 = vst [vmem:[%s359_s19] sm:$0xff] %v3016_v27  ;;  %3026 = vst [vmem:[%s359_s19 + $0x10] sm:$0xff] %v3018_v16  ;;  %v3017_v30 = vsub.f32 %v2712_v21, %v2930_v28  ;;  %v3019_v31 = vsub.f32 %v2789_v51, %v3007_v29 }
 0x526   : > { %v2934_v32 = vpop.f32.mrf.mxu0  ;;  %v3011_v33 = vpop.f32.mrf.mxu1 }
 0x527   : > { %3025 = vst [vmem:[%s359_s19 + $0x8] sm:$0xff] %v3017_v30  ;;  %3027 = vst [vmem:[%s359_s19 + $0x18] sm:$0xff] %v3019_v31  ;;  %v3020_v34 = vsub.f32 %v2716_v22, %v2934_v32  ;;  %v3022_v35 = vsub.f32 %v2793_v23, %v3011_v33 }
 0x528   : > { %v2936_v36 = vpop.f32.mrf.mxu0  ;;  %v3013_v37 = vpop.f32.mrf.mxu1 }
 0x529   : > { %3028 = vst [vmem:[%s359_s19 + $0x20] sm:$0xff] %v3020_v34  ;;  %3030 = vst [vmem:[%s359_s19 + $0x30] sm:$0xff] %v3022_v35  ;;  %v3021_v38 = vsub.f32 %v2718_v53, %v2936_v36  ;;  %v3023_v39 = vsub.f32 %v2795_v24, %v3013_v37 }
 0x52b   : > { %3029 = vst [vmem:[%s359_s19 + $0x28] sm:$0xff] %v3021_v38  ;;  %3031 = vst [vmem:[%s359_s19 + $0x38] sm:$0xff] %v3023_v39 }
 0x52c PF: > { %s20_s13 = sadd.s32 1, %s3352_s13  }
 0x52d   : > { %p17_p4 = scmp.ge.s32.totalorder %s20_s13, 4  }
 0x52f   :  { %19 = sbr.rel (!%p17_p4) target bundleno = 1 (0x1), region = 90 }

</bundles_post_ra>
